<compile_context>
chip_gen: v7x
topology: tpu7x:2x2x1
jax: 0.10.0
libtpu: 0.0.40
codegen_flags: <defaults>
</compile_context>

<pallas_src>
import functools

import jax
import jax.numpy as jnp
from jax import lax
from jax.experimental import pallas as pl
from jax.experimental.pallas import tpu as pltpu

EPS = 1e-5
PRIMITIVES = ("max_pool_3x3", "avg_pool_3x3", "skip_connect",
              "sep_conv_3x3", "sep_conv_5x5", "dil_conv_3x3", "dil_conv_5x5")

_PARAMS_1D = pltpu.CompilerParams(
    dimension_semantics=("parallel",),
    vmem_limit_bytes=32 * 1024 * 1024,   # ample here; safe on v5e/v6e/v7x
)
_PARAMS_2D = pltpu.CompilerParams(
    dimension_semantics=("parallel", "parallel"),
    vmem_limit_bytes=32 * 1024 * 1024,
)


def _full_spec(shape):
    """Whole-array VMEM block (weights / index planes), constant across the grid."""
    nd = len(shape)
    return pl.BlockSpec(shape, lambda *_: (0,) * nd)


# ---------------------------------------------------------------------------
# Shared in-kernel helpers for the flattened, lane-dense (C, H*W) layout.
# ---------------------------------------------------------------------------
def _make_tools(rc_ref, *, H, W, pad):
    """rc_ref: (2, HW) int32 [row; col] index of every flat pixel (precomputed
    on the host so no in-kernel integer div/mod is needed).

    Returns (tap_mask, dw_conv):
      tap_mask(dy, dx): bool (1, HW) mask of output pixels whose (dy, dx)
                        shifted source lies inside the image (None == all valid).
      dw_conv(scr, wdw_ref, K, dil): depthwise KxK (dilated) conv of the
                        zero-padded flat scratch `scr` -> (C, HW).
                        One slice per tap shared across all channels; the tap
                        weight is a (C, 1) lane-broadcast.
    """
    HW = H * W
    rc = rc_ref[...]
    rows = rc[0:1, :]
    cols = rc[1:2, :]
    cache = {}

    def tap_mask(dy, dx):
        key = (dy, dx)
        if key not in cache:
            conds = []
            if dy < 0:
                conds.append(rows >= -dy)
            if dy > 0:
                conds.append(rows < H - dy)
            if dx < 0:
                conds.append(cols >= -dx)
            if dx > 0:
                conds.append(cols < W - dx)
            m = None
            for c in conds:
                m = c if m is None else (m & c)
            cache[key] = m
        return cache[key]

    def dw_conv(scr, wdw_ref, K, dil):
        half = (K // 2) * dil
        acc = None
        for kh in range(K):
            for kw in range(K):
                dy = kh * dil - half
                dx = kw * dil - half
                off = pad + dy * W + dx
                v = scr[:, off:off + HW]                 # one slice for all channels
                m = tap_mask(dy, dx)
                if m is not None:
                    v = jnp.where(m, v, 0.0)             # mask cross-row leakage
                t = v * wdw_ref[:, kh * K + kw:kh * K + kw + 1]   # (C,1) bcast
                acc = t if acc is None else acc + t
        return acc

    return tap_mask, dw_conv


def _store_branch(o_ref, stats_ref, j, y):
    """Lane-dense (C, HW) store + per-image BN partial sums (sum, sum of sq)."""
    o_ref[0] = y
    stats_ref[0, 2 * j] = jnp.sum(y, axis=1, keepdims=True)          # (C, 1)
    stats_ref[0, 2 * j + 1] = jnp.sum(y * y, axis=1, keepdims=True)  # (C, 1)


# ---------------------------------------------------------------------------
# Stage 1 (grid over N): reads x once and produces all six "first" branch
# activations (sep3/sep5 first halves, dil3, dil5, maxpool, avgpool) plus
# their BN partial statistics.
# ---------------------------------------------------------------------------
def _stage1_kernel(rc_ref, x_ref,
                   wdw_s3, wpw_s3, wdw_s5, wpw_s5,
                   wdw_d3, wpw_d3, wdw_d5, wpw_d5,
                   o_s3, o_s5, o_d3, o_d5, o_mx, o_av, stats_ref,
                   relu_scr, raw_scr,
                   *, C, H, W, pad):
    HW = H * W
    tap_mask, dw_conv = _make_tools(rc_ref, H=H, W=W, pad=pad)

    x = x_ref[0]                                         # (C, HW), read once
    zpad = jnp.zeros((C, pad), jnp.float32)
    # Halo built in VMEM (no jnp.pad / HBM round-trip); `pad` is a multiple of
    # 128 so the centre stores are lane-aligned.
    relu_scr[:, :pad] = zpad
    relu_scr[:, pad + HW:] = zpad
    relu_scr[:, pad:pad + HW] = jnp.maximum(x, 0.0)      # ReLU hoisted, shared
    raw_scr[:, :pad] = zpad
    raw_scr[:, pad + HW:] = zpad
    raw_scr[:, pad:pad + HW] = x

    # Four ReLU -> depthwise -> pointwise(1x1 on the MXU) branches.
    branch_cfg = ((o_s3, wdw_s3, wpw_s3, 3, 1),    # sep_conv_3x3 first half
                  (o_s5, wdw_s5, wpw_s5, 5, 1),    # sep_conv_5x5 first half
                  (o_d3, wdw_d3, wpw_d3, 3, 2),    # dil_conv_3x3
                  (o_d5, wdw_d5, wpw_d5, 5, 2))    # dil_conv_5x5
    for j, (o_ref, wdw, wpw, K, dil) in enumerate(branch_cfg):
        dw = dw_conv(relu_scr, wdw, K, dil)                       # (C, HW)
        y = jnp.dot(wpw[...], dw, preferred_element_type=jnp.float32)  # MXU
        _store_branch(o_ref, stats_ref, j, y)

    # max / avg pool 3x3 (stride 1, pad 1, count_include_pad=False).
    mx = sm = cnt = None
    for kh in range(3):
        for kw in range(3):
            dy, dx = kh - 1, kw - 1
            off = pad + dy * W + dx
            v = raw_scr[:, off:off + HW]
            m = tap_mask(dy, dx)
            if m is None:
                vm, vs, mf = v, v, None
            else:
                vm = jnp.where(m, v, -jnp.inf)      # max-pool pads with -inf
                vs = jnp.where(m, v, 0.0)           # avg-pool valid-only sum
                mf = m.astype(jnp.float32)
            mx = vm if mx is None else jnp.maximum(mx, vm)
            sm = vs if sm is None else sm + vs
            add = jnp.ones((1, HW), jnp.float32) if mf is None else mf
            cnt = add if cnt is None else cnt + add
    _store_branch(o_mx, stats_ref, 4, mx)
    _store_branch(o_av, stats_ref, 5, sm * (1.0 / cnt))


def _stage1(xf, rc, weights, *, N, C, H, W, pad):
    HW = H * W
    img_spec = pl.BlockSpec((1, C, HW), lambda n: (n, 0, 0))
    stats_spec = pl.BlockSpec((1, 12, C, 1), lambda n: (n, 0, 0, 0))
    out_sd = jax.ShapeDtypeStruct((N, C, HW), jnp.float32)
    stats_sd = jax.ShapeDtypeStruct((N, 12, C, 1), jnp.float32)
    kernel = functools.partial(_stage1_kernel, C=C, H=H, W=W, pad=pad)
    return pl.pallas_call(
        kernel,
        grid=(N,),
        in_specs=[_full_spec(rc.shape), img_spec]
        + [_full_spec(w.shape) for w in weights],
        out_specs=[img_spec] * 6 + [stats_spec],
        out_shape=[out_sd] * 6 + [stats_sd],
        scratch_shapes=[pltpu.VMEM((C, HW + 2 * pad), jnp.float32),
                        pltpu.VMEM((C, HW + 2 * pad), jnp.float32)],
        compiler_params=_PARAMS_1D,
    )(rc, xf, *weights)


# ---------------------------------------------------------------------------
# Stage 2 (grid over N): second halves of both SepConvs.  The mid-BatchNorm
# (global stats as per-channel scale/bias) + ReLU is fused in front of the
# depthwise conv; the halo is built in VMEM from the UNPADDED stage1 output.
# ---------------------------------------------------------------------------
def _stage2_kernel(rc_ref, y3_ref, y5_ref,
                   wdw2_s3, wpw2_s3, wdw2_s5, wpw2_s5, bn_s3, bn_s5,
                   o_s3, o_s5, stats_ref, scr,
                   *, C, H, W, pad):
    HW = H * W
    _, dw_conv = _make_tools(rc_ref, H=H, W=W, pad=pad)

    zpad = jnp.zeros((C, pad), jnp.float32)
    scr[:, :pad] = zpad
    scr[:, pad + HW:] = zpad

    def run(y_ref, wdw, wpw, bn, K, o_ref, j):
        y = y_ref[0]                                           # (C, HW)
        # fused mid-BN (per-channel scale/bias) + ReLU; halo stays zero.
        a = jnp.maximum(y * bn[:, 0:1] + bn[:, 1:2], 0.0)
        scr[:, pad:pad + HW] = a
        dw = dw_conv(scr, wdw, K, 1)
        out = jnp.dot(wpw[...], dw, preferred_element_type=jnp.float32)  # MXU
        _store_branch(o_ref, stats_ref, j, out)

    run(y3_ref, wdw2_s3, wpw2_s3, bn_s3, 3, o_s3, 0)
    run(y5_ref, wdw2_s5, wpw2_s5, bn_s5, 5, o_s5, 1)


def _stage2(y3, y5, rc, weights, *, N, C, H, W, pad):
    HW = H * W
    img_spec = pl.BlockSpec((1, C, HW), lambda n: (n, 0, 0))
    stats_spec = pl.BlockSpec((1, 4, C, 1), lambda n: (n, 0, 0, 0))
    out_sd = jax.ShapeDtypeStruct((N, C, HW), jnp.float32)
    stats_sd = jax.ShapeDtypeStruct((N, 4, C, 1), jnp.float32)
    kernel = functools.partial(_stage2_kernel, C=C, H=H, W=W, pad=pad)
    return pl.pallas_call(
        kernel,
        grid=(N,),
        in_specs=[_full_spec(rc.shape), img_spec, img_spec]
        + [_full_spec(w.shape) for w in weights],
        out_specs=[img_spec] * 2 + [stats_spec],
        out_shape=[out_sd] * 2 + [stats_sd],
        scratch_shapes=[pltpu.VMEM((C, HW + 2 * pad), jnp.float32)],
        compiler_params=_PARAMS_1D,
    )(rc, y3, y5, *weights)


# ---------------------------------------------------------------------------
# Combine: final BatchNorm of every branch folded into per-row scale/bias
# plus the alpha-weighted sum, on the flattened (N*C, H*W) view.  Lane-dense
# loads/stores; 2-D parallel grid so both v7x TensorCores participate.
# ---------------------------------------------------------------------------
def _combine_kernel(sb_ref, b_mx, b_av, b_sk, b_s3, b_s5, b_d3, b_d5, o_ref):
    sb = sb_ref[...]                    # (BR, 8): cols 0..6 alpha*scale, 7 bias
    o_ref[...] = (sb[:, 7:8]
                  + b_mx[...] * sb[:, 0:1] + b_av[...] * sb[:, 1:2]
                  + b_sk[...] * sb[:, 2:3] + b_s3[...] * sb[:, 3:4]
                  + b_s5[...] * sb[:, 4:5] + b_d3[...] * sb[:, 5:6]
                  + b_d5[...] * sb[:, 6:7])


def _combine(sb, branches, *, R, HW):
    BR = R if R <= 128 else 128
    # NOTE: if R > 128 and R % 128 != 0 the last row-block is partial; Pallas
    # clamps the OOB stores, and the padded sb rows it reads are never used.
    THW = HW // 2 if HW % 256 == 0 else HW   # >= 2 grid steps for v7x's 2 TCs
    row_spec = pl.BlockSpec((BR, THW), lambda i, j: (i, j))
    sb_spec = pl.BlockSpec((BR, 8), lambda i, j: (i, 0))
    return pl.pallas_call(
        _combine_kernel,
        grid=(pl.cdiv(R, BR), HW // THW),
        in_specs=[sb_spec] + [row_spec] * 7,
        out_specs=row_spec,
        out_shape=jax.ShapeDtypeStruct((R, HW), jnp.float32),
        compiler_params=_PARAMS_2D,
    )(sb, *branches)


# ---------------------------------------------------------------------------
# Full MixedOpV2 forward (NCHW in / NCHW out).
# ---------------------------------------------------------------------------
def mixed_op_pallas(x, params, alphas, *, stride=1):
    assert stride == 1  # TODO(synk): stride>1 path (incl. FactorizedReduce) n/a
    N, C, H, W = x.shape
    HW = H * W
    x = x.astype(jnp.float32)
    xf = x.reshape(N, C, HW)                       # free, contiguous
    alphas = jnp.asarray(alphas, jnp.float32)

    # halo for the flat padded scratch: max offset = dil_conv_5x5 => 4*W + 4,
    # rounded up to a lane-aligned multiple of 128.
    pad = ((4 * W + 4 + 127) // 128) * 128

    idx = jnp.arange(HW, dtype=jnp.int32)
    rc = jnp.stack([idx // W, idx % W]).astype(jnp.int32)   # (2, HW)

    f32 = jnp.float32
    dwW = lambda a: a.reshape(C, -1).astype(f32)            # (C,1,K,K) -> (C,K*K)
    pwW = lambda a: a[:, :, 0, 0].astype(f32)               # (C,C)

    w1 = (dwW(params["sep3"]["dw1"]), pwW(params["sep3"]["pw1"]),
          dwW(params["sep5"]["dw1"]), pwW(params["sep5"]["pw1"]),
          dwW(params["dil3"]["dw"]),  pwW(params["dil3"]["pw"]),
          dwW(params["dil5"]["dw"]),  pwW(params["dil5"]["pw"]))

    (y_s3a, y_s5a, y_d3, y_d5, y_mx, y_av, stats1) = _stage1(
        xf, rc, w1, N=N, C=C, H=H, W=W, pad=pad)

    # finalize exact global BN stats from the tiny in-kernel partial sums
    cnt = jnp.float32(N * HW)
    st1 = jnp.sum(stats1[..., 0], axis=0)                   # (12, C)

    def finalize(j, st):
        s, ss = st[2 * j], st[2 * j + 1]
        m = s / cnt
        v = jnp.maximum(ss / cnt - m * m, 0.0)
        sc = lax.rsqrt(v + EPS)
        return sc, -m * sc

    sc_s3a, bi_s3a = finalize(0, st1)                        # mid-BN of sep3
    sc_s5a, bi_s5a = finalize(1, st1)                        # mid-BN of sep5

    w2 = (dwW(params["sep3"]["dw2"]), pwW(params["sep3"]["pw2"]),
          dwW(params["sep5"]["dw2"]), pwW(params["sep5"]["pw2"]),
          jnp.stack([sc_s3a, bi_s3a], axis=1),               # (C, 2)
          jnp.stack([sc_s5a, bi_s5a], axis=1))

    y_s3, y_s5, stats2 = _stage2(y_s3a, y_s5a, rc, w2, N=N, C=C, H=H, W=W,
                                 pad=pad)
    st2 = jnp.sum(stats2[..., 0], axis=0)                    # (4, C)

    # fold each branch's final BN (+ alpha) into per-row scale / shared bias
    sc_d3, bi_d3 = finalize(2, st1)
    sc_d5, bi_d5 = finalize(3, st1)
    sc_mx, bi_mx = finalize(4, st1)
    sc_av, bi_av = finalize(5, st1)
    sc_s3, bi_s3 = finalize(0, st2)
    sc_s5, bi_s5 = finalize(1, st2)

    ones = jnp.ones((C,), f32)
    zeros = jnp.zeros((C,), f32)
    # order matches PRIMITIVES / alphaRow: max, avg, skip, sep3, sep5, dil3, dil5
    scales = [sc_mx, sc_av, ones, sc_s3, sc_s5, sc_d3, sc_d5]
    biases = [bi_mx, bi_av, zeros, bi_s3, bi_s5, bi_d3, bi_d5]
    total_bias = sum(alphas[j] * biases[j] for j in range(7))
    cols_sb = [jnp.tile(alphas[j] * scales[j], N) for j in range(7)]
    cols_sb.append(jnp.tile(total_bias, N))
    sb = jnp.stack(cols_sb, axis=1)                          # (N*C, 8)

    R = N * C
    branches = [y_mx.reshape(R, HW), y_av.reshape(R, HW), xf.reshape(R, HW),
                y_s3.reshape(R, HW), y_s5.reshape(R, HW),
                y_d3.reshape(R, HW), y_d5.reshape(R, HW)]
    out2d = _combine(sb, branches, R=R, HW=HW)
    return out2d.reshape(N, C, H, W)


# ---------------------------------------------------------------------------
# Pure-JAX reference (mirrors the PyTorch module at stride=1, training mode).
# ---------------------------------------------------------------------------
def mixed_op_ref(x, params, alphas):
    def bn(a):
        m = jnp.mean(a, axis=(0, 2, 3), keepdims=True)
        v = jnp.mean(jnp.square(a - m), axis=(0, 2, 3), keepdims=True)
        return (a - m) * lax.rsqrt(v + EPS)

    def dwconv(a, w, pad, dil):
        return lax.conv_general_dilated(
            a, w, (1, 1), [(pad, pad), (pad, pad)], rhs_dilation=(dil, dil),
            dimension_numbers=("NCHW", "OIHW", "NCHW"),
            feature_group_count=a.shape[1])

    def pwconv(a, w):
        return lax.conv_general_dilated(
            a, w, (1, 1), [(0, 0), (0, 0)],
            dimension_numbers=("NCHW", "OIHW", "NCHW"))

    def sepconv(a, p, pad):
        y = jax.nn.relu(a)
        y = bn(pwconv(dwconv(y, p["dw1"], pad, 1), p["pw1"]))
        y = jax.nn.relu(y)
        return bn(pwconv(dwconv(y, p["dw2"], pad, 1), p["pw2"]))

    def dilconv(a, p, pad):
        return bn(pwconv(dwconv(jax.nn.relu(a), p["dw"], pad, 2), p["pw"]))

    def maxpool(a):
        return lax.reduce_window(a, -jnp.inf, lax.max, (1, 1, 3, 3),
                                 (1, 1, 1, 1),
                                 ((0, 0), (0, 0), (1, 1), (1, 1)))

    def avgpool(a):
        s = lax.reduce_window(a, 0.0, lax.add, (1, 1, 3, 3), (1, 1, 1, 1),
                              ((0, 0), (0, 0), (1, 1), (1, 1)))
        c = lax.reduce_window(jnp.ones_like(a), 0.0, lax.add, (1, 1, 3, 3),
                              (1, 1, 1, 1), ((0, 0), (0, 0), (1, 1), (1, 1)))
        return s / c

    branches = [
        bn(maxpool(x)), bn(avgpool(x)), x,
        sepconv(x, params["sep3"], 1), sepconv(x, params["sep5"], 2),
        dilconv(x, params["dil3"], 2), dilconv(x, params["dil5"], 4),
    ]
    out = jnp.zeros_like(x)
    for a, b in zip(alphas, branches):
        out = out + a * b
    return out


if __name__ == "__main__":
    N, C, H, W = 2, 4, 16, 16

    key = jax.random.PRNGKey(0)
    ks = jax.random.split(key, 16)
    x = jax.random.normal(ks[0], (N, C, H, W), jnp.float32)

    def winit(k, shape, scale=0.3):
        return scale * jax.random.normal(k, shape, jnp.float32)

    params = {
        "sep3": {"dw1": winit(ks[1], (C, 1, 3, 3)), "pw1": winit(ks[2], (C, C, 1, 1)),
                 "dw2": winit(ks[3], (C, 1, 3, 3)), "pw2": winit(ks[4], (C, C, 1, 1))},
        "sep5": {"dw1": winit(ks[5], (C, 1, 5, 5)), "pw1": winit(ks[6], (C, C, 1, 1)),
                 "dw2": winit(ks[7], (C, 1, 5, 5)), "pw2": winit(ks[8], (C, C, 1, 1))},
        "dil3": {"dw": winit(ks[9], (C, 1, 3, 3)), "pw": winit(ks[10], (C, C, 1, 1))},
        "dil5": {"dw": winit(ks[11], (C, 1, 5, 5)), "pw": winit(ks[12], (C, C, 1, 1))},
    }
    alphas = jax.nn.softmax(jax.random.normal(ks[13], (7,), jnp.float32))

    out = jax.jit(mixed_op_pallas)(x, params, alphas)
    out = jax.block_until_ready(out)

    ref = mixed_op_ref(x, params, alphas)
    ref = jax.block_until_ready(ref)

    assert out.shape == ref.shape, (out.shape, ref.shape)
    max_err = float(jnp.max(jnp.abs(out - ref)))
    assert jnp.allclose(out, ref, rtol=1e-3, atol=1e-3), max_err

    print("KERNEL_OK")
</pallas_src>

<mosaic_0001>
module attributes {stable_mosaic.version = 11 : i64} {
  func.func @_stage1_kernel(%arg0: i32, %arg1: memref<2x256xi32, #tpu.memory_space<vmem>>, %arg2: memref<1x4x256xf32, #tpu.memory_space<vmem>>, %arg3: memref<4x9xf32, #tpu.memory_space<vmem>>, %arg4: memref<4x4xf32, #tpu.memory_space<vmem>>, %arg5: memref<4x25xf32, #tpu.memory_space<vmem>>, %arg6: memref<4x4xf32, #tpu.memory_space<vmem>>, %arg7: memref<4x9xf32, #tpu.memory_space<vmem>>, %arg8: memref<4x4xf32, #tpu.memory_space<vmem>>, %arg9: memref<4x25xf32, #tpu.memory_space<vmem>>, %arg10: memref<4x4xf32, #tpu.memory_space<vmem>>, %arg11: memref<1x4x256xf32, #tpu.memory_space<vmem>>, %arg12: memref<1x4x256xf32, #tpu.memory_space<vmem>>, %arg13: memref<1x4x256xf32, #tpu.memory_space<vmem>>, %arg14: memref<1x4x256xf32, #tpu.memory_space<vmem>>, %arg15: memref<1x4x256xf32, #tpu.memory_space<vmem>>, %arg16: memref<1x4x256xf32, #tpu.memory_space<vmem>>, %arg17: memref<1x12x4x1xf32, #tpu.memory_space<vmem>>, %arg18: memref<4x512xf32, #tpu.memory_space<vmem>>, %arg19: memref<4x512xf32, #tpu.memory_space<vmem>>) attributes {dimension_semantics = [#tpu.dimension_semantics<parallel>], iteration_bounds = array<i64: 2>, scalar_prefetch = 0 : i64, scratch_operands = 2 : i64, tpu.core_type = #tpu.core_type<tc>, window_params = [{pipeline_mode = #tpu.pipeline_mode<synchronous>, transform_indices = @transform_0, window_bounds = array<i64: 2, 256>}, {transform_indices = @transform_1, window_bounds = array<i64: 1, 4, 256>}, {pipeline_mode = #tpu.pipeline_mode<synchronous>, transform_indices = @transform_2, window_bounds = array<i64: 4, 9>}, {pipeline_mode = #tpu.pipeline_mode<synchronous>, transform_indices = @transform_3, window_bounds = array<i64: 4, 4>}, {pipeline_mode = #tpu.pipeline_mode<synchronous>, transform_indices = @transform_4, window_bounds = array<i64: 4, 25>}, {pipeline_mode = #tpu.pipeline_mode<synchronous>, transform_indices = @transform_5, window_bounds = array<i64: 4, 4>}, {pipeline_mode = #tpu.pipeline_mode<synchronous>, transform_indices = @transform_6, window_bounds = array<i64: 4, 9>}, {pipeline_mode = #tpu.pipeline_mode<synchronous>, transform_indices = @transform_7, window_bounds = array<i64: 4, 4>}, {pipeline_mode = #tpu.pipeline_mode<synchronous>, transform_indices = @transform_8, window_bounds = array<i64: 4, 25>}, {pipeline_mode = #tpu.pipeline_mode<synchronous>, transform_indices = @transform_9, window_bounds = array<i64: 4, 4>}, {transform_indices = @transform_10, window_bounds = array<i64: 1, 4, 256>}, {transform_indices = @transform_11, window_bounds = array<i64: 1, 4, 256>}, {transform_indices = @transform_12, window_bounds = array<i64: 1, 4, 256>}, {transform_indices = @transform_13, window_bounds = array<i64: 1, 4, 256>}, {transform_indices = @transform_14, window_bounds = array<i64: 1, 4, 256>}, {transform_indices = @transform_15, window_bounds = array<i64: 1, 4, 256>}, {transform_indices = @transform_16, window_bounds = array<i64: 1, 12, 4, 1>}]} {
    %c0 = arith.constant 0 : index
    %c0_0 = arith.constant 0 : index
    %0 = vector.load %arg1[%c0, %c0_0] : memref<2x256xi32, #tpu.memory_space<vmem>>, vector<2x256xi32>
    %1 = vector.extract_strided_slice %0 {offsets = [0, 0], sizes = [1, 256], strides = [1, 1]} : vector<2x256xi32> to vector<1x256xi32>
    %2 = vector.extract_strided_slice %0 {offsets = [1, 0], sizes = [1, 256], strides = [1, 1]} : vector<2x256xi32> to vector<1x256xi32>
    %c0_1 = arith.constant 0 : index
    %c0_2 = arith.constant 0 : index
    %c0_3 = arith.constant 0 : index
    %3 = vector.load %arg2[%c0_1, %c0_2, %c0_3] : memref<1x4x256xf32, #tpu.memory_space<vmem>>, vector<1x4x256xf32>
    %4 = vector.shape_cast %3 : vector<1x4x256xf32> to vector<4x256xf32>
    %cst = arith.constant 0.000000e+00 : f32
    %5 = vector.broadcast %cst : f32 to vector<4x128xf32>
    %c0_4 = arith.constant 0 : index
    %c0_5 = arith.constant 0 : index
    %6 = vector.load %arg18[%c0_4, %c0_5] : memref<4x512xf32, #tpu.memory_space<vmem>>, vector<4x128xf32>
    tpu.vector_store %arg18[%c0_4, %c0_5], %5 {strides = array<i32>} : memref<4x512xf32, #tpu.memory_space<vmem>>, vector<4x128xf32>,
    %c0_6 = arith.constant 0 : index
    %c384 = arith.constant 384 : index
    %7 = vector.load %arg18[%c0_6, %c384] : memref<4x512xf32, #tpu.memory_space<vmem>>, vector<4x128xf32>
    tpu.vector_store %arg18[%c0_6, %c384], %5 {strides = array<i32>} : memref<4x512xf32, #tpu.memory_space<vmem>>, vector<4x128xf32>,
    %cst_7 = arith.constant 0.000000e+00 : f32
    %8 = vector.broadcast %cst_7 : f32 to vector<4x256xf32>
    %9 = arith.maximumf %4, %8 : vector<4x256xf32>
    %c0_8 = arith.constant 0 : index
    %c128 = arith.constant 128 : index
    %10 = vector.load %arg18[%c0_8, %c128] : memref<4x512xf32, #tpu.memory_space<vmem>>, vector<4x256xf32>
    tpu.vector_store %arg18[%c0_8, %c128], %9 {strides = array<i32>} : memref<4x512xf32, #tpu.memory_space<vmem>>, vector<4x256xf32>,
    %c0_9 = arith.constant 0 : index
    %c0_10 = arith.constant 0 : index
    %11 = vector.load %arg19[%c0_9, %c0_10] : memref<4x512xf32, #tpu.memory_space<vmem>>, vector<4x128xf32>
    tpu.vector_store %arg19[%c0_9, %c0_10], %5 {strides = array<i32>} : memref<4x512xf32, #tpu.memory_space<vmem>>, vector<4x128xf32>,
    %c0_11 = arith.constant 0 : index
    %c384_12 = arith.constant 384 : index
    %12 = vector.load %arg19[%c0_11, %c384_12] : memref<4x512xf32, #tpu.memory_space<vmem>>, vector<4x128xf32>
    tpu.vector_store %arg19[%c0_11, %c384_12], %5 {strides = array<i32>} : memref<4x512xf32, #tpu.memory_space<vmem>>, vector<4x128xf32>,
    %c0_13 = arith.constant 0 : index
    %c128_14 = arith.constant 128 : index
    %13 = vector.load %arg19[%c0_13, %c128_14] : memref<4x512xf32, #tpu.memory_space<vmem>>, vector<4x256xf32>
    tpu.vector_store %arg19[%c0_13, %c128_14], %4 {strides = array<i32>} : memref<4x512xf32, #tpu.memory_space<vmem>>, vector<4x256xf32>,
    %c0_15 = arith.constant 0 : index
    %c111 = arith.constant 111 : index
    %14 = vector.load %arg18[%c0_15, %c111] : memref<4x512xf32, #tpu.memory_space<vmem>>, vector<4x256xf32>
    %c1_i32 = arith.constant 1 : i32
    %15 = vector.broadcast %c1_i32 : i32 to vector<1x256xi32>
    %16 = arith.cmpi sge, %1, %15 : vector<1x256xi32>
    %c1_i32_16 = arith.constant 1 : i32
    %17 = vector.broadcast %c1_i32_16 : i32 to vector<1x256xi32>
    %18 = arith.cmpi sge, %2, %17 : vector<1x256xi32>
    %19 = arith.andi %16, %18 : vector<1x256xi1>
    %cst_17 = arith.constant 0.000000e+00 : f32
    %20 = vector.shape_cast %19 : vector<1x256xi1> to vector<1x256xi1>
    %21 = vector.broadcast %20 : vector<1x256xi1> to vector<4x256xi1>
    %22 = vector.broadcast %cst_17 : f32 to vector<4x256xf32>
    %23 = arith.select %21, %14, %22 : vector<4x256xi1>, vector<4x256xf32>
    %c0_18 = arith.constant 0 : index
    %c0_19 = arith.constant 0 : index
    %24 = vector.load %arg3[%c0_18, %c0_19] : memref<4x9xf32, #tpu.memory_space<vmem>>, vector<4x1xf32>
    %25 = vector.broadcast %24 : vector<4x1xf32> to vector<4x256xf32>
    %26 = arith.mulf %23, %25 : vector<4x256xf32>
    %c0_20 = arith.constant 0 : index
    %c112 = arith.constant 112 : index
    %27 = vector.load %arg18[%c0_20, %c112] : memref<4x512xf32, #tpu.memory_space<vmem>>, vector<4x256xf32>
    %c1_i32_21 = arith.constant 1 : i32
    %28 = vector.broadcast %c1_i32_21 : i32 to vector<1x256xi32>
    %29 = arith.cmpi sge, %1, %28 : vector<1x256xi32>
    %cst_22 = arith.constant 0.000000e+00 : f32
    %30 = vector.shape_cast %29 : vector<1x256xi1> to vector<1x256xi1>
    %31 = vector.broadcast %30 : vector<1x256xi1> to vector<4x256xi1>
    %32 = vector.broadcast %cst_22 : f32 to vector<4x256xf32>
    %33 = arith.select %31, %27, %32 : vector<4x256xi1>, vector<4x256xf32>
    %c0_23 = arith.constant 0 : index
    %c1 = arith.constant 1 : index
    %34 = vector.load %arg3[%c0_23, %c1] : memref<4x9xf32, #tpu.memory_space<vmem>>, vector<4x1xf32>
    %35 = vector.broadcast %34 : vector<4x1xf32> to vector<4x256xf32>
    %36 = arith.mulf %33, %35 : vector<4x256xf32>
    %37 = arith.addf %26, %36 : vector<4x256xf32>
    %c0_24 = arith.constant 0 : index
    %c113 = arith.constant 113 : index
    %38 = vector.load %arg18[%c0_24, %c113] : memref<4x512xf32, #tpu.memory_space<vmem>>, vector<4x256xf32>
    %c1_i32_25 = arith.constant 1 : i32
    %39 = vector.broadcast %c1_i32_25 : i32 to vector<1x256xi32>
    %40 = arith.cmpi sge, %1, %39 : vector<1x256xi32>
    %c15_i32 = arith.constant 15 : i32
    %41 = vector.broadcast %c15_i32 : i32 to vector<1x256xi32>
    %42 = arith.cmpi slt, %2, %41 : vector<1x256xi32>
    %43 = arith.andi %40, %42 : vector<1x256xi1>
    %cst_26 = arith.constant 0.000000e+00 : f32
    %44 = vector.shape_cast %43 : vector<1x256xi1> to vector<1x256xi1>
    %45 = vector.broadcast %44 : vector<1x256xi1> to vector<4x256xi1>
    %46 = vector.broadcast %cst_26 : f32 to vector<4x256xf32>
    %47 = arith.select %45, %38, %46 : vector<4x256xi1>, vector<4x256xf32>
    %c0_27 = arith.constant 0 : index
    %c2 = arith.constant 2 : index
    %48 = vector.load %arg3[%c0_27, %c2] : memref<4x9xf32, #tpu.memory_space<vmem>>, vector<4x1xf32>
    %49 = vector.broadcast %48 : vector<4x1xf32> to vector<4x256xf32>
    %50 = arith.mulf %47, %49 : vector<4x256xf32>
    %51 = arith.addf %37, %50 : vector<4x256xf32>
    %c0_28 = arith.constant 0 : index
    %c127 = arith.constant 127 : index
    %52 = vector.load %arg18[%c0_28, %c127] : memref<4x512xf32, #tpu.memory_space<vmem>>, vector<4x256xf32>
    %c1_i32_29 = arith.constant 1 : i32
    %53 = vector.broadcast %c1_i32_29 : i32 to vector<1x256xi32>
    %54 = arith.cmpi sge, %2, %53 : vector<1x256xi32>
    %cst_30 = arith.constant 0.000000e+00 : f32
    %55 = vector.shape_cast %54 : vector<1x256xi1> to vector<1x256xi1>
    %56 = vector.broadcast %55 : vector<1x256xi1> to vector<4x256xi1>
    %57 = vector.broadcast %cst_30 : f32 to vector<4x256xf32>
    %58 = arith.select %56, %52, %57 : vector<4x256xi1>, vector<4x256xf32>
    %c0_31 = arith.constant 0 : index
    %c3 = arith.constant 3 : index
    %59 = vector.load %arg3[%c0_31, %c3] : memref<4x9xf32, #tpu.memory_space<vmem>>, vector<4x1xf32>
    %60 = vector.broadcast %59 : vector<4x1xf32> to vector<4x256xf32>
    %61 = arith.mulf %58, %60 : vector<4x256xf32>
    %62 = arith.addf %51, %61 : vector<4x256xf32>
    %c0_32 = arith.constant 0 : index
    %c128_33 = arith.constant 128 : index
    %63 = vector.load %arg18[%c0_32, %c128_33] : memref<4x512xf32, #tpu.memory_space<vmem>>, vector<4x256xf32>
    %c0_34 = arith.constant 0 : index
    %c4 = arith.constant 4 : index
    %64 = vector.load %arg3[%c0_34, %c4] : memref<4x9xf32, #tpu.memory_space<vmem>>, vector<4x1xf32>
    %65 = vector.broadcast %64 : vector<4x1xf32> to vector<4x256xf32>
    %66 = arith.mulf %63, %65 : vector<4x256xf32>
    %67 = arith.addf %62, %66 : vector<4x256xf32>
    %c0_35 = arith.constant 0 : index
    %c129 = arith.constant 129 : index
    %68 = vector.load %arg18[%c0_35, %c129] : memref<4x512xf32, #tpu.memory_space<vmem>>, vector<4x256xf32>
    %c15_i32_36 = arith.constant 15 : i32
    %69 = vector.broadcast %c15_i32_36 : i32 to vector<1x256xi32>
    %70 = arith.cmpi slt, %2, %69 : vector<1x256xi32>
    %cst_37 = arith.constant 0.000000e+00 : f32
    %71 = vector.shape_cast %70 : vector<1x256xi1> to vector<1x256xi1>
    %72 = vector.broadcast %71 : vector<1x256xi1> to vector<4x256xi1>
    %73 = vector.broadcast %cst_37 : f32 to vector<4x256xf32>
    %74 = arith.select %72, %68, %73 : vector<4x256xi1>, vector<4x256xf32>
    %c0_38 = arith.constant 0 : index
    %c5 = arith.constant 5 : index
    %75 = vector.load %arg3[%c0_38, %c5] : memref<4x9xf32, #tpu.memory_space<vmem>>, vector<4x1xf32>
    %76 = vector.broadcast %75 : vector<4x1xf32> to vector<4x256xf32>
    %77 = arith.mulf %74, %76 : vector<4x256xf32>
    %78 = arith.addf %67, %77 : vector<4x256xf32>
    %c0_39 = arith.constant 0 : index
    %c143 = arith.constant 143 : index
    %79 = vector.load %arg18[%c0_39, %c143] : memref<4x512xf32, #tpu.memory_space<vmem>>, vector<4x256xf32>
    %c15_i32_40 = arith.constant 15 : i32
    %80 = vector.broadcast %c15_i32_40 : i32 to vector<1x256xi32>
    %81 = arith.cmpi slt, %1, %80 : vector<1x256xi32>
    %c1_i32_41 = arith.constant 1 : i32
    %82 = vector.broadcast %c1_i32_41 : i32 to vector<1x256xi32>
    %83 = arith.cmpi sge, %2, %82 : vector<1x256xi32>
    %84 = arith.andi %81, %83 : vector<1x256xi1>
    %cst_42 = arith.constant 0.000000e+00 : f32
    %85 = vector.shape_cast %84 : vector<1x256xi1> to vector<1x256xi1>
    %86 = vector.broadcast %85 : vector<1x256xi1> to vector<4x256xi1>
    %87 = vector.broadcast %cst_42 : f32 to vector<4x256xf32>
    %88 = arith.select %86, %79, %87 : vector<4x256xi1>, vector<4x256xf32>
    %c0_43 = arith.constant 0 : index
    %c6 = arith.constant 6 : index
    %89 = vector.load %arg3[%c0_43, %c6] : memref<4x9xf32, #tpu.memory_space<vmem>>, vector<4x1xf32>
    %90 = vector.broadcast %89 : vector<4x1xf32> to vector<4x256xf32>
    %91 = arith.mulf %88, %90 : vector<4x256xf32>
    %92 = arith.addf %78, %91 : vector<4x256xf32>
    %c0_44 = arith.constant 0 : index
    %c144 = arith.constant 144 : index
    %93 = vector.load %arg18[%c0_44, %c144] : memref<4x512xf32, #tpu.memory_space<vmem>>, vector<4x256xf32>
    %c15_i32_45 = arith.constant 15 : i32
    %94 = vector.broadcast %c15_i32_45 : i32 to vector<1x256xi32>
    %95 = arith.cmpi slt, %1, %94 : vector<1x256xi32>
    %cst_46 = arith.constant 0.000000e+00 : f32
    %96 = vector.shape_cast %95 : vector<1x256xi1> to vector<1x256xi1>
    %97 = vector.broadcast %96 : vector<1x256xi1> to vector<4x256xi1>
    %98 = vector.broadcast %cst_46 : f32 to vector<4x256xf32>
    %99 = arith.select %97, %93, %98 : vector<4x256xi1>, vector<4x256xf32>
    %c0_47 = arith.constant 0 : index
    %c7 = arith.constant 7 : index
    %100 = vector.load %arg3[%c0_47, %c7] : memref<4x9xf32, #tpu.memory_space<vmem>>, vector<4x1xf32>
    %101 = vector.broadcast %100 : vector<4x1xf32> to vector<4x256xf32>
    %102 = arith.mulf %99, %101 : vector<4x256xf32>
    %103 = arith.addf %92, %102 : vector<4x256xf32>
    %c0_48 = arith.constant 0 : index
    %c145 = arith.constant 145 : index
    %104 = vector.load %arg18[%c0_48, %c145] : memref<4x512xf32, #tpu.memory_space<vmem>>, vector<4x256xf32>
    %c15_i32_49 = arith.constant 15 : i32
    %105 = vector.broadcast %c15_i32_49 : i32 to vector<1x256xi32>
    %106 = arith.cmpi slt, %1, %105 : vector<1x256xi32>
    %c15_i32_50 = arith.constant 15 : i32
    %107 = vector.broadcast %c15_i32_50 : i32 to vector<1x256xi32>
    %108 = arith.cmpi slt, %2, %107 : vector<1x256xi32>
    %109 = arith.andi %106, %108 : vector<1x256xi1>
    %cst_51 = arith.constant 0.000000e+00 : f32
    %110 = vector.shape_cast %109 : vector<1x256xi1> to vector<1x256xi1>
    %111 = vector.broadcast %110 : vector<1x256xi1> to vector<4x256xi1>
    %112 = vector.broadcast %cst_51 : f32 to vector<4x256xf32>
    %113 = arith.select %111, %104, %112 : vector<4x256xi1>, vector<4x256xf32>
    %c0_52 = arith.constant 0 : index
    %c8 = arith.constant 8 : index
    %114 = vector.load %arg3[%c0_52, %c8] : memref<4x9xf32, #tpu.memory_space<vmem>>, vector<4x1xf32>
    %115 = vector.broadcast %114 : vector<4x1xf32> to vector<4x256xf32>
    %116 = arith.mulf %113, %115 : vector<4x256xf32>
    %117 = arith.addf %103, %116 : vector<4x256xf32>
    %c0_53 = arith.constant 0 : index
    %c0_54 = arith.constant 0 : index
    %118 = vector.load %arg4[%c0_53, %c0_54] : memref<4x4xf32, #tpu.memory_space<vmem>>, vector<4x4xf32>
    %cst_55 = arith.constant dense<0.000000e+00> : vector<4x256xf32>
    %119 = tpu.matmul %118, %117, %cst_55 {dimension_numbers = #tpu.dot_dimension_numbers<[1], [0], [0], [1], [0, 0, 1, 1], [], []>} : vector<4x4xf32>, vector<4x256xf32>, vector<4x256xf32> -> vector<4x256xf32>
    %c0_56 = arith.constant 0 : index
    %c0_57 = arith.constant 0 : index
    %c0_58 = arith.constant 0 : index
    %120 = vector.load %arg11[%c0_56, %c0_57, %c0_58] : memref<1x4x256xf32, #tpu.memory_space<vmem>>, vector<1x4x256xf32>
    %121 = vector.shape_cast %120 : vector<1x4x256xf32> to vector<4x256xf32>
    %122 = vector.shape_cast %119 : vector<4x256xf32> to vector<1x4x256xf32>
    tpu.vector_store %arg11[%c0_56, %c0_57, %c0_58], %122 {strides = array<i32>} : memref<1x4x256xf32, #tpu.memory_space<vmem>>, vector<1x4x256xf32>,
    %cst_59 = arith.constant dense<0.000000e+00> : vector<4xf32>
    %123 = vector.multi_reduction <add>, %119, %cst_59 [1] : vector<4x256xf32> to vector<4xf32>
    %124 = vector.shape_cast %123 : vector<4xf32> to vector<4x1xf32>
    %c0_60 = arith.constant 0 : index
    %c0_61 = arith.constant 0 : index
    %c0_62 = arith.constant 0 : index
    %c0_63 = arith.constant 0 : index
    %125 = vector.load %arg17[%c0_60, %c0_61, %c0_62, %c0_63] : memref<1x12x4x1xf32, #tpu.memory_space<vmem>>, vector<1x1x4x1xf32>
    %126 = vector.shape_cast %125 : vector<1x1x4x1xf32> to vector<4x1xf32>
    %127 = vector.shape_cast %124 : vector<4x1xf32> to vector<1x1x4x1xf32>
    tpu.vector_store %arg17[%c0_60, %c0_61, %c0_62, %c0_63], %127 {strides = array<i32>} : memref<1x12x4x1xf32, #tpu.memory_space<vmem>>, vector<1x1x4x1xf32>,
    %128 = arith.mulf %119, %119 : vector<4x256xf32>
    %cst_64 = arith.constant dense<0.000000e+00> : vector<4xf32>
    %129 = vector.multi_reduction <add>, %128, %cst_64 [1] : vector<4x256xf32> to vector<4xf32>
    %130 = vector.shape_cast %129 : vector<4xf32> to vector<4x1xf32>
    %c0_65 = arith.constant 0 : index
    %c1_66 = arith.constant 1 : index
    %c0_67 = arith.constant 0 : index
    %c0_68 = arith.constant 0 : index
    %131 = vector.load %arg17[%c0_65, %c1_66, %c0_67, %c0_68] : memref<1x12x4x1xf32, #tpu.memory_space<vmem>>, vector<1x1x4x1xf32>
    %132 = vector.shape_cast %131 : vector<1x1x4x1xf32> to vector<4x1xf32>
    %133 = vector.shape_cast %130 : vector<4x1xf32> to vector<1x1x4x1xf32>
    tpu.vector_store %arg17[%c0_65, %c1_66, %c0_67, %c0_68], %133 {strides = array<i32>} : memref<1x12x4x1xf32, #tpu.memory_space<vmem>>, vector<1x1x4x1xf32>,
    %c0_69 = arith.constant 0 : index
    %c94 = arith.constant 94 : index
    %134 = vector.load %arg18[%c0_69, %c94] : memref<4x512xf32, #tpu.memory_space<vmem>>, vector<4x256xf32>
    %c2_i32 = arith.constant 2 : i32
    %135 = vector.broadcast %c2_i32 : i32 to vector<1x256xi32>
    %136 = arith.cmpi sge, %1, %135 : vector<1x256xi32>
    %c2_i32_70 = arith.constant 2 : i32
    %137 = vector.broadcast %c2_i32_70 : i32 to vector<1x256xi32>
    %138 = arith.cmpi sge, %2, %137 : vector<1x256xi32>
    %139 = arith.andi %136, %138 : vector<1x256xi1>
    %cst_71 = arith.constant 0.000000e+00 : f32
    %140 = vector.shape_cast %139 : vector<1x256xi1> to vector<1x256xi1>
    %141 = vector.broadcast %140 : vector<1x256xi1> to vector<4x256xi1>
    %142 = vector.broadcast %cst_71 : f32 to vector<4x256xf32>
    %143 = arith.select %141, %134, %142 : vector<4x256xi1>, vector<4x256xf32>
    %c0_72 = arith.constant 0 : index
    %c0_73 = arith.constant 0 : index
    %144 = vector.load %arg5[%c0_72, %c0_73] : memref<4x25xf32, #tpu.memory_space<vmem>>, vector<4x1xf32>
    %145 = vector.broadcast %144 : vector<4x1xf32> to vector<4x256xf32>
    %146 = arith.mulf %143, %145 : vector<4x256xf32>
    %c0_74 = arith.constant 0 : index
    %c95 = arith.constant 95 : index
    %147 = vector.load %arg18[%c0_74, %c95] : memref<4x512xf32, #tpu.memory_space<vmem>>, vector<4x256xf32>
    %c2_i32_75 = arith.constant 2 : i32
    %148 = vector.broadcast %c2_i32_75 : i32 to vector<1x256xi32>
    %149 = arith.cmpi sge, %1, %148 : vector<1x256xi32>
    %c1_i32_76 = arith.constant 1 : i32
    %150 = vector.broadcast %c1_i32_76 : i32 to vector<1x256xi32>
    %151 = arith.cmpi sge, %2, %150 : vector<1x256xi32>
    %152 = arith.andi %149, %151 : vector<1x256xi1>
    %cst_77 = arith.constant 0.000000e+00 : f32
    %153 = vector.shape_cast %152 : vector<1x256xi1> to vector<1x256xi1>
    %154 = vector.broadcast %153 : vector<1x256xi1> to vector<4x256xi1>
    %155 = vector.broadcast %cst_77 : f32 to vector<4x256xf32>
    %156 = arith.select %154, %147, %155 : vector<4x256xi1>, vector<4x256xf32>
    %c0_78 = arith.constant 0 : index
    %c1_79 = arith.constant 1 : index
    %157 = vector.load %arg5[%c0_78, %c1_79] : memref<4x25xf32, #tpu.memory_space<vmem>>, vector<4x1xf32>
    %158 = vector.broadcast %157 : vector<4x1xf32> to vector<4x256xf32>
    %159 = arith.mulf %156, %158 : vector<4x256xf32>
    %160 = arith.addf %146, %159 : vector<4x256xf32>
    %c0_80 = arith.constant 0 : index
    %c96 = arith.constant 96 : index
    %161 = vector.load %arg18[%c0_80, %c96] : memref<4x512xf32, #tpu.memory_space<vmem>>, vector<4x256xf32>
    %c2_i32_81 = arith.constant 2 : i32
    %162 = vector.broadcast %c2_i32_81 : i32 to vector<1x256xi32>
    %163 = arith.cmpi sge, %1, %162 : vector<1x256xi32>
    %cst_82 = arith.constant 0.000000e+00 : f32
    %164 = vector.shape_cast %163 : vector<1x256xi1> to vector<1x256xi1>
    %165 = vector.broadcast %164 : vector<1x256xi1> to vector<4x256xi1>
    %166 = vector.broadcast %cst_82 : f32 to vector<4x256xf32>
    %167 = arith.select %165, %161, %166 : vector<4x256xi1>, vector<4x256xf32>
    %c0_83 = arith.constant 0 : index
    %c2_84 = arith.constant 2 : index
    %168 = vector.load %arg5[%c0_83, %c2_84] : memref<4x25xf32, #tpu.memory_space<vmem>>, vector<4x1xf32>
    %169 = vector.broadcast %168 : vector<4x1xf32> to vector<4x256xf32>
    %170 = arith.mulf %167, %169 : vector<4x256xf32>
    %171 = arith.addf %160, %170 : vector<4x256xf32>
    %c0_85 = arith.constant 0 : index
    %c97 = arith.constant 97 : index
    %172 = vector.load %arg18[%c0_85, %c97] : memref<4x512xf32, #tpu.memory_space<vmem>>, vector<4x256xf32>
    %c2_i32_86 = arith.constant 2 : i32
    %173 = vector.broadcast %c2_i32_86 : i32 to vector<1x256xi32>
    %174 = arith.cmpi sge, %1, %173 : vector<1x256xi32>
    %c15_i32_87 = arith.constant 15 : i32
    %175 = vector.broadcast %c15_i32_87 : i32 to vector<1x256xi32>
    %176 = arith.cmpi slt, %2, %175 : vector<1x256xi32>
    %177 = arith.andi %174, %176 : vector<1x256xi1>
    %cst_88 = arith.constant 0.000000e+00 : f32
    %178 = vector.shape_cast %177 : vector<1x256xi1> to vector<1x256xi1>
    %179 = vector.broadcast %178 : vector<1x256xi1> to vector<4x256xi1>
    %180 = vector.broadcast %cst_88 : f32 to vector<4x256xf32>
    %181 = arith.select %179, %172, %180 : vector<4x256xi1>, vector<4x256xf32>
    %c0_89 = arith.constant 0 : index
    %c3_90 = arith.constant 3 : index
    %182 = vector.load %arg5[%c0_89, %c3_90] : memref<4x25xf32, #tpu.memory_space<vmem>>, vector<4x1xf32>
    %183 = vector.broadcast %182 : vector<4x1xf32> to vector<4x256xf32>
    %184 = arith.mulf %181, %183 : vector<4x256xf32>
    %185 = arith.addf %171, %184 : vector<4x256xf32>
    %c0_91 = arith.constant 0 : index
    %c98 = arith.constant 98 : index
    %186 = vector.load %arg18[%c0_91, %c98] : memref<4x512xf32, #tpu.memory_space<vmem>>, vector<4x256xf32>
    %c2_i32_92 = arith.constant 2 : i32
    %187 = vector.broadcast %c2_i32_92 : i32 to vector<1x256xi32>
    %188 = arith.cmpi sge, %1, %187 : vector<1x256xi32>
    %c14_i32 = arith.constant 14 : i32
    %189 = vector.broadcast %c14_i32 : i32 to vector<1x256xi32>
    %190 = arith.cmpi slt, %2, %189 : vector<1x256xi32>
    %191 = arith.andi %188, %190 : vector<1x256xi1>
    %cst_93 = arith.constant 0.000000e+00 : f32
    %192 = vector.shape_cast %191 : vector<1x256xi1> to vector<1x256xi1>
    %193 = vector.broadcast %192 : vector<1x256xi1> to vector<4x256xi1>
    %194 = vector.broadcast %cst_93 : f32 to vector<4x256xf32>
    %195 = arith.select %193, %186, %194 : vector<4x256xi1>, vector<4x256xf32>
    %c0_94 = arith.constant 0 : index
    %c4_95 = arith.constant 4 : index
    %196 = vector.load %arg5[%c0_94, %c4_95] : memref<4x25xf32, #tpu.memory_space<vmem>>, vector<4x1xf32>
    %197 = vector.broadcast %196 : vector<4x1xf32> to vector<4x256xf32>
    %198 = arith.mulf %195, %197 : vector<4x256xf32>
    %199 = arith.addf %185, %198 : vector<4x256xf32>
    %c0_96 = arith.constant 0 : index
    %c110 = arith.constant 110 : index
    %200 = vector.load %arg18[%c0_96, %c110] : memref<4x512xf32, #tpu.memory_space<vmem>>, vector<4x256xf32>
    %c1_i32_97 = arith.constant 1 : i32
    %201 = vector.broadcast %c1_i32_97 : i32 to vector<1x256xi32>
    %202 = arith.cmpi sge, %1, %201 : vector<1x256xi32>
    %c2_i32_98 = arith.constant 2 : i32
    %203 = vector.broadcast %c2_i32_98 : i32 to vector<1x256xi32>
    %204 = arith.cmpi sge, %2, %203 : vector<1x256xi32>
    %205 = arith.andi %202, %204 : vector<1x256xi1>
    %cst_99 = arith.constant 0.000000e+00 : f32
    %206 = vector.shape_cast %205 : vector<1x256xi1> to vector<1x256xi1>
    %207 = vector.broadcast %206 : vector<1x256xi1> to vector<4x256xi1>
    %208 = vector.broadcast %cst_99 : f32 to vector<4x256xf32>
    %209 = arith.select %207, %200, %208 : vector<4x256xi1>, vector<4x256xf32>
    %c0_100 = arith.constant 0 : index
    %c5_101 = arith.constant 5 : index
    %210 = vector.load %arg5[%c0_100, %c5_101] : memref<4x25xf32, #tpu.memory_space<vmem>>, vector<4x1xf32>
    %211 = vector.broadcast %210 : vector<4x1xf32> to vector<4x256xf32>
    %212 = arith.mulf %209, %211 : vector<4x256xf32>
    %213 = arith.addf %199, %212 : vector<4x256xf32>
    %c0_102 = arith.constant 0 : index
    %c111_103 = arith.constant 111 : index
    %214 = vector.load %arg18[%c0_102, %c111_103] : memref<4x512xf32, #tpu.memory_space<vmem>>, vector<4x256xf32>
    %cst_104 = arith.constant 0.000000e+00 : f32
    %215 = vector.shape_cast %19 : vector<1x256xi1> to vector<1x256xi1>
    %216 = vector.broadcast %215 : vector<1x256xi1> to vector<4x256xi1>
    %217 = vector.broadcast %cst_104 : f32 to vector<4x256xf32>
    %218 = arith.select %216, %214, %217 : vector<4x256xi1>, vector<4x256xf32>
    %c0_105 = arith.constant 0 : index
    %c6_106 = arith.constant 6 : index
    %219 = vector.load %arg5[%c0_105, %c6_106] : memref<4x25xf32, #tpu.memory_space<vmem>>, vector<4x1xf32>
    %220 = vector.broadcast %219 : vector<4x1xf32> to vector<4x256xf32>
    %221 = arith.mulf %218, %220 : vector<4x256xf32>
    %222 = arith.addf %213, %221 : vector<4x256xf32>
    %c0_107 = arith.constant 0 : index
    %c112_108 = arith.constant 112 : index
    %223 = vector.load %arg18[%c0_107, %c112_108] : memref<4x512xf32, #tpu.memory_space<vmem>>, vector<4x256xf32>
    %cst_109 = arith.constant 0.000000e+00 : f32
    %224 = vector.shape_cast %29 : vector<1x256xi1> to vector<1x256xi1>
    %225 = vector.broadcast %224 : vector<1x256xi1> to vector<4x256xi1>
    %226 = vector.broadcast %cst_109 : f32 to vector<4x256xf32>
    %227 = arith.select %225, %223, %226 : vector<4x256xi1>, vector<4x256xf32>
    %c0_110 = arith.constant 0 : index
    %c7_111 = arith.constant 7 : index
    %228 = vector.load %arg5[%c0_110, %c7_111] : memref<4x25xf32, #tpu.memory_space<vmem>>, vector<4x1xf32>
    %229 = vector.broadcast %228 : vector<4x1xf32> to vector<4x256xf32>
    %230 = arith.mulf %227, %229 : vector<4x256xf32>
    %231 = arith.addf %222, %230 : vector<4x256xf32>
    %c0_112 = arith.constant 0 : index
    %c113_113 = arith.constant 113 : index
    %232 = vector.load %arg18[%c0_112, %c113_113] : memref<4x512xf32, #tpu.memory_space<vmem>>, vector<4x256xf32>
    %cst_114 = arith.constant 0.000000e+00 : f32
    %233 = vector.shape_cast %43 : vector<1x256xi1> to vector<1x256xi1>
    %234 = vector.broadcast %233 : vector<1x256xi1> to vector<4x256xi1>
    %235 = vector.broadcast %cst_114 : f32 to vector<4x256xf32>
    %236 = arith.select %234, %232, %235 : vector<4x256xi1>, vector<4x256xf32>
    %c0_115 = arith.constant 0 : index
    %c8_116 = arith.constant 8 : index
    %237 = vector.load %arg5[%c0_115, %c8_116] : memref<4x25xf32, #tpu.memory_space<vmem>>, vector<4x1xf32>
    %238 = vector.broadcast %237 : vector<4x1xf32> to vector<4x256xf32>
    %239 = arith.mulf %236, %238 : vector<4x256xf32>
    %240 = arith.addf %231, %239 : vector<4x256xf32>
    %c0_117 = arith.constant 0 : index
    %c114 = arith.constant 114 : index
    %241 = vector.load %arg18[%c0_117, %c114] : memref<4x512xf32, #tpu.memory_space<vmem>>, vector<4x256xf32>
    %c1_i32_118 = arith.constant 1 : i32
    %242 = vector.broadcast %c1_i32_118 : i32 to vector<1x256xi32>
    %243 = arith.cmpi sge, %1, %242 : vector<1x256xi32>
    %c14_i32_119 = arith.constant 14 : i32
    %244 = vector.broadcast %c14_i32_119 : i32 to vector<1x256xi32>
    %245 = arith.cmpi slt, %2, %244 : vector<1x256xi32>
    %246 = arith.andi %243, %245 : vector<1x256xi1>
    %cst_120 = arith.constant 0.000000e+00 : f32
    %247 = vector.shape_cast %246 : vector<1x256xi1> to vector<1x256xi1>
    %248 = vector.broadcast %247 : vector<1x256xi1> to vector<4x256xi1>
    %249 = vector.broadcast %cst_120 : f32 to vector<4x256xf32>
    %250 = arith.select %248, %241, %249 : vector<4x256xi1>, vector<4x256xf32>
    %c0_121 = arith.constant 0 : index
    %c9 = arith.constant 9 : index
    %251 = vector.load %arg5[%c0_121, %c9] : memref<4x25xf32, #tpu.memory_space<vmem>>, vector<4x1xf32>
    %252 = vector.broadcast %251 : vector<4x1xf32> to vector<4x256xf32>
    %253 = arith.mulf %250, %252 : vector<4x256xf32>
    %254 = arith.addf %240, %253 : vector<4x256xf32>
    %c0_122 = arith.constant 0 : index
    %c126 = arith.constant 126 : index
    %255 = vector.load %arg18[%c0_122, %c126] : memref<4x512xf32, #tpu.memory_space<vmem>>, vector<4x256xf32>
    %c2_i32_123 = arith.constant 2 : i32
    %256 = vector.broadcast %c2_i32_123 : i32 to vector<1x256xi32>
    %257 = arith.cmpi sge, %2, %256 : vector<1x256xi32>
    %cst_124 = arith.constant 0.000000e+00 : f32
    %258 = vector.shape_cast %257 : vector<1x256xi1> to vector<1x256xi1>
    %259 = vector.broadcast %258 : vector<1x256xi1> to vector<4x256xi1>
    %260 = vector.broadcast %cst_124 : f32 to vector<4x256xf32>
    %261 = arith.select %259, %255, %260 : vector<4x256xi1>, vector<4x256xf32>
    %c0_125 = arith.constant 0 : index
    %c10 = arith.constant 10 : index
    %262 = vector.load %arg5[%c0_125, %c10] : memref<4x25xf32, #tpu.memory_space<vmem>>, vector<4x1xf32>
    %263 = vector.broadcast %262 : vector<4x1xf32> to vector<4x256xf32>
    %264 = arith.mulf %261, %263 : vector<4x256xf32>
    %265 = arith.addf %254, %264 : vector<4x256xf32>
    %c0_126 = arith.constant 0 : index
    %c127_127 = arith.constant 127 : index
    %266 = vector.load %arg18[%c0_126, %c127_127] : memref<4x512xf32, #tpu.memory_space<vmem>>, vector<4x256xf32>
    %cst_128 = arith.constant 0.000000e+00 : f32
    %267 = vector.shape_cast %54 : vector<1x256xi1> to vector<1x256xi1>
    %268 = vector.broadcast %267 : vector<1x256xi1> to vector<4x256xi1>
    %269 = vector.broadcast %cst_128 : f32 to vector<4x256xf32>
    %270 = arith.select %268, %266, %269 : vector<4x256xi1>, vector<4x256xf32>
    %c0_129 = arith.constant 0 : index
    %c11 = arith.constant 11 : index
    %271 = vector.load %arg5[%c0_129, %c11] : memref<4x25xf32, #tpu.memory_space<vmem>>, vector<4x1xf32>
    %272 = vector.broadcast %271 : vector<4x1xf32> to vector<4x256xf32>
    %273 = arith.mulf %270, %272 : vector<4x256xf32>
    %274 = arith.addf %265, %273 : vector<4x256xf32>
    %c0_130 = arith.constant 0 : index
    %c128_131 = arith.constant 128 : index
    %275 = vector.load %arg18[%c0_130, %c128_131] : memref<4x512xf32, #tpu.memory_space<vmem>>, vector<4x256xf32>
    %c0_132 = arith.constant 0 : index
    %c12 = arith.constant 12 : index
    %276 = vector.load %arg5[%c0_132, %c12] : memref<4x25xf32, #tpu.memory_space<vmem>>, vector<4x1xf32>
    %277 = vector.broadcast %276 : vector<4x1xf32> to vector<4x256xf32>
    %278 = arith.mulf %275, %277 : vector<4x256xf32>
    %279 = arith.addf %274, %278 : vector<4x256xf32>
    %c0_133 = arith.constant 0 : index
    %c129_134 = arith.constant 129 : index
    %280 = vector.load %arg18[%c0_133, %c129_134] : memref<4x512xf32, #tpu.memory_space<vmem>>, vector<4x256xf32>
    %cst_135 = arith.constant 0.000000e+00 : f32
    %281 = vector.shape_cast %70 : vector<1x256xi1> to vector<1x256xi1>
    %282 = vector.broadcast %281 : vector<1x256xi1> to vector<4x256xi1>
    %283 = vector.broadcast %cst_135 : f32 to vector<4x256xf32>
    %284 = arith.select %282, %280, %283 : vector<4x256xi1>, vector<4x256xf32>
    %c0_136 = arith.constant 0 : index
    %c13 = arith.constant 13 : index
    %285 = vector.load %arg5[%c0_136, %c13] : memref<4x25xf32, #tpu.memory_space<vmem>>, vector<4x1xf32>
    %286 = vector.broadcast %285 : vector<4x1xf32> to vector<4x256xf32>
    %287 = arith.mulf %284, %286 : vector<4x256xf32>
    %288 = arith.addf %279, %287 : vector<4x256xf32>
    %c0_137 = arith.constant 0 : index
    %c130 = arith.constant 130 : index
    %289 = vector.load %arg18[%c0_137, %c130] : memref<4x512xf32, #tpu.memory_space<vmem>>, vector<4x256xf32>
    %c14_i32_138 = arith.constant 14 : i32
    %290 = vector.broadcast %c14_i32_138 : i32 to vector<1x256xi32>
    %291 = arith.cmpi slt, %2, %290 : vector<1x256xi32>
    %cst_139 = arith.constant 0.000000e+00 : f32
    %292 = vector.shape_cast %291 : vector<1x256xi1> to vector<1x256xi1>
    %293 = vector.broadcast %292 : vector<1x256xi1> to vector<4x256xi1>
    %294 = vector.broadcast %cst_139 : f32 to vector<4x256xf32>
    %295 = arith.select %293, %289, %294 : vector<4x256xi1>, vector<4x256xf32>
    %c0_140 = arith.constant 0 : index
    %c14 = arith.constant 14 : index
    %296 = vector.load %arg5[%c0_140, %c14] : memref<4x25xf32, #tpu.memory_space<vmem>>, vector<4x1xf32>
    %297 = vector.broadcast %296 : vector<4x1xf32> to vector<4x256xf32>
    %298 = arith.mulf %295, %297 : vector<4x256xf32>
    %299 = arith.addf %288, %298 : vector<4x256xf32>
    %c0_141 = arith.constant 0 : index
    %c142 = arith.constant 142 : index
    %300 = vector.load %arg18[%c0_141, %c142] : memref<4x512xf32, #tpu.memory_space<vmem>>, vector<4x256xf32>
    %c15_i32_142 = arith.constant 15 : i32
    %301 = vector.broadcast %c15_i32_142 : i32 to vector<1x256xi32>
    %302 = arith.cmpi slt, %1, %301 : vector<1x256xi32>
    %c2_i32_143 = arith.constant 2 : i32
    %303 = vector.broadcast %c2_i32_143 : i32 to vector<1x256xi32>
    %304 = arith.cmpi sge, %2, %303 : vector<1x256xi32>
    %305 = arith.andi %302, %304 : vector<1x256xi1>
    %cst_144 = arith.constant 0.000000e+00 : f32
    %306 = vector.shape_cast %305 : vector<1x256xi1> to vector<1x256xi1>
    %307 = vector.broadcast %306 : vector<1x256xi1> to vector<4x256xi1>
    %308 = vector.broadcast %cst_144 : f32 to vector<4x256xf32>
    %309 = arith.select %307, %300, %308 : vector<4x256xi1>, vector<4x256xf32>
    %c0_145 = arith.constant 0 : index
    %c15 = arith.constant 15 : index
    %310 = vector.load %arg5[%c0_145, %c15] : memref<4x25xf32, #tpu.memory_space<vmem>>, vector<4x1xf32>
    %311 = vector.broadcast %310 : vector<4x1xf32> to vector<4x256xf32>
    %312 = arith.mulf %309, %311 : vector<4x256xf32>
    %313 = arith.addf %299, %312 : vector<4x256xf32>
    %c0_146 = arith.constant 0 : index
    %c143_147 = arith.constant 143 : index
    %314 = vector.load %arg18[%c0_146, %c143_147] : memref<4x512xf32, #tpu.memory_space<vmem>>, vector<4x256xf32>
    %cst_148 = arith.constant 0.000000e+00 : f32
    %315 = vector.shape_cast %84 : vector<1x256xi1> to vector<1x256xi1>
    %316 = vector.broadcast %315 : vector<1x256xi1> to vector<4x256xi1>
    %317 = vector.broadcast %cst_148 : f32 to vector<4x256xf32>
    %318 = arith.select %316, %314, %317 : vector<4x256xi1>, vector<4x256xf32>
    %c0_149 = arith.constant 0 : index
    %c16 = arith.constant 16 : index
    %319 = vector.load %arg5[%c0_149, %c16] : memref<4x25xf32, #tpu.memory_space<vmem>>, vector<4x1xf32>
    %320 = vector.broadcast %319 : vector<4x1xf32> to vector<4x256xf32>
    %321 = arith.mulf %318, %320 : vector<4x256xf32>
    %322 = arith.addf %313, %321 : vector<4x256xf32>
    %c0_150 = arith.constant 0 : index
    %c144_151 = arith.constant 144 : index
    %323 = vector.load %arg18[%c0_150, %c144_151] : memref<4x512xf32, #tpu.memory_space<vmem>>, vector<4x256xf32>
    %cst_152 = arith.constant 0.000000e+00 : f32
    %324 = vector.shape_cast %95 : vector<1x256xi1> to vector<1x256xi1>
    %325 = vector.broadcast %324 : vector<1x256xi1> to vector<4x256xi1>
    %326 = vector.broadcast %cst_152 : f32 to vector<4x256xf32>
    %327 = arith.select %325, %323, %326 : vector<4x256xi1>, vector<4x256xf32>
    %c0_153 = arith.constant 0 : index
    %c17 = arith.constant 17 : index
    %328 = vector.load %arg5[%c0_153, %c17] : memref<4x25xf32, #tpu.memory_space<vmem>>, vector<4x1xf32>
    %329 = vector.broadcast %328 : vector<4x1xf32> to vector<4x256xf32>
    %330 = arith.mulf %327, %329 : vector<4x256xf32>
    %331 = arith.addf %322, %330 : vector<4x256xf32>
    %c0_154 = arith.constant 0 : index
    %c145_155 = arith.constant 145 : index
    %332 = vector.load %arg18[%c0_154, %c145_155] : memref<4x512xf32, #tpu.memory_space<vmem>>, vector<4x256xf32>
    %cst_156 = arith.constant 0.000000e+00 : f32
    %333 = vector.shape_cast %109 : vector<1x256xi1> to vector<1x256xi1>
    %334 = vector.broadcast %333 : vector<1x256xi1> to vector<4x256xi1>
    %335 = vector.broadcast %cst_156 : f32 to vector<4x256xf32>
    %336 = arith.select %334, %332, %335 : vector<4x256xi1>, vector<4x256xf32>
    %c0_157 = arith.constant 0 : index
    %c18 = arith.constant 18 : index
    %337 = vector.load %arg5[%c0_157, %c18] : memref<4x25xf32, #tpu.memory_space<vmem>>, vector<4x1xf32>
    %338 = vector.broadcast %337 : vector<4x1xf32> to vector<4x256xf32>
    %339 = arith.mulf %336, %338 : vector<4x256xf32>
    %340 = arith.addf %331, %339 : vector<4x256xf32>
    %c0_158 = arith.constant 0 : index
    %c146 = arith.constant 146 : index
    %341 = vector.load %arg18[%c0_158, %c146] : memref<4x512xf32, #tpu.memory_space<vmem>>, vector<4x256xf32>
    %c15_i32_159 = arith.constant 15 : i32
    %342 = vector.broadcast %c15_i32_159 : i32 to vector<1x256xi32>
    %343 = arith.cmpi slt, %1, %342 : vector<1x256xi32>
    %c14_i32_160 = arith.constant 14 : i32
    %344 = vector.broadcast %c14_i32_160 : i32 to vector<1x256xi32>
    %345 = arith.cmpi slt, %2, %344 : vector<1x256xi32>
    %346 = arith.andi %343, %345 : vector<1x256xi1>
    %cst_161 = arith.constant 0.000000e+00 : f32
    %347 = vector.shape_cast %346 : vector<1x256xi1> to vector<1x256xi1>
    %348 = vector.broadcast %347 : vector<1x256xi1> to vector<4x256xi1>
    %349 = vector.broadcast %cst_161 : f32 to vector<4x256xf32>
    %350 = arith.select %348, %341, %349 : vector<4x256xi1>, vector<4x256xf32>
    %c0_162 = arith.constant 0 : index
    %c19 = arith.constant 19 : index
    %351 = vector.load %arg5[%c0_162, %c19] : memref<4x25xf32, #tpu.memory_space<vmem>>, vector<4x1xf32>
    %352 = vector.broadcast %351 : vector<4x1xf32> to vector<4x256xf32>
    %353 = arith.mulf %350, %352 : vector<4x256xf32>
    %354 = arith.addf %340, %353 : vector<4x256xf32>
    %c0_163 = arith.constant 0 : index
    %c158 = arith.constant 158 : index
    %355 = vector.load %arg18[%c0_163, %c158] : memref<4x512xf32, #tpu.memory_space<vmem>>, vector<4x256xf32>
    %c14_i32_164 = arith.constant 14 : i32
    %356 = vector.broadcast %c14_i32_164 : i32 to vector<1x256xi32>
    %357 = arith.cmpi slt, %1, %356 : vector<1x256xi32>
    %c2_i32_165 = arith.constant 2 : i32
    %358 = vector.broadcast %c2_i32_165 : i32 to vector<1x256xi32>
    %359 = arith.cmpi sge, %2, %358 : vector<1x256xi32>
    %360 = arith.andi %357, %359 : vector<1x256xi1>
    %cst_166 = arith.constant 0.000000e+00 : f32
    %361 = vector.shape_cast %360 : vector<1x256xi1> to vector<1x256xi1>
    %362 = vector.broadcast %361 : vector<1x256xi1> to vector<4x256xi1>
    %363 = vector.broadcast %cst_166 : f32 to vector<4x256xf32>
    %364 = arith.select %362, %355, %363 : vector<4x256xi1>, vector<4x256xf32>
    %c0_167 = arith.constant 0 : index
    %c20 = arith.constant 20 : index
    %365 = vector.load %arg5[%c0_167, %c20] : memref<4x25xf32, #tpu.memory_space<vmem>>, vector<4x1xf32>
    %366 = vector.broadcast %365 : vector<4x1xf32> to vector<4x256xf32>
    %367 = arith.mulf %364, %366 : vector<4x256xf32>
    %368 = arith.addf %354, %367 : vector<4x256xf32>
    %c0_168 = arith.constant 0 : index
    %c159 = arith.constant 159 : index
    %369 = vector.load %arg18[%c0_168, %c159] : memref<4x512xf32, #tpu.memory_space<vmem>>, vector<4x256xf32>
    %c14_i32_169 = arith.constant 14 : i32
    %370 = vector.broadcast %c14_i32_169 : i32 to vector<1x256xi32>
    %371 = arith.cmpi slt, %1, %370 : vector<1x256xi32>
    %c1_i32_170 = arith.constant 1 : i32
    %372 = vector.broadcast %c1_i32_170 : i32 to vector<1x256xi32>
    %373 = arith.cmpi sge, %2, %372 : vector<1x256xi32>
    %374 = arith.andi %371, %373 : vector<1x256xi1>
    %cst_171 = arith.constant 0.000000e+00 : f32
    %375 = vector.shape_cast %374 : vector<1x256xi1> to vector<1x256xi1>
    %376 = vector.broadcast %375 : vector<1x256xi1> to vector<4x256xi1>
    %377 = vector.broadcast %cst_171 : f32 to vector<4x256xf32>
    %378 = arith.select %376, %369, %377 : vector<4x256xi1>, vector<4x256xf32>
    %c0_172 = arith.constant 0 : index
    %c21 = arith.constant 21 : index
    %379 = vector.load %arg5[%c0_172, %c21] : memref<4x25xf32, #tpu.memory_space<vmem>>, vector<4x1xf32>
    %380 = vector.broadcast %379 : vector<4x1xf32> to vector<4x256xf32>
    %381 = arith.mulf %378, %380 : vector<4x256xf32>
    %382 = arith.addf %368, %381 : vector<4x256xf32>
    %c0_173 = arith.constant 0 : index
    %c160 = arith.constant 160 : index
    %383 = vector.load %arg18[%c0_173, %c160] : memref<4x512xf32, #tpu.memory_space<vmem>>, vector<4x256xf32>
    %c14_i32_174 = arith.constant 14 : i32
    %384 = vector.broadcast %c14_i32_174 : i32 to vector<1x256xi32>
    %385 = arith.cmpi slt, %1, %384 : vector<1x256xi32>
    %cst_175 = arith.constant 0.000000e+00 : f32
    %386 = vector.shape_cast %385 : vector<1x256xi1> to vector<1x256xi1>
    %387 = vector.broadcast %386 : vector<1x256xi1> to vector<4x256xi1>
    %388 = vector.broadcast %cst_175 : f32 to vector<4x256xf32>
    %389 = arith.select %387, %383, %388 : vector<4x256xi1>, vector<4x256xf32>
    %c0_176 = arith.constant 0 : index
    %c22 = arith.constant 22 : index
    %390 = vector.load %arg5[%c0_176, %c22] : memref<4x25xf32, #tpu.memory_space<vmem>>, vector<4x1xf32>
    %391 = vector.broadcast %390 : vector<4x1xf32> to vector<4x256xf32>
    %392 = arith.mulf %389, %391 : vector<4x256xf32>
    %393 = arith.addf %382, %392 : vector<4x256xf32>
    %c0_177 = arith.constant 0 : index
    %c161 = arith.constant 161 : index
    %394 = vector.load %arg18[%c0_177, %c161] : memref<4x512xf32, #tpu.memory_space<vmem>>, vector<4x256xf32>
    %c14_i32_178 = arith.constant 14 : i32
    %395 = vector.broadcast %c14_i32_178 : i32 to vector<1x256xi32>
    %396 = arith.cmpi slt, %1, %395 : vector<1x256xi32>
    %c15_i32_179 = arith.constant 15 : i32
    %397 = vector.broadcast %c15_i32_179 : i32 to vector<1x256xi32>
    %398 = arith.cmpi slt, %2, %397 : vector<1x256xi32>
    %399 = arith.andi %396, %398 : vector<1x256xi1>
    %cst_180 = arith.constant 0.000000e+00 : f32
    %400 = vector.shape_cast %399 : vector<1x256xi1> to vector<1x256xi1>
    %401 = vector.broadcast %400 : vector<1x256xi1> to vector<4x256xi1>
    %402 = vector.broadcast %cst_180 : f32 to vector<4x256xf32>
    %403 = arith.select %401, %394, %402 : vector<4x256xi1>, vector<4x256xf32>
    %c0_181 = arith.constant 0 : index
    %c23 = arith.constant 23 : index
    %404 = vector.load %arg5[%c0_181, %c23] : memref<4x25xf32, #tpu.memory_space<vmem>>, vector<4x1xf32>
    %405 = vector.broadcast %404 : vector<4x1xf32> to vector<4x256xf32>
    %406 = arith.mulf %403, %405 : vector<4x256xf32>
    %407 = arith.addf %393, %406 : vector<4x256xf32>
    %c0_182 = arith.constant 0 : index
    %c162 = arith.constant 162 : index
    %408 = vector.load %arg18[%c0_182, %c162] : memref<4x512xf32, #tpu.memory_space<vmem>>, vector<4x256xf32>
    %c14_i32_183 = arith.constant 14 : i32
    %409 = vector.broadcast %c14_i32_183 : i32 to vector<1x256xi32>
    %410 = arith.cmpi slt, %1, %409 : vector<1x256xi32>
    %c14_i32_184 = arith.constant 14 : i32
    %411 = vector.broadcast %c14_i32_184 : i32 to vector<1x256xi32>
    %412 = arith.cmpi slt, %2, %411 : vector<1x256xi32>
    %413 = arith.andi %410, %412 : vector<1x256xi1>
    %cst_185 = arith.constant 0.000000e+00 : f32
    %414 = vector.shape_cast %413 : vector<1x256xi1> to vector<1x256xi1>
    %415 = vector.broadcast %414 : vector<1x256xi1> to vector<4x256xi1>
    %416 = vector.broadcast %cst_185 : f32 to vector<4x256xf32>
    %417 = arith.select %415, %408, %416 : vector<4x256xi1>, vector<4x256xf32>
    %c0_186 = arith.constant 0 : index
    %c24 = arith.constant 24 : index
    %418 = vector.load %arg5[%c0_186, %c24] : memref<4x25xf32, #tpu.memory_space<vmem>>, vector<4x1xf32>
    %419 = vector.broadcast %418 : vector<4x1xf32> to vector<4x256xf32>
    %420 = arith.mulf %417, %419 : vector<4x256xf32>
    %421 = arith.addf %407, %420 : vector<4x256xf32>
    %c0_187 = arith.constant 0 : index
    %c0_188 = arith.constant 0 : index
    %422 = vector.load %arg6[%c0_187, %c0_188] : memref<4x4xf32, #tpu.memory_space<vmem>>, vector<4x4xf32>
    %cst_189 = arith.constant dense<0.000000e+00> : vector<4x256xf32>
    %423 = tpu.matmul %422, %421, %cst_189 {dimension_numbers = #tpu.dot_dimension_numbers<[1], [0], [0], [1], [0, 0, 1, 1], [], []>} : vector<4x4xf32>, vector<4x256xf32>, vector<4x256xf32> -> vector<4x256xf32>
    %c0_190 = arith.constant 0 : index
    %c0_191 = arith.constant 0 : index
    %c0_192 = arith.constant 0 : index
    %424 = vector.load %arg12[%c0_190, %c0_191, %c0_192] : memref<1x4x256xf32, #tpu.memory_space<vmem>>, vector<1x4x256xf32>
    %425 = vector.shape_cast %424 : vector<1x4x256xf32> to vector<4x256xf32>
    %426 = vector.shape_cast %423 : vector<4x256xf32> to vector<1x4x256xf32>
    tpu.vector_store %arg12[%c0_190, %c0_191, %c0_192], %426 {strides = array<i32>} : memref<1x4x256xf32, #tpu.memory_space<vmem>>, vector<1x4x256xf32>,
    %cst_193 = arith.constant dense<0.000000e+00> : vector<4xf32>
    %427 = vector.multi_reduction <add>, %423, %cst_193 [1] : vector<4x256xf32> to vector<4xf32>
    %428 = vector.shape_cast %427 : vector<4xf32> to vector<4x1xf32>
    %c0_194 = arith.constant 0 : index
    %c2_195 = arith.constant 2 : index
    %c0_196 = arith.constant 0 : index
    %c0_197 = arith.constant 0 : index
    %429 = vector.load %arg17[%c0_194, %c2_195, %c0_196, %c0_197] : memref<1x12x4x1xf32, #tpu.memory_space<vmem>>, vector<1x1x4x1xf32>
    %430 = vector.shape_cast %429 : vector<1x1x4x1xf32> to vector<4x1xf32>
    %431 = vector.shape_cast %428 : vector<4x1xf32> to vector<1x1x4x1xf32>
    tpu.vector_store %arg17[%c0_194, %c2_195, %c0_196, %c0_197], %431 {strides = array<i32>} : memref<1x12x4x1xf32, #tpu.memory_space<vmem>>, vector<1x1x4x1xf32>,
    %432 = arith.mulf %423, %423 : vector<4x256xf32>
    %cst_198 = arith.constant dense<0.000000e+00> : vector<4xf32>
    %433 = vector.multi_reduction <add>, %432, %cst_198 [1] : vector<4x256xf32> to vector<4xf32>
    %434 = vector.shape_cast %433 : vector<4xf32> to vector<4x1xf32>
    %c0_199 = arith.constant 0 : index
    %c3_200 = arith.constant 3 : index
    %c0_201 = arith.constant 0 : index
    %c0_202 = arith.constant 0 : index
    %435 = vector.load %arg17[%c0_199, %c3_200, %c0_201, %c0_202] : memref<1x12x4x1xf32, #tpu.memory_space<vmem>>, vector<1x1x4x1xf32>
    %436 = vector.shape_cast %435 : vector<1x1x4x1xf32> to vector<4x1xf32>
    %437 = vector.shape_cast %434 : vector<4x1xf32> to vector<1x1x4x1xf32>
    tpu.vector_store %arg17[%c0_199, %c3_200, %c0_201, %c0_202], %437 {strides = array<i32>} : memref<1x12x4x1xf32, #tpu.memory_space<vmem>>, vector<1x1x4x1xf32>,
    %c0_203 = arith.constant 0 : index
    %c94_204 = arith.constant 94 : index
    %438 = vector.load %arg18[%c0_203, %c94_204] : memref<4x512xf32, #tpu.memory_space<vmem>>, vector<4x256xf32>
    %cst_205 = arith.constant 0.000000e+00 : f32
    %439 = vector.shape_cast %139 : vector<1x256xi1> to vector<1x256xi1>
    %440 = vector.broadcast %439 : vector<1x256xi1> to vector<4x256xi1>
    %441 = vector.broadcast %cst_205 : f32 to vector<4x256xf32>
    %442 = arith.select %440, %438, %441 : vector<4x256xi1>, vector<4x256xf32>
    %c0_206 = arith.constant 0 : index
    %c0_207 = arith.constant 0 : index
    %443 = vector.load %arg7[%c0_206, %c0_207] : memref<4x9xf32, #tpu.memory_space<vmem>>, vector<4x1xf32>
    %444 = vector.broadcast %443 : vector<4x1xf32> to vector<4x256xf32>
    %445 = arith.mulf %442, %444 : vector<4x256xf32>
    %c0_208 = arith.constant 0 : index
    %c96_209 = arith.constant 96 : index
    %446 = vector.load %arg18[%c0_208, %c96_209] : memref<4x512xf32, #tpu.memory_space<vmem>>, vector<4x256xf32>
    %cst_210 = arith.constant 0.000000e+00 : f32
    %447 = vector.shape_cast %163 : vector<1x256xi1> to vector<1x256xi1>
    %448 = vector.broadcast %447 : vector<1x256xi1> to vector<4x256xi1>
    %449 = vector.broadcast %cst_210 : f32 to vector<4x256xf32>
    %450 = arith.select %448, %446, %449 : vector<4x256xi1>, vector<4x256xf32>
    %c0_211 = arith.constant 0 : index
    %c1_212 = arith.constant 1 : index
    %451 = vector.load %arg7[%c0_211, %c1_212] : memref<4x9xf32, #tpu.memory_space<vmem>>, vector<4x1xf32>
    %452 = vector.broadcast %451 : vector<4x1xf32> to vector<4x256xf32>
    %453 = arith.mulf %450, %452 : vector<4x256xf32>
    %454 = arith.addf %445, %453 : vector<4x256xf32>
    %c0_213 = arith.constant 0 : index
    %c98_214 = arith.constant 98 : index
    %455 = vector.load %arg18[%c0_213, %c98_214] : memref<4x512xf32, #tpu.memory_space<vmem>>, vector<4x256xf32>
    %cst_215 = arith.constant 0.000000e+00 : f32
    %456 = vector.shape_cast %191 : vector<1x256xi1> to vector<1x256xi1>
    %457 = vector.broadcast %456 : vector<1x256xi1> to vector<4x256xi1>
    %458 = vector.broadcast %cst_215 : f32 to vector<4x256xf32>
    %459 = arith.select %457, %455, %458 : vector<4x256xi1>, vector<4x256xf32>
    %c0_216 = arith.constant 0 : index
    %c2_217 = arith.constant 2 : index
    %460 = vector.load %arg7[%c0_216, %c2_217] : memref<4x9xf32, #tpu.memory_space<vmem>>, vector<4x1xf32>
    %461 = vector.broadcast %460 : vector<4x1xf32> to vector<4x256xf32>
    %462 = arith.mulf %459, %461 : vector<4x256xf32>
    %463 = arith.addf %454, %462 : vector<4x256xf32>
    %c0_218 = arith.constant 0 : index
    %c126_219 = arith.constant 126 : index
    %464 = vector.load %arg18[%c0_218, %c126_219] : memref<4x512xf32, #tpu.memory_space<vmem>>, vector<4x256xf32>
    %cst_220 = arith.constant 0.000000e+00 : f32
    %465 = vector.shape_cast %257 : vector<1x256xi1> to vector<1x256xi1>
    %466 = vector.broadcast %465 : vector<1x256xi1> to vector<4x256xi1>
    %467 = vector.broadcast %cst_220 : f32 to vector<4x256xf32>
    %468 = arith.select %466, %464, %467 : vector<4x256xi1>, vector<4x256xf32>
    %c0_221 = arith.constant 0 : index
    %c3_222 = arith.constant 3 : index
    %469 = vector.load %arg7[%c0_221, %c3_222] : memref<4x9xf32, #tpu.memory_space<vmem>>, vector<4x1xf32>
    %470 = vector.broadcast %469 : vector<4x1xf32> to vector<4x256xf32>
    %471 = arith.mulf %468, %470 : vector<4x256xf32>
    %472 = arith.addf %463, %471 : vector<4x256xf32>
    %c0_223 = arith.constant 0 : index
    %c128_224 = arith.constant 128 : index
    %473 = vector.load %arg18[%c0_223, %c128_224] : memref<4x512xf32, #tpu.memory_space<vmem>>, vector<4x256xf32>
    %c0_225 = arith.constant 0 : index
    %c4_226 = arith.constant 4 : index
    %474 = vector.load %arg7[%c0_225, %c4_226] : memref<4x9xf32, #tpu.memory_space<vmem>>, vector<4x1xf32>
    %475 = vector.broadcast %474 : vector<4x1xf32> to vector<4x256xf32>
    %476 = arith.mulf %473, %475 : vector<4x256xf32>
    %477 = arith.addf %472, %476 : vector<4x256xf32>
    %c0_227 = arith.constant 0 : index
    %c130_228 = arith.constant 130 : index
    %478 = vector.load %arg18[%c0_227, %c130_228] : memref<4x512xf32, #tpu.memory_space<vmem>>, vector<4x256xf32>
    %cst_229 = arith.constant 0.000000e+00 : f32
    %479 = vector.shape_cast %291 : vector<1x256xi1> to vector<1x256xi1>
    %480 = vector.broadcast %479 : vector<1x256xi1> to vector<4x256xi1>
    %481 = vector.broadcast %cst_229 : f32 to vector<4x256xf32>
    %482 = arith.select %480, %478, %481 : vector<4x256xi1>, vector<4x256xf32>
    %c0_230 = arith.constant 0 : index
    %c5_231 = arith.constant 5 : index
    %483 = vector.load %arg7[%c0_230, %c5_231] : memref<4x9xf32, #tpu.memory_space<vmem>>, vector<4x1xf32>
    %484 = vector.broadcast %483 : vector<4x1xf32> to vector<4x256xf32>
    %485 = arith.mulf %482, %484 : vector<4x256xf32>
    %486 = arith.addf %477, %485 : vector<4x256xf32>
    %c0_232 = arith.constant 0 : index
    %c158_233 = arith.constant 158 : index
    %487 = vector.load %arg18[%c0_232, %c158_233] : memref<4x512xf32, #tpu.memory_space<vmem>>, vector<4x256xf32>
    %cst_234 = arith.constant 0.000000e+00 : f32
    %488 = vector.shape_cast %360 : vector<1x256xi1> to vector<1x256xi1>
    %489 = vector.broadcast %488 : vector<1x256xi1> to vector<4x256xi1>
    %490 = vector.broadcast %cst_234 : f32 to vector<4x256xf32>
    %491 = arith.select %489, %487, %490 : vector<4x256xi1>, vector<4x256xf32>
    %c0_235 = arith.constant 0 : index
    %c6_236 = arith.constant 6 : index
    %492 = vector.load %arg7[%c0_235, %c6_236] : memref<4x9xf32, #tpu.memory_space<vmem>>, vector<4x1xf32>
    %493 = vector.broadcast %492 : vector<4x1xf32> to vector<4x256xf32>
    %494 = arith.mulf %491, %493 : vector<4x256xf32>
    %495 = arith.addf %486, %494 : vector<4x256xf32>
    %c0_237 = arith.constant 0 : index
    %c160_238 = arith.constant 160 : index
    %496 = vector.load %arg18[%c0_237, %c160_238] : memref<4x512xf32, #tpu.memory_space<vmem>>, vector<4x256xf32>
    %cst_239 = arith.constant 0.000000e+00 : f32
    %497 = vector.shape_cast %385 : vector<1x256xi1> to vector<1x256xi1>
    %498 = vector.broadcast %497 : vector<1x256xi1> to vector<4x256xi1>
    %499 = vector.broadcast %cst_239 : f32 to vector<4x256xf32>
    %500 = arith.select %498, %496, %499 : vector<4x256xi1>, vector<4x256xf32>
    %c0_240 = arith.constant 0 : index
    %c7_241 = arith.constant 7 : index
    %501 = vector.load %arg7[%c0_240, %c7_241] : memref<4x9xf32, #tpu.memory_space<vmem>>, vector<4x1xf32>
    %502 = vector.broadcast %501 : vector<4x1xf32> to vector<4x256xf32>
    %503 = arith.mulf %500, %502 : vector<4x256xf32>
    %504 = arith.addf %495, %503 : vector<4x256xf32>
    %c0_242 = arith.constant 0 : index
    %c162_243 = arith.constant 162 : index
    %505 = vector.load %arg18[%c0_242, %c162_243] : memref<4x512xf32, #tpu.memory_space<vmem>>, vector<4x256xf32>
    %cst_244 = arith.constant 0.000000e+00 : f32
    %506 = vector.shape_cast %413 : vector<1x256xi1> to vector<1x256xi1>
    %507 = vector.broadcast %506 : vector<1x256xi1> to vector<4x256xi1>
    %508 = vector.broadcast %cst_244 : f32 to vector<4x256xf32>
    %509 = arith.select %507, %505, %508 : vector<4x256xi1>, vector<4x256xf32>
    %c0_245 = arith.constant 0 : index
    %c8_246 = arith.constant 8 : index
    %510 = vector.load %arg7[%c0_245, %c8_246] : memref<4x9xf32, #tpu.memory_space<vmem>>, vector<4x1xf32>
    %511 = vector.broadcast %510 : vector<4x1xf32> to vector<4x256xf32>
    %512 = arith.mulf %509, %511 : vector<4x256xf32>
    %513 = arith.addf %504, %512 : vector<4x256xf32>
    %c0_247 = arith.constant 0 : index
    %c0_248 = arith.constant 0 : index
    %514 = vector.load %arg8[%c0_247, %c0_248] : memref<4x4xf32, #tpu.memory_space<vmem>>, vector<4x4xf32>
    %cst_249 = arith.constant dense<0.000000e+00> : vector<4x256xf32>
    %515 = tpu.matmul %514, %513, %cst_249 {dimension_numbers = #tpu.dot_dimension_numbers<[1], [0], [0], [1], [0, 0, 1, 1], [], []>} : vector<4x4xf32>, vector<4x256xf32>, vector<4x256xf32> -> vector<4x256xf32>
    %c0_250 = arith.constant 0 : index
    %c0_251 = arith.constant 0 : index
    %c0_252 = arith.constant 0 : index
    %516 = vector.load %arg13[%c0_250, %c0_251, %c0_252] : memref<1x4x256xf32, #tpu.memory_space<vmem>>, vector<1x4x256xf32>
    %517 = vector.shape_cast %516 : vector<1x4x256xf32> to vector<4x256xf32>
    %518 = vector.shape_cast %515 : vector<4x256xf32> to vector<1x4x256xf32>
    tpu.vector_store %arg13[%c0_250, %c0_251, %c0_252], %518 {strides = array<i32>} : memref<1x4x256xf32, #tpu.memory_space<vmem>>, vector<1x4x256xf32>,
    %cst_253 = arith.constant dense<0.000000e+00> : vector<4xf32>
    %519 = vector.multi_reduction <add>, %515, %cst_253 [1] : vector<4x256xf32> to vector<4xf32>
    %520 = vector.shape_cast %519 : vector<4xf32> to vector<4x1xf32>
    %c0_254 = arith.constant 0 : index
    %c4_255 = arith.constant 4 : index
    %c0_256 = arith.constant 0 : index
    %c0_257 = arith.constant 0 : index
    %521 = vector.load %arg17[%c0_254, %c4_255, %c0_256, %c0_257] : memref<1x12x4x1xf32, #tpu.memory_space<vmem>>, vector<1x1x4x1xf32>
    %522 = vector.shape_cast %521 : vector<1x1x4x1xf32> to vector<4x1xf32>
    %523 = vector.shape_cast %520 : vector<4x1xf32> to vector<1x1x4x1xf32>
    tpu.vector_store %arg17[%c0_254, %c4_255, %c0_256, %c0_257], %523 {strides = array<i32>} : memref<1x12x4x1xf32, #tpu.memory_space<vmem>>, vector<1x1x4x1xf32>,
    %524 = arith.mulf %515, %515 : vector<4x256xf32>
    %cst_258 = arith.constant dense<0.000000e+00> : vector<4xf32>
    %525 = vector.multi_reduction <add>, %524, %cst_258 [1] : vector<4x256xf32> to vector<4xf32>
    %526 = vector.shape_cast %525 : vector<4xf32> to vector<4x1xf32>
    %c0_259 = arith.constant 0 : index
    %c5_260 = arith.constant 5 : index
    %c0_261 = arith.constant 0 : index
    %c0_262 = arith.constant 0 : index
    %527 = vector.load %arg17[%c0_259, %c5_260, %c0_261, %c0_262] : memref<1x12x4x1xf32, #tpu.memory_space<vmem>>, vector<1x1x4x1xf32>
    %528 = vector.shape_cast %527 : vector<1x1x4x1xf32> to vector<4x1xf32>
    %529 = vector.shape_cast %526 : vector<4x1xf32> to vector<1x1x4x1xf32>
    tpu.vector_store %arg17[%c0_259, %c5_260, %c0_261, %c0_262], %529 {strides = array<i32>} : memref<1x12x4x1xf32, #tpu.memory_space<vmem>>, vector<1x1x4x1xf32>,
    %c0_263 = arith.constant 0 : index
    %c60 = arith.constant 60 : index
    %530 = vector.load %arg18[%c0_263, %c60] : memref<4x512xf32, #tpu.memory_space<vmem>>, vector<4x256xf32>
    %c4_i32 = arith.constant 4 : i32
    %531 = vector.broadcast %c4_i32 : i32 to vector<1x256xi32>
    %532 = arith.cmpi sge, %1, %531 : vector<1x256xi32>
    %c4_i32_264 = arith.constant 4 : i32
    %533 = vector.broadcast %c4_i32_264 : i32 to vector<1x256xi32>
    %534 = arith.cmpi sge, %2, %533 : vector<1x256xi32>
    %535 = arith.andi %532, %534 : vector<1x256xi1>
    %cst_265 = arith.constant 0.000000e+00 : f32
    %536 = vector.shape_cast %535 : vector<1x256xi1> to vector<1x256xi1>
    %537 = vector.broadcast %536 : vector<1x256xi1> to vector<4x256xi1>
    %538 = vector.broadcast %cst_265 : f32 to vector<4x256xf32>
    %539 = arith.select %537, %530, %538 : vector<4x256xi1>, vector<4x256xf32>
    %c0_266 = arith.constant 0 : index
    %c0_267 = arith.constant 0 : index
    %540 = vector.load %arg9[%c0_266, %c0_267] : memref<4x25xf32, #tpu.memory_space<vmem>>, vector<4x1xf32>
    %541 = vector.broadcast %540 : vector<4x1xf32> to vector<4x256xf32>
    %542 = arith.mulf %539, %541 : vector<4x256xf32>
    %c0_268 = arith.constant 0 : index
    %c62 = arith.constant 62 : index
    %543 = vector.load %arg18[%c0_268, %c62] : memref<4x512xf32, #tpu.memory_space<vmem>>, vector<4x256xf32>
    %c4_i32_269 = arith.constant 4 : i32
    %544 = vector.broadcast %c4_i32_269 : i32 to vector<1x256xi32>
    %545 = arith.cmpi sge, %1, %544 : vector<1x256xi32>
    %c2_i32_270 = arith.constant 2 : i32
    %546 = vector.broadcast %c2_i32_270 : i32 to vector<1x256xi32>
    %547 = arith.cmpi sge, %2, %546 : vector<1x256xi32>
    %548 = arith.andi %545, %547 : vector<1x256xi1>
    %cst_271 = arith.constant 0.000000e+00 : f32
    %549 = vector.shape_cast %548 : vector<1x256xi1> to vector<1x256xi1>
    %550 = vector.broadcast %549 : vector<1x256xi1> to vector<4x256xi1>
    %551 = vector.broadcast %cst_271 : f32 to vector<4x256xf32>
    %552 = arith.select %550, %543, %551 : vector<4x256xi1>, vector<4x256xf32>
    %c0_272 = arith.constant 0 : index
    %c1_273 = arith.constant 1 : index
    %553 = vector.load %arg9[%c0_272, %c1_273] : memref<4x25xf32, #tpu.memory_space<vmem>>, vector<4x1xf32>
    %554 = vector.broadcast %553 : vector<4x1xf32> to vector<4x256xf32>
    %555 = arith.mulf %552, %554 : vector<4x256xf32>
    %556 = arith.addf %542, %555 : vector<4x256xf32>
    %c0_274 = arith.constant 0 : index
    %c64 = arith.constant 64 : index
    %557 = vector.load %arg18[%c0_274, %c64] : memref<4x512xf32, #tpu.memory_space<vmem>>, vector<4x256xf32>
    %c4_i32_275 = arith.constant 4 : i32
    %558 = vector.broadcast %c4_i32_275 : i32 to vector<1x256xi32>
    %559 = arith.cmpi sge, %1, %558 : vector<1x256xi32>
    %cst_276 = arith.constant 0.000000e+00 : f32
    %560 = vector.shape_cast %559 : vector<1x256xi1> to vector<1x256xi1>
    %561 = vector.broadcast %560 : vector<1x256xi1> to vector<4x256xi1>
    %562 = vector.broadcast %cst_276 : f32 to vector<4x256xf32>
    %563 = arith.select %561, %557, %562 : vector<4x256xi1>, vector<4x256xf32>
    %c0_277 = arith.constant 0 : index
    %c2_278 = arith.constant 2 : index
    %564 = vector.load %arg9[%c0_277, %c2_278] : memref<4x25xf32, #tpu.memory_space<vmem>>, vector<4x1xf32>
    %565 = vector.broadcast %564 : vector<4x1xf32> to vector<4x256xf32>
    %566 = arith.mulf %563, %565 : vector<4x256xf32>
    %567 = arith.addf %556, %566 : vector<4x256xf32>
    %c0_279 = arith.constant 0 : index
    %c66 = arith.constant 66 : index
    %568 = vector.load %arg18[%c0_279, %c66] : memref<4x512xf32, #tpu.memory_space<vmem>>, vector<4x256xf32>
    %c4_i32_280 = arith.constant 4 : i32
    %569 = vector.broadcast %c4_i32_280 : i32 to vector<1x256xi32>
    %570 = arith.cmpi sge, %1, %569 : vector<1x256xi32>
    %c14_i32_281 = arith.constant 14 : i32
    %571 = vector.broadcast %c14_i32_281 : i32 to vector<1x256xi32>
    %572 = arith.cmpi slt, %2, %571 : vector<1x256xi32>
    %573 = arith.andi %570, %572 : vector<1x256xi1>
    %cst_282 = arith.constant 0.000000e+00 : f32
    %574 = vector.shape_cast %573 : vector<1x256xi1> to vector<1x256xi1>
    %575 = vector.broadcast %574 : vector<1x256xi1> to vector<4x256xi1>
    %576 = vector.broadcast %cst_282 : f32 to vector<4x256xf32>
    %577 = arith.select %575, %568, %576 : vector<4x256xi1>, vector<4x256xf32>
    %c0_283 = arith.constant 0 : index
    %c3_284 = arith.constant 3 : index
    %578 = vector.load %arg9[%c0_283, %c3_284] : memref<4x25xf32, #tpu.memory_space<vmem>>, vector<4x1xf32>
    %579 = vector.broadcast %578 : vector<4x1xf32> to vector<4x256xf32>
    %580 = arith.mulf %577, %579 : vector<4x256xf32>
    %581 = arith.addf %567, %580 : vector<4x256xf32>
    %c0_285 = arith.constant 0 : index
    %c68 = arith.constant 68 : index
    %582 = vector.load %arg18[%c0_285, %c68] : memref<4x512xf32, #tpu.memory_space<vmem>>, vector<4x256xf32>
    %c4_i32_286 = arith.constant 4 : i32
    %583 = vector.broadcast %c4_i32_286 : i32 to vector<1x256xi32>
    %584 = arith.cmpi sge, %1, %583 : vector<1x256xi32>
    %c12_i32 = arith.constant 12 : i32
    %585 = vector.broadcast %c12_i32 : i32 to vector<1x256xi32>
    %586 = arith.cmpi slt, %2, %585 : vector<1x256xi32>
    %587 = arith.andi %584, %586 : vector<1x256xi1>
    %cst_287 = arith.constant 0.000000e+00 : f32
    %588 = vector.shape_cast %587 : vector<1x256xi1> to vector<1x256xi1>
    %589 = vector.broadcast %588 : vector<1x256xi1> to vector<4x256xi1>
    %590 = vector.broadcast %cst_287 : f32 to vector<4x256xf32>
    %591 = arith.select %589, %582, %590 : vector<4x256xi1>, vector<4x256xf32>
    %c0_288 = arith.constant 0 : index
    %c4_289 = arith.constant 4 : index
    %592 = vector.load %arg9[%c0_288, %c4_289] : memref<4x25xf32, #tpu.memory_space<vmem>>, vector<4x1xf32>
    %593 = vector.broadcast %592 : vector<4x1xf32> to vector<4x256xf32>
    %594 = arith.mulf %591, %593 : vector<4x256xf32>
    %595 = arith.addf %581, %594 : vector<4x256xf32>
    %c0_290 = arith.constant 0 : index
    %c92 = arith.constant 92 : index
    %596 = vector.load %arg18[%c0_290, %c92] : memref<4x512xf32, #tpu.memory_space<vmem>>, vector<4x256xf32>
    %c2_i32_291 = arith.constant 2 : i32
    %597 = vector.broadcast %c2_i32_291 : i32 to vector<1x256xi32>
    %598 = arith.cmpi sge, %1, %597 : vector<1x256xi32>
    %c4_i32_292 = arith.constant 4 : i32
    %599 = vector.broadcast %c4_i32_292 : i32 to vector<1x256xi32>
    %600 = arith.cmpi sge, %2, %599 : vector<1x256xi32>
    %601 = arith.andi %598, %600 : vector<1x256xi1>
    %cst_293 = arith.constant 0.000000e+00 : f32
    %602 = vector.shape_cast %601 : vector<1x256xi1> to vector<1x256xi1>
    %603 = vector.broadcast %602 : vector<1x256xi1> to vector<4x256xi1>
    %604 = vector.broadcast %cst_293 : f32 to vector<4x256xf32>
    %605 = arith.select %603, %596, %604 : vector<4x256xi1>, vector<4x256xf32>
    %c0_294 = arith.constant 0 : index
    %c5_295 = arith.constant 5 : index
    %606 = vector.load %arg9[%c0_294, %c5_295] : memref<4x25xf32, #tpu.memory_space<vmem>>, vector<4x1xf32>
    %607 = vector.broadcast %606 : vector<4x1xf32> to vector<4x256xf32>
    %608 = arith.mulf %605, %607 : vector<4x256xf32>
    %609 = arith.addf %595, %608 : vector<4x256xf32>
    %c0_296 = arith.constant 0 : index
    %c94_297 = arith.constant 94 : index
    %610 = vector.load %arg18[%c0_296, %c94_297] : memref<4x512xf32, #tpu.memory_space<vmem>>, vector<4x256xf32>
    %cst_298 = arith.constant 0.000000e+00 : f32
    %611 = vector.shape_cast %139 : vector<1x256xi1> to vector<1x256xi1>
    %612 = vector.broadcast %611 : vector<1x256xi1> to vector<4x256xi1>
    %613 = vector.broadcast %cst_298 : f32 to vector<4x256xf32>
    %614 = arith.select %612, %610, %613 : vector<4x256xi1>, vector<4x256xf32>
    %c0_299 = arith.constant 0 : index
    %c6_300 = arith.constant 6 : index
    %615 = vector.load %arg9[%c0_299, %c6_300] : memref<4x25xf32, #tpu.memory_space<vmem>>, vector<4x1xf32>
    %616 = vector.broadcast %615 : vector<4x1xf32> to vector<4x256xf32>
    %617 = arith.mulf %614, %616 : vector<4x256xf32>
    %618 = arith.addf %609, %617 : vector<4x256xf32>
    %c0_301 = arith.constant 0 : index
    %c96_302 = arith.constant 96 : index
    %619 = vector.load %arg18[%c0_301, %c96_302] : memref<4x512xf32, #tpu.memory_space<vmem>>, vector<4x256xf32>
    %cst_303 = arith.constant 0.000000e+00 : f32
    %620 = vector.shape_cast %163 : vector<1x256xi1> to vector<1x256xi1>
    %621 = vector.broadcast %620 : vector<1x256xi1> to vector<4x256xi1>
    %622 = vector.broadcast %cst_303 : f32 to vector<4x256xf32>
    %623 = arith.select %621, %619, %622 : vector<4x256xi1>, vector<4x256xf32>
    %c0_304 = arith.constant 0 : index
    %c7_305 = arith.constant 7 : index
    %624 = vector.load %arg9[%c0_304, %c7_305] : memref<4x25xf32, #tpu.memory_space<vmem>>, vector<4x1xf32>
    %625 = vector.broadcast %624 : vector<4x1xf32> to vector<4x256xf32>
    %626 = arith.mulf %623, %625 : vector<4x256xf32>
    %627 = arith.addf %618, %626 : vector<4x256xf32>
    %c0_306 = arith.constant 0 : index
    %c98_307 = arith.constant 98 : index
    %628 = vector.load %arg18[%c0_306, %c98_307] : memref<4x512xf32, #tpu.memory_space<vmem>>, vector<4x256xf32>
    %cst_308 = arith.constant 0.000000e+00 : f32
    %629 = vector.shape_cast %191 : vector<1x256xi1> to vector<1x256xi1>
    %630 = vector.broadcast %629 : vector<1x256xi1> to vector<4x256xi1>
    %631 = vector.broadcast %cst_308 : f32 to vector<4x256xf32>
    %632 = arith.select %630, %628, %631 : vector<4x256xi1>, vector<4x256xf32>
    %c0_309 = arith.constant 0 : index
    %c8_310 = arith.constant 8 : index
    %633 = vector.load %arg9[%c0_309, %c8_310] : memref<4x25xf32, #tpu.memory_space<vmem>>, vector<4x1xf32>
    %634 = vector.broadcast %633 : vector<4x1xf32> to vector<4x256xf32>
    %635 = arith.mulf %632, %634 : vector<4x256xf32>
    %636 = arith.addf %627, %635 : vector<4x256xf32>
    %c0_311 = arith.constant 0 : index
    %c100 = arith.constant 100 : index
    %637 = vector.load %arg18[%c0_311, %c100] : memref<4x512xf32, #tpu.memory_space<vmem>>, vector<4x256xf32>
    %c2_i32_312 = arith.constant 2 : i32
    %638 = vector.broadcast %c2_i32_312 : i32 to vector<1x256xi32>
    %639 = arith.cmpi sge, %1, %638 : vector<1x256xi32>
    %c12_i32_313 = arith.constant 12 : i32
    %640 = vector.broadcast %c12_i32_313 : i32 to vector<1x256xi32>
    %641 = arith.cmpi slt, %2, %640 : vector<1x256xi32>
    %642 = arith.andi %639, %641 : vector<1x256xi1>
    %cst_314 = arith.constant 0.000000e+00 : f32
    %643 = vector.shape_cast %642 : vector<1x256xi1> to vector<1x256xi1>
    %644 = vector.broadcast %643 : vector<1x256xi1> to vector<4x256xi1>
    %645 = vector.broadcast %cst_314 : f32 to vector<4x256xf32>
    %646 = arith.select %644, %637, %645 : vector<4x256xi1>, vector<4x256xf32>
    %c0_315 = arith.constant 0 : index
    %c9_316 = arith.constant 9 : index
    %647 = vector.load %arg9[%c0_315, %c9_316] : memref<4x25xf32, #tpu.memory_space<vmem>>, vector<4x1xf32>
    %648 = vector.broadcast %647 : vector<4x1xf32> to vector<4x256xf32>
    %649 = arith.mulf %646, %648 : vector<4x256xf32>
    %650 = arith.addf %636, %649 : vector<4x256xf32>
    %c0_317 = arith.constant 0 : index
    %c124 = arith.constant 124 : index
    %651 = vector.load %arg18[%c0_317, %c124] : memref<4x512xf32, #tpu.memory_space<vmem>>, vector<4x256xf32>
    %c4_i32_318 = arith.constant 4 : i32
    %652 = vector.broadcast %c4_i32_318 : i32 to vector<1x256xi32>
    %653 = arith.cmpi sge, %2, %652 : vector<1x256xi32>
    %cst_319 = arith.constant 0.000000e+00 : f32
    %654 = vector.shape_cast %653 : vector<1x256xi1> to vector<1x256xi1>
    %655 = vector.broadcast %654 : vector<1x256xi1> to vector<4x256xi1>
    %656 = vector.broadcast %cst_319 : f32 to vector<4x256xf32>
    %657 = arith.select %655, %651, %656 : vector<4x256xi1>, vector<4x256xf32>
    %c0_320 = arith.constant 0 : index
    %c10_321 = arith.constant 10 : index
    %658 = vector.load %arg9[%c0_320, %c10_321] : memref<4x25xf32, #tpu.memory_space<vmem>>, vector<4x1xf32>
    %659 = vector.broadcast %658 : vector<4x1xf32> to vector<4x256xf32>
    %660 = arith.mulf %657, %659 : vector<4x256xf32>
    %661 = arith.addf %650, %660 : vector<4x256xf32>
    %c0_322 = arith.constant 0 : index
    %c126_323 = arith.constant 126 : index
    %662 = vector.load %arg18[%c0_322, %c126_323] : memref<4x512xf32, #tpu.memory_space<vmem>>, vector<4x256xf32>
    %cst_324 = arith.constant 0.000000e+00 : f32
    %663 = vector.shape_cast %257 : vector<1x256xi1> to vector<1x256xi1>
    %664 = vector.broadcast %663 : vector<1x256xi1> to vector<4x256xi1>
    %665 = vector.broadcast %cst_324 : f32 to vector<4x256xf32>
    %666 = arith.select %664, %662, %665 : vector<4x256xi1>, vector<4x256xf32>
    %c0_325 = arith.constant 0 : index
    %c11_326 = arith.constant 11 : index
    %667 = vector.load %arg9[%c0_325, %c11_326] : memref<4x25xf32, #tpu.memory_space<vmem>>, vector<4x1xf32>
    %668 = vector.broadcast %667 : vector<4x1xf32> to vector<4x256xf32>
    %669 = arith.mulf %666, %668 : vector<4x256xf32>
    %670 = arith.addf %661, %669 : vector<4x256xf32>
    %c0_327 = arith.constant 0 : index
    %c128_328 = arith.constant 128 : index
    %671 = vector.load %arg18[%c0_327, %c128_328] : memref<4x512xf32, #tpu.memory_space<vmem>>, vector<4x256xf32>
    %c0_329 = arith.constant 0 : index
    %c12_330 = arith.constant 12 : index
    %672 = vector.load %arg9[%c0_329, %c12_330] : memref<4x25xf32, #tpu.memory_space<vmem>>, vector<4x1xf32>
    %673 = vector.broadcast %672 : vector<4x1xf32> to vector<4x256xf32>
    %674 = arith.mulf %671, %673 : vector<4x256xf32>
    %675 = arith.addf %670, %674 : vector<4x256xf32>
    %c0_331 = arith.constant 0 : index
    %c130_332 = arith.constant 130 : index
    %676 = vector.load %arg18[%c0_331, %c130_332] : memref<4x512xf32, #tpu.memory_space<vmem>>, vector<4x256xf32>
    %cst_333 = arith.constant 0.000000e+00 : f32
    %677 = vector.shape_cast %291 : vector<1x256xi1> to vector<1x256xi1>
    %678 = vector.broadcast %677 : vector<1x256xi1> to vector<4x256xi1>
    %679 = vector.broadcast %cst_333 : f32 to vector<4x256xf32>
    %680 = arith.select %678, %676, %679 : vector<4x256xi1>, vector<4x256xf32>
    %c0_334 = arith.constant 0 : index
    %c13_335 = arith.constant 13 : index
    %681 = vector.load %arg9[%c0_334, %c13_335] : memref<4x25xf32, #tpu.memory_space<vmem>>, vector<4x1xf32>
    %682 = vector.broadcast %681 : vector<4x1xf32> to vector<4x256xf32>
    %683 = arith.mulf %680, %682 : vector<4x256xf32>
    %684 = arith.addf %675, %683 : vector<4x256xf32>
    %c0_336 = arith.constant 0 : index
    %c132 = arith.constant 132 : index
    %685 = vector.load %arg18[%c0_336, %c132] : memref<4x512xf32, #tpu.memory_space<vmem>>, vector<4x256xf32>
    %c12_i32_337 = arith.constant 12 : i32
    %686 = vector.broadcast %c12_i32_337 : i32 to vector<1x256xi32>
    %687 = arith.cmpi slt, %2, %686 : vector<1x256xi32>
    %cst_338 = arith.constant 0.000000e+00 : f32
    %688 = vector.shape_cast %687 : vector<1x256xi1> to vector<1x256xi1>
    %689 = vector.broadcast %688 : vector<1x256xi1> to vector<4x256xi1>
    %690 = vector.broadcast %cst_338 : f32 to vector<4x256xf32>
    %691 = arith.select %689, %685, %690 : vector<4x256xi1>, vector<4x256xf32>
    %c0_339 = arith.constant 0 : index
    %c14_340 = arith.constant 14 : index
    %692 = vector.load %arg9[%c0_339, %c14_340] : memref<4x25xf32, #tpu.memory_space<vmem>>, vector<4x1xf32>
    %693 = vector.broadcast %692 : vector<4x1xf32> to vector<4x256xf32>
    %694 = arith.mulf %691, %693 : vector<4x256xf32>
    %695 = arith.addf %684, %694 : vector<4x256xf32>
    %c0_341 = arith.constant 0 : index
    %c156 = arith.constant 156 : index
    %696 = vector.load %arg18[%c0_341, %c156] : memref<4x512xf32, #tpu.memory_space<vmem>>, vector<4x256xf32>
    %c14_i32_342 = arith.constant 14 : i32
    %697 = vector.broadcast %c14_i32_342 : i32 to vector<1x256xi32>
    %698 = arith.cmpi slt, %1, %697 : vector<1x256xi32>
    %c4_i32_343 = arith.constant 4 : i32
    %699 = vector.broadcast %c4_i32_343 : i32 to vector<1x256xi32>
    %700 = arith.cmpi sge, %2, %699 : vector<1x256xi32>
    %701 = arith.andi %698, %700 : vector<1x256xi1>
    %cst_344 = arith.constant 0.000000e+00 : f32
    %702 = vector.shape_cast %701 : vector<1x256xi1> to vector<1x256xi1>
    %703 = vector.broadcast %702 : vector<1x256xi1> to vector<4x256xi1>
    %704 = vector.broadcast %cst_344 : f32 to vector<4x256xf32>
    %705 = arith.select %703, %696, %704 : vector<4x256xi1>, vector<4x256xf32>
    %c0_345 = arith.constant 0 : index
    %c15_346 = arith.constant 15 : index
    %706 = vector.load %arg9[%c0_345, %c15_346] : memref<4x25xf32, #tpu.memory_space<vmem>>, vector<4x1xf32>
    %707 = vector.broadcast %706 : vector<4x1xf32> to vector<4x256xf32>
    %708 = arith.mulf %705, %707 : vector<4x256xf32>
    %709 = arith.addf %695, %708 : vector<4x256xf32>
    %c0_347 = arith.constant 0 : index
    %c158_348 = arith.constant 158 : index
    %710 = vector.load %arg18[%c0_347, %c158_348] : memref<4x512xf32, #tpu.memory_space<vmem>>, vector<4x256xf32>
    %cst_349 = arith.constant 0.000000e+00 : f32
    %711 = vector.shape_cast %360 : vector<1x256xi1> to vector<1x256xi1>
    %712 = vector.broadcast %711 : vector<1x256xi1> to vector<4x256xi1>
    %713 = vector.broadcast %cst_349 : f32 to vector<4x256xf32>
    %714 = arith.select %712, %710, %713 : vector<4x256xi1>, vector<4x256xf32>
    %c0_350 = arith.constant 0 : index
    %c16_351 = arith.constant 16 : index
    %715 = vector.load %arg9[%c0_350, %c16_351] : memref<4x25xf32, #tpu.memory_space<vmem>>, vector<4x1xf32>
    %716 = vector.broadcast %715 : vector<4x1xf32> to vector<4x256xf32>
    %717 = arith.mulf %714, %716 : vector<4x256xf32>
    %718 = arith.addf %709, %717 : vector<4x256xf32>
    %c0_352 = arith.constant 0 : index
    %c160_353 = arith.constant 160 : index
    %719 = vector.load %arg18[%c0_352, %c160_353] : memref<4x512xf32, #tpu.memory_space<vmem>>, vector<4x256xf32>
    %cst_354 = arith.constant 0.000000e+00 : f32
    %720 = vector.shape_cast %385 : vector<1x256xi1> to vector<1x256xi1>
    %721 = vector.broadcast %720 : vector<1x256xi1> to vector<4x256xi1>
    %722 = vector.broadcast %cst_354 : f32 to vector<4x256xf32>
    %723 = arith.select %721, %719, %722 : vector<4x256xi1>, vector<4x256xf32>
    %c0_355 = arith.constant 0 : index
    %c17_356 = arith.constant 17 : index
    %724 = vector.load %arg9[%c0_355, %c17_356] : memref<4x25xf32, #tpu.memory_space<vmem>>, vector<4x1xf32>
    %725 = vector.broadcast %724 : vector<4x1xf32> to vector<4x256xf32>
    %726 = arith.mulf %723, %725 : vector<4x256xf32>
    %727 = arith.addf %718, %726 : vector<4x256xf32>
    %c0_357 = arith.constant 0 : index
    %c162_358 = arith.constant 162 : index
    %728 = vector.load %arg18[%c0_357, %c162_358] : memref<4x512xf32, #tpu.memory_space<vmem>>, vector<4x256xf32>
    %cst_359 = arith.constant 0.000000e+00 : f32
    %729 = vector.shape_cast %413 : vector<1x256xi1> to vector<1x256xi1>
    %730 = vector.broadcast %729 : vector<1x256xi1> to vector<4x256xi1>
    %731 = vector.broadcast %cst_359 : f32 to vector<4x256xf32>
    %732 = arith.select %730, %728, %731 : vector<4x256xi1>, vector<4x256xf32>
    %c0_360 = arith.constant 0 : index
    %c18_361 = arith.constant 18 : index
    %733 = vector.load %arg9[%c0_360, %c18_361] : memref<4x25xf32, #tpu.memory_space<vmem>>, vector<4x1xf32>
    %734 = vector.broadcast %733 : vector<4x1xf32> to vector<4x256xf32>
    %735 = arith.mulf %732, %734 : vector<4x256xf32>
    %736 = arith.addf %727, %735 : vector<4x256xf32>
    %c0_362 = arith.constant 0 : index
    %c164 = arith.constant 164 : index
    %737 = vector.load %arg18[%c0_362, %c164] : memref<4x512xf32, #tpu.memory_space<vmem>>, vector<4x256xf32>
    %c14_i32_363 = arith.constant 14 : i32
    %738 = vector.broadcast %c14_i32_363 : i32 to vector<1x256xi32>
    %739 = arith.cmpi slt, %1, %738 : vector<1x256xi32>
    %c12_i32_364 = arith.constant 12 : i32
    %740 = vector.broadcast %c12_i32_364 : i32 to vector<1x256xi32>
    %741 = arith.cmpi slt, %2, %740 : vector<1x256xi32>
    %742 = arith.andi %739, %741 : vector<1x256xi1>
    %cst_365 = arith.constant 0.000000e+00 : f32
    %743 = vector.shape_cast %742 : vector<1x256xi1> to vector<1x256xi1>
    %744 = vector.broadcast %743 : vector<1x256xi1> to vector<4x256xi1>
    %745 = vector.broadcast %cst_365 : f32 to vector<4x256xf32>
    %746 = arith.select %744, %737, %745 : vector<4x256xi1>, vector<4x256xf32>
    %c0_366 = arith.constant 0 : index
    %c19_367 = arith.constant 19 : index
    %747 = vector.load %arg9[%c0_366, %c19_367] : memref<4x25xf32, #tpu.memory_space<vmem>>, vector<4x1xf32>
    %748 = vector.broadcast %747 : vector<4x1xf32> to vector<4x256xf32>
    %749 = arith.mulf %746, %748 : vector<4x256xf32>
    %750 = arith.addf %736, %749 : vector<4x256xf32>
    %c0_368 = arith.constant 0 : index
    %c188 = arith.constant 188 : index
    %751 = vector.load %arg18[%c0_368, %c188] : memref<4x512xf32, #tpu.memory_space<vmem>>, vector<4x256xf32>
    %c12_i32_369 = arith.constant 12 : i32
    %752 = vector.broadcast %c12_i32_369 : i32 to vector<1x256xi32>
    %753 = arith.cmpi slt, %1, %752 : vector<1x256xi32>
    %c4_i32_370 = arith.constant 4 : i32
    %754 = vector.broadcast %c4_i32_370 : i32 to vector<1x256xi32>
    %755 = arith.cmpi sge, %2, %754 : vector<1x256xi32>
    %756 = arith.andi %753, %755 : vector<1x256xi1>
    %cst_371 = arith.constant 0.000000e+00 : f32
    %757 = vector.shape_cast %756 : vector<1x256xi1> to vector<1x256xi1>
    %758 = vector.broadcast %757 : vector<1x256xi1> to vector<4x256xi1>
    %759 = vector.broadcast %cst_371 : f32 to vector<4x256xf32>
    %760 = arith.select %758, %751, %759 : vector<4x256xi1>, vector<4x256xf32>
    %c0_372 = arith.constant 0 : index
    %c20_373 = arith.constant 20 : index
    %761 = vector.load %arg9[%c0_372, %c20_373] : memref<4x25xf32, #tpu.memory_space<vmem>>, vector<4x1xf32>
    %762 = vector.broadcast %761 : vector<4x1xf32> to vector<4x256xf32>
    %763 = arith.mulf %760, %762 : vector<4x256xf32>
    %764 = arith.addf %750, %763 : vector<4x256xf32>
    %c0_374 = arith.constant 0 : index
    %c190 = arith.constant 190 : index
    %765 = vector.load %arg18[%c0_374, %c190] : memref<4x512xf32, #tpu.memory_space<vmem>>, vector<4x256xf32>
    %c12_i32_375 = arith.constant 12 : i32
    %766 = vector.broadcast %c12_i32_375 : i32 to vector<1x256xi32>
    %767 = arith.cmpi slt, %1, %766 : vector<1x256xi32>
    %c2_i32_376 = arith.constant 2 : i32
    %768 = vector.broadcast %c2_i32_376 : i32 to vector<1x256xi32>
    %769 = arith.cmpi sge, %2, %768 : vector<1x256xi32>
    %770 = arith.andi %767, %769 : vector<1x256xi1>
    %cst_377 = arith.constant 0.000000e+00 : f32
    %771 = vector.shape_cast %770 : vector<1x256xi1> to vector<1x256xi1>
    %772 = vector.broadcast %771 : vector<1x256xi1> to vector<4x256xi1>
    %773 = vector.broadcast %cst_377 : f32 to vector<4x256xf32>
    %774 = arith.select %772, %765, %773 : vector<4x256xi1>, vector<4x256xf32>
    %c0_378 = arith.constant 0 : index
    %c21_379 = arith.constant 21 : index
    %775 = vector.load %arg9[%c0_378, %c21_379] : memref<4x25xf32, #tpu.memory_space<vmem>>, vector<4x1xf32>
    %776 = vector.broadcast %775 : vector<4x1xf32> to vector<4x256xf32>
    %777 = arith.mulf %774, %776 : vector<4x256xf32>
    %778 = arith.addf %764, %777 : vector<4x256xf32>
    %c0_380 = arith.constant 0 : index
    %c192 = arith.constant 192 : index
    %779 = vector.load %arg18[%c0_380, %c192] : memref<4x512xf32, #tpu.memory_space<vmem>>, vector<4x256xf32>
    %c12_i32_381 = arith.constant 12 : i32
    %780 = vector.broadcast %c12_i32_381 : i32 to vector<1x256xi32>
    %781 = arith.cmpi slt, %1, %780 : vector<1x256xi32>
    %cst_382 = arith.constant 0.000000e+00 : f32
    %782 = vector.shape_cast %781 : vector<1x256xi1> to vector<1x256xi1>
    %783 = vector.broadcast %782 : vector<1x256xi1> to vector<4x256xi1>
    %784 = vector.broadcast %cst_382 : f32 to vector<4x256xf32>
    %785 = arith.select %783, %779, %784 : vector<4x256xi1>, vector<4x256xf32>
    %c0_383 = arith.constant 0 : index
    %c22_384 = arith.constant 22 : index
    %786 = vector.load %arg9[%c0_383, %c22_384] : memref<4x25xf32, #tpu.memory_space<vmem>>, vector<4x1xf32>
    %787 = vector.broadcast %786 : vector<4x1xf32> to vector<4x256xf32>
    %788 = arith.mulf %785, %787 : vector<4x256xf32>
    %789 = arith.addf %778, %788 : vector<4x256xf32>
    %c0_385 = arith.constant 0 : index
    %c194 = arith.constant 194 : index
    %790 = vector.load %arg18[%c0_385, %c194] : memref<4x512xf32, #tpu.memory_space<vmem>>, vector<4x256xf32>
    %c12_i32_386 = arith.constant 12 : i32
    %791 = vector.broadcast %c12_i32_386 : i32 to vector<1x256xi32>
    %792 = arith.cmpi slt, %1, %791 : vector<1x256xi32>
    %c14_i32_387 = arith.constant 14 : i32
    %793 = vector.broadcast %c14_i32_387 : i32 to vector<1x256xi32>
    %794 = arith.cmpi slt, %2, %793 : vector<1x256xi32>
    %795 = arith.andi %792, %794 : vector<1x256xi1>
    %cst_388 = arith.constant 0.000000e+00 : f32
    %796 = vector.shape_cast %795 : vector<1x256xi1> to vector<1x256xi1>
    %797 = vector.broadcast %796 : vector<1x256xi1> to vector<4x256xi1>
    %798 = vector.broadcast %cst_388 : f32 to vector<4x256xf32>
    %799 = arith.select %797, %790, %798 : vector<4x256xi1>, vector<4x256xf32>
    %c0_389 = arith.constant 0 : index
    %c23_390 = arith.constant 23 : index
    %800 = vector.load %arg9[%c0_389, %c23_390] : memref<4x25xf32, #tpu.memory_space<vmem>>, vector<4x1xf32>
    %801 = vector.broadcast %800 : vector<4x1xf32> to vector<4x256xf32>
    %802 = arith.mulf %799, %801 : vector<4x256xf32>
    %803 = arith.addf %789, %802 : vector<4x256xf32>
    %c0_391 = arith.constant 0 : index
    %c196 = arith.constant 196 : index
    %804 = vector.load %arg18[%c0_391, %c196] : memref<4x512xf32, #tpu.memory_space<vmem>>, vector<4x256xf32>
    %c12_i32_392 = arith.constant 12 : i32
    %805 = vector.broadcast %c12_i32_392 : i32 to vector<1x256xi32>
    %806 = arith.cmpi slt, %1, %805 : vector<1x256xi32>
    %c12_i32_393 = arith.constant 12 : i32
    %807 = vector.broadcast %c12_i32_393 : i32 to vector<1x256xi32>
    %808 = arith.cmpi slt, %2, %807 : vector<1x256xi32>
    %809 = arith.andi %806, %808 : vector<1x256xi1>
    %cst_394 = arith.constant 0.000000e+00 : f32
    %810 = vector.shape_cast %809 : vector<1x256xi1> to vector<1x256xi1>
    %811 = vector.broadcast %810 : vector<1x256xi1> to vector<4x256xi1>
    %812 = vector.broadcast %cst_394 : f32 to vector<4x256xf32>
    %813 = arith.select %811, %804, %812 : vector<4x256xi1>, vector<4x256xf32>
    %c0_395 = arith.constant 0 : index
    %c24_396 = arith.constant 24 : index
    %814 = vector.load %arg9[%c0_395, %c24_396] : memref<4x25xf32, #tpu.memory_space<vmem>>, vector<4x1xf32>
    %815 = vector.broadcast %814 : vector<4x1xf32> to vector<4x256xf32>
    %816 = arith.mulf %813, %815 : vector<4x256xf32>
    %817 = arith.addf %803, %816 : vector<4x256xf32>
    %c0_397 = arith.constant 0 : index
    %c0_398 = arith.constant 0 : index
    %818 = vector.load %arg10[%c0_397, %c0_398] : memref<4x4xf32, #tpu.memory_space<vmem>>, vector<4x4xf32>
    %cst_399 = arith.constant dense<0.000000e+00> : vector<4x256xf32>
    %819 = tpu.matmul %818, %817, %cst_399 {dimension_numbers = #tpu.dot_dimension_numbers<[1], [0], [0], [1], [0, 0, 1, 1], [], []>} : vector<4x4xf32>, vector<4x256xf32>, vector<4x256xf32> -> vector<4x256xf32>
    %c0_400 = arith.constant 0 : index
    %c0_401 = arith.constant 0 : index
    %c0_402 = arith.constant 0 : index
    %820 = vector.load %arg14[%c0_400, %c0_401, %c0_402] : memref<1x4x256xf32, #tpu.memory_space<vmem>>, vector<1x4x256xf32>
    %821 = vector.shape_cast %820 : vector<1x4x256xf32> to vector<4x256xf32>
    %822 = vector.shape_cast %819 : vector<4x256xf32> to vector<1x4x256xf32>
    tpu.vector_store %arg14[%c0_400, %c0_401, %c0_402], %822 {strides = array<i32>} : memref<1x4x256xf32, #tpu.memory_space<vmem>>, vector<1x4x256xf32>,
    %cst_403 = arith.constant dense<0.000000e+00> : vector<4xf32>
    %823 = vector.multi_reduction <add>, %819, %cst_403 [1] : vector<4x256xf32> to vector<4xf32>
    %824 = vector.shape_cast %823 : vector<4xf32> to vector<4x1xf32>
    %c0_404 = arith.constant 0 : index
    %c6_405 = arith.constant 6 : index
    %c0_406 = arith.constant 0 : index
    %c0_407 = arith.constant 0 : index
    %825 = vector.load %arg17[%c0_404, %c6_405, %c0_406, %c0_407] : memref<1x12x4x1xf32, #tpu.memory_space<vmem>>, vector<1x1x4x1xf32>
    %826 = vector.shape_cast %825 : vector<1x1x4x1xf32> to vector<4x1xf32>
    %827 = vector.shape_cast %824 : vector<4x1xf32> to vector<1x1x4x1xf32>
    tpu.vector_store %arg17[%c0_404, %c6_405, %c0_406, %c0_407], %827 {strides = array<i32>} : memref<1x12x4x1xf32, #tpu.memory_space<vmem>>, vector<1x1x4x1xf32>,
    %828 = arith.mulf %819, %819 : vector<4x256xf32>
    %cst_408 = arith.constant dense<0.000000e+00> : vector<4xf32>
    %829 = vector.multi_reduction <add>, %828, %cst_408 [1] : vector<4x256xf32> to vector<4xf32>
    %830 = vector.shape_cast %829 : vector<4xf32> to vector<4x1xf32>
    %c0_409 = arith.constant 0 : index
    %c7_410 = arith.constant 7 : index
    %c0_411 = arith.constant 0 : index
    %c0_412 = arith.constant 0 : index
    %831 = vector.load %arg17[%c0_409, %c7_410, %c0_411, %c0_412] : memref<1x12x4x1xf32, #tpu.memory_space<vmem>>, vector<1x1x4x1xf32>
    %832 = vector.shape_cast %831 : vector<1x1x4x1xf32> to vector<4x1xf32>
    %833 = vector.shape_cast %830 : vector<4x1xf32> to vector<1x1x4x1xf32>
    tpu.vector_store %arg17[%c0_409, %c7_410, %c0_411, %c0_412], %833 {strides = array<i32>} : memref<1x12x4x1xf32, #tpu.memory_space<vmem>>, vector<1x1x4x1xf32>,
    %c0_413 = arith.constant 0 : index
    %c111_414 = arith.constant 111 : index
    %834 = vector.load %arg19[%c0_413, %c111_414] : memref<4x512xf32, #tpu.memory_space<vmem>>, vector<4x256xf32>
    %cst_415 = arith.constant 0xFF800000 : f32
    %835 = vector.shape_cast %19 : vector<1x256xi1> to vector<1x256xi1>
    %836 = vector.broadcast %835 : vector<1x256xi1> to vector<4x256xi1>
    %837 = vector.broadcast %cst_415 : f32 to vector<4x256xf32>
    %838 = arith.select %836, %834, %837 : vector<4x256xi1>, vector<4x256xf32>
    %cst_416 = arith.constant 0.000000e+00 : f32
    %839 = vector.shape_cast %19 : vector<1x256xi1> to vector<1x256xi1>
    %840 = vector.broadcast %839 : vector<1x256xi1> to vector<4x256xi1>
    %841 = vector.broadcast %cst_416 : f32 to vector<4x256xf32>
    %842 = arith.select %840, %834, %841 : vector<4x256xi1>, vector<4x256xf32>
    %843 = arith.extui %19 : vector<1x256xi1> to vector<1x256xi32>
    %844 = arith.sitofp %843 : vector<1x256xi32> to vector<1x256xf32>
    %c0_417 = arith.constant 0 : index
    %c112_418 = arith.constant 112 : index
    %845 = vector.load %arg19[%c0_417, %c112_418] : memref<4x512xf32, #tpu.memory_space<vmem>>, vector<4x256xf32>
    %cst_419 = arith.constant 0xFF800000 : f32
    %846 = vector.shape_cast %29 : vector<1x256xi1> to vector<1x256xi1>
    %847 = vector.broadcast %846 : vector<1x256xi1> to vector<4x256xi1>
    %848 = vector.broadcast %cst_419 : f32 to vector<4x256xf32>
    %849 = arith.select %847, %845, %848 : vector<4x256xi1>, vector<4x256xf32>
    %cst_420 = arith.constant 0.000000e+00 : f32
    %850 = vector.shape_cast %29 : vector<1x256xi1> to vector<1x256xi1>
    %851 = vector.broadcast %850 : vector<1x256xi1> to vector<4x256xi1>
    %852 = vector.broadcast %cst_420 : f32 to vector<4x256xf32>
    %853 = arith.select %851, %845, %852 : vector<4x256xi1>, vector<4x256xf32>
    %854 = arith.extui %29 : vector<1x256xi1> to vector<1x256xi32>
    %855 = arith.sitofp %854 : vector<1x256xi32> to vector<1x256xf32>
    %856 = arith.maximumf %838, %849 : vector<4x256xf32>
    %857 = arith.addf %842, %853 : vector<4x256xf32>
    %858 = arith.addf %844, %855 : vector<1x256xf32>
    %c0_421 = arith.constant 0 : index
    %c113_422 = arith.constant 113 : index
    %859 = vector.load %arg19[%c0_421, %c113_422] : memref<4x512xf32, #tpu.memory_space<vmem>>, vector<4x256xf32>
    %cst_423 = arith.constant 0xFF800000 : f32
    %860 = vector.shape_cast %43 : vector<1x256xi1> to vector<1x256xi1>
    %861 = vector.broadcast %860 : vector<1x256xi1> to vector<4x256xi1>
    %862 = vector.broadcast %cst_423 : f32 to vector<4x256xf32>
    %863 = arith.select %861, %859, %862 : vector<4x256xi1>, vector<4x256xf32>
    %cst_424 = arith.constant 0.000000e+00 : f32
    %864 = vector.shape_cast %43 : vector<1x256xi1> to vector<1x256xi1>
    %865 = vector.broadcast %864 : vector<1x256xi1> to vector<4x256xi1>
    %866 = vector.broadcast %cst_424 : f32 to vector<4x256xf32>
    %867 = arith.select %865, %859, %866 : vector<4x256xi1>, vector<4x256xf32>
    %868 = arith.extui %43 : vector<1x256xi1> to vector<1x256xi32>
    %869 = arith.sitofp %868 : vector<1x256xi32> to vector<1x256xf32>
    %870 = arith.maximumf %856, %863 : vector<4x256xf32>
    %871 = arith.addf %857, %867 : vector<4x256xf32>
    %872 = arith.addf %858, %869 : vector<1x256xf32>
    %c0_425 = arith.constant 0 : index
    %c127_426 = arith.constant 127 : index
    %873 = vector.load %arg19[%c0_425, %c127_426] : memref<4x512xf32, #tpu.memory_space<vmem>>, vector<4x256xf32>
    %cst_427 = arith.constant 0xFF800000 : f32
    %874 = vector.shape_cast %54 : vector<1x256xi1> to vector<1x256xi1>
    %875 = vector.broadcast %874 : vector<1x256xi1> to vector<4x256xi1>
    %876 = vector.broadcast %cst_427 : f32 to vector<4x256xf32>
    %877 = arith.select %875, %873, %876 : vector<4x256xi1>, vector<4x256xf32>
    %cst_428 = arith.constant 0.000000e+00 : f32
    %878 = vector.shape_cast %54 : vector<1x256xi1> to vector<1x256xi1>
    %879 = vector.broadcast %878 : vector<1x256xi1> to vector<4x256xi1>
    %880 = vector.broadcast %cst_428 : f32 to vector<4x256xf32>
    %881 = arith.select %879, %873, %880 : vector<4x256xi1>, vector<4x256xf32>
    %882 = arith.extui %54 : vector<1x256xi1> to vector<1x256xi32>
    %883 = arith.sitofp %882 : vector<1x256xi32> to vector<1x256xf32>
    %884 = arith.maximumf %870, %877 : vector<4x256xf32>
    %885 = arith.addf %871, %881 : vector<4x256xf32>
    %886 = arith.addf %872, %883 : vector<1x256xf32>
    %c0_429 = arith.constant 0 : index
    %c128_430 = arith.constant 128 : index
    %887 = vector.load %arg19[%c0_429, %c128_430] : memref<4x512xf32, #tpu.memory_space<vmem>>, vector<4x256xf32>
    %888 = arith.maximumf %884, %887 : vector<4x256xf32>
    %889 = arith.addf %885, %887 : vector<4x256xf32>
    %cst_431 = arith.constant 1.000000e+00 : f32
    %890 = vector.broadcast %cst_431 : f32 to vector<1x256xf32>
    %891 = arith.addf %886, %890 : vector<1x256xf32>
    %c0_432 = arith.constant 0 : index
    %c129_433 = arith.constant 129 : index
    %892 = vector.load %arg19[%c0_432, %c129_433] : memref<4x512xf32, #tpu.memory_space<vmem>>, vector<4x256xf32>
    %cst_434 = arith.constant 0xFF800000 : f32
    %893 = vector.shape_cast %70 : vector<1x256xi1> to vector<1x256xi1>
    %894 = vector.broadcast %893 : vector<1x256xi1> to vector<4x256xi1>
    %895 = vector.broadcast %cst_434 : f32 to vector<4x256xf32>
    %896 = arith.select %894, %892, %895 : vector<4x256xi1>, vector<4x256xf32>
    %cst_435 = arith.constant 0.000000e+00 : f32
    %897 = vector.shape_cast %70 : vector<1x256xi1> to vector<1x256xi1>
    %898 = vector.broadcast %897 : vector<1x256xi1> to vector<4x256xi1>
    %899 = vector.broadcast %cst_435 : f32 to vector<4x256xf32>
    %900 = arith.select %898, %892, %899 : vector<4x256xi1>, vector<4x256xf32>
    %901 = arith.extui %70 : vector<1x256xi1> to vector<1x256xi32>
    %902 = arith.sitofp %901 : vector<1x256xi32> to vector<1x256xf32>
    %903 = arith.maximumf %888, %896 : vector<4x256xf32>
    %904 = arith.addf %889, %900 : vector<4x256xf32>
    %905 = arith.addf %891, %902 : vector<1x256xf32>
    %c0_436 = arith.constant 0 : index
    %c143_437 = arith.constant 143 : index
    %906 = vector.load %arg19[%c0_436, %c143_437] : memref<4x512xf32, #tpu.memory_space<vmem>>, vector<4x256xf32>
    %cst_438 = arith.constant 0xFF800000 : f32
    %907 = vector.shape_cast %84 : vector<1x256xi1> to vector<1x256xi1>
    %908 = vector.broadcast %907 : vector<1x256xi1> to vector<4x256xi1>
    %909 = vector.broadcast %cst_438 : f32 to vector<4x256xf32>
    %910 = arith.select %908, %906, %909 : vector<4x256xi1>, vector<4x256xf32>
    %cst_439 = arith.constant 0.000000e+00 : f32
    %911 = vector.shape_cast %84 : vector<1x256xi1> to vector<1x256xi1>
    %912 = vector.broadcast %911 : vector<1x256xi1> to vector<4x256xi1>
    %913 = vector.broadcast %cst_439 : f32 to vector<4x256xf32>
    %914 = arith.select %912, %906, %913 : vector<4x256xi1>, vector<4x256xf32>
    %915 = arith.extui %84 : vector<1x256xi1> to vector<1x256xi32>
    %916 = arith.sitofp %915 : vector<1x256xi32> to vector<1x256xf32>
    %917 = arith.maximumf %903, %910 : vector<4x256xf32>
    %918 = arith.addf %904, %914 : vector<4x256xf32>
    %919 = arith.addf %905, %916 : vector<1x256xf32>
    %c0_440 = arith.constant 0 : index
    %c144_441 = arith.constant 144 : index
    %920 = vector.load %arg19[%c0_440, %c144_441] : memref<4x512xf32, #tpu.memory_space<vmem>>, vector<4x256xf32>
    %cst_442 = arith.constant 0xFF800000 : f32
    %921 = vector.shape_cast %95 : vector<1x256xi1> to vector<1x256xi1>
    %922 = vector.broadcast %921 : vector<1x256xi1> to vector<4x256xi1>
    %923 = vector.broadcast %cst_442 : f32 to vector<4x256xf32>
    %924 = arith.select %922, %920, %923 : vector<4x256xi1>, vector<4x256xf32>
    %cst_443 = arith.constant 0.000000e+00 : f32
    %925 = vector.shape_cast %95 : vector<1x256xi1> to vector<1x256xi1>
    %926 = vector.broadcast %925 : vector<1x256xi1> to vector<4x256xi1>
    %927 = vector.broadcast %cst_443 : f32 to vector<4x256xf32>
    %928 = arith.select %926, %920, %927 : vector<4x256xi1>, vector<4x256xf32>
    %929 = arith.extui %95 : vector<1x256xi1> to vector<1x256xi32>
    %930 = arith.sitofp %929 : vector<1x256xi32> to vector<1x256xf32>
    %931 = arith.maximumf %917, %924 : vector<4x256xf32>
    %932 = arith.addf %918, %928 : vector<4x256xf32>
    %933 = arith.addf %919, %930 : vector<1x256xf32>
    %c0_444 = arith.constant 0 : index
    %c145_445 = arith.constant 145 : index
    %934 = vector.load %arg19[%c0_444, %c145_445] : memref<4x512xf32, #tpu.memory_space<vmem>>, vector<4x256xf32>
    %cst_446 = arith.constant 0xFF800000 : f32
    %935 = vector.shape_cast %109 : vector<1x256xi1> to vector<1x256xi1>
    %936 = vector.broadcast %935 : vector<1x256xi1> to vector<4x256xi1>
    %937 = vector.broadcast %cst_446 : f32 to vector<4x256xf32>
    %938 = arith.select %936, %934, %937 : vector<4x256xi1>, vector<4x256xf32>
    %cst_447 = arith.constant 0.000000e+00 : f32
    %939 = vector.shape_cast %109 : vector<1x256xi1> to vector<1x256xi1>
    %940 = vector.broadcast %939 : vector<1x256xi1> to vector<4x256xi1>
    %941 = vector.broadcast %cst_447 : f32 to vector<4x256xf32>
    %942 = arith.select %940, %934, %941 : vector<4x256xi1>, vector<4x256xf32>
    %943 = arith.extui %109 : vector<1x256xi1> to vector<1x256xi32>
    %944 = arith.sitofp %943 : vector<1x256xi32> to vector<1x256xf32>
    %945 = arith.maximumf %931, %938 : vector<4x256xf32>
    %946 = arith.addf %932, %942 : vector<4x256xf32>
    %947 = arith.addf %933, %944 : vector<1x256xf32>
    %c0_448 = arith.constant 0 : index
    %c0_449 = arith.constant 0 : index
    %c0_450 = arith.constant 0 : index
    %948 = vector.load %arg15[%c0_448, %c0_449, %c0_450] : memref<1x4x256xf32, #tpu.memory_space<vmem>>, vector<1x4x256xf32>
    %949 = vector.shape_cast %948 : vector<1x4x256xf32> to vector<4x256xf32>
    %950 = vector.shape_cast %945 : vector<4x256xf32> to vector<1x4x256xf32>
    tpu.vector_store %arg15[%c0_448, %c0_449, %c0_450], %950 {strides = array<i32>} : memref<1x4x256xf32, #tpu.memory_space<vmem>>, vector<1x4x256xf32>,
    %cst_451 = arith.constant dense<0.000000e+00> : vector<4xf32>
    %951 = vector.multi_reduction <add>, %945, %cst_451 [1] : vector<4x256xf32> to vector<4xf32>
    %952 = vector.shape_cast %951 : vector<4xf32> to vector<4x1xf32>
    %c0_452 = arith.constant 0 : index
    %c8_453 = arith.constant 8 : index
    %c0_454 = arith.constant 0 : index
    %c0_455 = arith.constant 0 : index
    %953 = vector.load %arg17[%c0_452, %c8_453, %c0_454, %c0_455] : memref<1x12x4x1xf32, #tpu.memory_space<vmem>>, vector<1x1x4x1xf32>
    %954 = vector.shape_cast %953 : vector<1x1x4x1xf32> to vector<4x1xf32>
    %955 = vector.shape_cast %952 : vector<4x1xf32> to vector<1x1x4x1xf32>
    tpu.vector_store %arg17[%c0_452, %c8_453, %c0_454, %c0_455], %955 {strides = array<i32>} : memref<1x12x4x1xf32, #tpu.memory_space<vmem>>, vector<1x1x4x1xf32>,
    %956 = arith.mulf %945, %945 : vector<4x256xf32>
    %cst_456 = arith.constant dense<0.000000e+00> : vector<4xf32>
    %957 = vector.multi_reduction <add>, %956, %cst_456 [1] : vector<4x256xf32> to vector<4xf32>
    %958 = vector.shape_cast %957 : vector<4xf32> to vector<4x1xf32>
    %c0_457 = arith.constant 0 : index
    %c9_458 = arith.constant 9 : index
    %c0_459 = arith.constant 0 : index
    %c0_460 = arith.constant 0 : index
    %959 = vector.load %arg17[%c0_457, %c9_458, %c0_459, %c0_460] : memref<1x12x4x1xf32, #tpu.memory_space<vmem>>, vector<1x1x4x1xf32>
    %960 = vector.shape_cast %959 : vector<1x1x4x1xf32> to vector<4x1xf32>
    %961 = vector.shape_cast %958 : vector<4x1xf32> to vector<1x1x4x1xf32>
    tpu.vector_store %arg17[%c0_457, %c9_458, %c0_459, %c0_460], %961 {strides = array<i32>} : memref<1x12x4x1xf32, #tpu.memory_space<vmem>>, vector<1x1x4x1xf32>,
    %cst_461 = arith.constant 1.000000e+00 : f32
    %962 = vector.broadcast %cst_461 : f32 to vector<1x256xf32>
    %963 = arith.divf %962, %947 : vector<1x256xf32>
    %964 = vector.broadcast %963 : vector<1x256xf32> to vector<4x256xf32>
    %965 = arith.mulf %946, %964 : vector<4x256xf32>
    %c0_462 = arith.constant 0 : index
    %c0_463 = arith.constant 0 : index
    %c0_464 = arith.constant 0 : index
    %966 = vector.load %arg16[%c0_462, %c0_463, %c0_464] : memref<1x4x256xf32, #tpu.memory_space<vmem>>, vector<1x4x256xf32>
    %967 = vector.shape_cast %966 : vector<1x4x256xf32> to vector<4x256xf32>
    %968 = vector.shape_cast %965 : vector<4x256xf32> to vector<1x4x256xf32>
    tpu.vector_store %arg16[%c0_462, %c0_463, %c0_464], %968 {strides = array<i32>} : memref<1x4x256xf32, #tpu.memory_space<vmem>>, vector<1x4x256xf32>,
    %cst_465 = arith.constant dense<0.000000e+00> : vector<4xf32>
    %969 = vector.multi_reduction <add>, %965, %cst_465 [1] : vector<4x256xf32> to vector<4xf32>
    %970 = vector.shape_cast %969 : vector<4xf32> to vector<4x1xf32>
    %c0_466 = arith.constant 0 : index
    %c10_467 = arith.constant 10 : index
    %c0_468 = arith.constant 0 : index
    %c0_469 = arith.constant 0 : index
    %971 = vector.load %arg17[%c0_466, %c10_467, %c0_468, %c0_469] : memref<1x12x4x1xf32, #tpu.memory_space<vmem>>, vector<1x1x4x1xf32>
    %972 = vector.shape_cast %971 : vector<1x1x4x1xf32> to vector<4x1xf32>
    %973 = vector.shape_cast %970 : vector<4x1xf32> to vector<1x1x4x1xf32>
    tpu.vector_store %arg17[%c0_466, %c10_467, %c0_468, %c0_469], %973 {strides = array<i32>} : memref<1x12x4x1xf32, #tpu.memory_space<vmem>>, vector<1x1x4x1xf32>,
    %974 = arith.mulf %965, %965 : vector<4x256xf32>
    %cst_470 = arith.constant dense<0.000000e+00> : vector<4xf32>
    %975 = vector.multi_reduction <add>, %974, %cst_470 [1] : vector<4x256xf32> to vector<4xf32>
    %976 = vector.shape_cast %975 : vector<4xf32> to vector<4x1xf32>
    %c0_471 = arith.constant 0 : index
    %c11_472 = arith.constant 11 : index
    %c0_473 = arith.constant 0 : index
    %c0_474 = arith.constant 0 : index
    %977 = vector.load %arg17[%c0_471, %c11_472, %c0_473, %c0_474] : memref<1x12x4x1xf32, #tpu.memory_space<vmem>>, vector<1x1x4x1xf32>
    %978 = vector.shape_cast %977 : vector<1x1x4x1xf32> to vector<4x1xf32>
    %979 = vector.shape_cast %976 : vector<4x1xf32> to vector<1x1x4x1xf32>
    tpu.vector_store %arg17[%c0_471, %c11_472, %c0_473, %c0_474], %979 {strides = array<i32>} : memref<1x12x4x1xf32, #tpu.memory_space<vmem>>, vector<1x1x4x1xf32>,
    return
  }
  func.func @transform_0(%arg0: i32) -> (i32, i32) {
    %c0_i32 = arith.constant 0 : i32
    %c0_i32_0 = arith.constant 0 : i32
    %c0_i32_1 = arith.constant 0 : i32
    return %c0_i32, %c0_i32_0 : i32, i32
  }
  func.func @transform_1(%arg0: i32) -> (i32, i32, i32) {
    %c0_i32 = arith.constant 0 : i32
    %c0_i32_0 = arith.constant 0 : i32
    %c0_i32_1 = arith.constant 0 : i32
    return %arg0, %c0_i32, %c0_i32_0 : i32, i32, i32
  }
  func.func @transform_2(%arg0: i32) -> (i32, i32) {
    %c0_i32 = arith.constant 0 : i32
    %c0_i32_0 = arith.constant 0 : i32
    %c0_i32_1 = arith.constant 0 : i32
    return %c0_i32, %c0_i32_0 : i32, i32
  }
  func.func @transform_3(%arg0: i32) -> (i32, i32) {
    %c0_i32 = arith.constant 0 : i32
    %c0_i32_0 = arith.constant 0 : i32
    %c0_i32_1 = arith.constant 0 : i32
    return %c0_i32, %c0_i32_0 : i32, i32
  }
  func.func @transform_4(%arg0: i32) -> (i32, i32) {
    %c0_i32 = arith.constant 0 : i32
    %c0_i32_0 = arith.constant 0 : i32
    %c0_i32_1 = arith.constant 0 : i32
    return %c0_i32, %c0_i32_0 : i32, i32
  }
  func.func @transform_5(%arg0: i32) -> (i32, i32) {
    %c0_i32 = arith.constant 0 : i32
    %c0_i32_0 = arith.constant 0 : i32
    %c0_i32_1 = arith.constant 0 : i32
    return %c0_i32, %c0_i32_0 : i32, i32
  }
  func.func @transform_6(%arg0: i32) -> (i32, i32) {
    %c0_i32 = arith.constant 0 : i32
    %c0_i32_0 = arith.constant 0 : i32
    %c0_i32_1 = arith.constant 0 : i32
    return %c0_i32, %c0_i32_0 : i32, i32
  }
  func.func @transform_7(%arg0: i32) -> (i32, i32) {
    %c0_i32 = arith.constant 0 : i32
    %c0_i32_0 = arith.constant 0 : i32
    %c0_i32_1 = arith.constant 0 : i32
    return %c0_i32, %c0_i32_0 : i32, i32
  }
  func.func @transform_8(%arg0: i32) -> (i32, i32) {
    %c0_i32 = arith.constant 0 : i32
    %c0_i32_0 = arith.constant 0 : i32
    %c0_i32_1 = arith.constant 0 : i32
    return %c0_i32, %c0_i32_0 : i32, i32
  }
  func.func @transform_9(%arg0: i32) -> (i32, i32) {
    %c0_i32 = arith.constant 0 : i32
    %c0_i32_0 = arith.constant 0 : i32
    %c0_i32_1 = arith.constant 0 : i32
    return %c0_i32, %c0_i32_0 : i32, i32
  }
  func.func @transform_10(%arg0: i32) -> (i32, i32, i32) {
    %c0_i32 = arith.constant 0 : i32
    %c0_i32_0 = arith.constant 0 : i32
    %c0_i32_1 = arith.constant 0 : i32
    return %arg0, %c0_i32, %c0_i32_0 : i32, i32, i32
  }
  func.func @transform_11(%arg0: i32) -> (i32, i32, i32) {
    %c0_i32 = arith.constant 0 : i32
    %c0_i32_0 = arith.constant 0 : i32
    %c0_i32_1 = arith.constant 0 : i32
    return %arg0, %c0_i32, %c0_i32_0 : i32, i32, i32
  }
  func.func @transform_12(%arg0: i32) -> (i32, i32, i32) {
    %c0_i32 = arith.constant 0 : i32
    %c0_i32_0 = arith.constant 0 : i32
    %c0_i32_1 = arith.constant 0 : i32
    return %arg0, %c0_i32, %c0_i32_0 : i32, i32, i32
  }
  func.func @transform_13(%arg0: i32) -> (i32, i32, i32) {
    %c0_i32 = arith.constant 0 : i32
    %c0_i32_0 = arith.constant 0 : i32
    %c0_i32_1 = arith.constant 0 : i32
    return %arg0, %c0_i32, %c0_i32_0 : i32, i32, i32
  }
  func.func @transform_14(%arg0: i32) -> (i32, i32, i32) {
    %c0_i32 = arith.constant 0 : i32
    %c0_i32_0 = arith.constant 0 : i32
    %c0_i32_1 = arith.constant 0 : i32
    return %arg0, %c0_i32, %c0_i32_0 : i32, i32, i32
  }
  func.func @transform_15(%arg0: i32) -> (i32, i32, i32) {
    %c0_i32 = arith.constant 0 : i32
    %c0_i32_0 = arith.constant 0 : i32
    %c0_i32_1 = arith.constant 0 : i32
    return %arg0, %c0_i32, %c0_i32_0 : i32, i32, i32
  }
  func.func @transform_16(%arg0: i32) -> (i32, i32, i32, i32) {
    %c0_i32 = arith.constant 0 : i32
    %c0_i32_0 = arith.constant 0 : i32
    %c0_i32_1 = arith.constant 0 : i32
    %c0_i32_2 = arith.constant 0 : i32
    return %arg0, %c0_i32, %c0_i32_0, %c0_i32_1 : i32, i32, i32, i32
  }
}

module attributes {stable_mosaic.version = 11 : i64} {
  func.func @_stage2_kernel(%arg0: i32, %arg1: memref<2x256xi32, #tpu.memory_space<vmem>>, %arg2: memref<1x4x256xf32, #tpu.memory_space<vmem>>, %arg3: memref<1x4x256xf32, #tpu.memory_space<vmem>>, %arg4: memref<4x9xf32, #tpu.memory_space<vmem>>, %arg5: memref<4x4xf32, #tpu.memory_space<vmem>>, %arg6: memref<4x25xf32, #tpu.memory_space<vmem>>, %arg7: memref<4x4xf32, #tpu.memory_space<vmem>>, %arg8: memref<4x2xf32, #tpu.memory_space<vmem>>, %arg9: memref<4x2xf32, #tpu.memory_space<vmem>>, %arg10: memref<1x4x256xf32, #tpu.memory_space<vmem>>, %arg11: memref<1x4x256xf32, #tpu.memory_space<vmem>>, %arg12: memref<1x4x4x1xf32, #tpu.memory_space<vmem>>, %arg13: memref<4x512xf32, #tpu.memory_space<vmem>>) attributes {dimension_semantics = [#tpu.dimension_semantics<parallel>], iteration_bounds = array<i64: 2>, scalar_prefetch = 0 : i64, scratch_operands = 1 : i64, tpu.core_type = #tpu.core_type<tc>, window_params = [{pipeline_mode = #tpu.pipeline_mode<synchronous>, transform_indices = @transform_0, window_bounds = array<i64: 2, 256>}, {transform_indices = @transform_1, window_bounds = array<i64: 1, 4, 256>}, {transform_indices = @transform_2, window_bounds = array<i64: 1, 4, 256>}, {pipeline_mode = #tpu.pipeline_mode<synchronous>, transform_indices = @transform_3, window_bounds = array<i64: 4, 9>}, {pipeline_mode = #tpu.pipeline_mode<synchronous>, transform_indices = @transform_4, window_bounds = array<i64: 4, 4>}, {pipeline_mode = #tpu.pipeline_mode<synchronous>, transform_indices = @transform_5, window_bounds = array<i64: 4, 25>}, {pipeline_mode = #tpu.pipeline_mode<synchronous>, transform_indices = @transform_6, window_bounds = array<i64: 4, 4>}, {pipeline_mode = #tpu.pipeline_mode<synchronous>, transform_indices = @transform_7, window_bounds = array<i64: 4, 2>}, {pipeline_mode = #tpu.pipeline_mode<synchronous>, transform_indices = @transform_8, window_bounds = array<i64: 4, 2>}, {transform_indices = @transform_9, window_bounds = array<i64: 1, 4, 256>}, {transform_indices = @transform_10, window_bounds = array<i64: 1, 4, 256>}, {transform_indices = @transform_11, window_bounds = array<i64: 1, 4, 4, 1>}]} {
    %c0 = arith.constant 0 : index
    %c0_0 = arith.constant 0 : index
    %0 = vector.load %arg1[%c0, %c0_0] : memref<2x256xi32, #tpu.memory_space<vmem>>, vector<2x256xi32>
    %1 = vector.extract_strided_slice %0 {offsets = [0, 0], sizes = [1, 256], strides = [1, 1]} : vector<2x256xi32> to vector<1x256xi32>
    %2 = vector.extract_strided_slice %0 {offsets = [1, 0], sizes = [1, 256], strides = [1, 1]} : vector<2x256xi32> to vector<1x256xi32>
    %cst = arith.constant 0.000000e+00 : f32
    %3 = vector.broadcast %cst : f32 to vector<4x128xf32>
    %c0_1 = arith.constant 0 : index
    %c0_2 = arith.constant 0 : index
    %4 = vector.load %arg13[%c0_1, %c0_2] : memref<4x512xf32, #tpu.memory_space<vmem>>, vector<4x128xf32>
    tpu.vector_store %arg13[%c0_1, %c0_2], %3 {strides = array<i32>} : memref<4x512xf32, #tpu.memory_space<vmem>>, vector<4x128xf32>,
    %c0_3 = arith.constant 0 : index
    %c384 = arith.constant 384 : index
    %5 = vector.load %arg13[%c0_3, %c384] : memref<4x512xf32, #tpu.memory_space<vmem>>, vector<4x128xf32>
    tpu.vector_store %arg13[%c0_3, %c384], %3 {strides = array<i32>} : memref<4x512xf32, #tpu.memory_space<vmem>>, vector<4x128xf32>,
    %c0_4 = arith.constant 0 : index
    %c0_5 = arith.constant 0 : index
    %c0_6 = arith.constant 0 : index
    %6 = vector.load %arg2[%c0_4, %c0_5, %c0_6] : memref<1x4x256xf32, #tpu.memory_space<vmem>>, vector<1x4x256xf32>
    %7 = vector.shape_cast %6 : vector<1x4x256xf32> to vector<4x256xf32>
    %c0_7 = arith.constant 0 : index
    %c0_8 = arith.constant 0 : index
    %8 = vector.load %arg8[%c0_7, %c0_8] : memref<4x2xf32, #tpu.memory_space<vmem>>, vector<4x1xf32>
    %9 = vector.broadcast %8 : vector<4x1xf32> to vector<4x256xf32>
    %10 = arith.mulf %7, %9 : vector<4x256xf32>
    %c0_9 = arith.constant 0 : index
    %c1 = arith.constant 1 : index
    %11 = vector.load %arg8[%c0_9, %c1] : memref<4x2xf32, #tpu.memory_space<vmem>>, vector<4x1xf32>
    %12 = vector.broadcast %11 : vector<4x1xf32> to vector<4x256xf32>
    %13 = arith.addf %10, %12 : vector<4x256xf32>
    %cst_10 = arith.constant 0.000000e+00 : f32
    %14 = vector.broadcast %cst_10 : f32 to vector<4x256xf32>
    %15 = arith.maximumf %13, %14 : vector<4x256xf32>
    %c0_11 = arith.constant 0 : index
    %c128 = arith.constant 128 : index
    %16 = vector.load %arg13[%c0_11, %c128] : memref<4x512xf32, #tpu.memory_space<vmem>>, vector<4x256xf32>
    tpu.vector_store %arg13[%c0_11, %c128], %15 {strides = array<i32>} : memref<4x512xf32, #tpu.memory_space<vmem>>, vector<4x256xf32>,
    %c0_12 = arith.constant 0 : index
    %c111 = arith.constant 111 : index
    %17 = vector.load %arg13[%c0_12, %c111] : memref<4x512xf32, #tpu.memory_space<vmem>>, vector<4x256xf32>
    %c1_i32 = arith.constant 1 : i32
    %18 = vector.broadcast %c1_i32 : i32 to vector<1x256xi32>
    %19 = arith.cmpi sge, %1, %18 : vector<1x256xi32>
    %c1_i32_13 = arith.constant 1 : i32
    %20 = vector.broadcast %c1_i32_13 : i32 to vector<1x256xi32>
    %21 = arith.cmpi sge, %2, %20 : vector<1x256xi32>
    %22 = arith.andi %19, %21 : vector<1x256xi1>
    %cst_14 = arith.constant 0.000000e+00 : f32
    %23 = vector.shape_cast %22 : vector<1x256xi1> to vector<1x256xi1>
    %24 = vector.broadcast %23 : vector<1x256xi1> to vector<4x256xi1>
    %25 = vector.broadcast %cst_14 : f32 to vector<4x256xf32>
    %26 = arith.select %24, %17, %25 : vector<4x256xi1>, vector<4x256xf32>
    %c0_15 = arith.constant 0 : index
    %c0_16 = arith.constant 0 : index
    %27 = vector.load %arg4[%c0_15, %c0_16] : memref<4x9xf32, #tpu.memory_space<vmem>>, vector<4x1xf32>
    %28 = vector.broadcast %27 : vector<4x1xf32> to vector<4x256xf32>
    %29 = arith.mulf %26, %28 : vector<4x256xf32>
    %c0_17 = arith.constant 0 : index
    %c112 = arith.constant 112 : index
    %30 = vector.load %arg13[%c0_17, %c112] : memref<4x512xf32, #tpu.memory_space<vmem>>, vector<4x256xf32>
    %c1_i32_18 = arith.constant 1 : i32
    %31 = vector.broadcast %c1_i32_18 : i32 to vector<1x256xi32>
    %32 = arith.cmpi sge, %1, %31 : vector<1x256xi32>
    %cst_19 = arith.constant 0.000000e+00 : f32
    %33 = vector.shape_cast %32 : vector<1x256xi1> to vector<1x256xi1>
    %34 = vector.broadcast %33 : vector<1x256xi1> to vector<4x256xi1>
    %35 = vector.broadcast %cst_19 : f32 to vector<4x256xf32>
    %36 = arith.select %34, %30, %35 : vector<4x256xi1>, vector<4x256xf32>
    %c0_20 = arith.constant 0 : index
    %c1_21 = arith.constant 1 : index
    %37 = vector.load %arg4[%c0_20, %c1_21] : memref<4x9xf32, #tpu.memory_space<vmem>>, vector<4x1xf32>
    %38 = vector.broadcast %37 : vector<4x1xf32> to vector<4x256xf32>
    %39 = arith.mulf %36, %38 : vector<4x256xf32>
    %40 = arith.addf %29, %39 : vector<4x256xf32>
    %c0_22 = arith.constant 0 : index
    %c113 = arith.constant 113 : index
    %41 = vector.load %arg13[%c0_22, %c113] : memref<4x512xf32, #tpu.memory_space<vmem>>, vector<4x256xf32>
    %c1_i32_23 = arith.constant 1 : i32
    %42 = vector.broadcast %c1_i32_23 : i32 to vector<1x256xi32>
    %43 = arith.cmpi sge, %1, %42 : vector<1x256xi32>
    %c15_i32 = arith.constant 15 : i32
    %44 = vector.broadcast %c15_i32 : i32 to vector<1x256xi32>
    %45 = arith.cmpi slt, %2, %44 : vector<1x256xi32>
    %46 = arith.andi %43, %45 : vector<1x256xi1>
    %cst_24 = arith.constant 0.000000e+00 : f32
    %47 = vector.shape_cast %46 : vector<1x256xi1> to vector<1x256xi1>
    %48 = vector.broadcast %47 : vector<1x256xi1> to vector<4x256xi1>
    %49 = vector.broadcast %cst_24 : f32 to vector<4x256xf32>
    %50 = arith.select %48, %41, %49 : vector<4x256xi1>, vector<4x256xf32>
    %c0_25 = arith.constant 0 : index
    %c2 = arith.constant 2 : index
    %51 = vector.load %arg4[%c0_25, %c2] : memref<4x9xf32, #tpu.memory_space<vmem>>, vector<4x1xf32>
    %52 = vector.broadcast %51 : vector<4x1xf32> to vector<4x256xf32>
    %53 = arith.mulf %50, %52 : vector<4x256xf32>
    %54 = arith.addf %40, %53 : vector<4x256xf32>
    %c0_26 = arith.constant 0 : index
    %c127 = arith.constant 127 : index
    %55 = vector.load %arg13[%c0_26, %c127] : memref<4x512xf32, #tpu.memory_space<vmem>>, vector<4x256xf32>
    %c1_i32_27 = arith.constant 1 : i32
    %56 = vector.broadcast %c1_i32_27 : i32 to vector<1x256xi32>
    %57 = arith.cmpi sge, %2, %56 : vector<1x256xi32>
    %cst_28 = arith.constant 0.000000e+00 : f32
    %58 = vector.shape_cast %57 : vector<1x256xi1> to vector<1x256xi1>
    %59 = vector.broadcast %58 : vector<1x256xi1> to vector<4x256xi1>
    %60 = vector.broadcast %cst_28 : f32 to vector<4x256xf32>
    %61 = arith.select %59, %55, %60 : vector<4x256xi1>, vector<4x256xf32>
    %c0_29 = arith.constant 0 : index
    %c3 = arith.constant 3 : index
    %62 = vector.load %arg4[%c0_29, %c3] : memref<4x9xf32, #tpu.memory_space<vmem>>, vector<4x1xf32>
    %63 = vector.broadcast %62 : vector<4x1xf32> to vector<4x256xf32>
    %64 = arith.mulf %61, %63 : vector<4x256xf32>
    %65 = arith.addf %54, %64 : vector<4x256xf32>
    %c0_30 = arith.constant 0 : index
    %c128_31 = arith.constant 128 : index
    %66 = vector.load %arg13[%c0_30, %c128_31] : memref<4x512xf32, #tpu.memory_space<vmem>>, vector<4x256xf32>
    %c0_32 = arith.constant 0 : index
    %c4 = arith.constant 4 : index
    %67 = vector.load %arg4[%c0_32, %c4] : memref<4x9xf32, #tpu.memory_space<vmem>>, vector<4x1xf32>
    %68 = vector.broadcast %67 : vector<4x1xf32> to vector<4x256xf32>
    %69 = arith.mulf %66, %68 : vector<4x256xf32>
    %70 = arith.addf %65, %69 : vector<4x256xf32>
    %c0_33 = arith.constant 0 : index
    %c129 = arith.constant 129 : index
    %71 = vector.load %arg13[%c0_33, %c129] : memref<4x512xf32, #tpu.memory_space<vmem>>, vector<4x256xf32>
    %c15_i32_34 = arith.constant 15 : i32
    %72 = vector.broadcast %c15_i32_34 : i32 to vector<1x256xi32>
    %73 = arith.cmpi slt, %2, %72 : vector<1x256xi32>
    %cst_35 = arith.constant 0.000000e+00 : f32
    %74 = vector.shape_cast %73 : vector<1x256xi1> to vector<1x256xi1>
    %75 = vector.broadcast %74 : vector<1x256xi1> to vector<4x256xi1>
    %76 = vector.broadcast %cst_35 : f32 to vector<4x256xf32>
    %77 = arith.select %75, %71, %76 : vector<4x256xi1>, vector<4x256xf32>
    %c0_36 = arith.constant 0 : index
    %c5 = arith.constant 5 : index
    %78 = vector.load %arg4[%c0_36, %c5] : memref<4x9xf32, #tpu.memory_space<vmem>>, vector<4x1xf32>
    %79 = vector.broadcast %78 : vector<4x1xf32> to vector<4x256xf32>
    %80 = arith.mulf %77, %79 : vector<4x256xf32>
    %81 = arith.addf %70, %80 : vector<4x256xf32>
    %c0_37 = arith.constant 0 : index
    %c143 = arith.constant 143 : index
    %82 = vector.load %arg13[%c0_37, %c143] : memref<4x512xf32, #tpu.memory_space<vmem>>, vector<4x256xf32>
    %c15_i32_38 = arith.constant 15 : i32
    %83 = vector.broadcast %c15_i32_38 : i32 to vector<1x256xi32>
    %84 = arith.cmpi slt, %1, %83 : vector<1x256xi32>
    %c1_i32_39 = arith.constant 1 : i32
    %85 = vector.broadcast %c1_i32_39 : i32 to vector<1x256xi32>
    %86 = arith.cmpi sge, %2, %85 : vector<1x256xi32>
    %87 = arith.andi %84, %86 : vector<1x256xi1>
    %cst_40 = arith.constant 0.000000e+00 : f32
    %88 = vector.shape_cast %87 : vector<1x256xi1> to vector<1x256xi1>
    %89 = vector.broadcast %88 : vector<1x256xi1> to vector<4x256xi1>
    %90 = vector.broadcast %cst_40 : f32 to vector<4x256xf32>
    %91 = arith.select %89, %82, %90 : vector<4x256xi1>, vector<4x256xf32>
    %c0_41 = arith.constant 0 : index
    %c6 = arith.constant 6 : index
    %92 = vector.load %arg4[%c0_41, %c6] : memref<4x9xf32, #tpu.memory_space<vmem>>, vector<4x1xf32>
    %93 = vector.broadcast %92 : vector<4x1xf32> to vector<4x256xf32>
    %94 = arith.mulf %91, %93 : vector<4x256xf32>
    %95 = arith.addf %81, %94 : vector<4x256xf32>
    %c0_42 = arith.constant 0 : index
    %c144 = arith.constant 144 : index
    %96 = vector.load %arg13[%c0_42, %c144] : memref<4x512xf32, #tpu.memory_space<vmem>>, vector<4x256xf32>
    %c15_i32_43 = arith.constant 15 : i32
    %97 = vector.broadcast %c15_i32_43 : i32 to vector<1x256xi32>
    %98 = arith.cmpi slt, %1, %97 : vector<1x256xi32>
    %cst_44 = arith.constant 0.000000e+00 : f32
    %99 = vector.shape_cast %98 : vector<1x256xi1> to vector<1x256xi1>
    %100 = vector.broadcast %99 : vector<1x256xi1> to vector<4x256xi1>
    %101 = vector.broadcast %cst_44 : f32 to vector<4x256xf32>
    %102 = arith.select %100, %96, %101 : vector<4x256xi1>, vector<4x256xf32>
    %c0_45 = arith.constant 0 : index
    %c7 = arith.constant 7 : index
    %103 = vector.load %arg4[%c0_45, %c7] : memref<4x9xf32, #tpu.memory_space<vmem>>, vector<4x1xf32>
    %104 = vector.broadcast %103 : vector<4x1xf32> to vector<4x256xf32>
    %105 = arith.mulf %102, %104 : vector<4x256xf32>
    %106 = arith.addf %95, %105 : vector<4x256xf32>
    %c0_46 = arith.constant 0 : index
    %c145 = arith.constant 145 : index
    %107 = vector.load %arg13[%c0_46, %c145] : memref<4x512xf32, #tpu.memory_space<vmem>>, vector<4x256xf32>
    %c15_i32_47 = arith.constant 15 : i32
    %108 = vector.broadcast %c15_i32_47 : i32 to vector<1x256xi32>
    %109 = arith.cmpi slt, %1, %108 : vector<1x256xi32>
    %c15_i32_48 = arith.constant 15 : i32
    %110 = vector.broadcast %c15_i32_48 : i32 to vector<1x256xi32>
    %111 = arith.cmpi slt, %2, %110 : vector<1x256xi32>
    %112 = arith.andi %109, %111 : vector<1x256xi1>
    %cst_49 = arith.constant 0.000000e+00 : f32
    %113 = vector.shape_cast %112 : vector<1x256xi1> to vector<1x256xi1>
    %114 = vector.broadcast %113 : vector<1x256xi1> to vector<4x256xi1>
    %115 = vector.broadcast %cst_49 : f32 to vector<4x256xf32>
    %116 = arith.select %114, %107, %115 : vector<4x256xi1>, vector<4x256xf32>
    %c0_50 = arith.constant 0 : index
    %c8 = arith.constant 8 : index
    %117 = vector.load %arg4[%c0_50, %c8] : memref<4x9xf32, #tpu.memory_space<vmem>>, vector<4x1xf32>
    %118 = vector.broadcast %117 : vector<4x1xf32> to vector<4x256xf32>
    %119 = arith.mulf %116, %118 : vector<4x256xf32>
    %120 = arith.addf %106, %119 : vector<4x256xf32>
    %c0_51 = arith.constant 0 : index
    %c0_52 = arith.constant 0 : index
    %121 = vector.load %arg5[%c0_51, %c0_52] : memref<4x4xf32, #tpu.memory_space<vmem>>, vector<4x4xf32>
    %cst_53 = arith.constant dense<0.000000e+00> : vector<4x256xf32>
    %122 = tpu.matmul %121, %120, %cst_53 {dimension_numbers = #tpu.dot_dimension_numbers<[1], [0], [0], [1], [0, 0, 1, 1], [], []>} : vector<4x4xf32>, vector<4x256xf32>, vector<4x256xf32> -> vector<4x256xf32>
    %c0_54 = arith.constant 0 : index
    %c0_55 = arith.constant 0 : index
    %c0_56 = arith.constant 0 : index
    %123 = vector.load %arg10[%c0_54, %c0_55, %c0_56] : memref<1x4x256xf32, #tpu.memory_space<vmem>>, vector<1x4x256xf32>
    %124 = vector.shape_cast %123 : vector<1x4x256xf32> to vector<4x256xf32>
    %125 = vector.shape_cast %122 : vector<4x256xf32> to vector<1x4x256xf32>
    tpu.vector_store %arg10[%c0_54, %c0_55, %c0_56], %125 {strides = array<i32>} : memref<1x4x256xf32, #tpu.memory_space<vmem>>, vector<1x4x256xf32>,
    %cst_57 = arith.constant dense<0.000000e+00> : vector<4xf32>
    %126 = vector.multi_reduction <add>, %122, %cst_57 [1] : vector<4x256xf32> to vector<4xf32>
    %127 = vector.shape_cast %126 : vector<4xf32> to vector<4x1xf32>
    %c0_58 = arith.constant 0 : index
    %c0_59 = arith.constant 0 : index
    %c0_60 = arith.constant 0 : index
    %c0_61 = arith.constant 0 : index
    %128 = vector.load %arg12[%c0_58, %c0_59, %c0_60, %c0_61] : memref<1x4x4x1xf32, #tpu.memory_space<vmem>>, vector<1x1x4x1xf32>
    %129 = vector.shape_cast %128 : vector<1x1x4x1xf32> to vector<4x1xf32>
    %130 = vector.shape_cast %127 : vector<4x1xf32> to vector<1x1x4x1xf32>
    tpu.vector_store %arg12[%c0_58, %c0_59, %c0_60, %c0_61], %130 {strides = array<i32>} : memref<1x4x4x1xf32, #tpu.memory_space<vmem>>, vector<1x1x4x1xf32>,
    %131 = arith.mulf %122, %122 : vector<4x256xf32>
    %cst_62 = arith.constant dense<0.000000e+00> : vector<4xf32>
    %132 = vector.multi_reduction <add>, %131, %cst_62 [1] : vector<4x256xf32> to vector<4xf32>
    %133 = vector.shape_cast %132 : vector<4xf32> to vector<4x1xf32>
    %c0_63 = arith.constant 0 : index
    %c1_64 = arith.constant 1 : index
    %c0_65 = arith.constant 0 : index
    %c0_66 = arith.constant 0 : index
    %134 = vector.load %arg12[%c0_63, %c1_64, %c0_65, %c0_66] : memref<1x4x4x1xf32, #tpu.memory_space<vmem>>, vector<1x1x4x1xf32>
    %135 = vector.shape_cast %134 : vector<1x1x4x1xf32> to vector<4x1xf32>
    %136 = vector.shape_cast %133 : vector<4x1xf32> to vector<1x1x4x1xf32>
    tpu.vector_store %arg12[%c0_63, %c1_64, %c0_65, %c0_66], %136 {strides = array<i32>} : memref<1x4x4x1xf32, #tpu.memory_space<vmem>>, vector<1x1x4x1xf32>,
    %c0_67 = arith.constant 0 : index
    %c0_68 = arith.constant 0 : index
    %c0_69 = arith.constant 0 : index
    %137 = vector.load %arg3[%c0_67, %c0_68, %c0_69] : memref<1x4x256xf32, #tpu.memory_space<vmem>>, vector<1x4x256xf32>
    %138 = vector.shape_cast %137 : vector<1x4x256xf32> to vector<4x256xf32>
    %c0_70 = arith.constant 0 : index
    %c0_71 = arith.constant 0 : index
    %139 = vector.load %arg9[%c0_70, %c0_71] : memref<4x2xf32, #tpu.memory_space<vmem>>, vector<4x1xf32>
    %140 = vector.broadcast %139 : vector<4x1xf32> to vector<4x256xf32>
    %141 = arith.mulf %138, %140 : vector<4x256xf32>
    %c0_72 = arith.constant 0 : index
    %c1_73 = arith.constant 1 : index
    %142 = vector.load %arg9[%c0_72, %c1_73] : memref<4x2xf32, #tpu.memory_space<vmem>>, vector<4x1xf32>
    %143 = vector.broadcast %142 : vector<4x1xf32> to vector<4x256xf32>
    %144 = arith.addf %141, %143 : vector<4x256xf32>
    %cst_74 = arith.constant 0.000000e+00 : f32
    %145 = vector.broadcast %cst_74 : f32 to vector<4x256xf32>
    %146 = arith.maximumf %144, %145 : vector<4x256xf32>
    %c0_75 = arith.constant 0 : index
    %c128_76 = arith.constant 128 : index
    %147 = vector.load %arg13[%c0_75, %c128_76] : memref<4x512xf32, #tpu.memory_space<vmem>>, vector<4x256xf32>
    tpu.vector_store %arg13[%c0_75, %c128_76], %146 {strides = array<i32>} : memref<4x512xf32, #tpu.memory_space<vmem>>, vector<4x256xf32>,
    %c0_77 = arith.constant 0 : index
    %c94 = arith.constant 94 : index
    %148 = vector.load %arg13[%c0_77, %c94] : memref<4x512xf32, #tpu.memory_space<vmem>>, vector<4x256xf32>
    %c2_i32 = arith.constant 2 : i32
    %149 = vector.broadcast %c2_i32 : i32 to vector<1x256xi32>
    %150 = arith.cmpi sge, %1, %149 : vector<1x256xi32>
    %c2_i32_78 = arith.constant 2 : i32
    %151 = vector.broadcast %c2_i32_78 : i32 to vector<1x256xi32>
    %152 = arith.cmpi sge, %2, %151 : vector<1x256xi32>
    %153 = arith.andi %150, %152 : vector<1x256xi1>
    %cst_79 = arith.constant 0.000000e+00 : f32
    %154 = vector.shape_cast %153 : vector<1x256xi1> to vector<1x256xi1>
    %155 = vector.broadcast %154 : vector<1x256xi1> to vector<4x256xi1>
    %156 = vector.broadcast %cst_79 : f32 to vector<4x256xf32>
    %157 = arith.select %155, %148, %156 : vector<4x256xi1>, vector<4x256xf32>
    %c0_80 = arith.constant 0 : index
    %c0_81 = arith.constant 0 : index
    %158 = vector.load %arg6[%c0_80, %c0_81] : memref<4x25xf32, #tpu.memory_space<vmem>>, vector<4x1xf32>
    %159 = vector.broadcast %158 : vector<4x1xf32> to vector<4x256xf32>
    %160 = arith.mulf %157, %159 : vector<4x256xf32>
    %c0_82 = arith.constant 0 : index
    %c95 = arith.constant 95 : index
    %161 = vector.load %arg13[%c0_82, %c95] : memref<4x512xf32, #tpu.memory_space<vmem>>, vector<4x256xf32>
    %c2_i32_83 = arith.constant 2 : i32
    %162 = vector.broadcast %c2_i32_83 : i32 to vector<1x256xi32>
    %163 = arith.cmpi sge, %1, %162 : vector<1x256xi32>
    %c1_i32_84 = arith.constant 1 : i32
    %164 = vector.broadcast %c1_i32_84 : i32 to vector<1x256xi32>
    %165 = arith.cmpi sge, %2, %164 : vector<1x256xi32>
    %166 = arith.andi %163, %165 : vector<1x256xi1>
    %cst_85 = arith.constant 0.000000e+00 : f32
    %167 = vector.shape_cast %166 : vector<1x256xi1> to vector<1x256xi1>
    %168 = vector.broadcast %167 : vector<1x256xi1> to vector<4x256xi1>
    %169 = vector.broadcast %cst_85 : f32 to vector<4x256xf32>
    %170 = arith.select %168, %161, %169 : vector<4x256xi1>, vector<4x256xf32>
    %c0_86 = arith.constant 0 : index
    %c1_87 = arith.constant 1 : index
    %171 = vector.load %arg6[%c0_86, %c1_87] : memref<4x25xf32, #tpu.memory_space<vmem>>, vector<4x1xf32>
    %172 = vector.broadcast %171 : vector<4x1xf32> to vector<4x256xf32>
    %173 = arith.mulf %170, %172 : vector<4x256xf32>
    %174 = arith.addf %160, %173 : vector<4x256xf32>
    %c0_88 = arith.constant 0 : index
    %c96 = arith.constant 96 : index
    %175 = vector.load %arg13[%c0_88, %c96] : memref<4x512xf32, #tpu.memory_space<vmem>>, vector<4x256xf32>
    %c2_i32_89 = arith.constant 2 : i32
    %176 = vector.broadcast %c2_i32_89 : i32 to vector<1x256xi32>
    %177 = arith.cmpi sge, %1, %176 : vector<1x256xi32>
    %cst_90 = arith.constant 0.000000e+00 : f32
    %178 = vector.shape_cast %177 : vector<1x256xi1> to vector<1x256xi1>
    %179 = vector.broadcast %178 : vector<1x256xi1> to vector<4x256xi1>
    %180 = vector.broadcast %cst_90 : f32 to vector<4x256xf32>
    %181 = arith.select %179, %175, %180 : vector<4x256xi1>, vector<4x256xf32>
    %c0_91 = arith.constant 0 : index
    %c2_92 = arith.constant 2 : index
    %182 = vector.load %arg6[%c0_91, %c2_92] : memref<4x25xf32, #tpu.memory_space<vmem>>, vector<4x1xf32>
    %183 = vector.broadcast %182 : vector<4x1xf32> to vector<4x256xf32>
    %184 = arith.mulf %181, %183 : vector<4x256xf32>
    %185 = arith.addf %174, %184 : vector<4x256xf32>
    %c0_93 = arith.constant 0 : index
    %c97 = arith.constant 97 : index
    %186 = vector.load %arg13[%c0_93, %c97] : memref<4x512xf32, #tpu.memory_space<vmem>>, vector<4x256xf32>
    %c2_i32_94 = arith.constant 2 : i32
    %187 = vector.broadcast %c2_i32_94 : i32 to vector<1x256xi32>
    %188 = arith.cmpi sge, %1, %187 : vector<1x256xi32>
    %c15_i32_95 = arith.constant 15 : i32
    %189 = vector.broadcast %c15_i32_95 : i32 to vector<1x256xi32>
    %190 = arith.cmpi slt, %2, %189 : vector<1x256xi32>
    %191 = arith.andi %188, %190 : vector<1x256xi1>
    %cst_96 = arith.constant 0.000000e+00 : f32
    %192 = vector.shape_cast %191 : vector<1x256xi1> to vector<1x256xi1>
    %193 = vector.broadcast %192 : vector<1x256xi1> to vector<4x256xi1>
    %194 = vector.broadcast %cst_96 : f32 to vector<4x256xf32>
    %195 = arith.select %193, %186, %194 : vector<4x256xi1>, vector<4x256xf32>
    %c0_97 = arith.constant 0 : index
    %c3_98 = arith.constant 3 : index
    %196 = vector.load %arg6[%c0_97, %c3_98] : memref<4x25xf32, #tpu.memory_space<vmem>>, vector<4x1xf32>
    %197 = vector.broadcast %196 : vector<4x1xf32> to vector<4x256xf32>
    %198 = arith.mulf %195, %197 : vector<4x256xf32>
    %199 = arith.addf %185, %198 : vector<4x256xf32>
    %c0_99 = arith.constant 0 : index
    %c98 = arith.constant 98 : index
    %200 = vector.load %arg13[%c0_99, %c98] : memref<4x512xf32, #tpu.memory_space<vmem>>, vector<4x256xf32>
    %c2_i32_100 = arith.constant 2 : i32
    %201 = vector.broadcast %c2_i32_100 : i32 to vector<1x256xi32>
    %202 = arith.cmpi sge, %1, %201 : vector<1x256xi32>
    %c14_i32 = arith.constant 14 : i32
    %203 = vector.broadcast %c14_i32 : i32 to vector<1x256xi32>
    %204 = arith.cmpi slt, %2, %203 : vector<1x256xi32>
    %205 = arith.andi %202, %204 : vector<1x256xi1>
    %cst_101 = arith.constant 0.000000e+00 : f32
    %206 = vector.shape_cast %205 : vector<1x256xi1> to vector<1x256xi1>
    %207 = vector.broadcast %206 : vector<1x256xi1> to vector<4x256xi1>
    %208 = vector.broadcast %cst_101 : f32 to vector<4x256xf32>
    %209 = arith.select %207, %200, %208 : vector<4x256xi1>, vector<4x256xf32>
    %c0_102 = arith.constant 0 : index
    %c4_103 = arith.constant 4 : index
    %210 = vector.load %arg6[%c0_102, %c4_103] : memref<4x25xf32, #tpu.memory_space<vmem>>, vector<4x1xf32>
    %211 = vector.broadcast %210 : vector<4x1xf32> to vector<4x256xf32>
    %212 = arith.mulf %209, %211 : vector<4x256xf32>
    %213 = arith.addf %199, %212 : vector<4x256xf32>
    %c0_104 = arith.constant 0 : index
    %c110 = arith.constant 110 : index
    %214 = vector.load %arg13[%c0_104, %c110] : memref<4x512xf32, #tpu.memory_space<vmem>>, vector<4x256xf32>
    %c1_i32_105 = arith.constant 1 : i32
    %215 = vector.broadcast %c1_i32_105 : i32 to vector<1x256xi32>
    %216 = arith.cmpi sge, %1, %215 : vector<1x256xi32>
    %c2_i32_106 = arith.constant 2 : i32
    %217 = vector.broadcast %c2_i32_106 : i32 to vector<1x256xi32>
    %218 = arith.cmpi sge, %2, %217 : vector<1x256xi32>
    %219 = arith.andi %216, %218 : vector<1x256xi1>
    %cst_107 = arith.constant 0.000000e+00 : f32
    %220 = vector.shape_cast %219 : vector<1x256xi1> to vector<1x256xi1>
    %221 = vector.broadcast %220 : vector<1x256xi1> to vector<4x256xi1>
    %222 = vector.broadcast %cst_107 : f32 to vector<4x256xf32>
    %223 = arith.select %221, %214, %222 : vector<4x256xi1>, vector<4x256xf32>
    %c0_108 = arith.constant 0 : index
    %c5_109 = arith.constant 5 : index
    %224 = vector.load %arg6[%c0_108, %c5_109] : memref<4x25xf32, #tpu.memory_space<vmem>>, vector<4x1xf32>
    %225 = vector.broadcast %224 : vector<4x1xf32> to vector<4x256xf32>
    %226 = arith.mulf %223, %225 : vector<4x256xf32>
    %227 = arith.addf %213, %226 : vector<4x256xf32>
    %c0_110 = arith.constant 0 : index
    %c111_111 = arith.constant 111 : index
    %228 = vector.load %arg13[%c0_110, %c111_111] : memref<4x512xf32, #tpu.memory_space<vmem>>, vector<4x256xf32>
    %cst_112 = arith.constant 0.000000e+00 : f32
    %229 = vector.shape_cast %22 : vector<1x256xi1> to vector<1x256xi1>
    %230 = vector.broadcast %229 : vector<1x256xi1> to vector<4x256xi1>
    %231 = vector.broadcast %cst_112 : f32 to vector<4x256xf32>
    %232 = arith.select %230, %228, %231 : vector<4x256xi1>, vector<4x256xf32>
    %c0_113 = arith.constant 0 : index
    %c6_114 = arith.constant 6 : index
    %233 = vector.load %arg6[%c0_113, %c6_114] : memref<4x25xf32, #tpu.memory_space<vmem>>, vector<4x1xf32>
    %234 = vector.broadcast %233 : vector<4x1xf32> to vector<4x256xf32>
    %235 = arith.mulf %232, %234 : vector<4x256xf32>
    %236 = arith.addf %227, %235 : vector<4x256xf32>
    %c0_115 = arith.constant 0 : index
    %c112_116 = arith.constant 112 : index
    %237 = vector.load %arg13[%c0_115, %c112_116] : memref<4x512xf32, #tpu.memory_space<vmem>>, vector<4x256xf32>
    %cst_117 = arith.constant 0.000000e+00 : f32
    %238 = vector.shape_cast %32 : vector<1x256xi1> to vector<1x256xi1>
    %239 = vector.broadcast %238 : vector<1x256xi1> to vector<4x256xi1>
    %240 = vector.broadcast %cst_117 : f32 to vector<4x256xf32>
    %241 = arith.select %239, %237, %240 : vector<4x256xi1>, vector<4x256xf32>
    %c0_118 = arith.constant 0 : index
    %c7_119 = arith.constant 7 : index
    %242 = vector.load %arg6[%c0_118, %c7_119] : memref<4x25xf32, #tpu.memory_space<vmem>>, vector<4x1xf32>
    %243 = vector.broadcast %242 : vector<4x1xf32> to vector<4x256xf32>
    %244 = arith.mulf %241, %243 : vector<4x256xf32>
    %245 = arith.addf %236, %244 : vector<4x256xf32>
    %c0_120 = arith.constant 0 : index
    %c113_121 = arith.constant 113 : index
    %246 = vector.load %arg13[%c0_120, %c113_121] : memref<4x512xf32, #tpu.memory_space<vmem>>, vector<4x256xf32>
    %cst_122 = arith.constant 0.000000e+00 : f32
    %247 = vector.shape_cast %46 : vector<1x256xi1> to vector<1x256xi1>
    %248 = vector.broadcast %247 : vector<1x256xi1> to vector<4x256xi1>
    %249 = vector.broadcast %cst_122 : f32 to vector<4x256xf32>
    %250 = arith.select %248, %246, %249 : vector<4x256xi1>, vector<4x256xf32>
    %c0_123 = arith.constant 0 : index
    %c8_124 = arith.constant 8 : index
    %251 = vector.load %arg6[%c0_123, %c8_124] : memref<4x25xf32, #tpu.memory_space<vmem>>, vector<4x1xf32>
    %252 = vector.broadcast %251 : vector<4x1xf32> to vector<4x256xf32>
    %253 = arith.mulf %250, %252 : vector<4x256xf32>
    %254 = arith.addf %245, %253 : vector<4x256xf32>
    %c0_125 = arith.constant 0 : index
    %c114 = arith.constant 114 : index
    %255 = vector.load %arg13[%c0_125, %c114] : memref<4x512xf32, #tpu.memory_space<vmem>>, vector<4x256xf32>
    %c1_i32_126 = arith.constant 1 : i32
    %256 = vector.broadcast %c1_i32_126 : i32 to vector<1x256xi32>
    %257 = arith.cmpi sge, %1, %256 : vector<1x256xi32>
    %c14_i32_127 = arith.constant 14 : i32
    %258 = vector.broadcast %c14_i32_127 : i32 to vector<1x256xi32>
    %259 = arith.cmpi slt, %2, %258 : vector<1x256xi32>
    %260 = arith.andi %257, %259 : vector<1x256xi1>
    %cst_128 = arith.constant 0.000000e+00 : f32
    %261 = vector.shape_cast %260 : vector<1x256xi1> to vector<1x256xi1>
    %262 = vector.broadcast %261 : vector<1x256xi1> to vector<4x256xi1>
    %263 = vector.broadcast %cst_128 : f32 to vector<4x256xf32>
    %264 = arith.select %262, %255, %263 : vector<4x256xi1>, vector<4x256xf32>
    %c0_129 = arith.constant 0 : index
    %c9 = arith.constant 9 : index
    %265 = vector.load %arg6[%c0_129, %c9] : memref<4x25xf32, #tpu.memory_space<vmem>>, vector<4x1xf32>
    %266 = vector.broadcast %265 : vector<4x1xf32> to vector<4x256xf32>
    %267 = arith.mulf %264, %266 : vector<4x256xf32>
    %268 = arith.addf %254, %267 : vector<4x256xf32>
    %c0_130 = arith.constant 0 : index
    %c126 = arith.constant 126 : index
    %269 = vector.load %arg13[%c0_130, %c126] : memref<4x512xf32, #tpu.memory_space<vmem>>, vector<4x256xf32>
    %c2_i32_131 = arith.constant 2 : i32
    %270 = vector.broadcast %c2_i32_131 : i32 to vector<1x256xi32>
    %271 = arith.cmpi sge, %2, %270 : vector<1x256xi32>
    %cst_132 = arith.constant 0.000000e+00 : f32
    %272 = vector.shape_cast %271 : vector<1x256xi1> to vector<1x256xi1>
    %273 = vector.broadcast %272 : vector<1x256xi1> to vector<4x256xi1>
    %274 = vector.broadcast %cst_132 : f32 to vector<4x256xf32>
    %275 = arith.select %273, %269, %274 : vector<4x256xi1>, vector<4x256xf32>
    %c0_133 = arith.constant 0 : index
    %c10 = arith.constant 10 : index
    %276 = vector.load %arg6[%c0_133, %c10] : memref<4x25xf32, #tpu.memory_space<vmem>>, vector<4x1xf32>
    %277 = vector.broadcast %276 : vector<4x1xf32> to vector<4x256xf32>
    %278 = arith.mulf %275, %277 : vector<4x256xf32>
    %279 = arith.addf %268, %278 : vector<4x256xf32>
    %c0_134 = arith.constant 0 : index
    %c127_135 = arith.constant 127 : index
    %280 = vector.load %arg13[%c0_134, %c127_135] : memref<4x512xf32, #tpu.memory_space<vmem>>, vector<4x256xf32>
    %cst_136 = arith.constant 0.000000e+00 : f32
    %281 = vector.shape_cast %57 : vector<1x256xi1> to vector<1x256xi1>
    %282 = vector.broadcast %281 : vector<1x256xi1> to vector<4x256xi1>
    %283 = vector.broadcast %cst_136 : f32 to vector<4x256xf32>
    %284 = arith.select %282, %280, %283 : vector<4x256xi1>, vector<4x256xf32>
    %c0_137 = arith.constant 0 : index
    %c11 = arith.constant 11 : index
    %285 = vector.load %arg6[%c0_137, %c11] : memref<4x25xf32, #tpu.memory_space<vmem>>, vector<4x1xf32>
    %286 = vector.broadcast %285 : vector<4x1xf32> to vector<4x256xf32>
    %287 = arith.mulf %284, %286 : vector<4x256xf32>
    %288 = arith.addf %279, %287 : vector<4x256xf32>
    %c0_138 = arith.constant 0 : index
    %c128_139 = arith.constant 128 : index
    %289 = vector.load %arg13[%c0_138, %c128_139] : memref<4x512xf32, #tpu.memory_space<vmem>>, vector<4x256xf32>
    %c0_140 = arith.constant 0 : index
    %c12 = arith.constant 12 : index
    %290 = vector.load %arg6[%c0_140, %c12] : memref<4x25xf32, #tpu.memory_space<vmem>>, vector<4x1xf32>
    %291 = vector.broadcast %290 : vector<4x1xf32> to vector<4x256xf32>
    %292 = arith.mulf %289, %291 : vector<4x256xf32>
    %293 = arith.addf %288, %292 : vector<4x256xf32>
    %c0_141 = arith.constant 0 : index
    %c129_142 = arith.constant 129 : index
    %294 = vector.load %arg13[%c0_141, %c129_142] : memref<4x512xf32, #tpu.memory_space<vmem>>, vector<4x256xf32>
    %cst_143 = arith.constant 0.000000e+00 : f32
    %295 = vector.shape_cast %73 : vector<1x256xi1> to vector<1x256xi1>
    %296 = vector.broadcast %295 : vector<1x256xi1> to vector<4x256xi1>
    %297 = vector.broadcast %cst_143 : f32 to vector<4x256xf32>
    %298 = arith.select %296, %294, %297 : vector<4x256xi1>, vector<4x256xf32>
    %c0_144 = arith.constant 0 : index
    %c13 = arith.constant 13 : index
    %299 = vector.load %arg6[%c0_144, %c13] : memref<4x25xf32, #tpu.memory_space<vmem>>, vector<4x1xf32>
    %300 = vector.broadcast %299 : vector<4x1xf32> to vector<4x256xf32>
    %301 = arith.mulf %298, %300 : vector<4x256xf32>
    %302 = arith.addf %293, %301 : vector<4x256xf32>
    %c0_145 = arith.constant 0 : index
    %c130 = arith.constant 130 : index
    %303 = vector.load %arg13[%c0_145, %c130] : memref<4x512xf32, #tpu.memory_space<vmem>>, vector<4x256xf32>
    %c14_i32_146 = arith.constant 14 : i32
    %304 = vector.broadcast %c14_i32_146 : i32 to vector<1x256xi32>
    %305 = arith.cmpi slt, %2, %304 : vector<1x256xi32>
    %cst_147 = arith.constant 0.000000e+00 : f32
    %306 = vector.shape_cast %305 : vector<1x256xi1> to vector<1x256xi1>
    %307 = vector.broadcast %306 : vector<1x256xi1> to vector<4x256xi1>
    %308 = vector.broadcast %cst_147 : f32 to vector<4x256xf32>
    %309 = arith.select %307, %303, %308 : vector<4x256xi1>, vector<4x256xf32>
    %c0_148 = arith.constant 0 : index
    %c14 = arith.constant 14 : index
    %310 = vector.load %arg6[%c0_148, %c14] : memref<4x25xf32, #tpu.memory_space<vmem>>, vector<4x1xf32>
    %311 = vector.broadcast %310 : vector<4x1xf32> to vector<4x256xf32>
    %312 = arith.mulf %309, %311 : vector<4x256xf32>
    %313 = arith.addf %302, %312 : vector<4x256xf32>
    %c0_149 = arith.constant 0 : index
    %c142 = arith.constant 142 : index
    %314 = vector.load %arg13[%c0_149, %c142] : memref<4x512xf32, #tpu.memory_space<vmem>>, vector<4x256xf32>
    %c15_i32_150 = arith.constant 15 : i32
    %315 = vector.broadcast %c15_i32_150 : i32 to vector<1x256xi32>
    %316 = arith.cmpi slt, %1, %315 : vector<1x256xi32>
    %c2_i32_151 = arith.constant 2 : i32
    %317 = vector.broadcast %c2_i32_151 : i32 to vector<1x256xi32>
    %318 = arith.cmpi sge, %2, %317 : vector<1x256xi32>
    %319 = arith.andi %316, %318 : vector<1x256xi1>
    %cst_152 = arith.constant 0.000000e+00 : f32
    %320 = vector.shape_cast %319 : vector<1x256xi1> to vector<1x256xi1>
    %321 = vector.broadcast %320 : vector<1x256xi1> to vector<4x256xi1>
    %322 = vector.broadcast %cst_152 : f32 to vector<4x256xf32>
    %323 = arith.select %321, %314, %322 : vector<4x256xi1>, vector<4x256xf32>
    %c0_153 = arith.constant 0 : index
    %c15 = arith.constant 15 : index
    %324 = vector.load %arg6[%c0_153, %c15] : memref<4x25xf32, #tpu.memory_space<vmem>>, vector<4x1xf32>
    %325 = vector.broadcast %324 : vector<4x1xf32> to vector<4x256xf32>
    %326 = arith.mulf %323, %325 : vector<4x256xf32>
    %327 = arith.addf %313, %326 : vector<4x256xf32>
    %c0_154 = arith.constant 0 : index
    %c143_155 = arith.constant 143 : index
    %328 = vector.load %arg13[%c0_154, %c143_155] : memref<4x512xf32, #tpu.memory_space<vmem>>, vector<4x256xf32>
    %cst_156 = arith.constant 0.000000e+00 : f32
    %329 = vector.shape_cast %87 : vector<1x256xi1> to vector<1x256xi1>
    %330 = vector.broadcast %329 : vector<1x256xi1> to vector<4x256xi1>
    %331 = vector.broadcast %cst_156 : f32 to vector<4x256xf32>
    %332 = arith.select %330, %328, %331 : vector<4x256xi1>, vector<4x256xf32>
    %c0_157 = arith.constant 0 : index
    %c16 = arith.constant 16 : index
    %333 = vector.load %arg6[%c0_157, %c16] : memref<4x25xf32, #tpu.memory_space<vmem>>, vector<4x1xf32>
    %334 = vector.broadcast %333 : vector<4x1xf32> to vector<4x256xf32>
    %335 = arith.mulf %332, %334 : vector<4x256xf32>
    %336 = arith.addf %327, %335 : vector<4x256xf32>
    %c0_158 = arith.constant 0 : index
    %c144_159 = arith.constant 144 : index
    %337 = vector.load %arg13[%c0_158, %c144_159] : memref<4x512xf32, #tpu.memory_space<vmem>>, vector<4x256xf32>
    %cst_160 = arith.constant 0.000000e+00 : f32
    %338 = vector.shape_cast %98 : vector<1x256xi1> to vector<1x256xi1>
    %339 = vector.broadcast %338 : vector<1x256xi1> to vector<4x256xi1>
    %340 = vector.broadcast %cst_160 : f32 to vector<4x256xf32>
    %341 = arith.select %339, %337, %340 : vector<4x256xi1>, vector<4x256xf32>
    %c0_161 = arith.constant 0 : index
    %c17 = arith.constant 17 : index
    %342 = vector.load %arg6[%c0_161, %c17] : memref<4x25xf32, #tpu.memory_space<vmem>>, vector<4x1xf32>
    %343 = vector.broadcast %342 : vector<4x1xf32> to vector<4x256xf32>
    %344 = arith.mulf %341, %343 : vector<4x256xf32>
    %345 = arith.addf %336, %344 : vector<4x256xf32>
    %c0_162 = arith.constant 0 : index
    %c145_163 = arith.constant 145 : index
    %346 = vector.load %arg13[%c0_162, %c145_163] : memref<4x512xf32, #tpu.memory_space<vmem>>, vector<4x256xf32>
    %cst_164 = arith.constant 0.000000e+00 : f32
    %347 = vector.shape_cast %112 : vector<1x256xi1> to vector<1x256xi1>
    %348 = vector.broadcast %347 : vector<1x256xi1> to vector<4x256xi1>
    %349 = vector.broadcast %cst_164 : f32 to vector<4x256xf32>
    %350 = arith.select %348, %346, %349 : vector<4x256xi1>, vector<4x256xf32>
    %c0_165 = arith.constant 0 : index
    %c18 = arith.constant 18 : index
    %351 = vector.load %arg6[%c0_165, %c18] : memref<4x25xf32, #tpu.memory_space<vmem>>, vector<4x1xf32>
    %352 = vector.broadcast %351 : vector<4x1xf32> to vector<4x256xf32>
    %353 = arith.mulf %350, %352 : vector<4x256xf32>
    %354 = arith.addf %345, %353 : vector<4x256xf32>
    %c0_166 = arith.constant 0 : index
    %c146 = arith.constant 146 : index
    %355 = vector.load %arg13[%c0_166, %c146] : memref<4x512xf32, #tpu.memory_space<vmem>>, vector<4x256xf32>
    %c15_i32_167 = arith.constant 15 : i32
    %356 = vector.broadcast %c15_i32_167 : i32 to vector<1x256xi32>
    %357 = arith.cmpi slt, %1, %356 : vector<1x256xi32>
    %c14_i32_168 = arith.constant 14 : i32
    %358 = vector.broadcast %c14_i32_168 : i32 to vector<1x256xi32>
    %359 = arith.cmpi slt, %2, %358 : vector<1x256xi32>
    %360 = arith.andi %357, %359 : vector<1x256xi1>
    %cst_169 = arith.constant 0.000000e+00 : f32
    %361 = vector.shape_cast %360 : vector<1x256xi1> to vector<1x256xi1>
    %362 = vector.broadcast %361 : vector<1x256xi1> to vector<4x256xi1>
    %363 = vector.broadcast %cst_169 : f32 to vector<4x256xf32>
    %364 = arith.select %362, %355, %363 : vector<4x256xi1>, vector<4x256xf32>
    %c0_170 = arith.constant 0 : index
    %c19 = arith.constant 19 : index
    %365 = vector.load %arg6[%c0_170, %c19] : memref<4x25xf32, #tpu.memory_space<vmem>>, vector<4x1xf32>
    %366 = vector.broadcast %365 : vector<4x1xf32> to vector<4x256xf32>
    %367 = arith.mulf %364, %366 : vector<4x256xf32>
    %368 = arith.addf %354, %367 : vector<4x256xf32>
    %c0_171 = arith.constant 0 : index
    %c158 = arith.constant 158 : index
    %369 = vector.load %arg13[%c0_171, %c158] : memref<4x512xf32, #tpu.memory_space<vmem>>, vector<4x256xf32>
    %c14_i32_172 = arith.constant 14 : i32
    %370 = vector.broadcast %c14_i32_172 : i32 to vector<1x256xi32>
    %371 = arith.cmpi slt, %1, %370 : vector<1x256xi32>
    %c2_i32_173 = arith.constant 2 : i32
    %372 = vector.broadcast %c2_i32_173 : i32 to vector<1x256xi32>
    %373 = arith.cmpi sge, %2, %372 : vector<1x256xi32>
    %374 = arith.andi %371, %373 : vector<1x256xi1>
    %cst_174 = arith.constant 0.000000e+00 : f32
    %375 = vector.shape_cast %374 : vector<1x256xi1> to vector<1x256xi1>
    %376 = vector.broadcast %375 : vector<1x256xi1> to vector<4x256xi1>
    %377 = vector.broadcast %cst_174 : f32 to vector<4x256xf32>
    %378 = arith.select %376, %369, %377 : vector<4x256xi1>, vector<4x256xf32>
    %c0_175 = arith.constant 0 : index
    %c20 = arith.constant 20 : index
    %379 = vector.load %arg6[%c0_175, %c20] : memref<4x25xf32, #tpu.memory_space<vmem>>, vector<4x1xf32>
    %380 = vector.broadcast %379 : vector<4x1xf32> to vector<4x256xf32>
    %381 = arith.mulf %378, %380 : vector<4x256xf32>
    %382 = arith.addf %368, %381 : vector<4x256xf32>
    %c0_176 = arith.constant 0 : index
    %c159 = arith.constant 159 : index
    %383 = vector.load %arg13[%c0_176, %c159] : memref<4x512xf32, #tpu.memory_space<vmem>>, vector<4x256xf32>
    %c14_i32_177 = arith.constant 14 : i32
    %384 = vector.broadcast %c14_i32_177 : i32 to vector<1x256xi32>
    %385 = arith.cmpi slt, %1, %384 : vector<1x256xi32>
    %c1_i32_178 = arith.constant 1 : i32
    %386 = vector.broadcast %c1_i32_178 : i32 to vector<1x256xi32>
    %387 = arith.cmpi sge, %2, %386 : vector<1x256xi32>
    %388 = arith.andi %385, %387 : vector<1x256xi1>
    %cst_179 = arith.constant 0.000000e+00 : f32
    %389 = vector.shape_cast %388 : vector<1x256xi1> to vector<1x256xi1>
    %390 = vector.broadcast %389 : vector<1x256xi1> to vector<4x256xi1>
    %391 = vector.broadcast %cst_179 : f32 to vector<4x256xf32>
    %392 = arith.select %390, %383, %391 : vector<4x256xi1>, vector<4x256xf32>
    %c0_180 = arith.constant 0 : index
    %c21 = arith.constant 21 : index
    %393 = vector.load %arg6[%c0_180, %c21] : memref<4x25xf32, #tpu.memory_space<vmem>>, vector<4x1xf32>
    %394 = vector.broadcast %393 : vector<4x1xf32> to vector<4x256xf32>
    %395 = arith.mulf %392, %394 : vector<4x256xf32>
    %396 = arith.addf %382, %395 : vector<4x256xf32>
    %c0_181 = arith.constant 0 : index
    %c160 = arith.constant 160 : index
    %397 = vector.load %arg13[%c0_181, %c160] : memref<4x512xf32, #tpu.memory_space<vmem>>, vector<4x256xf32>
    %c14_i32_182 = arith.constant 14 : i32
    %398 = vector.broadcast %c14_i32_182 : i32 to vector<1x256xi32>
    %399 = arith.cmpi slt, %1, %398 : vector<1x256xi32>
    %cst_183 = arith.constant 0.000000e+00 : f32
    %400 = vector.shape_cast %399 : vector<1x256xi1> to vector<1x256xi1>
    %401 = vector.broadcast %400 : vector<1x256xi1> to vector<4x256xi1>
    %402 = vector.broadcast %cst_183 : f32 to vector<4x256xf32>
    %403 = arith.select %401, %397, %402 : vector<4x256xi1>, vector<4x256xf32>
    %c0_184 = arith.constant 0 : index
    %c22 = arith.constant 22 : index
    %404 = vector.load %arg6[%c0_184, %c22] : memref<4x25xf32, #tpu.memory_space<vmem>>, vector<4x1xf32>
    %405 = vector.broadcast %404 : vector<4x1xf32> to vector<4x256xf32>
    %406 = arith.mulf %403, %405 : vector<4x256xf32>
    %407 = arith.addf %396, %406 : vector<4x256xf32>
    %c0_185 = arith.constant 0 : index
    %c161 = arith.constant 161 : index
    %408 = vector.load %arg13[%c0_185, %c161] : memref<4x512xf32, #tpu.memory_space<vmem>>, vector<4x256xf32>
    %c14_i32_186 = arith.constant 14 : i32
    %409 = vector.broadcast %c14_i32_186 : i32 to vector<1x256xi32>
    %410 = arith.cmpi slt, %1, %409 : vector<1x256xi32>
    %c15_i32_187 = arith.constant 15 : i32
    %411 = vector.broadcast %c15_i32_187 : i32 to vector<1x256xi32>
    %412 = arith.cmpi slt, %2, %411 : vector<1x256xi32>
    %413 = arith.andi %410, %412 : vector<1x256xi1>
    %cst_188 = arith.constant 0.000000e+00 : f32
    %414 = vector.shape_cast %413 : vector<1x256xi1> to vector<1x256xi1>
    %415 = vector.broadcast %414 : vector<1x256xi1> to vector<4x256xi1>
    %416 = vector.broadcast %cst_188 : f32 to vector<4x256xf32>
    %417 = arith.select %415, %408, %416 : vector<4x256xi1>, vector<4x256xf32>
    %c0_189 = arith.constant 0 : index
    %c23 = arith.constant 23 : index
    %418 = vector.load %arg6[%c0_189, %c23] : memref<4x25xf32, #tpu.memory_space<vmem>>, vector<4x1xf32>
    %419 = vector.broadcast %418 : vector<4x1xf32> to vector<4x256xf32>
    %420 = arith.mulf %417, %419 : vector<4x256xf32>
    %421 = arith.addf %407, %420 : vector<4x256xf32>
    %c0_190 = arith.constant 0 : index
    %c162 = arith.constant 162 : index
    %422 = vector.load %arg13[%c0_190, %c162] : memref<4x512xf32, #tpu.memory_space<vmem>>, vector<4x256xf32>
    %c14_i32_191 = arith.constant 14 : i32
    %423 = vector.broadcast %c14_i32_191 : i32 to vector<1x256xi32>
    %424 = arith.cmpi slt, %1, %423 : vector<1x256xi32>
    %c14_i32_192 = arith.constant 14 : i32
    %425 = vector.broadcast %c14_i32_192 : i32 to vector<1x256xi32>
    %426 = arith.cmpi slt, %2, %425 : vector<1x256xi32>
    %427 = arith.andi %424, %426 : vector<1x256xi1>
    %cst_193 = arith.constant 0.000000e+00 : f32
    %428 = vector.shape_cast %427 : vector<1x256xi1> to vector<1x256xi1>
    %429 = vector.broadcast %428 : vector<1x256xi1> to vector<4x256xi1>
    %430 = vector.broadcast %cst_193 : f32 to vector<4x256xf32>
    %431 = arith.select %429, %422, %430 : vector<4x256xi1>, vector<4x256xf32>
    %c0_194 = arith.constant 0 : index
    %c24 = arith.constant 24 : index
    %432 = vector.load %arg6[%c0_194, %c24] : memref<4x25xf32, #tpu.memory_space<vmem>>, vector<4x1xf32>
    %433 = vector.broadcast %432 : vector<4x1xf32> to vector<4x256xf32>
    %434 = arith.mulf %431, %433 : vector<4x256xf32>
    %435 = arith.addf %421, %434 : vector<4x256xf32>
    %c0_195 = arith.constant 0 : index
    %c0_196 = arith.constant 0 : index
    %436 = vector.load %arg7[%c0_195, %c0_196] : memref<4x4xf32, #tpu.memory_space<vmem>>, vector<4x4xf32>
    %cst_197 = arith.constant dense<0.000000e+00> : vector<4x256xf32>
    %437 = tpu.matmul %436, %435, %cst_197 {dimension_numbers = #tpu.dot_dimension_numbers<[1], [0], [0], [1], [0, 0, 1, 1], [], []>} : vector<4x4xf32>, vector<4x256xf32>, vector<4x256xf32> -> vector<4x256xf32>
    %c0_198 = arith.constant 0 : index
    %c0_199 = arith.constant 0 : index
    %c0_200 = arith.constant 0 : index
    %438 = vector.load %arg11[%c0_198, %c0_199, %c0_200] : memref<1x4x256xf32, #tpu.memory_space<vmem>>, vector<1x4x256xf32>
    %439 = vector.shape_cast %438 : vector<1x4x256xf32> to vector<4x256xf32>
    %440 = vector.shape_cast %437 : vector<4x256xf32> to vector<1x4x256xf32>
    tpu.vector_store %arg11[%c0_198, %c0_199, %c0_200], %440 {strides = array<i32>} : memref<1x4x256xf32, #tpu.memory_space<vmem>>, vector<1x4x256xf32>,
    %cst_201 = arith.constant dense<0.000000e+00> : vector<4xf32>
    %441 = vector.multi_reduction <add>, %437, %cst_201 [1] : vector<4x256xf32> to vector<4xf32>
    %442 = vector.shape_cast %441 : vector<4xf32> to vector<4x1xf32>
    %c0_202 = arith.constant 0 : index
    %c2_203 = arith.constant 2 : index
    %c0_204 = arith.constant 0 : index
    %c0_205 = arith.constant 0 : index
    %443 = vector.load %arg12[%c0_202, %c2_203, %c0_204, %c0_205] : memref<1x4x4x1xf32, #tpu.memory_space<vmem>>, vector<1x1x4x1xf32>
    %444 = vector.shape_cast %443 : vector<1x1x4x1xf32> to vector<4x1xf32>
    %445 = vector.shape_cast %442 : vector<4x1xf32> to vector<1x1x4x1xf32>
    tpu.vector_store %arg12[%c0_202, %c2_203, %c0_204, %c0_205], %445 {strides = array<i32>} : memref<1x4x4x1xf32, #tpu.memory_space<vmem>>, vector<1x1x4x1xf32>,
    %446 = arith.mulf %437, %437 : vector<4x256xf32>
    %cst_206 = arith.constant dense<0.000000e+00> : vector<4xf32>
    %447 = vector.multi_reduction <add>, %446, %cst_206 [1] : vector<4x256xf32> to vector<4xf32>
    %448 = vector.shape_cast %447 : vector<4xf32> to vector<4x1xf32>
    %c0_207 = arith.constant 0 : index
    %c3_208 = arith.constant 3 : index
    %c0_209 = arith.constant 0 : index
    %c0_210 = arith.constant 0 : index
    %449 = vector.load %arg12[%c0_207, %c3_208, %c0_209, %c0_210] : memref<1x4x4x1xf32, #tpu.memory_space<vmem>>, vector<1x1x4x1xf32>
    %450 = vector.shape_cast %449 : vector<1x1x4x1xf32> to vector<4x1xf32>
    %451 = vector.shape_cast %448 : vector<4x1xf32> to vector<1x1x4x1xf32>
    tpu.vector_store %arg12[%c0_207, %c3_208, %c0_209, %c0_210], %451 {strides = array<i32>} : memref<1x4x4x1xf32, #tpu.memory_space<vmem>>, vector<1x1x4x1xf32>,
    return
  }
  func.func @transform_0(%arg0: i32) -> (i32, i32) {
    %c0_i32 = arith.constant 0 : i32
    %c0_i32_0 = arith.constant 0 : i32
    %c0_i32_1 = arith.constant 0 : i32
    return %c0_i32, %c0_i32_0 : i32, i32
  }
  func.func @transform_1(%arg0: i32) -> (i32, i32, i32) {
    %c0_i32 = arith.constant 0 : i32
    %c0_i32_0 = arith.constant 0 : i32
    %c0_i32_1 = arith.constant 0 : i32
    return %arg0, %c0_i32, %c0_i32_0 : i32, i32, i32
  }
  func.func @transform_2(%arg0: i32) -> (i32, i32, i32) {
    %c0_i32 = arith.constant 0 : i32
    %c0_i32_0 = arith.constant 0 : i32
    %c0_i32_1 = arith.constant 0 : i32
    return %arg0, %c0_i32, %c0_i32_0 : i32, i32, i32
  }
  func.func @transform_3(%arg0: i32) -> (i32, i32) {
    %c0_i32 = arith.constant 0 : i32
    %c0_i32_0 = arith.constant 0 : i32
    %c0_i32_1 = arith.constant 0 : i32
    return %c0_i32, %c0_i32_0 : i32, i32
  }
  func.func @transform_4(%arg0: i32) -> (i32, i32) {
    %c0_i32 = arith.constant 0 : i32
    %c0_i32_0 = arith.constant 0 : i32
    %c0_i32_1 = arith.constant 0 : i32
    return %c0_i32, %c0_i32_0 : i32, i32
  }
  func.func @transform_5(%arg0: i32) -> (i32, i32) {
    %c0_i32 = arith.constant 0 : i32
    %c0_i32_0 = arith.constant 0 : i32
    %c0_i32_1 = arith.constant 0 : i32
    return %c0_i32, %c0_i32_0 : i32, i32
  }
  func.func @transform_6(%arg0: i32) -> (i32, i32) {
    %c0_i32 = arith.constant 0 : i32
    %c0_i32_0 = arith.constant 0 : i32
    %c0_i32_1 = arith.constant 0 : i32
    return %c0_i32, %c0_i32_0 : i32, i32
  }
  func.func @transform_7(%arg0: i32) -> (i32, i32) {
    %c0_i32 = arith.constant 0 : i32
    %c0_i32_0 = arith.constant 0 : i32
    %c0_i32_1 = arith.constant 0 : i32
    return %c0_i32, %c0_i32_0 : i32, i32
  }
  func.func @transform_8(%arg0: i32) -> (i32, i32) {
    %c0_i32 = arith.constant 0 : i32
    %c0_i32_0 = arith.constant 0 : i32
    %c0_i32_1 = arith.constant 0 : i32
    return %c0_i32, %c0_i32_0 : i32, i32
  }
  func.func @transform_9(%arg0: i32) -> (i32, i32, i32) {
    %c0_i32 = arith.constant 0 : i32
    %c0_i32_0 = arith.constant 0 : i32
    %c0_i32_1 = arith.constant 0 : i32
    return %arg0, %c0_i32, %c0_i32_0 : i32, i32, i32
  }
  func.func @transform_10(%arg0: i32) -> (i32, i32, i32) {
    %c0_i32 = arith.constant 0 : i32
    %c0_i32_0 = arith.constant 0 : i32
    %c0_i32_1 = arith.constant 0 : i32
    return %arg0, %c0_i32, %c0_i32_0 : i32, i32, i32
  }
  func.func @transform_11(%arg0: i32) -> (i32, i32, i32, i32) {
    %c0_i32 = arith.constant 0 : i32
    %c0_i32_0 = arith.constant 0 : i32
    %c0_i32_1 = arith.constant 0 : i32
    %c0_i32_2 = arith.constant 0 : i32
    return %arg0, %c0_i32, %c0_i32_0, %c0_i32_1 : i32, i32, i32, i32
  }
}

module attributes {stable_mosaic.version = 11 : i64} {
  func.func @_combine_kernel(%arg0: i32, %arg1: i32, %arg2: memref<8x8xf32, #tpu.memory_space<vmem>>, %arg3: memref<8x128xf32, #tpu.memory_space<vmem>>, %arg4: memref<8x128xf32, #tpu.memory_space<vmem>>, %arg5: memref<8x128xf32, #tpu.memory_space<vmem>>, %arg6: memref<8x128xf32, #tpu.memory_space<vmem>>, %arg7: memref<8x128xf32, #tpu.memory_space<vmem>>, %arg8: memref<8x128xf32, #tpu.memory_space<vmem>>, %arg9: memref<8x128xf32, #tpu.memory_space<vmem>>, %arg10: memref<8x128xf32, #tpu.memory_space<vmem>>) attributes {dimension_semantics = [#tpu.dimension_semantics<parallel>, #tpu.dimension_semantics<parallel>], iteration_bounds = array<i64: 1, 2>, scalar_prefetch = 0 : i64, scratch_operands = 0 : i64, tpu.core_type = #tpu.core_type<tc>, window_params = [{transform_indices = @transform_0, window_bounds = array<i64: 8, 8>}, {transform_indices = @transform_1, window_bounds = array<i64: 8, 128>}, {transform_indices = @transform_2, window_bounds = array<i64: 8, 128>}, {transform_indices = @transform_3, window_bounds = array<i64: 8, 128>}, {transform_indices = @transform_4, window_bounds = array<i64: 8, 128>}, {transform_indices = @transform_5, window_bounds = array<i64: 8, 128>}, {transform_indices = @transform_6, window_bounds = array<i64: 8, 128>}, {transform_indices = @transform_7, window_bounds = array<i64: 8, 128>}, {transform_indices = @transform_8, window_bounds = array<i64: 8, 128>}]} {
    %c0 = arith.constant 0 : index
    %c0_0 = arith.constant 0 : index
    %0 = vector.load %arg2[%c0, %c0_0] : memref<8x8xf32, #tpu.memory_space<vmem>>, vector<8x8xf32>
    %1 = vector.extract_strided_slice %0 {offsets = [0, 7], sizes = [8, 1], strides = [1, 1]} : vector<8x8xf32> to vector<8x1xf32>
    %c0_1 = arith.constant 0 : index
    %c0_2 = arith.constant 0 : index
    %2 = vector.load %arg3[%c0_1, %c0_2] : memref<8x128xf32, #tpu.memory_space<vmem>>, vector<8x128xf32>
    %3 = vector.extract_strided_slice %0 {offsets = [0, 0], sizes = [8, 1], strides = [1, 1]} : vector<8x8xf32> to vector<8x1xf32>
    %4 = vector.broadcast %3 : vector<8x1xf32> to vector<8x128xf32>
    %5 = arith.mulf %2, %4 : vector<8x128xf32>
    %6 = vector.broadcast %1 : vector<8x1xf32> to vector<8x128xf32>
    %7 = arith.addf %6, %5 : vector<8x128xf32>
    %c0_3 = arith.constant 0 : index
    %c0_4 = arith.constant 0 : index
    %8 = vector.load %arg4[%c0_3, %c0_4] : memref<8x128xf32, #tpu.memory_space<vmem>>, vector<8x128xf32>
    %9 = vector.extract_strided_slice %0 {offsets = [0, 1], sizes = [8, 1], strides = [1, 1]} : vector<8x8xf32> to vector<8x1xf32>
    %10 = vector.broadcast %9 : vector<8x1xf32> to vector<8x128xf32>
    %11 = arith.mulf %8, %10 : vector<8x128xf32>
    %12 = arith.addf %7, %11 : vector<8x128xf32>
    %c0_5 = arith.constant 0 : index
    %c0_6 = arith.constant 0 : index
    %13 = vector.load %arg5[%c0_5, %c0_6] : memref<8x128xf32, #tpu.memory_space<vmem>>, vector<8x128xf32>
    %14 = vector.extract_strided_slice %0 {offsets = [0, 2], sizes = [8, 1], strides = [1, 1]} : vector<8x8xf32> to vector<8x1xf32>
    %15 = vector.broadcast %14 : vector<8x1xf32> to vector<8x128xf32>
    %16 = arith.mulf %13, %15 : vector<8x128xf32>
    %17 = arith.addf %12, %16 : vector<8x128xf32>
    %c0_7 = arith.constant 0 : index
    %c0_8 = arith.constant 0 : index
    %18 = vector.load %arg6[%c0_7, %c0_8] : memref<8x128xf32, #tpu.memory_space<vmem>>, vector<8x128xf32>
    %19 = vector.extract_strided_slice %0 {offsets = [0, 3], sizes = [8, 1], strides = [1, 1]} : vector<8x8xf32> to vector<8x1xf32>
    %20 = vector.broadcast %19 : vector<8x1xf32> to vector<8x128xf32>
    %21 = arith.mulf %18, %20 : vector<8x128xf32>
    %22 = arith.addf %17, %21 : vector<8x128xf32>
    %c0_9 = arith.constant 0 : index
    %c0_10 = arith.constant 0 : index
    %23 = vector.load %arg7[%c0_9, %c0_10] : memref<8x128xf32, #tpu.memory_space<vmem>>, vector<8x128xf32>
    %24 = vector.extract_strided_slice %0 {offsets = [0, 4], sizes = [8, 1], strides = [1, 1]} : vector<8x8xf32> to vector<8x1xf32>
    %25 = vector.broadcast %24 : vector<8x1xf32> to vector<8x128xf32>
    %26 = arith.mulf %23, %25 : vector<8x128xf32>
    %27 = arith.addf %22, %26 : vector<8x128xf32>
    %c0_11 = arith.constant 0 : index
    %c0_12 = arith.constant 0 : index
    %28 = vector.load %arg8[%c0_11, %c0_12] : memref<8x128xf32, #tpu.memory_space<vmem>>, vector<8x128xf32>
    %29 = vector.extract_strided_slice %0 {offsets = [0, 5], sizes = [8, 1], strides = [1, 1]} : vector<8x8xf32> to vector<8x1xf32>
    %30 = vector.broadcast %29 : vector<8x1xf32> to vector<8x128xf32>
    %31 = arith.mulf %28, %30 : vector<8x128xf32>
    %32 = arith.addf %27, %31 : vector<8x128xf32>
    %c0_13 = arith.constant 0 : index
    %c0_14 = arith.constant 0 : index
    %33 = vector.load %arg9[%c0_13, %c0_14] : memref<8x128xf32, #tpu.memory_space<vmem>>, vector<8x128xf32>
    %34 = vector.extract_strided_slice %0 {offsets = [0, 6], sizes = [8, 1], strides = [1, 1]} : vector<8x8xf32> to vector<8x1xf32>
    %35 = vector.broadcast %34 : vector<8x1xf32> to vector<8x128xf32>
    %36 = arith.mulf %33, %35 : vector<8x128xf32>
    %37 = arith.addf %32, %36 : vector<8x128xf32>
    %c0_15 = arith.constant 0 : index
    %c0_16 = arith.constant 0 : index
    %38 = vector.load %arg10[%c0_15, %c0_16] : memref<8x128xf32, #tpu.memory_space<vmem>>, vector<8x128xf32>
    tpu.vector_store %arg10[%c0_15, %c0_16], %37 {strides = array<i32>} : memref<8x128xf32, #tpu.memory_space<vmem>>, vector<8x128xf32>,
    return
  }
  func.func @transform_0(%arg0: i32, %arg1: i32) -> (i32, i32) {
    %c0_i32 = arith.constant 0 : i32
    %c0_i32_0 = arith.constant 0 : i32
    return %arg0, %c0_i32 : i32, i32
  }
  func.func @transform_1(%arg0: i32, %arg1: i32) -> (i32, i32) {
    %c0_i32 = arith.constant 0 : i32
    return %arg0, %arg1 : i32, i32
  }
  func.func @transform_2(%arg0: i32, %arg1: i32) -> (i32, i32) {
    %c0_i32 = arith.constant 0 : i32
    return %arg0, %arg1 : i32, i32
  }
  func.func @transform_3(%arg0: i32, %arg1: i32) -> (i32, i32) {
    %c0_i32 = arith.constant 0 : i32
    return %arg0, %arg1 : i32, i32
  }
  func.func @transform_4(%arg0: i32, %arg1: i32) -> (i32, i32) {
    %c0_i32 = arith.constant 0 : i32
    return %arg0, %arg1 : i32, i32
  }
  func.func @transform_5(%arg0: i32, %arg1: i32) -> (i32, i32) {
    %c0_i32 = arith.constant 0 : i32
    return %arg0, %arg1 : i32, i32
  }
  func.func @transform_6(%arg0: i32, %arg1: i32) -> (i32, i32) {
    %c0_i32 = arith.constant 0 : i32
    return %arg0, %arg1 : i32, i32
  }
  func.func @transform_7(%arg0: i32, %arg1: i32) -> (i32, i32) {
    %c0_i32 = arith.constant 0 : i32
    return %arg0, %arg1 : i32, i32
  }
  func.func @transform_8(%arg0: i32, %arg1: i32) -> (i32, i32) {
    %c0_i32 = arith.constant 0 : i32
    return %arg0, %arg1 : i32, i32
  }
}

</mosaic_0001>

<bundles_post_ra>
// kernel: mul.109
= control target key start
LH: loop header
LB: loop body
LE: loop exit
PB: predicated region body
PF: predicated region fallthrough
CT: control target
= control target key end

     0   :  { %s34_s0 = inlined_call_operand.vmem [shape: f32[4,1], index: 0, kind: input, shape index: {}]   ;;  %s35_s1 = inlined_call_operand.vmem [shape: f32[4,1], index: 1, kind: input, shape index: {}]   ;;  %s36_s2 = inlined_call_operand.vmem [shape: f32[4,1], index: 2, kind: output, shape index: {}]  }
   0x1   :  { %v3_v0 = vld [vmem:[%s34_s0] sm:$0xf] }
   0x2   :  { %v4_v1 = vld [vmem:[%s35_s1] sm:$0xf] }
   0x3   :  { %v7_v2 = vmul.f32 %v4_v1, %v3_v0 }
   0x5   :  { %9 = vst [vmem:[%s36_s2] sm:$0xf] %v7_v2 }

// kernel: tile.71
= control target key start
LH: loop header
LB: loop body
LE: loop exit
PB: predicated region body
PF: predicated region fallthrough
CT: control target
= control target key end

     0   :  { %s22_s0 = inlined_call_operand.vmem [shape: f32[4], index: 0, kind: input, shape index: {}]   ;;  %s23_s1 = inlined_call_operand.vmem [shape: f32[2,4], index: 1, kind: output, shape index: {}]  }
   0x1   :  { %v4_v0 = vld [vmem:[%s22_s0] ss:$0 sm:$0xff] }
   0x2   :  { %5 = vst [vmem:[%s23_s1] sm:$0x3] %v4_v0 }

// kernel: tile.6
= control target key start
LH: loop header
LB: loop body
LE: loop exit
PB: predicated region body
PF: predicated region fallthrough
CT: control target
= control target key end

     0   :  { %s34_s8 = smov 125   ;;  %vm7_vm0 = vcmask 7168   ;;  %s35_s11 = smov 126   ;;  %s61_s0 = inlined_call_operand.vmem [shape: f32[2,4], index: 0, kind: input, shape index: {}]   ;;  %s62_s1 = inlined_call_operand.vmem [shape: f32[8,1], index: 1, kind: output, shape index: {}]  }
   0x1   :  { %v4_v0 = vld [vmem:[%s61_s0] sm:$0x3]  ;;  %s33_s0 = smov 127  }
   0x2   :  { %5 = vst [vmem:[#allocation0] sm:$0x3] %v4_v0 }
   0x9   :  { %v9_v1 = vld [vmem:[#allocation0] sm:$0x3]  }
   0xa   :  { %v21_v2 = vld [vmem:[#allocation0] sm:$0x3]   ;;  %10 = vrot.lane.b32.xlu0 %v9_v1, %s33_s0 }
   0xb   :  { %22 = vrot.lane.b32.xlu1 %v21_v2, %s34_s8  ;;  %v6_v3 = vld [vmem:[#allocation0] sm:$0x3]  }
   0xc   :  { %v15_v4 = vld [vmem:[#allocation0] sm:$0x3]   ;;  %8 = vst.msk [vmem:[%s62_s1] ss:$4 sm:$0x3] %vm7_vm0, %v6_v3  }
   0xe   :  { %16 = vrot.lane.b32.xlu0 %v15_v4, %s35_s11 }
  0x7c   :  { %v11_v5 = vpop.permute.xlu0 %10  }
  0x7d   :  { %v23_v6 = vpop.permute.xlu1 %22   ;;  %27 = vst.msk [vmem:[%s62_s1 + $0x1] ss:$4 sm:$0x3] %vm7_vm0, %v11_v5  }
  0x7e   :  { %29 = vst.msk [vmem:[%s62_s1 + $0x3] ss:$4 sm:$0x3] %vm7_vm0, %v23_v6  }
  0x80   :  { %v17_v7 = vpop.permute.xlu0 %16  }
  0x81   :  { %28 = vst.msk [vmem:[%s62_s1 + $0x2] ss:$4 sm:$0x3] %vm7_vm0, %v17_v7  }

// kernel: mixed_op_pallas.5
= control target key start
LH: loop header
LB: loop body
LE: loop exit
PB: predicated region body
PF: predicated region fallthrough
CT: control target
= control target key end

     0   :  { %s937_s27 = smov 0   ;;  %s939_s28 = smov 0   ;;  %s1005_s0 = inlined_call_operand.vmem [shape: f32[8,8], index: 0, kind: input, shape index: {}]   ;;  %s1006_s1 = inlined_call_operand.vmem [shape: f32[8,256], index: 1, kind: input, shape index: {}]   ;;  %s1007_s2 = inlined_call_operand.vmem [shape: f32[8,256], index: 2, kind: input, shape index: {}]   ;;  %s1008_s3 = inlined_call_operand.vmem [shape: f32[8,256], index: 3, kind: input, shape index: {}]   ;;  %s1009_s4 = inlined_call_operand.vmem [shape: f32[8,256], index: 4, kind: input, shape index: {}]   ;;  %s1010_s5 = inlined_call_operand.vmem [shape: f32[8,256], index: 5, kind: input, shape index: {}]   ;;  %s1011_s6 = inlined_call_operand.vmem [shape: f32[8,256], index: 6, kind: input, shape index: {}]   ;;  %s1012_s7 = inlined_call_operand.vmem [shape: f32[8,256], index: 7, kind: input, shape index: {}]   ;;  %s1013_s8 = inlined_call_operand.vmem [shape: f32[8,256], index: 8, kind: output, shape index: {}]  }
   0x1   :  { %s941_s29 = smov 0  }
   0x2 LB: > { %s27_s30 = sadd.s32 1, %s878_s28  ;;  %p808_p0 = scmp.ge.s32.totalorder %s882_s29, 1  ;;  %s882_s29 = sphi %s941_s29, %s18_s29   ;;  %s878_s28 = sphi %s939_s28, %s1015_s28   ;;  %s874_s27 = sphi %s937_s27, %s1014_s27  }
   0x3   : > { %p28_p1 = scmp.ge.s32.totalorder %s27_s30, 2  ;;  %p380_p2 = scmp.lt.s32.totalorder %s882_s29, 3 }
   0x5   : > { %s1017_s30 = smov (%p28_p1, %s27_s30), 0  ;;  %p381_p3 = pnand %p808_p0, %p380_p2 }
   0x6   : > { %v540_v0 = vld [vmem:[%s1005_s0] sm:$0xff] (!%p381_p3)  ;;  %v884_v1 = vmov (!%p381_p3), 1   ;;  %v885_v2 = vmov (!%p381_p3), 0   ;;  %v886_v3 = vmov (!%p381_p3), 2   ;;  %v887_v4 = vmov (!%p381_p3), 7   ;;  %p478_p4 = scmp.lt.s32.totalorder (!%p381_p3), %s874_s27, 1 }
   0x7   : > { %384 = sbr.rel (%p381_p3) target bundleno = 161 (0xa1), region = 52  ;;  %853 = vset.pattern.permute.xlu1 (!%p381_p3), %v884_v1  ;;  %851 = vset.pattern.permute.xlu0 (!%p381_p3), %v885_v2  ;;  %v888_v5 = vmov (!%p381_p3), 3   ;;  %v889_v6 = vmov (!%p381_p3), 4   ;;  %v890_v7 = vmov (!%p381_p3), 5   ;;  %v891_v8 = vmov (!%p381_p3), 6  }
   0x8   : > { %555 = vperm.xlu1 (!%p381_p3), %853, %v540_v0   ;;  %544 = vperm.xlu0 (!%p381_p3), %851, %v540_v0  }
   0xc   : > { %854 = vset.pattern.permute.xlu1 (!%p381_p3), %v886_v3  ;;  %852 = vset.pattern.permute.xlu0 (!%p381_p3), %v887_v4 }
   0xd   : > { %562 = vperm.xlu1 (!%p381_p3), %854, %v540_v0   ;;  %549 = vperm.xlu0 (!%p381_p3), %852, %v540_v0  }
   0xe   : > { %s1019_s27 = smov (!%p478_p4, %s874_s27), 1 }
   0xf   : > { %s962_s11 = sshll.u32 %s1019_s27, 3 }
  0x10   : > { %s483_s14 = scalar_lea.vmem %s1006_s1, %s962_s11  ;;  %s491_s17 = scalar_lea.vmem %s1007_s2, %s962_s11 }
  0x11   : > { %855 = vset.pattern.permute.xlu1 %v888_v5  ;;  %856 = vset.pattern.permute.xlu0 %v889_v6  ;;  %v541_v9 = vld [vmem:[%s483_s14] sm:$0xff]  ;;  %s499_s20 = scalar_lea.vmem %s1008_s3, %s962_s11  ;;  %s507_s23 = scalar_lea.vmem %s1009_s4, %s962_s11 }
  0x12   : > { %569 = vperm.xlu1 %855, %v540_v0   ;;  %576 = vperm.xlu0 %856, %v540_v0   ;;  %v553_v13 = vld [vmem:[%s491_s17] sm:$0xff]  ;;  %s515_s26 = scalar_lea.vmem %s1010_s5, %s962_s11  ;;  %s523_s10 = scalar_lea.vmem %s1011_s6, %s962_s11 }
  0x13   : > { %v560_v15 = vld [vmem:[%s499_s20] sm:$0xff]  ;;  %s531_s14 = scalar_lea.vmem %s1012_s7, %s962_s11  ;;  %s539_s17 = scalar_lea.vmem %s1013_s8, %s962_s11 }
  0x14   : > { %v567_v21 = vld [vmem:[%s507_s23] sm:$0xff] }
  0x15   : > { %v574_v25 = vld [vmem:[%s515_s26] sm:$0xff] }
  0x16   : > { %857 = vset.pattern.permute.xlu1 %v890_v7  ;;  %859 = vset.pattern.permute.xlu0 %v891_v8  ;;  %v581_v29 = vld [vmem:[%s523_s10] sm:$0xff] }
  0x17   : > { %583 = vperm.xlu1 %857, %v540_v0   ;;  %v588_v33 = vld [vmem:[%s531_s14] sm:$0xff] }
  0x1b   : > { %858 = vset.pattern.permute.xlu1 %v891_v8 }
  0x1c   : > { %590 = vperm.xlu1 %858, %v540_v0  }
  0x87   : > { %v556_v10 = vpop.permute.xlu1 %555  ;;  %v545_v11 = vpop.permute.xlu0 %544 }
  0x88   : > { %v547_v12 = vmul.f32 %v545_v11, %v541_v9  ;;  %v558_v17 = vmul.f32 %v556_v10, %v553_v13 }
  0x8c   : > { %v563_v14 = vpop.permute.xlu1 %562  ;;  %v550_v16 = vpop.permute.xlu0 %549 }
  0x8d   : > { %v552_v18 = vadd.f32 %v550_v16, %v547_v12  ;;  %v565_v19 = vmul.f32 %v563_v14, %v560_v15 }
  0x8f   : > { %v559_v20 = vadd.f32 %v558_v17, %v552_v18 }
  0x91   : > { %v570_v22 = vpop.permute.xlu1 %569  ;;  %v566_v23 = vadd.f32 %v565_v19, %v559_v20  ;;  %v577_v24 = vpop.permute.xlu0 %576 }
  0x92   : > { %v572_v26 = vmul.f32 %v570_v22, %v567_v21  ;;  %v579_v28 = vmul.f32 %v577_v24, %v574_v25 }
  0x94   : > { %v573_v27 = vadd.f32 %v572_v26, %v566_v23 }
  0x96   : > { %v584_v30 = vpop.permute.xlu1 %583  ;;  %v580_v31 = vadd.f32 %v579_v28, %v573_v27 }
  0x97   : > { %v586_v32 = vmul.f32 %v584_v30, %v581_v29 }
  0x99   : > { %v587_v35 = vadd.f32 %v586_v32, %v580_v31 }
  0x9b   : > { %v591_v34 = vpop.permute.xlu1 %590 }
  0x9c   : > { %v593_v36 = vmul.f32 %v591_v34, %v588_v33 }
  0x9e   : > { %v594_v37 = vadd.f32 %v593_v36, %v587_v35 }
  0xa0   : > { %595 = vst [vmem:[%s539_s17] sm:$0xff] %v594_v37 }
  0xa1 PF: > { %s18_s29 = sadd.s32 1, %s882_s29   ;;  %s1014_s27 = smov %s878_s28 }
  0xa2   : > { %p15_p5 = scmp.ge.s32.totalorder %s18_s29, 4   ;;  %s1015_s28 = smov %s1017_s30 }
  0xa4   :  { %17 = sbr.rel (!%p15_p5) target bundleno = 2 (0x2), region = 103 }

// kernel: mixed_op_pallas.4
= control target key start
LH: loop header
LB: loop body
LE: loop exit
PB: predicated region body
PF: predicated region fallthrough
CT: control target
= control target key end

     0   :  { %s2501_s17 = smov 0   ;;  %s3715_s0 = inlined_call_operand.vmem [shape: s32[2,256], index: 0, kind: input, shape index: {}]   ;;  %s3716_s1 = inlined_call_operand.vmem [shape: f32[2,4,256], index: 1, kind: input, shape index: {}]   ;;  %s3717_s2 = inlined_call_operand.vmem [shape: f32[2,4,256], index: 2, kind: input, shape index: {}]   ;;  %s3718_s3 = inlined_call_operand.vmem [shape: f32[4,9], index: 3, kind: input, shape index: {}]   ;;  %s3719_s4 = inlined_call_operand.vmem [shape: f32[4,4], index: 4, kind: input, shape index: {}]   ;;  %s3720_s5 = inlined_call_operand.vmem [shape: f32[4,25], index: 5, kind: input, shape index: {}]   ;;  %s3721_s6 = inlined_call_operand.vmem [shape: f32[4,4], index: 6, kind: input, shape index: {}]   ;;  %s3722_s7 = inlined_call_operand.vmem [shape: f32[4,2], index: 7, kind: input, shape index: {}]   ;;  %s3723_s8 = inlined_call_operand.vmem [shape: f32[4,2], index: 8, kind: input, shape index: {}]   ;;  %s3724_s9 = inlined_call_operand.vmem [shape: f32[2,4,256], index: 9, kind: output, shape index: {0}]   ;;  %s3725_s10 = inlined_call_operand.vmem [shape: f32[2,4,256], index: 10, kind: output, shape index: {1}]   ;;  %s3726_s11 = inlined_call_operand.vmem [shape: f32[2,4,4,1], index: 11, kind: output, shape index: {2}]  }
   0x1 LB: > { %s2236_s18 = sadd.s32 4294967295, %s2388_s17   ;;  %p2240_p0 = scmp.ge.s32.totalorder %s2388_s17, 1  ;;  %s2388_s17 = sphi %s2501_s17, %s22_s17  }
   0x2   : > { %p352_p1 = scmp.lt.s32.totalorder %s2388_s17, 3 }
   0x4   : > { %p353_p2 = pnand %p2240_p0, %p352_p1 }
   0x6   : > { %356 = sbr.rel (%p353_p2) target bundleno = 911 (0x38f), region = 56 }
   0xd   : > { %v971_v0 = vld [vmem:[%s3723_s8] sm:$0xf]  ;;  %v2390_v2 = vmov 1   ;;  %v3727_v3 = vmov 0   ;;  %v2392_v6 = vmov 0.0   ;;  %v2393_v8 = vmov 4  }
   0xe   : > { %v436_v1 = vld [vmem:[%s3722_s7] sm:$0xf]  ;;  %2330 = vset.pattern.permute.xlu0 %v2390_v2  ;;  %2331 = vset.pattern.permute.xlu1 %v3727_v3  ;;  %434 = vst [vmem:[#allocation2 + $0xc] sm:$0xf] %v2392_v6  ;;  %433 = vst [vmem:[#allocation2] sm:$0xf] %v2392_v6  ;;  %v444_v55 = vlaneseq }
   0xf   : > { %974 = vperm.xlu1 %2331, %v971_v0   ;;  %451 = vperm.xlu0 %2330, %v436_v1   ;;  %v1088_v4 = vld [vmem:[%s3720_s5] sm:$0xf]  ;;  %v2394_v11 = vmov 12   ;;  %v2395_v12 = vmov 2   ;;  %v2396_v15 = vmov 13   ;;  %v2397_v16 = vmov 5  }
  0x10   : > { %v1235_v5 = vld [vmem:[%s3720_s5] sm:$0xf]  ;;  %942 = vmatprep.mubr.f32.mxu0 %v2392_v6  ;;  %2075 = vmatprep.mubr.f32.mxu1 %v2392_v6  ;;  %v2398_v19 = vmov 15   ;;  %v2399_v20 = vmov 6   ;;  %v2400_v22 = vmov 7   ;;  %v2401_v25 = vmov 8  }
  0x11   : > { %v1042_v7 = vld [vmem:[%s3720_s5] sm:$0xf]  ;;  %v2402_v28 = vmov 17   ;;  %v2403_v29 = vmov 9   ;;  %v2404_v32 = vmov 10   ;;  %v2405_v34 = vmov 18  }
  0x12   : > { %v1485_v9 = vld [vmem:[%s3720_s5] sm:$0xf]  ;;  %v2406_v35 = vmov 11   ;;  %v2407_v39 = vmov 14   ;;  %s2408_s25 = smov 127   ;;  %v2409_v41 = vmov 16  }
  0x13   : > { %2332 = vset.pattern.permute.xlu1 %v2390_v2  ;;  %1091 = vperm.xlu0 %2330, %v1088_v4   ;;  %v1134_v10 = vld [vmem:[%s3720_s5] sm:$0xf]  ;;  %s2410_s28 = smov 126   ;;  %s2411_s12 = smov 114   ;;  %v2412_v49 = vmov 3   ;;  %v2610_v57 = vshrl.u32 %v444_v55, 7 }
  0x14   : > { %986 = vperm.xlu1 %2332, %v971_v0   ;;  %v1530_v13 = vld [vmem:[%s3720_s5] sm:$0xf]  ;;  %p407_p3 = scmp.lt.s32.totalorder %s2236_s18, 1  ;;  %v2413_v53 = vmov 839922192   ;;  %v2414_v59 = vmov 19  }
  0x15   : > { %v1283_v14 = vld [vmem:[%s3720_s5] sm:$0xf]  ;;  %v679_v37 = vld [vmem:[#allocation2 + $0xc] sm:$0xf]  ;;  %v442_v54 = vunpack.c.l.s4 %v2413_v53  ;;  %s2415_s24 = smov 34   ;;  %s2416_s26 = smov 33  }
  0x16   : > { %v1624_v17 = vld [vmem:[%s3720_s5] sm:$0xf]  ;;  %v1514_v38 = vld [vmem:[#allocation2 + $0xc] sm:$0xf]  ;;  %s3890_s18 = smov (!%p407_p3, %s2236_s18), 1  ;;  %s2417_s27 = smov 32  }
  0x17   : > { %2335 = vset.pattern.permute.xlu0 %v2393_v8  ;;  %v1310_v18 = vld [vmem:[%s3720_s5] sm:$0xf]  ;;  %v2348_v40 = vpack.i.bf16 %v679_v37, %v1514_v38  ;;  %v1541_v43 = vld [vmem:[#allocation2 + $0xc] sm:$0xf]  ;;  %v443_v56 = vunpack.c.0.s8 %v442_v54  ;;  %s2615_s15 = sshll.u32 %s3890_s18, 3  ;;  %s2418_s29 = smov 31  }
  0x18   : > { %2333 = vset.pattern.permute.xlu1 %v3727_v3  ;;  %1238 = vperm.xlu0 %2335, %v1235_v5   ;;  %v1337_v21 = vld [vmem:[%s3720_s5] sm:$0xf]  ;;  %v1587_v45 = vld [vmem:[#allocation2 + $0xc] sm:$0xf]  ;;  %s411_s20 = scalar_lea.vmem %s3716_s1, %s2615_s15  ;;  %s416_s23 = scalar_lea.vmem %s3717_s2, %s2615_s15  ;;  %vm1175_vm7 = vcmask 252928   ;;  %vm1081_vm9 = vcmask 269312  }
  0x19   : > { %1045 = vperm.xlu1 %2333, %v1042_v7   ;;  %v507_v23 = vld [vmem:[%s3718_s3] sm:$0xf]  ;;  %v2622_v60 = vsub.s32 %v443_v56, %v2610_v57  ;;  %s2419_s30 = smov 30   ;;  %s2420_s13 = smov 18   ;;  %v725_v54 = vld [vmem:[#allocation2 + $0xc] sm:$0xf] }
  0x1a   : > { %v1364_v24 = vld [vmem:[%s3720_s5] sm:$0xf]  ;;  %s2421_s14 = smov 17   ;;  %s2422_s16 = smov 16   ;;  %v1635_v55 = vld [vmem:[#allocation2 + $0xc] sm:$0xf] }
  0x1b   : > { %v1678_v26 = vld [vmem:[%s3720_s5] sm:$0xf]  ;;  %3775 = vst [vmem:[#allocation6_spill] sm:$0xff] %v2622_v60  ;;  %s2423_s19 = smov 15   ;;  %s2425_s21 = smov 2   ;;  %vm1228_vm10 = vcmask 244736  }
  0x1c   : > { %2342 = vset.pattern.permute.xlu0 %v2394_v11  ;;  %v1412_v27 = vld [vmem:[%s3720_s5] sm:$0xf]  ;;  %s2426_s22 = smov 1   ;;  %vm1276_vm13 = vcmask 146432   ;;  %vm1035_vm14 = vcmask 277504  }
  0x1d   : > { %2334 = vset.pattern.permute.xlu1 %v2395_v12  ;;  %1497 = vperm.xlu0 %2342, %v1485_v9   ;;  %v604_v30 = vld [vmem:[%s3718_s3] sm:$0xf] }
  0x1e   : > { %1137 = vperm.xlu1 %2334, %v1134_v10   ;;  %v1458_v31 = vld [vmem:[%s3720_s5] sm:$0xf] }
  0x1f   : > { %v1705_v33 = vld [vmem:[%s3720_s5] sm:$0xf] }
  0x20   : > { %v1576_v36 = vld [vmem:[%s3720_s5] sm:$0xf] }
  0x21   : > { %2344 = vset.pattern.permute.xlu0 %v2396_v15  ;;  %v1651_v42 = vld [vmem:[%s3720_s5] sm:$0xf] }
  0x22   : > { %2336 = vset.pattern.permute.xlu1 %v2397_v16  ;;  %1533 = vperm.xlu0 %2344, %v1530_v13   ;;  %v551_v44 = vld [vmem:[%s3718_s3] sm:$0xf] }
  0x23   : > { %1286 = vperm.xlu1 %2336, %v1283_v14   ;;  %v2593_v46 = vld [vmem:[%s3718_s3] sm:$0xf] }
  0x24   : > { %v435_v63 = vld [vmem:[%s411_s20] sm:$0xff]  ;;  %s2424_s20 = smov 14  }
  0x25   : > { %v970_v5 = vld [vmem:[%s416_s23] sm:$0xff]  ;;  %s2433_s23 = smov 98  }
  0x26   : > { %2346 = vset.pattern.permute.xlu0 %v2398_v19 }
  0x27   : > { %2337 = vset.pattern.permute.xlu1 %v2399_v20  ;;  %1627 = vperm.xlu0 %2346, %v1624_v17  }
  0x28   : > { %1313 = vperm.xlu1 %2337, %v1310_v18  }
  0x2b   : > { %2347 = vset.pattern.permute.xlu0 %v3727_v3 }
  0x2c   : > { %2338 = vset.pattern.permute.xlu1 %v2400_v22  ;;  %439 = vperm.xlu0 %2347, %v436_v1  }
  0x2d   : > { %1340 = vperm.xlu1 %2338, %v1337_v21  }
  0x30   : > { %510 = vperm.xlu0 %2347, %v507_v23  }
  0x31   : > { %2339 = vset.pattern.permute.xlu1 %v2401_v25 }
  0x32   : > { %1367 = vperm.xlu1 %2339, %v1364_v24  }
  0x34   : > { %2355 = vset.pattern.permute.xlu0 %v2402_v28 }
  0x35   : > { %1681 = vperm.xlu0 %2355, %v1678_v26  }
  0x36   : > { %2340 = vset.pattern.permute.xlu1 %v2403_v29 }
  0x37   : > { %1415 = vperm.xlu1 %2340, %v1412_v27  }
  0x39   : > { %2356 = vset.pattern.permute.xlu0 %v2395_v12 }
  0x3a   : > { %607 = vperm.xlu0 %2356, %v604_v30  }
  0x3b   : > { %2341 = vset.pattern.permute.xlu1 %v2404_v32 }
  0x3c   : > { %1461 = vperm.xlu1 %2341, %v1458_v31  }
  0x3e   : > { %2358 = vset.pattern.permute.xlu0 %v2405_v34 }
  0x3f   : > { %1708 = vperm.xlu0 %2358, %v1705_v33  }
  0x40   : > { %2343 = vset.pattern.permute.xlu1 %v2406_v35 }
  0x41   : > { %1488 = vperm.xlu1 %2343, %v1485_v9  }
  0x43   : > { %2359 = vset.pattern.permute.xlu0 %v2412_v49  ;;  %v1182_v49 = vld [vmem:[%s3720_s5] sm:$0xf] }
  0x45   : > { %2345 = vset.pattern.permute.xlu1 %v2407_v39 }
  0x46   : > { %1579 = vperm.xlu1 %2345, %v1576_v36  }
  0x4a   : > { %2349 = vrot.lane.b32.xlu1 %v2348_v40, %s2408_s25 }
  0x4b   : > { %2353 = vset.pattern.permute.xlu1 %v2409_v41 }
  0x4e   : > { %1654 = vperm.xlu1 %2353, %v1651_v42  }
  0x52   : > { %1567 = vrot.lane.b32.xlu1 %v1541_v43, %s2410_s28 }
  0x53   : > { %2354 = vset.pattern.permute.xlu1 %v2390_v2 }
  0x56   : > { %554 = vperm.xlu1 %2354, %v551_v44  }
  0x5a   : > { %1615 = vrot.lane.b32.xlu1 %v1587_v45, %s2411_s12 }
  0x5b   : > { %2357 = vset.pattern.permute.xlu1 %v2393_v8 }
  0x5e   : > { %662 = vperm.xlu1 %2357, %v2593_v46  }
  0x62   : > { %2365 = vset.pattern.permute.xlu1 %v2414_v59 }
  0x8e   : > { %v452_v47 = vpop.permute.xlu0 %451  ;;  %v975_v61 = vpop.permute.xlu1 %974 }
  0x8f   : > { %v459_v1 = vrot.slane %v452_v47, %v2622_v60  ;;  %v982_v4 = vrot.slane %v975_v61, %v2622_v60  ;;  %v2360_v61 = vpack.i.bf16 %v725_v54, %v1635_v55 }
  0x91   : > { %v984_v9 = vmul.f32 %v982_v4, %v970_v5  ;;  %v773_v4 = vld [vmem:[#allocation2 + $0xc] sm:$0xf] }
  0x92   : > { %v2596_v48 = vpop.permute.xlu0 %1091  ;;  %v1662_v5 = vld [vmem:[#allocation2 + $0xc] sm:$0xf] }
  0x93   : > { %v987_v6 = vpop.permute.xlu1 %986 }
  0x94   : > { %v994_v10 = vrot.slane %v987_v6, %v2622_v60  ;;  %v2429_v6 = vmov 20  }
  0x96   : > { %v996_v11 = vadd.f32 %v994_v10, %v984_v9  ;;  %v2366_v9 = vpack.i.bf16 %v773_v4, %v1662_v5  ;;  %v762_v4 = vld [vmem:[%s3718_s3] sm:$0xf]  ;;  %v1812_v5 = vld [vmem:[#allocation2 + $0xc] sm:$0xf] }
  0x97   : > { %v2598_v50 = vpop.permute.xlu0 %1238 }
  0x98   : > { %3772 = vst [vmem:[#allocation3_spill] sm:$0xff] %v2598_v50  ;;  %v2635_v12 = vmax.f32 %v996_v11, 0.0  ;;  %v2658_v28 = vpop.permute.xlu1 %1045 }
  0x9a   : > { %v2708_v47 = vcombine.high %v2635_v12, %v2635_v12 }
  0x9c   : > { %v2600_v51 = vpop.permute.xlu0 %1497 }
  0x9d   : > { %v2664_v30 = vpop.permute.xlu1 %1137 }
  0xa1   : > { %v2604_v52 = vpop.permute.xlu0 %1533 }
  0xa2   : > { %3773 = vst [vmem:[#allocation4_spill] sm:$0xff] %v2604_v52  ;;  %v2668_v33 = vpop.permute.xlu1 %1286 }
  0xa3   : > { %3777 = vst [vmem:[#allocation8_spill] sm:$0xff] %v2668_v33 }
  0xa6   : > { %v2612_v58 = vpop.permute.xlu0 %1627 }
  0xa7   : > { %3774 = vst [vmem:[#allocation5_spill] sm:$0xff] %v2612_v58  ;;  %v2673_v36 = vpop.permute.xlu1 %1313  ;;  %v1943_v58 = vld [vmem:[%s3720_s5] sm:$0xf] }
  0xa8   : > { %3778 = vst [vmem:[#allocation9_spill] sm:$0xff] %v2673_v36 }
  0xab   : > { %v440_v62 = vpop.permute.xlu0 %439 }
  0xac   : > { %v447_v0 = vrot.slane %v440_v62, %v2622_v60  ;;  %v2677_v38 = vpop.permute.xlu1 %1340 }
  0xad   : > { %3779 = vst [vmem:[#allocation10_spill] sm:$0xff] %v2677_v38 }
  0xae   : > { %v449_v2 = vmul.f32 %v447_v0, %v435_v63 }
  0xb0   : > { %v461_v7 = vadd.f32 %v459_v1, %v449_v2 }
  0xb1   : > { %v2683_v41 = vpop.permute.xlu1 %1367 }
  0xb2   : > { %v2631_v8 = vmax.f32 %v461_v7, 0.0  ;;  %3780 = vst [vmem:[#allocation11_spill] sm:$0xff] %v2683_v41 }
  0xb4   : > { %3776 = vst [vmem:[#allocation7_spill] sm:$0xff] %v2631_v8  ;;  %463 = vst [vmem:[#allocation2 + $0x4] sm:$0xff] %v2631_v8 }
  0xb6   : > { %v2688_v42 = vpop.permute.xlu1 %1415 }
  0xb7   : > { %3781 = vst [vmem:[#allocation12_spill] sm:$0xff] %v2688_v42 }
  0xbb   : > { %v2637_v13 = vld [vmem:[#allocation2] sm:$0xff]  ;;  %v2639_v14 = vld [vmem:[#allocation2 + $0x8] sm:$0xf]  ;;  %v2695_v43 = vpop.permute.xlu1 %1461 }
  0xbc   : > { %v2641_v15 = vld [vmem:[#allocation2 + $0x8] sm:$0xf]  ;;  %3782 = vst [vmem:[#allocation13_spill] sm:$0xff] %v2695_v43  ;;  %v493_v59 = vcombine.high %v2637_v13, %v2637_v13 }
  0xbd   : > { %v2643_v17 = vld [vmem:[#allocation2 + $0x8] sm:$0xf] }
  0xbe   : > { %v2645_v18 = vld [vmem:[#allocation2 + $0x8] sm:$0xf] }
  0xbf   : > { %998 = vst [vmem:[#allocation2 + $0x4] sm:$0xff] %v2635_v12 }
  0xc0   : > { %v2699_v44 = vpop.permute.xlu1 %1488 }
  0xc1   : > { %3783 = vst [vmem:[#allocation14_spill] sm:$0xff] %v2699_v44 }
  0xc5   : > { %v2704_v45 = vpop.permute.xlu1 %1579 }
  0xc6   : > { %v1000_v19 = vld [vmem:[#allocation2 + $0x8] sm:$0xf]  ;;  %v999_v21 = vld [vmem:[#allocation2] sm:$0xff]  ;;  %3784 = vst [vmem:[#allocation15_spill] sm:$0xff] %v2704_v45 }
  0xc7   : > { %1033 = vrot.lane.b32.xlu1 %v1000_v19, %s2415_s24  ;;  %1029 = vrot.lane.b32.xlu0 %v999_v21, %s2415_s24  ;;  %v1051_v23 = vld [vmem:[#allocation2 + $0x8] sm:$0xf]  ;;  %v1028_v39 = vcombine.high %v999_v21, %v999_v21 }
  0xc8   : > { %v1099_v24 = vld [vmem:[#allocation2 + $0x8] sm:$0xf] }
  0xc9   : > { %v1145_v26 = vld [vmem:[#allocation2 + $0x8] sm:$0xf]  ;;  %v2716_v53 = vpop.permute.xlu1 %2349 }
  0xca   : > { %v1193_v27 = vld [vmem:[#allocation2 + $0x8] sm:$0xf] }
  0xcb   : > { %1079 = vrot.lane.b32.xlu1 %v1051_v23, %s2416_s26  ;;  %1121 = vrot.lane.b32.xlu0 %v999_v21, %s2417_s27  ;;  %v1246_v29 = vld [vmem:[#allocation2 + $0x8] sm:$0xf] }
  0xcc   : > { %v1294_v31 = vld [vmem:[#allocation2 + $0x8] sm:$0xf] }
  0xcd   : > { %v1321_v32 = vld [vmem:[#allocation2 + $0x8] sm:$0xf]  ;;  %v2723_v56 = vpop.permute.xlu1 %1654 }
  0xce   : > { %v1348_v34 = vld [vmem:[#allocation2 + $0x8] sm:$0xf]  ;;  %3785 = vst [vmem:[#allocation16_spill] sm:$0xff] %v2723_v56 }
  0xcf   : > { %1075 = vrot.lane.b32.xlu1 %v999_v21, %s2416_s26  ;;  %1169 = vrot.lane.b32.xlu0 %v999_v21, %s2418_s29  ;;  %v1423_v35 = vld [vmem:[#allocation2 + $0x8] sm:$0xf] }
  0xd0   : > { %v1375_v37 = vld [vmem:[#allocation2 + $0x8] sm:$0xf] }
  0xd1   : > { %v1469_v40 = vld [vmem:[#allocation2 + $0x8] sm:$0xf]  ;;  %v2733_v62 = vpop.permute.xlu1 %1567 }
  0xd2   : > { %3787 = vst [vmem:[#allocation18_spill] sm:$0xff] %v2733_v62 }
  0xd3   : > { %1125 = vrot.lane.b32.xlu1 %v1099_v24, %s2417_s27  ;;  %1222 = vrot.lane.b32.xlu0 %v999_v21, %s2419_s30 }
  0xd5   : > { %v2746_v0 = vpop.permute.xlu1 %554 }
  0xd6   : > { %3789 = vst [vmem:[#allocation20_spill] sm:$0xff] %v2746_v0  ;;  %v2437_v0 = vmov 24  }
  0xd7   : > { %1173 = vrot.lane.b32.xlu1 %v1145_v26, %s2418_s29  ;;  %1270 = vrot.lane.b32.xlu0 %v999_v21, %s2420_s13  ;;  %v1689_v26 = vld [vmem:[#allocation2 + $0xc] sm:$0xf] }
  0xd9   : > { %v2752_v2 = vpop.permute.xlu1 %1615 }
  0xda   : > { %3791 = vst [vmem:[#allocation22_spill] sm:$0xff] %v2752_v2 }
  0xdb   : > { %1226 = vrot.lane.b32.xlu1 %v1193_v27, %s2419_s30  ;;  %1298 = vrot.lane.b32.xlu0 %v999_v21, %s2421_s14 }
  0xdd   : > { %v2763_v10 = vpop.permute.xlu1 %662 }
  0xde   : > { %3793 = vst [vmem:[#allocation24_spill] sm:$0xff] %v2763_v10 }
  0xdf   : > { %1274 = vrot.lane.b32.xlu1 %v1246_v29, %s2420_s13  ;;  %1325 = vrot.lane.b32.xlu0 %v999_v21, %s2422_s16 }
  0xe3   : > { %1302 = vrot.lane.b32.xlu1 %v1294_v31, %s2421_s14  ;;  %1352 = vrot.lane.b32.xlu0 %v999_v21, %s2423_s19  ;;  %v714_v31 = vld [vmem:[%s3718_s3] sm:$0xf] }
  0xe7   : > { %1329 = vrot.lane.b32.xlu1 %v1321_v32, %s2422_s16  ;;  %1399 = vrot.lane.b32.xlu0 %v999_v21, %s2424_s20 }
  0xeb   : > { %1356 = vrot.lane.b32.xlu1 %v1348_v34, %s2423_s19  ;;  %1449 = vrot.lane.b32.xlu0 %v1423_v35, %s2425_s21  ;;  %v1849_v35 = vld [vmem:[%s3720_s5] sm:$0xf] }
  0xef   : > { %1403 = vrot.lane.b32.xlu1 %v1375_v37, %s2424_s20  ;;  %1473 = vrot.lane.b32.xlu0 %v999_v21, %s2426_s22  ;;  %v2432_v37 = vmov 21  }
  0xf3   : > { %1445 = vrot.lane.b32.xlu1 %v999_v21, %s2425_s21  ;;  %1518 = vrot.lane.b32.xlu0 %v2635_v12, %s2408_s25 }
  0xf7   : > { %1477 = vrot.lane.b32.xlu1 %v1469_v40, %s2426_s22  ;;  %1077 = vrot.lane.b32.xlu0 %v1028_v39, %s2416_s26  ;;  %s2270_s26 = sshll.u32 %s3890_s18, 4 }
  0xfb   : > { %1563 = vrot.lane.b32.xlu1 %v2635_v12, %s2410_s28  ;;  %1171 = vrot.lane.b32.xlu0 %v1028_v39, %s2418_s29  ;;  %s2430_s29 = smov 111  }
  0xff   : > { %1611 = vrot.lane.b32.xlu1 %v2635_v12, %s2411_s12  ;;  %1224 = vrot.lane.b32.xlu0 %v1028_v39, %s2419_s30 }
 0x103   : > { %1272 = vrot.lane.b32.xlu0 %v1028_v39, %s2420_s13  ;;  %1031 = vrot.lane.b32.xlu1 %v1028_v39, %s2415_s24  ;;  %s426_s24 = scalar_lea.vmem %s3725_s10, %s2615_s15 }
 0x107   : > { %1300 = vrot.lane.b32.xlu0 %v1028_v39, %s2421_s14  ;;  %1123 = vrot.lane.b32.xlu1 %v1028_v39, %s2417_s27  ;;  %s2438_s27 = smov 96  }
 0x10b   : > { %1327 = vrot.lane.b32.xlu0 %v1028_v39, %s2422_s16  ;;  %1354 = vrot.lane.b32.xlu1 %v1028_v39, %s2423_s19 }
 0x10f   : > { %1401 = vrot.lane.b32.xlu0 %v1028_v39, %s2424_s20  ;;  %1447 = vrot.lane.b32.xlu1 %v1028_v39, %s2425_s21  ;;  %s2434_s20 = smov 97  }
 0x113   : > { %1565 = vrot.lane.b32.xlu0 %v2708_v47, %s2410_s28  ;;  %1475 = vrot.lane.b32.xlu1 %v1028_v39, %s2426_s22  ;;  %s2427_s28 = smov 113  }
 0x117   : > { %1185 = vperm.xlu0 %2359, %v1182_v49   ;;  %1520 = vrot.lane.b32.xlu1 %v2708_v47, %s2408_s25  ;;  %v808_v49 = vld [vmem:[%s3718_s3] sm:$0xf] }
 0x11b   : > { %653 = vperm.xlu0 %2359, %v2593_v46   ;;  %1613 = vrot.lane.b32.xlu1 %v2708_v47, %s2411_s12  ;;  %v2731_v46 = vpop.permute.xlu0 %510  ;;  %s2428_s12 = smov 112  }
 0x11c   : > { %3786 = vst [vmem:[#allocation17_spill] sm:$0xff] %v2731_v46 }
 0x11f   : > { %1641 = vrot.lane.b32.xlu1 %v2708_v47, %s2427_s28  ;;  %496 = vrot.lane.b32.xlu0 %v493_v59, %s2421_s14  ;;  %v2741_v63 = vpop.permute.xlu0 %1681 }
 0x120   : > { %2376 = vset.pattern.permute.xlu0 %v2400_v22  ;;  %3788 = vst [vmem:[#allocation19_spill] sm:$0xff] %v2741_v63  ;;  %v1753_v22 = vld [vmem:[%s3720_s5] sm:$0xf] }
 0x123   : > { %2361 = vrot.lane.b32.xlu1 %v2360_v61, %s2427_s28  ;;  %540 = vrot.lane.b32.xlu0 %v493_v59, %s2422_s16  ;;  %v2750_v1 = vpop.permute.xlu0 %607 }
 0x124   : > { %3790 = vst [vmem:[#allocation21_spill] sm:$0xff] %v2750_v1  ;;  %v2436_v1 = vmov 23  }
 0x127   : > { %1639 = vrot.lane.b32.xlu1 %v2635_v12, %s2427_s28  ;;  %1668 = vrot.lane.b32.xlu0 %v2708_v47, %s2428_s12  ;;  %v2761_v7 = vpop.permute.xlu0 %1708 }
 0x128   : > { %3792 = vst [vmem:[#allocation23_spill] sm:$0xff] %v2761_v7 }
 0x12b   : > { %1756 = vperm.xlu1 %2365, %v1753_v22   ;;  %494 = vrot.lane.b32.xlu0 %v2637_v13, %s2421_s14 }
 0x12f   : > { %498 = vrot.lane.b32.xlu1 %v2639_v14, %s2421_s14  ;;  %1666 = vrot.lane.b32.xlu0 %v2635_v12, %s2428_s12  ;;  %s2431_s14 = smov 110  }
 0x130   : > { %2371 = vset.pattern.permute.xlu1 %v2429_v6 }
 0x133   : > { %542 = vrot.lane.b32.xlu1 %v2641_v15, %s2422_s16  ;;  %593 = vrot.lane.b32.xlu0 %v493_v59, %s2423_s19  ;;  %v1801_v15 = vld [vmem:[%s3720_s5] sm:$0xf] }
 0x137   : > { %2367 = vrot.lane.b32.xlu1 %v2366_v9, %s2428_s12  ;;  %1695 = vrot.lane.b32.xlu0 %v2708_v47, %s2430_s29 }
 0x139   : > { %v2768_v11 = vpop.permute.xlu1 %1033  ;;  %v2770_v14 = vpop.permute.xlu0 %1029 }
 0x13b   : > { %538 = vrot.lane.b32.xlu1 %v2637_v13, %s2422_s16  ;;  %591 = vrot.lane.b32.xlu0 %v2637_v13, %s2423_s19 }
 0x13d   : > { %v2779_v19 = vpop.permute.xlu1 %1079  ;;  %v2781_v21 = vpop.permute.xlu0 %1121 }
 0x13f   : > { %1804 = vperm.xlu1 %2371, %v1801_v15   ;;  %1693 = vrot.lane.b32.xlu0 %v2635_v12, %s2430_s29 }
 0x141   : > { %v2785_v23 = vpop.permute.xlu1 %1075  ;;  %v2787_v24 = vpop.permute.xlu0 %1169 }
 0x143   : > { %595 = vrot.lane.b32.xlu1 %v2643_v17, %s2423_s19  ;;  %639 = vrot.lane.b32.xlu0 %v493_v59, %s2426_s22  ;;  %v1716_v59 = vld [vmem:[#allocation2 + $0xc] sm:$0xf] }
 0x144   : > { %2372 = vset.pattern.permute.xlu1 %v2397_v16 }
 0x145   : > { %v2793_v27 = vpop.permute.xlu1 %1125  ;;  %v2795_v29 = vpop.permute.xlu0 %1222 }
 0x147   : > { %1697 = vrot.lane.b32.xlu1 %v1689_v26, %s2430_s29  ;;  %1742 = vrot.lane.b32.xlu0 %v2708_v47, %s2431_s14 }
 0x149   : > { %v2802_v32 = vpop.permute.xlu1 %1173  ;;  %v2804_v17 = vpop.permute.xlu0 %1270 }
 0x14b   : > { %717 = vperm.xlu1 %2372, %v714_v31   ;;  %637 = vrot.lane.b32.xlu0 %v2637_v13, %s2426_s22  ;;  %v2825_v13 = vld [vmem:[%s3715_s0] sm:$0xf] }
 0x14c   : > { %vm466_vm0 = vcmp.ge.s32.totalorder %v2825_v13, 1  ;;  %vm1001_vm1 = vcmp.ge.s32.totalorder %v2825_v13, 2  ;;  %v1895_v31 = vld [vmem:[%s3720_s5] sm:$0xf]  ;;  %vm3766_vm6 = vcmp.lt.s32.totalorder %v2825_v13, 15  ;;  %vm3746_vm8 = vcmp.lt.s32.totalorder %v2825_v13, 14 }
 0x14d   : > { %v2808_v16 = vpop.permute.xlu1 %1226  ;;  %v2810_v34 = vpop.permute.xlu0 %1298  ;;  %v2862_v9 = vsel %vm1001_vm1, 1, %v3727_v3 }
 0x14f   : > { %2373 = vset.pattern.permute.xlu1 %v2432_v37  ;;  %1740 = vrot.lane.b32.xlu0 %v2635_v12, %s2431_s14  ;;  %v856_v37 = vld [vmem:[%s3718_s3] sm:$0xf] }
 0x150   : > { %1852 = vperm.xlu1 %2373, %v1849_v35   ;;  %v2435_v35 = vmov 22  }
 0x151   : > { %v2816_v39 = vpop.permute.xlu1 %1274  ;;  %v2818_v40 = vpop.permute.xlu0 %1325 }
 0x153   : > { %1790 = vrot.lane.b32.xlu0 %v2708_v47, %s2433_s23 }
 0x154   : > { %641 = vrot.lane.b32.xlu1 %v2645_v18, %s2426_s22  ;;  %v2844_v18 = vcombine.high %v2631_v8, %v2631_v8  ;;  %s2440_s22 = smov 94  }
 0x155   : > { %v2832_v54 = vpop.permute.xlu1 %1302  ;;  %v2834_v55 = vpop.permute.xlu0 %1352  ;;  %2374 = vset.pattern.permute.xlu1 %v2399_v20  ;;  %v2852_v20 = vsel %vm466_vm0, 1, %v3727_v3  ;;  %v1764_v3 = vld [vmem:[#allocation2 + $0xc] sm:$0xf] }
 0x156   : > { %v2251_v6 = vrot.slane %v2852_v20, 9 }
 0x157   : > { %811 = vperm.xlu0 %2376, %v808_v49  }
 0x158   : > { %1744 = vrot.lane.b32.xlu1 %v1716_v59, %s2431_s14  ;;  %vm2876_vm2 = vcmp.ne.s32.totalorder %v2251_v6, 0  ;;  %v2893_v6 = vsub.s32 0, %v2610_v57 }
 0x159   : > { %v2838_v61 = vpop.permute.xlu1 %1329  ;;  %v2840_v22 = vpop.permute.xlu0 %1399  ;;  %vm1052_vm3 = vmand %vm1001_vm1, %vm2876_vm2 }
 0x15b   : > { %703 = vrot.lane.b32.xlu0 %v2844_v18, %s2408_s25 }
 0x15c   : > { %765 = vperm.xlu1 %2374, %v762_v4   ;;  %2378 = vset.pattern.permute.xlu0 %v2401_v25  ;;  %v2257_v25 = vrot.slane %v2862_v9, 9 }
 0x15d   : > { %v2864_v15 = vpop.permute.xlu1 %1356  ;;  %v2866_v26 = vpop.permute.xlu0 %1449 }
 0x15e   : > { %vm2888_vm4 = vcmp.ne.s32.totalorder %v2257_v25, 0  ;;  %v1860_v25 = vld [vmem:[#allocation2 + $0xc] sm:$0xf] }
 0x15f   : > { %1840 = vrot.lane.b32.xlu0 %v1812_v5, %s2434_s20  ;;  %v3796_v5 = vmov 0  ;;  %vm1006_vm5 = vmand %vm1001_vm1, %vm2888_vm4 }
 0x160   : > { %2375 = vset.pattern.permute.xlu1 %v2435_v35  ;;  %v3797_v5 = vsel %vm2888_vm4, 4294967295, %v3796_v5 }
 0x161   : > { %v2880_v59 = vpop.permute.xlu1 %1403  ;;  %v2882_v4 = vpop.permute.xlu0 %1473  ;;  %1898 = vperm.xlu1 %2375, %v1895_v31   ;;  %3798 = vst [vmem:[#allocation25_spill] sm:$0xff] %v3797_v5  ;;  %v2901_v31 = vsub.s32 2, %v2610_v57  ;;  %v1954_v5 = vld [vmem:[#allocation2 + $0xc] sm:$0xf] }
 0x163   : > { %859 = vperm.xlu0 %2378, %v856_v37   ;;  %v3799_v37 = vmov 0  }
 0x164   : > { %v1053_v7 = vsel %vm1052_vm3, 1, %v3799_v37 }
 0x165   : > { %v2895_v35 = vpop.permute.xlu1 %1445  ;;  %v2897_v10 = vpop.permute.xlu0 %1518  ;;  %1792 = vrot.lane.b32.xlu1 %v1764_v3, %s2433_s23  ;;  %v1057_v3 = vrot.slane %v1053_v7, %v2893_v6  ;;  %v1061_v56 = vrot.slane %v1053_v7, %v2901_v31  ;;  %v2932_v7 = vsel %vm3766_vm6, 1, %v3799_v37 }
 0x166   : > { %2377 = vset.pattern.permute.xlu1 %v2436_v1  ;;  %v1007_v1 = vsel %vm1006_vm5, 1, %v3799_v37 }
 0x167   : > { %751 = vrot.lane.b32.xlu0 %v2844_v18, %s2427_s28  ;;  %v1011_v45 = vrot.slane %v1007_v1, %v2893_v6  ;;  %v1015_v52 = vrot.slane %v1007_v1, %v2901_v31  ;;  %v1065_v2 = vrot.slane %v1057_v3, %v2893_v6  ;;  %v1069_v43 = vrot.slane %v1061_v56, %v2893_v6 }
 0x168   : > { %2380 = vset.pattern.permute.xlu0 %v2437_v0  ;;  %v2252_v1 = vrot.slane %v2932_v7, 9 }
 0x169   : > { %v2910_v46 = vpop.permute.xlu1 %1477  ;;  %v1078_v63 = vpop.permute.xlu0 %1077  ;;  %1788 = vrot.lane.b32.xlu1 %v2635_v12, %s2433_s23  ;;  %v1023_v3 = vrot.slane %v1015_v52, %v2893_v6  ;;  %vm1070_vm11 = vcmp.eq.s32.totalorder %v1065_v2, 1  ;;  %v1107_v52 = vrot.slane %v2862_v9, %v2901_v31  ;;  %vm1071_vm12 = vcmp.eq.s32.totalorder %v1069_v43, 1  ;;  %s2439_s23 = smov 95  }
 0x16a   : > { %v1082_v41 = vsel %vm1081_vm9, %v2785_v23, %v1078_v63  ;;  %v1083_v38 = vsel %vm1081_vm9, %v1078_v63, %v2779_v19  ;;  %vm2971_vm5 = vcmp.ne.s32.totalorder %v2252_v1, 0  ;;  %v3802_v43 = vmov 0 }
 0x16b   : > { %1886 = vrot.lane.b32.xlu0 %v1860_v25, %s2438_s27  ;;  %vm1025_vm3 = vcmp.eq.s32.totalorder %v1023_v3, 1  ;;  %v3803_v43 = vsel %vm2971_vm5, 4294967295, %v3802_v43  ;;  %v1086_v63 = vsel %vm1070_vm11, %v1082_v41, 0.0  ;;  %v1087_v19 = vsel %vm1071_vm12, %v1083_v38, 0.0 }
 0x16c   : > { %3804 = vst [vmem:[#allocation28_spill] sm:$0xff] %v3803_v43  ;;  %v1115_v50 = vrot.slane %v1107_v52, %v2893_v6  ;;  %vm3747_vm9 = vcmask 138240   ;;  %vm1127_vm11 = vcmask 261120   ;;  %v1094_v1 = vmul.f32 %v2596_v48, %v1086_v63 }
 0x16d   : > { %v2925_v44 = vpop.permute.xlu1 %1563  ;;  %v2927_v62 = vpop.permute.xlu0 %1171  ;;  %1946 = vperm.xlu1 %2377, %v1943_v58   ;;  %v1019_v58 = vrot.slane %v1011_v45, %v2893_v6  ;;  %v1103_v45 = vrot.slane %v2862_v9, %v2893_v6  ;;  %v3805_v52 = vmov 0 }
 0x16e   : > { %v2938_v25 = vsel %vm1175_vm7, %v2787_v24, %v2927_v62  ;;  %v2951_v24 = vsel %vm3746_vm8, 1, %v3799_v37  ;;  %vm3749_vm8 = vcmask 121856  }
 0x16f   : > { %3800 = vst [vmem:[#allocation26_spill] sm:$0xff] %v2938_v25  ;;  %1882 = vrot.lane.b32.xlu0 %v2635_v12, %s2438_s27  ;;  %3801 = vst [vmem:[#allocation27_spill] sm:$0xff] %v2951_v24  ;;  %v2258_v33 = vrot.slane %v2951_v24, 9  ;;  %vm1024_vm15 = vcmp.eq.s32.totalorder %v1019_v58, 1 }
 0x171   : > { %v2946_v56 = vpop.permute.xlu1 %1611  ;;  %v2953_v42 = vpop.permute.xlu0 %1224  ;;  %1838 = vrot.lane.b32.xlu1 %v2708_v47, %s2434_s20  ;;  %vm2994_vm12 = vcmp.ne.s32.totalorder %v2258_v33, 0  ;;  %v1991_v33 = vld [vmem:[%s3720_s5] sm:$0xf] }
 0x172   : > { %v2966_v36 = vsel %vm1228_vm10, %v2795_v29, %v2953_v42  ;;  %2379 = vset.pattern.permute.xlu1 %v2437_v0  ;;  %v1111_v29 = vrot.slane %v1103_v45, %v2893_v6  ;;  %v1095_v45 = vmul.f32 %v2596_v48, %v1087_v19  ;;  %v3806_v52 = vsel %vm2994_vm12, 4294967295, %v3805_v52 }
 0x173   : > { %1932 = vrot.lane.b32.xlu0 %v2708_v47, %s2439_s23  ;;  %3807 = vst [vmem:[#allocation29_spill] sm:$0xff] %v3806_v52 }
 0x175   : > { %v1273_v23 = vpop.permute.xlu0 %1272  ;;  %701 = vrot.lane.b32.xlu1 %v2631_v8, %s2408_s25  ;;  %v1032_v0 = vpop.permute.xlu1 %1031  ;;  %s431_s25 = scalar_lea.vmem %s3726_s11, %s2270_s26 }
 0x176   : > { %v2981_v25 = vsel %vm1276_vm13, %v2804_v17, %v1273_v23  ;;  %v2984_v58 = vsel %vm1276_vm13, %v1273_v23, %v2816_v39  ;;  %v1036_v3 = vsel %vm1035_vm14, %v2770_v14, %v1032_v0  ;;  %v1037_v41 = vsel %vm1035_vm14, %v1032_v0, %v2768_v11 }
 0x177   : > { %v1040_v38 = vsel %vm1024_vm15, %v1036_v3, 0.0  ;;  %v1041_v2 = vsel %vm1025_vm3, %v1037_v41, 0.0  ;;  %795 = vrot.lane.b32.xlu0 %v2631_v8, %s2428_s12  ;;  %vm1116_vm13 = vcmp.eq.s32.totalorder %v1111_v29, 1  ;;  %vm1117_vm14 = vcmp.eq.s32.totalorder %v1115_v50, 1  ;;  %vm1146_vm15 = vmand %vm1001_vm1, %vm2971_vm5 }
 0x178   : > { %v1048_v17 = vmul.f32 %v2658_v28, %v1040_v38  ;;  %v1049_v39 = vmul.f32 %v2658_v28, %v1041_v2  ;;  %vm3758_vm3 = vcmask 130048   ;;  %v1147_v38 = vsel %vm1146_vm15, 1, %v3799_v37 }
 0x179   : > { %v1301_v11 = vpop.permute.xlu0 %1300  ;;  %1836 = vrot.lane.b32.xlu1 %v2635_v12, %s2434_s20  ;;  %v1124_v14 = vpop.permute.xlu1 %1123  ;;  %vm3748_vm15 = vcmask 7168   ;;  %s421_s20 = scalar_lea.vmem %s3724_s9, %s2615_s15 }
 0x17a   : > { %v1096_v23 = vadd.f32 %v1094_v1, %v1048_v17  ;;  %v1097_v0 = vadd.f32 %v1095_v45, %v1049_v39  ;;  %v3002_v48 = vsel %vm3747_vm9, %v2810_v34, %v1301_v11  ;;  %v3006_v28 = vsel %vm3747_vm9, %v1301_v11, %v2832_v54  ;;  %vm3027_vm9 = vmand %vm1001_vm1, %vm2994_vm12 }
 0x17b   : > { %v1128_v50 = vsel %vm1127_vm11, %v2781_v21, %v1124_v14  ;;  %v1129_v34 = vsel %vm1127_vm11, %v1124_v14, %v2793_v27  ;;  %845 = vrot.lane.b32.xlu0 %v2844_v18, %s2430_s29  ;;  %v1505_v54 = vrot.slane %v2600_v51, %v2622_v60  ;;  %vm1247_vm11 = vmand %vm466_vm0, %vm2888_vm4  ;;  %vm1405_vm1 = vcmask 113664  }
 0x17c   : > { %v1132_v63 = vsel %vm1116_vm13, %v1128_v50, 0.0  ;;  %v1133_v19 = vsel %vm1117_vm14, %v1129_v34, 0.0  ;;  %vm1451_vm13 = vcmask 15360   ;;  %v1248_v45 = vsel %vm1247_vm11, 1, %v3799_v37  ;;  %vm568_vm11 = vmand %vm466_vm0, %vm2971_vm5 }
 0x17d   : > { %v1140_v21 = vmul.f32 %v2664_v30, %v1132_v63  ;;  %v1141_v27 = vmul.f32 %v2664_v30, %v1133_v19  ;;  %v1328_v3 = vpop.permute.xlu0 %1327  ;;  %1994 = vperm.xlu1 %2379, %v1991_v33   ;;  %v1355_v41 = vpop.permute.xlu1 %1354  ;;  %vm3760_vm14 = vcmask 1031168  }
 0x17e   : > { %v3040_v51 = vsel %vm3758_vm3, %v2818_v40, %v1328_v3  ;;  %v3044_v2 = vsel %vm3758_vm3, %v1328_v3, %v2838_v61  ;;  %v3048_v30 = vsel %vm3749_vm8, %v2834_v55, %v1355_v41  ;;  %v3052_v1 = vsel %vm3749_vm8, %v1355_v41, %v2864_v15 }
 0x17f   : > { %1980 = vrot.lane.b32.xlu0 %v2708_v47, %s2440_s22  ;;  %v3057_v40 = vmul.f32 %v1505_v54, %v2635_v12  ;;  %v1151_v61 = vrot.slane %v1147_v38, %v2893_v6  ;;  %v1200_v55 = vsel %vm3027_vm9, 1, %v3799_v37  ;;  %v3066_v39 = vadd.f32 %v1140_v21, %v1096_v23  ;;  %vm3086_vm9 = vmand %vm466_vm0, %vm2876_vm2 }
 0x180   : > { %v3068_v11 = vadd.f32 %v1141_v27, %v1097_v0  ;;  %v1252_v0 = vrot.slane %v1248_v45, %v2893_v6  ;;  %v472_v21 = vsel %vm3086_vm9, 1, %v3799_v37  ;;  %vm3759_vm9 = vcmask 932864  }
 0x181   : > { %3810 = vst [vmem:[#allocation30_spill] sm:$0xff] %v3057_v40  ;;  %v1402_v17 = vpop.permute.xlu0 %1401  ;;  %1884 = vrot.lane.b32.xlu1 %v2708_v47, %s2438_s27  ;;  %v1448_v15 = vpop.permute.xlu1 %1447  ;;  %v3118_v29 = vrot.slane %v1151_v61, %v2893_v6  ;;  %v569_v61 = vsel %vm568_vm11, 1, %v3799_v37  ;;  %v476_v47 = vrot.slane %v472_v21, %v2893_v6 }
 0x182   : > { %v3071_v14 = vsel %vm1405_vm1, %v2840_v22, %v1402_v17  ;;  %v3074_v33 = vsel %vm1405_vm1, %v1402_v17, %v2880_v59  ;;  %v3077_v50 = vsel %vm1451_vm13, %v2895_v35, %v1448_v15  ;;  %v3080_v34 = vsel %vm1451_vm13, %v1448_v15, %v2866_v26  ;;  %vm3109_vm1 = vmand %vm466_vm0, %vm2994_vm12 }
 0x183   : > { %843 = vrot.lane.b32.xlu0 %v2631_v8, %s2430_s29  ;;  %v1155_v22 = vrot.slane %v1147_v38, %v2901_v31  ;;  %v1204_v59 = vrot.slane %v1200_v55, %v2893_v6  ;;  %v1208_v26 = vrot.slane %v1200_v55, %v2901_v31  ;;  %v3100_v35 = vsub.s32 1, %v2610_v57 }
 0x184   : > { %vm3761_vm0 = vcmask 1039360   ;;  %v3152_v15 = vrot.slane %v1252_v0, %v2893_v6  ;;  %v573_v54 = vrot.slane %v569_v61, %v2893_v6  ;;  %vm1164_vm13 = vcmp.eq.s32.totalorder %v3118_v29, 1 }
 0x185   : > { %v3113_v63 = vpop.permute.xlu0 %1565  ;;  %749 = vrot.lane.b32.xlu1 %v2631_v8, %s2427_s28  ;;  %v1476_v19 = vpop.permute.xlu1 %1475  ;;  %v3139_v55 = vrot.slane %v1155_v22, %v2893_v6  ;;  %v3142_v17 = vrot.slane %v1204_v59, %v2893_v6  ;;  %v480_v22 = vrot.slane %v472_v21, %v2901_v31  ;;  %v520_v59 = vrot.slane %v2852_v20, %v2893_v6 }
 0x186   : > { %v3126_v27 = vsel %vm3760_vm14, %v2925_v44, %v3113_v63  ;;  %v3130_v3 = vsel %vm3748_vm15, %v2882_v4, %v1476_v19  ;;  %v3134_v41 = vsel %vm3748_vm15, %v1476_v19, %v2910_v46  ;;  %v3145_v44 = vrot.slane %v1208_v26, %v2893_v6  ;;  %v1906_v19 = vld [vmem:[#allocation2 + $0xc] sm:$0xf] }
 0x187   : > { %3815 = vst [vmem:[#allocation31_spill] sm:$0xff] %v3126_v27  ;;  %v1256_v4 = vrot.slane %v1248_v45, %v2901_v31  ;;  %v1377_v46 = vsel %vm3109_vm1, 1, %v3799_v37  ;;  %v524_v45 = vrot.slane %v2852_v20, %v2901_v31  ;;  %v577_v21 = vrot.slane %v569_v61, %v2901_v31 }
 0x188   : > { %v1381_v23 = vrot.slane %v1377_v46, %v2893_v6  ;;  %vm1217_vm1 = vcmp.eq.s32.totalorder %v3142_v17, 1  ;;  %vm1218_vm15 = vcmp.eq.s32.totalorder %v3145_v44, 1  ;;  %v1385_v38 = vrot.slane %v1377_v46, %v2901_v31 }
 0x189   : > { %797 = vrot.lane.b32.xlu1 %v2844_v18, %s2428_s12  ;;  %v3160_v26 = vpop.permute.xlu1 %1520  ;;  %v3174_v18 = vsub.s32 3, %v2610_v57  ;;  %vm1265_vm8 = vcmp.eq.s32.totalorder %v3152_v15, 1  ;;  %v3183_v61 = vrot.slane %v476_v47, %v2893_v6  ;;  %v3186_v8 = vrot.slane %v480_v22, %v2893_v6 }
 0x18a   : > { %v3168_v0 = vsel %vm3761_vm0, %v2897_v10, %v3160_v26  ;;  %v1264_v10 = vrot.slane %v1256_v4, %v2893_v6  ;;  %v3189_v57 = vrot.slane %v520_v59, %v2893_v6  ;;  %v3195_v52 = vrot.slane %v524_v45, %v2893_v6 }
 0x18b   : > { %v1427_v4 = vrot.slane %v2862_v9, %v3100_v35  ;;  %v1545_v46 = vrot.slane %v2951_v24, %v3100_v35  ;;  %v3207_v22 = vrot.slane %v573_v54, %v2893_v6  ;;  %v3210_v59 = vrot.slane %v577_v21, %v2893_v6  ;;  %v819_v21 = vld [vmem:[#allocation2 + $0xc] sm:$0xf] }
 0x18c   : > { %v3213_v45 = vrot.slane %v1381_v23, %v2893_v6  ;;  %v3218_v43 = vrot.slane %v1385_v38, %v2893_v6  ;;  %v1549_v40 = vrot.slane %v2951_v24, %v3174_v18  ;;  %v623_v54 = vrot.slane %v2852_v20, %v3174_v18 }
 0x18d   : > { %1934 = vrot.lane.b32.xlu1 %v1906_v19, %s2439_s23  ;;  %v3192_v60 = vpop.permute.xlu1 %1613  ;;  %v1431_v19 = vrot.slane %v2862_v9, %v3174_v18  ;;  %vm1266_vm3 = vcmp.eq.s32.totalorder %v1264_v10, 1  ;;  %v683_v9 = vrot.slane %v2932_v7, %v3100_v35  ;;  %v3235_v38 = vrot.slane %v1427_v4, %v3100_v35  ;;  %v3823_v10 = vld [vmem:[#allocation8_spill] sm:$0xff] }
 0x18e   : > { %3816 = vst [vmem:[#allocation32_spill] sm:$0xff] %v3192_v60  ;;  %v3204_v47 = vsel %vm3759_vm9, %v2946_v56, %v3192_v60  ;;  %v619_v56 = vrot.slane %v2852_v20, %v3100_v35  ;;  %v3238_v20 = vrot.slane %v1545_v46, %v3100_v35  ;;  %v1177_v24 = vsel %vm1175_vm7, %v2927_v62, %v2802_v32  ;;  %vm3274_vm7 = vmand %vm3766_vm6, %vm2888_vm4 }
 0x18f   : > { %3817 = vst [vmem:[#allocation33_spill] sm:$0xff] %v3204_v47  ;;  %v1230_v47 = vsel %vm1228_vm10, %v2953_v42, %v2808_v16  ;;  %vm586_vm14 = vcmp.eq.s32.totalorder %v3207_v22, 1  ;;  %vm587_vm0 = vcmp.eq.s32.totalorder %v3210_v59, 1  ;;  %v3249_v27 = vrot.slane %v1431_v19, %v3100_v35  ;;  %v3820_v19 = vld [vmem:[#allocation26_spill] sm:$0xff] }
 0x190   : > { %v687_v4 = vrot.slane %v2932_v7, %v3174_v18  ;;  %vm1394_vm11 = vcmp.eq.s32.totalorder %v3213_v45, 1  ;;  %v3256_v62 = vrot.slane %v1549_v40, %v3100_v35  ;;  %v3259_v32 = vrot.slane %v619_v56, %v3100_v35 }
 0x191   : > { %1930 = vrot.lane.b32.xlu1 %v2635_v12, %s2439_s23  ;;  %v1642_v23 = vpop.permute.xlu1 %1641  ;;  %v3262_v42 = vrot.slane %v623_v54, %v3100_v35  ;;  %v1233_v16 = vsel %vm1217_vm1, %v2966_v36, 0.0  ;;  %v3268_v46 = vrot.slane %v683_v9, %v3100_v35  ;;  %v1180_v17 = vsel %vm1164_vm13, %v3820_v19, 0.0 }
 0x192   : > { %vm755_vm10 = vcmask 924672   ;;  %v1234_v36 = vsel %vm1218_vm15, %v1230_v47, 0.0  ;;  %v1281_v56 = vsel %vm1265_vm8, %v2981_v25, 0.0  ;;  %vm3821_vm1 = vcmp.eq.s32.totalorder %v3139_v55, 1  ;;  %v3822_v25 = vld [vmem:[#allocation3_spill] sm:$0xff] }
 0x193   : > { %v1181_v9 = vsel %vm3821_vm1, %v1177_v24, 0.0  ;;  %v1282_v60 = vsel %vm1266_vm3, %v2984_v58, 0.0  ;;  %vm1440_vm13 = vcmp.eq.s32.totalorder %v3235_v38, 1  ;;  %vm1441_vm9 = vcmp.eq.s32.totalorder %v3249_v27, 1  ;;  %vm726_vm3 = vmand %vm3766_vm6, %vm2876_vm2 }
 0x194   : > { %v3297_v29 = vrot.slane %v687_v4, %v3100_v35  ;;  %v1241_v47 = vmul.f32 %v3822_v25, %v1233_v16  ;;  %v1589_v24 = vsel %vm3274_vm7, 1, %v3799_v37  ;;  %v1242_v55 = vmul.f32 %v3822_v25, %v1234_v36 }
 0x195   : > { %847 = vrot.lane.b32.xlu1 %v819_v21, %s2430_s29  ;;  %v3279_v18 = vpop.permute.xlu1 %2361  ;;  %v1289_v35 = vmul.f32 %v3823_v10, %v1281_v56  ;;  %v1290_v40 = vmul.f32 %v3823_v10, %v1282_v60  ;;  %vm3824_vm7 = vcmp.eq.s32.totalorder %v3183_v61, 1  ;;  %vm3825_vm1 = vcmp.eq.s32.totalorder %v3186_v8, 1 }
 0x196   : > { %v2363_v54 = vunpack.i.l.bf16 %v3279_v18  ;;  %v1186_v21 = vpop.permute.xlu0 %1185  ;;  %vm3826_vm15 = vcmp.eq.s32.totalorder %v3189_v57, 1  ;;  %vm3827_vm6 = vcmp.eq.s32.totalorder %v3195_v52, 1  ;;  %vm697_vm8 = vcmp.eq.s32.totalorder %v3297_v29, 1 }
 0x197   : > { %v1188_v44 = vmul.f32 %v1186_v21, %v1180_v17  ;;  %v1189_v15 = vmul.f32 %v1186_v21, %v1181_v9  ;;  %v1308_v17 = vsel %vm3824_vm7, %v3002_v48, 0.0  ;;  %v1335_v36 = vsel %vm3826_vm15, %v3040_v51, 0.0  ;;  %v3828_v9 = vld [vmem:[#allocation9_spill] sm:$0xff] }
 0x198   : > { %v3306_v58 = vsel %vm755_vm10, %v1642_v23, %v2363_v54  ;;  %v1336_v60 = vsel %vm3827_vm6, %v3044_v2, 0.0  ;;  %vm696_vm7 = vcmp.eq.s32.totalorder %v3268_v46, 1  ;;  %v1593_v48 = vrot.slane %v1589_v24, %v2893_v6  ;;  %v3829_v2 = vld [vmem:[#allocation10_spill] sm:$0xff] }
 0x199   : > { %v1190_v4 = vadd.f32 %v1188_v44, %v3066_v39  ;;  %v1191_v19 = vadd.f32 %v1189_v15, %v3068_v11  ;;  %1982 = vrot.lane.b32.xlu1 %v1954_v5, %s2440_s22  ;;  %v1640_v16 = vpop.permute.xlu1 %1639  ;;  %v1309_v39 = vsel %vm3825_vm1, %v3006_v28, 0.0  ;;  %v1597_v28 = vrot.slane %v1589_v24, %v2901_v31 }
 0x19a   : > { %v3325_v11 = vsel %vm755_vm10, %v1640_v16, %v1642_v23  ;;  %v3327_v5 = vpop.permute.xlu0 %653  ;;  %v727_v23 = vsel %vm726_vm3, 1, %v3799_v37  ;;  %v1316_v21 = vmul.f32 %v3828_v9, %v1308_v17  ;;  %v1317_v51 = vmul.f32 %v3828_v9, %v1309_v39  ;;  %v3831_v17 = vld [vmem:[#allocation11_spill] sm:$0xff] }
 0x19b   : > { %v1243_v56 = vadd.f32 %v1241_v47, %v1190_v4  ;;  %v1244_v54 = vadd.f32 %v1242_v55, %v1191_v19  ;;  %v1343_v25 = vmul.f32 %v3829_v2, %v1335_v36  ;;  %v1344_v47 = vmul.f32 %v3829_v2, %v1336_v60 }
 0x19c   : > { %v1362_v55 = vsel %vm586_vm14, %v3048_v30, 0.0  ;;  %v1363_v24 = vsel %vm587_vm0, %v3052_v1, 0.0  ;;  %vm1558_vm6 = vcmp.eq.s32.totalorder %v3238_v20, 1  ;;  %vm3830_vm15 = vcmp.eq.s32.totalorder %v3218_v43, 1  ;;  %v3832_v43 = vld [vmem:[#allocation12_spill] sm:$0xff]  ;;  %v3847_v20 = vld [vmem:[#allocation30_spill] sm:$0xff] }
 0x19d   : > { %v1291_v44 = vadd.f32 %v1289_v35, %v1243_v56  ;;  %v1292_v15 = vadd.f32 %v1290_v40, %v1244_v54  ;;  %1978 = vrot.lane.b32.xlu1 %v2635_v12, %s2440_s22  ;;  %v1410_v12 = vsel %vm1394_vm11, %v3071_v14, 0.0  ;;  %v1411_v35 = vsel %vm3830_vm15, %v3074_v33, 0.0 }
 0x19e   : > { %v3353_v10 = vpop.permute.xlu0 %496  ;;  %vm1559_vm3 = vcmp.eq.s32.totalorder %v3256_v62, 1  ;;  %v1601_v19 = vrot.slane %v1593_v48, %v2893_v6  ;;  %v1605_v1 = vrot.slane %v1597_v28, %v2893_v6  ;;  %v731_v16 = vrot.slane %v727_v23, %v2893_v6 }
 0x19f   : > { %v1318_v4 = vadd.f32 %v1316_v21, %v1291_v44  ;;  %v1319_v30 = vadd.f32 %v1317_v51, %v1292_v15  ;;  %v735_v40 = vrot.slane %v727_v23, %v2901_v31  ;;  %v1370_v39 = vmul.f32 %v3831_v17, %v1362_v55 }
 0x1a0   : > { %v1371_v14 = vmul.f32 %v3831_v17, %v1363_v24  ;;  %v1418_v33 = vmul.f32 %v3832_v43, %v1410_v12  ;;  %v1419_v60 = vmul.f32 %v3832_v43, %v1411_v35  ;;  %v1456_v56 = vsel %vm1440_vm13, %v3077_v50, 0.0  ;;  %v3842_v17 = vld [vmem:[#allocation32_spill] sm:$0xff] }
 0x1a1   : > { %v1345_v45 = vadd.f32 %v1343_v25, %v1318_v4  ;;  %v1346_v36 = vadd.f32 %v1344_v47, %v1319_v30  ;;  %v1457_v54 = vsel %vm1441_vm9, %v3080_v34, 0.0  ;;  %vm3833_vm11 = vcmp.eq.s32.totalorder %v3259_v32, 1  ;;  %v3838_v25 = vld [vmem:[#allocation18_spill] sm:$0xff]  ;;  %v3845_v43 = vld [vmem:[#allocation4_spill] sm:$0xff] }
 0x1a2   : > { %v3376_v48 = vpop.permute.xlu0 %540  ;;  %v1483_v28 = vsel %vm3833_vm11, %v3130_v3, 0.0  ;;  %vm3834_vm1 = vcmp.eq.s32.totalorder %v3262_v42, 1  ;;  %v3835_v51 = vunpack.i.l.bf16 %v2716_v53  ;;  %vm3836_vm13 = vcmask 1039360   ;;  %v3837_v3 = vld [vmem:[#allocation13_spill] sm:$0xff] }
 0x1a3   : > { %v1484_v23 = vsel %vm3834_vm1, %v3134_v41, 0.0  ;;  %v1372_v9 = vadd.f32 %v1370_v39, %v1345_v45  ;;  %v1373_v21 = vadd.f32 %v1371_v14, %v1346_v36  ;;  %v3389_v27 = vrot.slane %v731_v16, %v2893_v6  ;;  %v3844_v14 = vld [vmem:[#allocation31_spill] sm:$0xff] }
 0x1a4   : > { %v1525_v50 = vsel %vm3836_vm13, %v3160_v26, %v3835_v51  ;;  %v777_v34 = vrot.slane %v2932_v7, %v2893_v6  ;;  %v3394_v38 = vrot.slane %v735_v40, %v2893_v6  ;;  %v1464_v44 = vmul.f32 %v3837_v3, %v1456_v56  ;;  %v3840_v26 = vld [vmem:[#allocation14_spill] sm:$0xff]  ;;  %v3846_v56 = vld [vmem:[#allocation33_spill] sm:$0xff] }
 0x1a5   : > { %v1465_v41 = vmul.f32 %v3837_v3, %v1457_v54  ;;  %v1420_v15 = vadd.f32 %v1418_v33, %v1372_v9  ;;  %v1421_v2 = vadd.f32 %v1419_v60, %v1373_v21  ;;  %vm3839_vm9 = vcmask 1031168   ;;  %v3841_v40 = vld [vmem:[#allocation22_spill] sm:$0xff] }
 0x1a6   : > { %v1571_v47 = vsel %vm3839_vm9, %v3113_v63, %v3838_v25  ;;  %v1491_v55 = vmul.f32 %v3840_v26, %v1483_v28  ;;  %v1492_v24 = vmul.f32 %v3840_v26, %v1484_v23  ;;  %vm1606_vm15 = vcmp.eq.s32.totalorder %v1601_v19, 1  ;;  %v3403_v12 = vpop.permute.xlu0 %1668  ;;  %v3853_v25 = vld [vmem:[#allocation5_spill] sm:$0xff] }
 0x1a7   : > { %v1528_v35 = vsel %vm696_vm7, %v3168_v0, 0.0  ;;  %v1529_v4 = vsel %vm697_vm8, %v1525_v50, 0.0  ;;  %v1467_v30 = vadd.f32 %v1465_v41, %v1421_v2  ;;  %v1466_v16 = vadd.f32 %v1464_v44, %v1420_v15 }
 0x1a8   : > { %vm1607_vm11 = vcmp.eq.s32.totalorder %v1605_v1, 1  ;;  %vm3843_vm1 = vcmask 932864   ;;  %v3414_v39 = vrot.slane %v777_v34, %v2893_v6  ;;  %vm745_vm13 = vcmp.eq.s32.totalorder %v3394_v38, 1  ;;  %v3850_v34 = vld [vmem:[#allocation15_spill] sm:$0xff] }
 0x1a9   : > { %v1619_v63 = vsel %vm3843_vm1, %v3842_v17, %v3841_v40  ;;  %v1574_v45 = vsel %vm1558_vm6, %v3844_v14, 0.0  ;;  %vm3768_vm9 = vcmp.eq.s32.totalorder %v3389_v27, 1  ;;  %v1493_v0 = vadd.f32 %v1491_v55, %v1466_v16  ;;  %v3854_v14 = vld [vmem:[#allocation16_spill] sm:$0xff] }
 0x1aa   : > { %v1494_v36 = vadd.f32 %v1492_v24, %v1467_v30  ;;  %v1575_v1 = vsel %vm1559_vm3, %v1571_v47, 0.0  ;;  %v1536_v33 = vmul.f32 %v3845_v43, %v1528_v35  ;;  %v1537_v60 = vmul.f32 %v3845_v43, %v1529_v4  ;;  %v3427_v28 = vpop.permute.xlu1 %1756  ;;  %v495_v23 = vpop.permute.xlu0 %494 }
 0x1ab   : > { %v1622_v54 = vsel %vm1606_vm15, %v3846_v56, 0.0  ;;  %v1623_v9 = vsel %vm1607_vm11, %v1619_v63, 0.0  ;;  %v1511_v21 = vadd.f32 %v3847_v20, %v1493_v0  ;;  %vm3848_vm6 = vcmask 138240  }
 0x1ac   : > { %v501_v51 = vsel %vm3848_vm6, %v495_v23, %v3353_v10  ;;  %v3849_v62 = vcombine.high %v3847_v20, %v3847_v20  ;;  %vm3767_vm3 = vcmp.eq.s32.totalorder %v3414_v39, 1  ;;  %vm3769_vm1 = vcmask 916480  }
 0x1ad   : > { %v781_v19 = vrot.slane %v2932_v7, %v2901_v31  ;;  %v1582_v3 = vmul.f32 %v3850_v34, %v1574_v45  ;;  %v1583_v44 = vmul.f32 %v3850_v34, %v1575_v1  ;;  %v1538_v41 = vadd.f32 %v1536_v33, %v1511_v21  ;;  %v3859_v21 = vld [vmem:[#allocation17_spill] sm:$0xff] }
 0x1ae   : > { %v1512_v50 = vadd.f32 %v3849_v62, %v1494_v36  ;;  %vm3852_vm15 = vcmp.lt.s32.totalorder %v2825_v13, 15  ;;  %v1630_v47 = vmul.f32 %v3853_v25, %v1622_v54  ;;  %v1631_v26 = vmul.f32 %v3853_v25, %v1623_v9  ;;  %v499_v7 = vpop.permute.xlu1 %498  ;;  %v1667_v24 = vpop.permute.xlu0 %1666 }
 0x1af   : > { %vm820_vm11 = vmand %vm3852_vm15, %vm2971_vm5  ;;  %v1649_v55 = vsel %vm3768_vm9, %v3325_v11, 0.0  ;;  %v1650_v35 = vsel %vm745_vm13, %v3306_v58, 0.0  ;;  %v1584_v4 = vadd.f32 %v1582_v3, %v1538_v41  ;;  %v502_v30 = vsel %vm3848_vm6, %v3353_v10, %v499_v7 }
 0x1b0   : > { %v1539_v2 = vadd.f32 %v1537_v60, %v1512_v50  ;;  %v1672_v16 = vsel %vm3769_vm1, %v1667_v24, %v3403_v12  ;;  %v821_v63 = vsel %vm820_vm11, 1, %v3799_v37  ;;  %v1657_v45 = vmul.f32 %v3854_v14, %v1649_v55  ;;  %v3856_v60 = vld [vmem:[#allocation19_spill] sm:$0xff]  ;;  %v3860_v50 = vld [vmem:[#allocation20_spill] sm:$0xff] }
 0x1b1   : > { %v1676_v17 = vsel %vm3767_vm3, %v1672_v16, 0.0  ;;  %v1632_v11 = vadd.f32 %v1630_v47, %v1584_v4  ;;  %v1658_v36 = vmul.f32 %v3854_v14, %v1650_v35  ;;  %vm3855_vm15 = vcmp.eq.s32.totalorder %v3186_v8, 1 }
 0x1b2   : > { %v1585_v40 = vadd.f32 %v1583_v44, %v1539_v2  ;;  %v506_v58 = vsel %vm3855_vm15, %v502_v30, 0.0  ;;  %v543_v1 = vpop.permute.xlu1 %542  ;;  %v594_v10 = vpop.permute.xlu0 %593  ;;  %v3464_v43 = vrot.slane %v781_v19, %v2893_v6  ;;  %v1684_v56 = vmul.f32 %v3856_v60, %v1676_v17 }
 0x1b3   : > { %v1659_v33 = vadd.f32 %v1657_v45, %v1632_v11  ;;  %vm3857_vm6 = vcmask 130048   ;;  %vm3858_vm11 = vcmp.eq.s32.totalorder %v3195_v52, 1  ;;  %v825_v20 = vrot.slane %v821_v63, %v2893_v6  ;;  %v3865_v11 = vld [vmem:[#allocation21_spill] sm:$0xff] }
 0x1b4   : > { %v1633_v0 = vadd.f32 %v1631_v26, %v1585_v40  ;;  %v546_v54 = vsel %vm3857_vm6, %v3376_v48, %v543_v1  ;;  %v514_v8 = vmul.f32 %v3859_v21, %v506_v58  ;;  %vm791_vm15 = vcmp.eq.s32.totalorder %v3464_v43, 1 }
 0x1b5   : > { %v550_v9 = vsel %vm3858_vm11, %v546_v54, 0.0  ;;  %v1686_v62 = vadd.f32 %v1684_v56, %v1659_v33  ;;  %v3479_v2 = vrot.slane %v825_v20, %v2893_v6  ;;  %vm3861_vm6 = vcmp.eq.s32.totalorder %v3183_v61, 1 }
 0x1b6   : > { %v1660_v23 = vadd.f32 %v1658_v36, %v1633_v0  ;;  %v558_v34 = vmul.f32 %v3860_v50, %v550_v9  ;;  %v3474_v3 = vpop.permute.xlu1 %2367  ;;  %v1696_v19 = vpop.permute.xlu0 %1695  ;;  %v505_v25 = vsel %vm3861_vm6, %v501_v51, 0.0  ;;  %vm3862_vm11 = vcmask 130048   ;;  %v3868_v36 = vld [vmem:[#allocation23_spill] sm:$0xff] }
 0x1b7   : > { %v2369_v41 = vunpack.i.l.bf16 %v3474_v3  ;;  %vm3863_vm3 = vcmask 121856   ;;  %vm3864_vm9 = vcmp.eq.s32.totalorder %v3189_v57, 1  ;;  %vm3771_vm6 = vcmp.eq.s32.totalorder %v3479_v2, 1 }
 0x1b8   : > { %v560_v44 = vadd.f32 %v558_v34, %v514_v8  ;;  %v513_v61 = vmul.f32 %v3859_v21, %v505_v25  ;;  %v829_v30 = vrot.slane %v821_v63, %v2901_v31 }
 0x1b9   : > { %v1673_v52 = vsel %vm3769_vm1, %v3403_v12, %v2369_v41  ;;  %vm849_vm1 = vcmask 908288  }
 0x1ba   : > { %v539_v47 = vpop.permute.xlu1 %538  ;;  %v592_v26 = vpop.permute.xlu0 %591  ;;  %v1677_v55 = vsel %vm791_vm15, %v1673_v52, 0.0  ;;  %v3511_v58 = vrot.slane %v829_v30, %v2893_v6  ;;  %v3872_v30 = vld [vmem:[#allocation24_spill] sm:$0xff] }
 0x1bb   : > { %v545_v7 = vsel %vm3862_vm11, %v539_v47, %v3376_v48  ;;  %v598_v24 = vsel %vm3863_vm3, %v592_v26, %v594_v10  ;;  %v1685_v35 = vmul.f32 %v3856_v60, %v1677_v55 }
 0x1bc   : > { %v549_v4 = vsel %vm3864_vm9, %v545_v7, 0.0  ;;  %v602_v12 = vsel %vm586_vm14, %v598_v24, 0.0  ;;  %vm3867_vm14 = vcmp.lt.s32.totalorder %v2825_v13, 15  ;;  %vm3770_vm11 = vcmp.eq.s32.totalorder %v3511_v58, 1 }
 0x1bd   : > { %v557_v51 = vmul.f32 %v3860_v50, %v549_v4  ;;  %v1687_v48 = vadd.f32 %v1685_v35, %v1660_v23  ;;  %v610_v57 = vmul.f32 %v3865_v11, %v602_v12  ;;  %vm1717_vm9 = vmand %vm3867_vm14, %vm2994_vm12  ;;  %vm3870_vm14 = vcmp.eq.s32.totalorder %v3259_v32, 1 }
 0x1be   : > { %v3499_v16 = vpop.permute.xlu1 %1804  ;;  %v1694_v40 = vpop.permute.xlu0 %1693  ;;  %v1718_v60 = vsel %vm1717_vm9, 1, %v3799_v37  ;;  %vm1746_vm9 = vcmask 900096  }
 0x1bf   : > { %v559_v17 = vadd.f32 %v557_v51, %v513_v61  ;;  %v1699_v14 = vsel %vm849_vm1, %v1694_v40, %v1696_v19  ;;  %v1722_v20 = vrot.slane %v1718_v60, %v2893_v6  ;;  %v1726_v55 = vrot.slane %v1718_v60, %v2901_v31  ;;  %v3871_v51 = vld [vmem:[#allocation6_spill] sm:$0xff] }
 0x1c0   : > { %v1703_v45 = vsel %vm3771_vm6, %v1699_v14, 0.0 }
 0x1c1   : > { %v612_v0 = vadd.f32 %v610_v57, %v559_v17  ;;  %v1711_v63 = vmul.f32 %v3868_v36, %v1703_v45  ;;  %v1734_v32 = vrot.slane %v1726_v55, %v2893_v6 }
 0x1c2   : > { %v596_v1 = vpop.permute.xlu1 %595  ;;  %v640_v33 = vpop.permute.xlu0 %639 }
 0x1c3   : > { %v1713_v56 = vadd.f32 %v1711_v63, %v1686_v62  ;;  %v599_v54 = vsel %vm3863_vm3, %v594_v10, %v596_v1  ;;  %v1730_v10 = vrot.slane %v1722_v20, %v2893_v6  ;;  %vm1736_vm6 = vcmp.eq.s32.totalorder %v1734_v32, 1 }
 0x1c4   : > { %v603_v23 = vsel %vm587_vm0, %v599_v54, 0.0  ;;  %vm3869_vm0 = vcmask 7168  }
 0x1c5   : > { %v611_v9 = vmul.f32 %v3865_v11, %v603_v23  ;;  %vm1735_vm3 = vcmp.eq.s32.totalorder %v1730_v10, 1 }
 0x1c6   : > { %v1698_v21 = vpop.permute.xlu1 %1697  ;;  %v1743_v8 = vpop.permute.xlu0 %1742 }
 0x1c7   : > { %v613_v50 = vadd.f32 %v611_v9, %v560_v44  ;;  %v1700_v34 = vsel %vm849_vm1, %v1696_v19, %v1698_v21 }
 0x1c8   : > { %v1704_v41 = vsel %vm3770_vm11, %v1700_v34, 0.0  ;;  %vm3875_vm11 = vcmp.lt.s32.totalorder %v2825_v13, 14 }
 0x1c9   : > { %v1712_v62 = vmul.f32 %v3868_v36, %v1704_v41  ;;  %v3876_v36 = vld [vmem:[#allocation7_spill] sm:$0xff] }
 0x1ca   : > { %v3525_v59 = vpop.permute.xlu1 %717  ;;  %v638_v52 = vpop.permute.xlu0 %637 }
 0x1cb   : > { %v644_v25 = vsel %vm3869_vm0, %v638_v52, %v640_v33  ;;  %v1714_v47 = vadd.f32 %v1712_v62, %v1687_v48  ;;  %v670_v48 = vrot.slane %v3872_v30, %v3871_v51 }
 0x1cc   : > { %v648_v26 = vsel %vm3870_vm14, %v644_v25, 0.0  ;;  %vm3873_vm14 = vcmp.eq.s32.totalorder %v3262_v42, 1 }
 0x1cd   : > { %v656_v44 = vmul.f32 %v3327_v5, %v648_v26  ;;  %v3552_v63 = vmul.f32 %v670_v48, %v3876_v36 }
 0x1ce   : > { %v1741_v19 = vpop.permute.xlu0 %1740 }
 0x1cf   : > { %v3532_v7 = vadd.f32 %v656_v44, %v612_v0  ;;  %v1747_v24 = vsel %vm1746_vm9, %v1741_v19, %v1743_v8  ;;  %v3535_v35 = vpop.permute.xlu1 %1852  ;;  %v2364_v19 = vunpack.i.h.bf16 %v3279_v18 }
 0x1d0   : > { %v1751_v4 = vsel %vm1735_vm3, %v1747_v24, 0.0  ;;  %vm1765_vm3 = vmand %vm3875_vm11, %vm2888_vm4  ;;  %vm3877_vm4 = vcmask 1039360  }
 0x1d1   : > { %v1759_v12 = vmul.f32 %v3427_v28, %v1751_v4  ;;  %v1766_v42 = vsel %vm1765_vm3, 1, %v3799_v37 }
 0x1d2   : > { %v1791_v61 = vpop.permute.xlu0 %1790  ;;  %v1774_v34 = vrot.slane %v1766_v42, %v2901_v31  ;;  %v1770_v52 = vrot.slane %v1766_v42, %v2893_v6 }
 0x1d3   : > { %v1761_v40 = vadd.f32 %v1759_v12, %v1713_v56  ;;  %v642_v17 = vpop.permute.xlu1 %641  ;;  %v2352_v56 = vunpack.i.h.bf16 %v2716_v53 }
 0x1d4   : > { %v645_v11 = vsel %vm3869_vm0, %v640_v33, %v642_v17  ;;  %v1778_v29 = vrot.slane %v1770_v52, %v2893_v6  ;;  %vm1842_vm0 = vcmask 793600  }
 0x1d5   : > { %v649_v57 = vsel %vm3873_vm14, %v645_v11, 0.0 }
 0x1d6   : > { %v657_v45 = vmul.f32 %v3327_v5, %v649_v57  ;;  %v3549_v0 = vpop.permute.xlu0 %811  ;;  %v674_v5 = vcombine.high %v3552_v63, %v3552_v63 }
 0x1d7   : > { %v1745_v1 = vpop.permute.xlu1 %1744 }
 0x1d8   : > { %v659_v60 = vadd.f32 %v657_v45, %v613_v50  ;;  %v1748_v33 = vsel %vm1746_vm9, %v1743_v8, %v1745_v1 }
 0x1d9   : > { %v1752_v54 = vsel %vm1736_vm6, %v1748_v33, 0.0  ;;  %vm3878_vm6 = vmmov %vm3875_vm11 }
 0x1da   : > { %v1760_v23 = vmul.f32 %v3427_v28, %v1752_v54  ;;  %v704_v9 = vpop.permute.xlu0 %703  ;;  %v677_v41 = vadd.f32 %v674_v5, %v659_v60  ;;  %v1782_v28 = vrot.slane %v1774_v34, %v2893_v6  ;;  %vm1813_vm11 = vmand %vm3878_vm6, %vm2876_vm2  ;;  %vm1783_vm2 = vcmp.eq.s32.totalorder %v1778_v29, 1 }
 0x1db   : > { %v709_v20 = vsel %vm3877_vm4, %v704_v9, %v2352_v56  ;;  %v3561_v21 = vpop.permute.xlu1 %765  ;;  %v1814_v44 = vsel %vm1813_vm11, 1, %v3799_v37 }
 0x1dc   : > { %v713_v8 = vsel %vm697_vm8, %v709_v20, 0.0  ;;  %v1762_v50 = vadd.f32 %v1760_v23, %v1714_v47  ;;  %vm1794_vm8 = vcmask 801792   ;;  %vm1784_vm9 = vcmp.eq.s32.totalorder %v1782_v28, 1 }
 0x1dd   : > { %v721_v53 = vmul.f32 %v3525_v59, %v713_v8  ;;  %v1822_v32 = vrot.slane %v1814_v44, %v2901_v31  ;;  %v1818_v38 = vrot.slane %v1814_v44, %v2893_v6  ;;  %v676_v8 = vadd.f32 %v3552_v63, %v3532_v7  ;;  %v3881_v44 = vld [vmem:[#allocation27_spill] sm:$0xff] }
 0x1de   : > { %v1841_v62 = vpop.permute.xlu0 %1840  ;;  %v2370_v63 = vunpack.i.h.bf16 %v3474_v3  ;;  %v1864_v15 = vrot.slane %v3881_v44, %v2893_v6 }
 0x1df   : > { %v723_v10 = vadd.f32 %v721_v53, %v677_v41  ;;  %v1830_v45 = vrot.slane %v1822_v32, %v2893_v6 }
 0x1e0   : > { %v3569_v25 = vpop.permute.xlu1 %1898  ;;  %v1872_v43 = vrot.slane %v1864_v15, %v2893_v6  ;;  %v2001_v15 = vld [vmem:[%s3721_s6] sm:$0xf] }
 0x1e1   : > { %vm1832_vm14 = vcmp.eq.s32.totalorder %v1830_v45, 1 }
 0x1e2   : > { %v3575_v26 = vpop.permute.xlu0 %859 }
 0x1e4   : > { %v1793_v47 = vpop.permute.xlu1 %1792 }
 0x1e5   : > { %v1796_v55 = vsel %vm1794_vm8, %v1791_v61, %v1793_v47 }
 0x1e6   : > { %v1800_v24 = vsel %vm1784_vm9, %v1796_v55, 0.0  ;;  %v752_v4 = vpop.permute.xlu0 %751 }
 0x1e7   : > { %v1808_v49 = vmul.f32 %v3499_v16, %v1800_v24  ;;  %v757_v12 = vsel %vm755_vm10, %v752_v4, %v2364_v19 }
 0x1e8   : > { %v761_v51 = vsel %vm745_vm13, %v757_v12, 0.0  ;;  %v1789_v30 = vpop.permute.xlu1 %1788  ;;  %vm3879_vm13 = vmmov %vm3877_vm4 }
 0x1e9   : > { %v769_v48 = vmul.f32 %v3561_v21, %v761_v51  ;;  %v1795_v17 = vsel %vm1794_vm8, %v1789_v30, %v1791_v61  ;;  %v1810_v18 = vadd.f32 %v1808_v49, %v1762_v50  ;;  %vm1888_vm8 = vcmask 785408  }
 0x1ea   : > { %v1799_v11 = vsel %vm1783_vm2, %v1795_v17, 0.0  ;;  %v1887_v14 = vpop.permute.xlu0 %1886  ;;  %vm3886_vm2 = vcmp.eq.s32.totalorder %v3414_v39, 1 }
 0x1eb   : > { %v1807_v57 = vmul.f32 %v3499_v16, %v1799_v11  ;;  %v771_v36 = vadd.f32 %v769_v48, %v723_v10  ;;  %v1826_v16 = vrot.slane %v1818_v38, %v2893_v6 }
 0x1ec   : > { %v3590_v1 = vpop.permute.xlu1 %1946 }
 0x1ed   : > { %v1809_v60 = vadd.f32 %v1807_v57, %v1761_v40  ;;  %vm1831_vm3 = vcmp.eq.s32.totalorder %v1826_v16, 1 }
 0x1ee   : > { %v3593_v42 = vpop.permute.xlu0 %1882 }
 0x1f0   : > { %v1839_v33 = vpop.permute.xlu1 %1838 }
 0x1f1   : > { %v1844_v61 = vsel %vm1842_vm0, %v1839_v33, %v1841_v62 }
 0x1f2   : > { %v1848_v56 = vsel %vm1832_vm14, %v1844_v61, 0.0  ;;  %v3603_v34 = vpop.permute.xlu0 %1932  ;;  %vm1877_vm14 = vcmp.eq.s32.totalorder %v1872_v43, 1 }
 0x1f3   : > { %v1856_v54 = vmul.f32 %v3535_v35, %v1848_v56 }
 0x1f4   : > { %v702_v23 = vpop.permute.xlu1 %701 }
 0x1f5   : > { %v708_v5 = vsel %vm3879_vm13, %v702_v23, %v704_v9  ;;  %v3599_v20 = vadd.f32 %v1856_v54, %v1810_v18 }
 0x1f6   : > { %v712_v40 = vsel %vm696_vm7, %v708_v5, 0.0  ;;  %v796_v52 = vpop.permute.xlu0 %795  ;;  %vm3880_vm7 = vmmov %vm3878_vm6  ;;  %vm3882_vm6 = vcmask 916480  }
 0x1f7   : > { %v720_v50 = vmul.f32 %v3525_v59, %v712_v40  ;;  %vm1907_vm4 = vmand %vm3880_vm7, %vm2971_vm5 }
 0x1f8   : > { %v1837_v41 = vpop.permute.xlu1 %1836  ;;  %v1908_v7 = vsel %vm1907_vm4, 1, %v3799_v37  ;;  %vm3883_vm11 = vmmov %vm3880_vm7  ;;  %vm3888_vm7 = vcmp.eq.s32.totalorder %v3511_v58, 1  ;;  %vm1984_vm4 = vcmask 769024  }
 0x1f9   : > { %v722_v53 = vadd.f32 %v720_v50, %v676_v8  ;;  %v1843_v62 = vsel %vm1842_vm0, %v1837_v41, %v1839_v33  ;;  %v1916_v49 = vrot.slane %v1908_v7, %v2901_v31  ;;  %vm1955_vm5 = vmand %vm3883_vm11, %vm2994_vm12  ;;  %v1912_v22 = vrot.slane %v1908_v7, %v2893_v6  ;;  %v866_v7 = vld [vmem:[%s3719_s4] sm:$0xf] }
 0x1fa   : > { %v1847_v10 = vsel %vm1831_vm3, %v1843_v62, 0.0  ;;  %v846_v47 = vpop.permute.xlu0 %845  ;;  %vm3884_vm9 = vmmov %vm3882_vm6  ;;  %v1956_v13 = vsel %vm1955_vm5, 1, %v3799_v37  ;;  %vm3885_vm12 = vcmp.eq.s32.totalorder %v3389_v27, 1  ;;  %vm3887_vm3 = vcmp.eq.s32.totalorder %v3479_v2, 1 }
 0x1fb   : > { %v1855_v9 = vmul.f32 %v3535_v35, %v1847_v10  ;;  %v1868_v35 = vrot.slane %v3881_v44, %v2901_v31  ;;  %v1920_v27 = vrot.slane %v1912_v22, %v2893_v6  ;;  %vm871_vm11 = vcmask 1043456  }
 0x1fc   : > { %v3610_v28 = vpop.permute.xlu1 %1994 }
 0x1fd   : > { %v3612_v46 = vadd.f32 %v1855_v9, %v1809_v60  ;;  %v1876_v32 = vrot.slane %v1868_v35, %v2893_v6  ;;  %v1964_v60 = vrot.slane %v1956_v13, %v2901_v31  ;;  %vm1925_vm13 = vcmp.eq.s32.totalorder %v1920_v27, 1 }
 0x1fe   : > { %v3622_v55 = vpop.permute.xlu0 %1980 }
 0x1ff   : > { %v1972_v31 = vrot.slane %v1964_v60, %v2893_v6 }
 0x200   : > { %v1885_v29 = vpop.permute.xlu1 %1884 }
 0x201   : > { %v1890_v11 = vsel %vm1888_vm8, %v1885_v29, %v1887_v14  ;;  %v1889_v39 = vsel %vm1888_vm8, %v3593_v42, %v1885_v29  ;;  %vm959_vm8 = vcmask 3072  }
 0x202   : > { %v844_v57 = vpop.permute.xlu0 %843  ;;  %v1893_v8 = vsel %vm1877_vm14, %v1889_v39, 0.0 }
 0x203   : > { %v850_v61 = vsel %vm849_vm1, %v844_v57, %v846_v47 }
 0x204   : > { %v750_v59 = vpop.permute.xlu1 %749  ;;  %v854_v5 = vsel %vm3887_vm3, %v850_v61, 0.0 }
 0x205   : > { %v756_v3 = vsel %vm755_vm10, %v750_v59, %v752_v4  ;;  %v1924_v4 = vrot.slane %v1916_v49, %v2893_v6  ;;  %vm1936_vm10 = vcmask 777216   ;;  %v862_v2 = vmul.f32 %v3575_v26, %v854_v5 }
 0x206   : > { %v760_v17 = vsel %vm3885_vm12, %v756_v3, 0.0 }
 0x207   : > { %v768_v37 = vmul.f32 %v3561_v21, %v760_v17  ;;  %vm1926_vm0 = vcmp.eq.s32.totalorder %v1924_v4, 1  ;;  %v1960_v21 = vrot.slane %v1956_v13, %v2893_v6 }
 0x208   : > { %v798_v19 = vpop.permute.xlu1 %797 }
 0x209   : > { %v803_v24 = vsel %vm3882_vm6, %v798_v19, %v2370_v63  ;;  %v802_v30 = vsel %vm3884_vm9, %v796_v52, %v798_v19  ;;  %v770_v56 = vadd.f32 %v768_v37, %v722_v53  ;;  %vm1974_vm6 = vcmp.eq.s32.totalorder %v1972_v31, 1 }
 0x20a   : > { %v807_v12 = vsel %vm791_vm15, %v803_v24, 0.0  ;;  %vm1878_vm15 = vcmp.eq.s32.totalorder %v1876_v32, 1  ;;  %v806_v45 = vsel %vm3886_vm2, %v802_v30, 0.0  ;;  %v1968_v62 = vrot.slane %v1960_v21, %v2893_v6 }
 0x20b   : > { %v815_v51 = vmul.f32 %v3549_v0, %v807_v12  ;;  %v1894_v33 = vsel %vm1878_vm15, %v1890_v11, 0.0  ;;  %v814_v14 = vmul.f32 %v3549_v0, %v806_v45 }
 0x20c   : > { %v1935_v48 = vpop.permute.xlu1 %1934  ;;  %v1902_v23 = vmul.f32 %v3569_v25, %v1894_v33  ;;  %vm1973_vm5 = vcmp.eq.s32.totalorder %v1968_v62, 1 }
 0x20d   : > { %v817_v18 = vadd.f32 %v815_v51, %v771_v36  ;;  %v1938_v36 = vsel %vm1936_vm10, %v3603_v34, %v1935_v48  ;;  %v816_v42 = vadd.f32 %v814_v14, %v770_v56 }
 0x20e   : > { %v1942_v54 = vsel %vm1926_vm0, %v1938_v36, 0.0  ;;  %v1904_v29 = vadd.f32 %v1902_v23, %v3599_v20 }
 0x20f   : > { %v1950_v41 = vmul.f32 %v3590_v1, %v1942_v54  ;;  %v864_v59 = vadd.f32 %v862_v2, %v816_v42 }
 0x210   : > { %v1931_v38 = vpop.permute.xlu1 %1930 }
 0x211   : > { %v1937_v0 = vsel %vm1936_vm10, %v1931_v38, %v3603_v34  ;;  %v1901_v34 = vmul.f32 %v3569_v25, %v1893_v8 }
 0x212   : > { %v1941_v10 = vsel %vm1925_vm13, %v1937_v0, 0.0 }
 0x213   : > { %v1949_v6 = vmul.f32 %v3590_v1, %v1941_v10  ;;  %v1903_v20 = vadd.f32 %v1901_v34, %v3612_v46 }
 0x214   : > { %v848_v16 = vpop.permute.xlu1 %847 }
 0x215   : > { %v851_v40 = vsel %vm849_vm1, %v846_v47, %v848_v16  ;;  %vm867_vm1 = vcmask 31744   ;;  %v1951_v1 = vadd.f32 %v1949_v6, %v1903_v20 }
 0x216   : > { %v855_v50 = vsel %vm3888_vm7, %v851_v40, 0.0 }
 0x217   : > { %v863_v53 = vmul.f32 %v3575_v26, %v855_v50  ;;  %v1952_v26 = vadd.f32 %v1950_v41, %v1904_v29 }
 0x218   : > { %v1983_v9 = vpop.permute.xlu1 %1982 }
 0x219   : > { %v1986_v52 = vsel %vm1984_vm4, %v3622_v55, %v1983_v9  ;;  %v865_v58 = vadd.f32 %v863_v53, %v817_v18 }
 0x21a   : > { %v1990_v47 = vsel %vm1974_vm6, %v1986_v52, 0.0 }
 0x21b   : > { %2253 = vmatprep.subr.msk.mxu0 %vm871_vm11, %v865_v58  ;;  %v1998_v25 = vmul.f32 %v3610_v28, %v1990_v47 }
 0x21c   : > { %v1979_v63 = vpop.permute.xlu1 %1978  ;;  %2254 = vmatpush1.msk.msra.mxu0 %vm871_vm11, %v864_v59 }
 0x21d   : > { %v1985_v44 = vsel %vm1984_vm4, %v1979_v63, %v3622_v55  ;;  %2255 = vmatmul.mubr.msk.f32.vlgmr.msra.gmra.mrb[0].mxu0 %vm867_vm1, %v866_v7  ;;  %v2000_v35 = vadd.f32 %v1998_v25, %v1952_v26 }
 0x21e   : > { %v1989_v19 = vsel %vm1973_vm5, %v1985_v44, 0.0 }
 0x21f   : > { %v1997_v24 = vmul.f32 %v3610_v28, %v1989_v19  ;;  %2259 = vmatprep.subr.msk.mxu1 %vm871_vm11, %v2000_v35 }
 0x221   : > { %v1999_v49 = vadd.f32 %v1997_v24, %v1951_v1 }
 0x223   : > { %2260 = vmatpush1.msk.msra.mxu1 %vm871_vm11, %v1999_v49 }
 0x224   : > { %2261 = vmatmul.mubr.msk.f32.vlgmr.msra.gmra.mrb[0].mxu1 %vm867_vm1, %v2001_v15 }
 0x2f0   : > { %v944_v46 = vpop.f32.mrb[0].mxu0 }
 0x2f1   : > { %v954_v55 = vsel %vm871_vm11, %v944_v46, 0.0  ;;  %v961_v3 = vmul.f32 %v944_v46, %v944_v46  ;;  %v946_v28 = vpop.f32.mrb[1].mxu0 }
 0x2f2   : > { %v951_v12 = vcombine.low %v944_v46, %v946_v28  ;;  %v955_v32 = vsel %vm871_vm11, %v946_v28, 0.0  ;;  %v962_v51 = vmul.f32 %v946_v28, %v946_v28 }
 0x2f3   : > { %v956_v30 = vadd.f32 %v955_v32, %v954_v55  ;;  %v963_v48 = vsel %vm871_vm11, %v961_v3, 0.0 }
 0x2f4   : > { %953 = vst [vmem:[%s421_s20] sm:$0xff] %v951_v12  ;;  %v964_v22 = vsel %vm871_vm11, %v962_v51, 0.0 }
 0x2f5   : > { %957 = vadd.xlane.f32.xlu0 %v956_v30  ;;  %v965_v13 = vadd.f32 %v964_v22, %v963_v48 }
 0x2f7   : > { %v2077_v17 = vpop.f32.mrb[0].mxu1  ;;  %966 = vadd.xlane.f32.xlu1 %v965_v13 }
 0x2f8   : > { %v2087_v4 = vsel %vm871_vm11, %v2077_v17, 0.0  ;;  %v2094_v18 = vmul.f32 %v2077_v17, %v2077_v17  ;;  %v2079_v43 = vpop.f32.mrb[1].mxu1 }
 0x2f9   : > { %v2084_v11 = vcombine.low %v2077_v17, %v2079_v43  ;;  %v2088_v57 = vsel %vm871_vm11, %v2079_v43, 0.0  ;;  %v2095_v45 = vmul.f32 %v2079_v43, %v2079_v43 }
 0x2fa   : > { %v2089_v60 = vadd.f32 %v2088_v57, %v2087_v4  ;;  %v2096_v37 = vsel %vm871_vm11, %v2094_v18, 0.0 }
 0x2fb   : > { %2086 = vst [vmem:[%s426_s24] sm:$0xff] %v2084_v11  ;;  %v2097_v27 = vsel %vm871_vm11, %v2095_v45, 0.0 }
 0x2fc   : > { %2090 = vadd.xlane.f32.xlu0 %v2089_v60  ;;  %v2098_v38 = vadd.f32 %v2097_v27, %v2096_v37 }
 0x300   : > { %2099 = vadd.xlane.f32.xlu0 %v2098_v38 }
 0x382   : > { %v958_v36 = vpop.xlane.xlu0 %957 }
 0x383   : > { %960 = vst.msk [vmem:[%s431_s25] sm:$0xf] %vm959_vm8, %v958_v36 }
 0x384   : > { %v967_v33 = vpop.xlane.xlu1 %966 }
 0x385   : > { %2256 = vst.msk [vmem:[%s431_s25 + $0x4] sm:$0xf] %vm959_vm8, %v967_v33 }
 0x389   : > { %v2091_v61 = vpop.xlane.xlu0 %2090 }
 0x38a   : > { %2262 = vst.msk [vmem:[%s431_s25 + $0x8] sm:$0xf] %vm959_vm8, %v2091_v61 }
 0x38d   : > { %v2100_v14 = vpop.xlane.xlu0 %2099 }
 0x38e   : > { %2263 = vst.msk [vmem:[%s431_s25 + $0xc] sm:$0xf] %vm959_vm8, %v2100_v14 }
 0x38f PF: > { %s22_s17 = sadd.s32 1, %s2388_s17  }
 0x390   : > { %p19_p4 = scmp.ge.s32.totalorder %s22_s17, 4  }
 0x392   :  { %21 = sbr.rel (!%p19_p4) target bundleno = 1 (0x1), region = 116 }

// kernel: mixed_op_pallas.3
= control target key start
LH: loop header
LB: loop body
LE: loop exit
PB: predicated region body
PF: predicated region fallthrough
CT: control target
= control target key end

     0   :  { %s4557_s21 = smov 0   ;;  %s7160_s0 = inlined_call_operand.vmem [shape: s32[2,256], index: 0, kind: input, shape index: {}]   ;;  %s7161_s1 = inlined_call_operand.vmem [shape: f32[2,4,256], index: 1, kind: input, shape index: {}]   ;;  %s7162_s2 = inlined_call_operand.vmem [shape: f32[4,9], index: 2, kind: input, shape index: {}]   ;;  %s7163_s3 = inlined_call_operand.vmem [shape: f32[4,4], index: 3, kind: input, shape index: {}]   ;;  %s7164_s4 = inlined_call_operand.vmem [shape: f32[4,25], index: 4, kind: input, shape index: {}]   ;;  %s7165_s5 = inlined_call_operand.vmem [shape: f32[4,4], index: 5, kind: input, shape index: {}]   ;;  %s7166_s6 = inlined_call_operand.vmem [shape: f32[4,9], index: 6, kind: input, shape index: {}]   ;;  %s7167_s7 = inlined_call_operand.vmem [shape: f32[4,4], index: 7, kind: input, shape index: {}]   ;;  %s7168_s8 = inlined_call_operand.vmem [shape: f32[4,25], index: 8, kind: input, shape index: {}]   ;;  %s7169_s9 = inlined_call_operand.vmem [shape: f32[4,4], index: 9, kind: input, shape index: {}]   ;;  %s7170_s10 = inlined_call_operand.vmem [shape: f32[2,4,256], index: 10, kind: output, shape index: {0}]   ;;  %s7171_s11 = inlined_call_operand.vmem [shape: f32[2,4,256], index: 11, kind: output, shape index: {1}]   ;;  %s7172_s12 = inlined_call_operand.vmem [shape: f32[2,4,256], index: 12, kind: output, shape index: {2}]   ;;  %s7173_s13 = inlined_call_operand.vmem [shape: f32[2,4,256], index: 13, kind: output, shape index: {3}]   ;;  %s7174_s14 = inlined_call_operand.vmem [shape: f32[2,4,256], index: 14, kind: output, shape index: {4}]   ;;  %s7175_s15 = inlined_call_operand.vmem [shape: f32[2,4,256], index: 15, kind: output, shape index: {5}]   ;;  %s7176_s16 = inlined_call_operand.vmem [shape: f32[2,12,4,1], index: 16, kind: output, shape index: {6}]  }
   0x1   :  { %7448 = sst [smem:[#allocation113_spill]] %s7160_s0 }
   0x2   :  { %7449 = sst [smem:[#allocation114_spill]] %s7161_s1 }
   0x3   :  { %7450 = sst [smem:[#allocation115_spill]] %s7162_s2 }
   0x4   :  { %7451 = sst [smem:[#allocation116_spill]] %s7163_s3 }
   0x5   :  { %7452 = sst [smem:[#allocation117_spill]] %s7164_s4 }
   0x6   :  { %7453 = sst [smem:[#allocation118_spill]] %s7165_s5 }
   0x7   :  { %7454 = sst [smem:[#allocation119_spill]] %s7170_s10 }
   0x8 LB: > { %s4144_s22 = sadd.s32 4294967295, %s4408_s21   ;;  %p4148_p0 = scmp.ge.s32.totalorder %s4408_s21, 1  ;;  %s4408_s21 = sphi %s4557_s21, %s27_s21  }
   0x9   : > { %p475_p1 = scmp.lt.s32.totalorder %s4408_s21, 3 }
   0xb   : > { %p476_p2 = pnand %p4148_p0, %p475_p1 }
   0xd   : > { %479 = sbr.rel (%p476_p2) target bundleno = 1491 (0x5d3), region = 60 }
  0x14   : > { %s7455_s2 = sld [smem:[#allocation115_spill]]  ;;  %v7223_v1 = vmov 0   ;;  %p555_p3 = scmp.lt.s32.totalorder %s4144_s22, 1  ;;  %v7215_v2 = vmov 0.0   ;;  %v7222_v4 = vmov 1   ;;  %v7220_v7 = vmov 2  }
  0x15   : > { %4281 = vset.pattern.permute.xlu1 %v7223_v1  ;;  %597 = vst [vmem:[#allocation2] sm:$0xf] %v7215_v2  ;;  %598 = vst [vmem:[#allocation2 + $0xc] sm:$0xf] %v7215_v2  ;;  %1082 = vmatprep.mubr.f32.mxu0 %v7215_v2  ;;  %s7456_s1 = sld [smem:[#allocation114_spill]]  ;;  %s7457_s18 = sld [smem:[#allocation113_spill]] }
  0x16   : > { %601 = vst [vmem:[#allocation3] sm:$0xf] %v7215_v2  ;;  %602 = vst [vmem:[#allocation3 + $0xc] sm:$0xf] %v7215_v2  ;;  %s8073_s22 = smov (!%p555_p3, %s4144_s22), 1  ;;  %2186 = vmatprep.mubr.f32.mxu1 %v7215_v2  ;;  %s7225_s19 = smov 17  }
  0x17   : > { %s4581_s27 = sshll.u32 %s8073_s22, 3  ;;  %s7198_s20 = smov 16   ;;  %v7459_v16 = vmov 0  ;;  %v7464_v20 = vmov 0  ;;  %v7217_v27 = vmov 3   ;;  %v7212_v32 = vmov 5  }
  0x18   : > { %s7194_s23 = smov 15   ;;  %s7192_s26 = smov 1   ;;  %v7211_v35 = vmov 12   ;;  %v7206_v43 = vmov 6   ;;  %v7204_v55 = vmov 7   ;;  %v7201_v60 = vmov 8  }
  0x19   : > { %4321 = vset.pattern.permute.xlu0 %v7211_v35  ;;  %s7178_s24 = smov 113   ;;  %s7182_s29 = smov 112  }
  0x1a   : > { %v647_v0 = vld [vmem:[%s7455_s2] sm:$0xf]  ;;  %s7180_s25 = smov 111   ;;  %s7474_s4 = sld [smem:[#allocation117_spill]] }
  0x1b   : > { %650 = vperm.xlu1 %4281, %v647_v0   ;;  %v691_v3 = vld [vmem:[%s7455_s2] sm:$0xf]  ;;  %s559_s30 = scalar_lea.vmem %s7456_s1, %s4581_s27  ;;  %s4429_s28 = smov 33  }
  0x1c   : > { %v596_v5 = vld [vmem:[%s559_s30] sm:$0xff]  ;;  %s7188_s30 = smov 127   ;;  %v819_v33 = vld [vmem:[#allocation2 + $0xc] sm:$0xf]  ;;  %s7186_s0 = smov 32  }
  0x1d   : > { %v4588_v6 = vmax.f32 %v596_v5, 0.0  ;;  %603 = vst [vmem:[#allocation3 + $0x4] sm:$0xff] %v596_v5  ;;  %v4595_v8 = vld [vmem:[%s7457_s18] sm:$0xf]  ;;  %v1625_v34 = vld [vmem:[#allocation2 + $0xc] sm:$0xf] }
  0x1e   : > { %7458 = vst [vmem:[#allocation4_spill] sm:$0xff] %v4595_v8  ;;  %vm606_vm0 = vcmp.ge.s32.totalorder %v4595_v8, 1  ;;  %vm703_vm1 = vcmp.lt.s32.totalorder %v4595_v8, 15  ;;  %v744_v25 = vld [vmem:[%s7455_s2] sm:$0xf]  ;;  %v4285_v36 = vpack.i.bf16 %v1625_v34, %v819_v33  ;;  %s4435_s17 = smov 14  }
  0x1f   : > { %4282 = vset.pattern.permute.xlu1 %v7222_v4  ;;  %600 = vst [vmem:[#allocation2 + $0x4] sm:$0xff] %v4588_v6  ;;  %v4602_v9 = vsel %vm606_vm0, 1, %v7223_v1  ;;  %v4607_v10 = vsel %vm703_vm1, 1, %v7223_v1  ;;  %v4190_v17 = vsel %vm606_vm0, 1.0, %v7215_v2  ;;  %v4673_v28 = vld [vmem:[%s7455_s2] sm:$0xf]  ;;  %v4679_v30 = vcombine.high %v4588_v6, %v4588_v6 }
  0x20   : > { %694 = vperm.xlu1 %4282, %v691_v3   ;;  %v4164_v14 = vrot.slane %v4602_v9, 9  ;;  %v4165_v15 = vrot.slane %v4607_v10, 9  ;;  %v854_v37 = vld [vmem:[%s7455_s2] sm:$0xf]  ;;  %v4192_v38 = vrot.slane %v4190_v17, 9  ;;  %v4193_v46 = vsel %vm703_vm1, 1.0, %v7215_v2 }
  0x21   : > { %v865_v39 = vld [vmem:[#allocation2 + $0xc] sm:$0xf]  ;;  %v902_v44 = vld [vmem:[%s7455_s2] sm:$0xf]  ;;  %v4194_v48 = vrot.slane %v4193_v46, 9  ;;  %vm7294_vm8 = vcmp.ge.s32.totalorder %v4595_v8, 2 }
  0x22   : > { %vm4624_vm2 = vcmp.ne.s32.totalorder %v4164_v14, 0  ;;  %vm4639_vm4 = vcmp.ne.s32.totalorder %v4165_v15, 0  ;;  %v1746_v40 = vld [vmem:[#allocation2 + $0xc] sm:$0xf]  ;;  %v948_v56 = vld [vmem:[%s7455_s2] sm:$0xf] }
  0x23   : > { %v7460_v16 = vsel %vm4624_vm2, 4294967295, %v7459_v16  ;;  %vm4635_vm3 = vmand %vm606_vm0, %vm4624_vm2  ;;  %v7465_v20 = vsel %vm4639_vm4, 4294967295, %v7464_v20  ;;  %v4291_v42 = vpack.i.bf16 %v1746_v40, %v865_v39  ;;  %v913_v50 = vld [vmem:[#allocation2 + $0xc] sm:$0xf]  ;;  %v996_v61 = vld [vmem:[%s7455_s2] sm:$0xf] }
  0x24   : > { %4283 = vset.pattern.permute.xlu1 %v7220_v7  ;;  %7461 = vst [vmem:[#allocation5_spill] sm:$0xff] %v7460_v16  ;;  %7466 = vst [vmem:[#allocation6_spill] sm:$0xff] %v7465_v20  ;;  %v4189_v21 = vsel %vm4635_vm3, 1.0, %v7215_v2  ;;  %v1773_v51 = vld [vmem:[#allocation2 + $0xc] sm:$0xf]  ;;  %vm7295_vm9 = vcmp.lt.s32.totalorder %v4595_v8, 14 }
  0x25   : > { %v3685_v22 = vadd.f32 %v4190_v17, %v4189_v21  ;;  %vm4650_vm5 = vmand %vm606_vm0, %vm4639_vm4  ;;  %v4297_v54 = vpack.i.bf16 %v1773_v51, %v913_v50  ;;  %v959_v57 = vld [vmem:[#allocation2 + $0xc] sm:$0xf]  ;;  %v1153_v5 = vld [vmem:[%s7474_s4] sm:$0xf]  ;;  %v7197_v51 = vmov 9   ;;  %s7711_s5 = sld [smem:[#allocation118_spill]] }
  0x26   : > { %v605_v11 = vld [vmem:[#allocation2 + $0x8] sm:$0xf]  ;;  %v4609_v12 = vld [vmem:[#allocation2] sm:$0xff]  ;;  %v4191_v24 = vsel %vm4650_vm5, 1.0, %v7215_v2  ;;  %vm4709_vm6 = vmand %vm703_vm1, %vm4624_vm2  ;;  %s7787_s3 = sld [smem:[#allocation116_spill]]  ;;  %s7788_s10 = sld [smem:[#allocation119_spill]] }
  0x27   : > { %638 = vrot.lane.b32.xlu1 %v605_v11, %s7225_s19  ;;  %634 = vrot.lane.b32.xlu0 %v4609_v12, %s7225_s19  ;;  %v4616_v13 = vcombine.high %v4609_v12, %v4609_v12  ;;  %v656_v18 = vld [vmem:[#allocation2 + $0x8] sm:$0xf]  ;;  %v3705_v26 = vadd.f32 %v4191_v24, %v3685_v22  ;;  %v4195_v49 = vsel %vm4709_vm6, 1.0, %v7215_v2  ;;  %v1800_v58 = vld [vmem:[#allocation2 + $0xc] sm:$0xf]  ;;  %vm4738_vm7 = vmand %vm703_vm1, %vm4639_vm4  ;;  %v7219_v24 = vmov 4  }
  0x28   : > { %v702_v29 = vld [vmem:[#allocation2 + $0x8] sm:$0xf]  ;;  %v4303_v59 = vpack.i.bf16 %v1800_v58, %v959_v57  ;;  %v4196_v0 = vsel %vm4738_vm7, 1.0, %v7215_v2  ;;  %v1199_v14 = vld [vmem:[%s7474_s4] sm:$0xf]  ;;  %vm1163_vm12 = vmand %vm7294_vm8, %vm4624_vm2  ;;  %s7385_s2 = smov 68  }
  0x29   : > { %v755_v31 = vld [vmem:[#allocation2 + $0x8] sm:$0xf]  ;;  %v3728_v41 = vadd.f32 %v4192_v38, %v3705_v26  ;;  %v1245_v17 = vld [vmem:[%s7474_s4] sm:$0xf]  ;;  %vm1257_vm14 = vmand %vm7294_vm8, %vm4639_vm4  ;;  %s7387_s1 = smov 64  }
  0x2a   : > { %v1111_v11 = vld [vmem:[#allocation2 + $0x8] sm:$0xf]  ;;  %v1293_v21 = vld [vmem:[%s7474_s4] sm:$0xf] }
  0x2b   : > { %680 = vrot.lane.b32.xlu1 %v4616_v13, %s7198_s20  ;;  %678 = vrot.lane.b32.xlu0 %v4609_v12, %s7198_s20  ;;  %v3737_v45 = vadd.f32 1.0, %v3728_v41  ;;  %v1162_v15 = vld [vmem:[#allocation2 + $0x8] sm:$0xf]  ;;  %v1421_v33 = vld [vmem:[%s7474_s4] sm:$0xf] }
  0x2c   : > { %v1256_v22 = vld [vmem:[#allocation2 + $0x8] sm:$0xf]  ;;  %v1448_v39 = vld [vmem:[%s7474_s4] sm:$0xf] }
  0x2d   : > { %v3766_v52 = vadd.f32 %v4194_v48, %v3737_v45  ;;  %v1304_v26 = vld [vmem:[#allocation2 + $0x8] sm:$0xf]  ;;  %v1475_v45 = vld [vmem:[%s7474_s4] sm:$0xf] }
  0x2e   : > { %v1405_v34 = vld [vmem:[#allocation2 + $0x8] sm:$0xf] }
  0x2f   : > { %733 = vrot.lane.b32.xlu1 %v4616_v13, %s7194_s23  ;;  %682 = vrot.lane.b32.xlu0 %v656_v18, %s7198_s20  ;;  %v3786_v53 = vadd.f32 %v4195_v49, %v3766_v52  ;;  %v1210_v18 = vld [vmem:[#allocation2 + $0x8] sm:$0xf]  ;;  %v1523_v52 = vld [vmem:[%s7474_s4] sm:$0xf] }
  0x30   : > { %v1432_v40 = vld [vmem:[#allocation2 + $0x8] sm:$0xf] }
  0x31   : > { %v3805_v63 = vadd.f32 %v4193_v46, %v3786_v53  ;;  %v1459_v46 = vld [vmem:[#allocation2 + $0x8] sm:$0xf] }
  0x32   : > { %v1486_v53 = vld [vmem:[#allocation2 + $0x8] sm:$0xf] }
  0x33   : > { %747 = vperm.xlu1 %4283, %v744_v25   ;;  %731 = vrot.lane.b32.xlu0 %v4609_v12, %s7194_s23  ;;  %v4746_v3 = vadd.f32 %v4196_v0, %v3805_v63  ;;  %v1346_v25 = vld [vmem:[%s7474_s4] sm:$0xf]  ;;  %v1534_v63 = vld [vmem:[#allocation2 + $0x8] sm:$0xf] }
  0x35   : > { %7473 = vst [vmem:[#allocation7_spill] sm:$0xff] %v4746_v3 }
  0x37   : > { %779 = vrot.lane.b32.xlu1 %v4616_v13, %s7192_s26  ;;  %636 = vrot.lane.b32.xlu0 %v4616_v13, %s7225_s19 }
  0x38   : > { %4284 = vset.pattern.permute.xlu1 %v7217_v27 }
  0x3b   : > { %793 = vperm.xlu1 %4284, %v4673_v28   ;;  %735 = vrot.lane.b32.xlu0 %v702_v29, %s7194_s23  ;;  %v1394_v29 = vld [vmem:[%s7474_s4] sm:$0xf] }
  0x3f   : > { %841 = vrot.lane.b32.xlu1 %v4588_v6, %s7188_s30  ;;  %777 = vrot.lane.b32.xlu0 %v4609_v12, %s7192_s26 }
  0x40   : > { %4290 = vset.pattern.permute.xlu1 %v7212_v32 }
  0x43   : > { %843 = vrot.lane.b32.xlu1 %v4679_v30, %s7188_s30  ;;  %781 = vrot.lane.b32.xlu0 %v755_v31, %s7192_s26  ;;  %v1357_v31 = vld [vmem:[#allocation2 + $0x8] sm:$0xf] }
  0x47   : > { %857 = vperm.xlu1 %4290, %v854_v37   ;;  %4286 = vrot.lane.b32.xlu0 %v4285_v36, %s7188_s30 }
  0x4b   : > { %891 = vrot.lane.b32.xlu1 %v4679_v30, %s7178_s24  ;;  %889 = vrot.lane.b32.xlu0 %v4588_v6, %s7178_s24 }
  0x4c   : > { %4296 = vset.pattern.permute.xlu1 %v7206_v43 }
  0x4f   : > { %905 = vperm.xlu1 %4296, %v902_v44   ;;  %4292 = vrot.lane.b32.xlu0 %v4291_v42, %s7178_s24  ;;  %s7184_s24 = smov 34  }
  0x53   : > { %937 = vrot.lane.b32.xlu1 %v4679_v30, %s7182_s29  ;;  %935 = vrot.lane.b32.xlu0 %v4588_v6, %s7182_s29 }
  0x54   : > { %4302 = vset.pattern.permute.xlu1 %v7204_v55 }
  0x57   : > { %951 = vperm.xlu1 %4302, %v948_v56   ;;  %4298 = vrot.lane.b32.xlu0 %v4297_v54, %s7182_s29  ;;  %s4431_s29 = smov 31  }
  0x5b   : > { %985 = vrot.lane.b32.xlu1 %v4679_v30, %s7180_s25  ;;  %983 = vrot.lane.b32.xlu0 %v4588_v6, %s7180_s25 }
  0x5c   : > { %4308 = vset.pattern.permute.xlu1 %v7201_v60 }
  0x5f   : > { %999 = vperm.xlu1 %4308, %v996_v61   ;;  %4304 = vrot.lane.b32.xlu0 %v4303_v59, %s7180_s25  ;;  %s4434_s25 = smov 18   ;;  %v7196_v59 = vmov 10   ;;  %v1569_v61 = vld [vmem:[%s7474_s4] sm:$0xf] }
  0x63   : > { %1142 = vrot.lane.b32.xlu1 %v4616_v13, %s7184_s24  ;;  %1140 = vrot.lane.b32.xlu0 %v4609_v12, %s7184_s24 }
  0x64   : > { %4309 = vset.pattern.permute.xlu1 %v7223_v1 }
  0x67   : > { %1156 = vperm.xlu1 %4309, %v1153_v5   ;;  %1144 = vrot.lane.b32.xlu0 %v1111_v11, %s7184_s24  ;;  %s7380_s24 = smov 30  }
  0x6b   : > { %1188 = vrot.lane.b32.xlu1 %v4616_v13, %s4429_s28  ;;  %1186 = vrot.lane.b32.xlu0 %v4609_v12, %s4429_s28 }
  0x6c   : > { %4310 = vset.pattern.permute.xlu1 %v7222_v4 }
  0x6f   : > { %1202 = vperm.xlu1 %4310, %v1199_v14   ;;  %1190 = vrot.lane.b32.xlu0 %v1162_v15, %s4429_s28  ;;  %s7378_s28 = smov 2   ;;  %v7191_v15 = vmov 11  }
  0x73   : > { %1234 = vrot.lane.b32.xlu1 %v4616_v13, %s7186_s0  ;;  %1232 = vrot.lane.b32.xlu0 %v4609_v12, %s7186_s0 }
  0x74   : > { %4311 = vset.pattern.permute.xlu1 %v7220_v7 }
  0x77   : > { %1248 = vperm.xlu1 %4311, %v1245_v17   ;;  %1236 = vrot.lane.b32.xlu0 %v1210_v18, %s7186_s0  ;;  %v1596_v17 = vld [vmem:[%s7474_s4] sm:$0xf]  ;;  %v1580_v18 = vld [vmem:[#allocation2 + $0x8] sm:$0xf]  ;;  %s4449_s0 = smov 110  }
  0x7b   : > { %1282 = vrot.lane.b32.xlu1 %v4616_v13, %s4431_s29  ;;  %1280 = vrot.lane.b32.xlu0 %v4609_v12, %s4431_s29 }
  0x7c   : > { %4312 = vset.pattern.permute.xlu1 %v7217_v27 }
  0x7f   : > { %1296 = vperm.xlu1 %4312, %v1293_v21   ;;  %1284 = vrot.lane.b32.xlu0 %v1256_v22, %s4431_s29  ;;  %s4444_s29 = smov 114  }
  0x83   : > { %1335 = vrot.lane.b32.xlu1 %v4616_v13, %s7380_s24  ;;  %1333 = vrot.lane.b32.xlu0 %v4609_v12, %s7380_s24 }
  0x84   : > { %4313 = vset.pattern.permute.xlu1 %v7219_v24 }
  0x87   : > { %1349 = vperm.xlu1 %4313, %v1346_v25   ;;  %1337 = vrot.lane.b32.xlu0 %v1304_v26, %s7380_s24 }
  0x8b   : > { %1383 = vrot.lane.b32.xlu1 %v4616_v13, %s4434_s25  ;;  %1381 = vrot.lane.b32.xlu0 %v4609_v12, %s4434_s25 }
  0x8c   : > { %4314 = vset.pattern.permute.xlu1 %v7212_v32  ;;  %v1875_v32 = vld [vmem:[#allocation2 + $0xc] sm:$0xf] }
  0x8f   : > { %1397 = vperm.xlu1 %4314, %v1394_v29   ;;  %1385 = vrot.lane.b32.xlu0 %v1357_v31, %s4434_s25  ;;  %v1641_v29 = vld [vmem:[%s7474_s4] sm:$0xf]  ;;  %v1652_v31 = vld [vmem:[#allocation2 + $0xc] sm:$0xf]  ;;  %s7507_s25 = smov 111  }
  0x93   : > { %1411 = vrot.lane.b32.xlu1 %v4616_v13, %s7225_s19  ;;  %1409 = vrot.lane.b32.xlu0 %v4609_v12, %s7225_s19 }
  0x94   : > { %4315 = vset.pattern.permute.xlu1 %v7206_v43  ;;  %v7214_v43 = vmov 18  }
  0x97   : > { %1424 = vperm.xlu1 %4315, %v1421_v33   ;;  %1413 = vrot.lane.b32.xlu0 %v1405_v34, %s7225_s19  ;;  %v3062_v33 = vld [vmem:[#allocation2 + $0xc] sm:$0xf]  ;;  %s7546_s19 = smov 126  }
  0x99   : > { %v4804_v37 = vpop.permute.xlu0 %634 }
  0x9a   : > { %v4801_v36 = vpop.permute.xlu1 %650  ;;  %7476 = vst [vmem:[#allocation9_spill] sm:$0xff] %v4804_v37  ;;  %v7531_v37 = vmov 1  }
  0x9b   : > { %7475 = vst [vmem:[#allocation8_spill] sm:$0xff] %v4801_v36  ;;  %1438 = vrot.lane.b32.xlu1 %v4616_v13, %s7198_s20  ;;  %1436 = vrot.lane.b32.xlu0 %v4609_v12, %s7198_s20  ;;  %v7251_v36 = vmov 24  }
  0x9c   : > { %4316 = vset.pattern.permute.xlu1 %v7204_v55  ;;  %v1816_v55 = vld [vmem:[%s7474_s4] sm:$0xf] }
  0x9d   : > { %v4816_v41 = vpop.permute.xlu0 %678 }
  0x9e   : > { %7478 = vst [vmem:[#allocation11_spill] sm:$0xff] %v4816_v41 }
  0x9f   : > { %v4810_v38 = vpop.permute.xlu1 %694  ;;  %1451 = vperm.xlu1 %4316, %v1448_v39   ;;  %1440 = vrot.lane.b32.xlu0 %v1432_v40, %s7198_s20  ;;  %v7208_v39 = vmov 13   ;;  %v4323_v40 = vpack.i.bf16 %v3062_v33, %v1652_v31  ;;  %s4454_s20 = smov 95  }
  0xa0   : > { %7477 = vst [vmem:[#allocation10_spill] sm:$0xff] %v4810_v38 }
  0xa1   : > { %v4819_v42 = vpop.permute.xlu0 %682 }
  0xa2   : > { %7479 = vst [vmem:[#allocation12_spill] sm:$0xff] %v4819_v42  ;;  %v7527_v42 = vmov 0  }
  0xa3   : > { %v4821_v44 = vpop.permute.xlu1 %638  ;;  %1465 = vrot.lane.b32.xlu1 %v4616_v13, %s7194_s23  ;;  %1463 = vrot.lane.b32.xlu0 %v4609_v12, %s7194_s23  ;;  %v961_v16 = vsel %vm4738_vm7, 1, %v7527_v42  ;;  %v1164_v47 = vsel %vm1163_vm12, 1, %v7527_v42 }
  0xa4   : > { %7480 = vst [vmem:[#allocation13_spill] sm:$0xff] %v4821_v44  ;;  %4317 = vset.pattern.permute.xlu1 %v7201_v60  ;;  %v7209_v60 = vmov 17   ;;  %v2231_v44 = vld [vmem:[%s7166_s6] sm:$0xf] }
  0xa5   : > { %v4831_v48 = vpop.permute.xlu0 %731 }
  0xa6   : > { %7481 = vst [vmem:[#allocation14_spill] sm:$0xff] %v4831_v48  ;;  %v2102_v48 = vld [vmem:[%s7474_s4] sm:$0xf] }
  0xa7   : > { %1478 = vperm.xlu1 %4317, %v1475_v45   ;;  %1467 = vrot.lane.b32.xlu0 %v1459_v46, %s7194_s23  ;;  %v4834_v49 = vpop.permute.xlu1 %680  ;;  %s7506_s23 = smov 112  }
  0xa8   : > { %7482 = vst [vmem:[#allocation15_spill] sm:$0xff] %v4834_v49  ;;  %v2294_v49 = vld [vmem:[#allocation2 + $0x8] sm:$0xf] }
  0xa9   : > { %v4836_v50 = vpop.permute.xlu0 %636 }
  0xaa   : > { %7483 = vst [vmem:[#allocation16_spill] sm:$0xff] %v4836_v50  ;;  %v2256_v50 = vld [vmem:[%s7166_s6] sm:$0xf] }
  0xab   : > { %1512 = vrot.lane.b32.xlu1 %v4616_v13, %s4435_s17  ;;  %1510 = vrot.lane.b32.xlu0 %v4609_v12, %s4435_s17  ;;  %v4846_v56 = vpop.permute.xlu1 %733 }
  0xac   : > { %4318 = vset.pattern.permute.xlu1 %v7197_v51  ;;  %7485 = vst [vmem:[#allocation18_spill] sm:$0xff] %v4846_v56 }
  0xad   : > { %v4844_v54 = vpop.permute.xlu0 %735 }
  0xae   : > { %7484 = vst [vmem:[#allocation17_spill] sm:$0xff] %v4844_v54  ;;  %v2240_v54 = vld [vmem:[#allocation2 + $0x8] sm:$0xf] }
  0xaf   : > { %1526 = vperm.xlu1 %4318, %v1523_v52   ;;  %1514 = vrot.lane.b32.xlu0 %v1486_v53, %s4435_s17  ;;  %s7230_s17 = smov 126   ;;  %v7200_v53 = vmov 16  }
  0xb1   : > { %v4848_v57 = vpop.permute.xlu0 %777 }
  0xb2   : > { %7486 = vst [vmem:[#allocation19_spill] sm:$0xff] %v4848_v57  ;;  %v4850_v58 = vpop.permute.xlu1 %747  ;;  %v2054_v57 = vld [vmem:[%s7474_s4] sm:$0xf] }
  0xb3   : > { %7487 = vst [vmem:[#allocation20_spill] sm:$0xff] %v4850_v58  ;;  %1558 = vrot.lane.b32.xlu1 %v4616_v13, %s7378_s28  ;;  %1556 = vrot.lane.b32.xlu0 %v4609_v12, %s7378_s28  ;;  %v2214_v58 = vld [vmem:[#allocation2] sm:$0xff] }
  0xb4   : > { %4319 = vset.pattern.permute.xlu1 %v7196_v59 }
  0xb5   : > { %v4860_v0 = vpop.permute.xlu0 %781 }
  0xb6   : > { %7488 = vst [vmem:[#allocation21_spill] sm:$0xff] %v4860_v0  ;;  %v4862_v5 = vpop.permute.xlu1 %779 }
  0xb7   : > { %7489 = vst [vmem:[#allocation22_spill] sm:$0xff] %v4862_v5  ;;  %1572 = vperm.xlu1 %4319, %v1569_v61   ;;  %1560 = vrot.lane.b32.xlu0 %v1534_v63, %s7378_s28  ;;  %v1687_v63 = vld [vmem:[%s7474_s4] sm:$0xf] }
  0xb9   : > { %v4865_v11 = vpop.permute.xlu0 %4286 }
  0xba   : > { %7490 = vst [vmem:[#allocation23_spill] sm:$0xff] %v4865_v11  ;;  %v4867_v14 = vpop.permute.xlu1 %793 }
  0xbb   : > { %7491 = vst [vmem:[#allocation24_spill] sm:$0xff] %v4867_v14  ;;  %1586 = vrot.lane.b32.xlu1 %v4616_v13, %s7192_s26  ;;  %1584 = vrot.lane.b32.xlu0 %v4609_v12, %s7192_s26  ;;  %v7190_v12 = vmov 14  }
  0xbc   : > { %4320 = vset.pattern.permute.xlu1 %v7191_v15 }
  0xbd   : > { %v4877_v21 = vpop.permute.xlu0 %889 }
  0xbe   : > { %7492 = vst [vmem:[#allocation25_spill] sm:$0xff] %v4877_v21  ;;  %v4879_v22 = vpop.permute.xlu1 %841  ;;  %v2065_v21 = vld [vmem:[#allocation2 + $0xc] sm:$0xf] }
  0xbf   : > { %7493 = vst [vmem:[#allocation26_spill] sm:$0xff] %v4879_v22  ;;  %1599 = vperm.xlu1 %4320, %v1596_v17   ;;  %1588 = vrot.lane.b32.xlu0 %v1580_v18, %s7192_s26  ;;  %v1698_v18 = vld [vmem:[#allocation2 + $0xc] sm:$0xf]  ;;  %s4451_s26 = smov 97  }
  0xc1   : > { %v4882_v25 = vpop.permute.xlu0 %4292 }
  0xc2   : > { %v4884_v13 = vpop.permute.xlu1 %843 }
  0xc3   : > { %7494 = vst [vmem:[#allocation27_spill] sm:$0xff] %v4884_v13  ;;  %1629 = vrot.lane.b32.xlu1 %v4588_v6, %s7188_s30  ;;  %1608 = vperm.xlu0 %4321, %v1596_v17   ;;  %v7244_v13 = vmov 22  }
  0xc4   : > { %4328 = vset.pattern.permute.xlu1 %v7190_v12  ;;  %v1735_v12 = vld [vmem:[%s7474_s4] sm:$0xf] }
  0xc5   : > { %v4889_v26 = vpop.permute.xlu0 %935 }
  0xc6   : > { %7495 = vst [vmem:[#allocation28_spill] sm:$0xff] %v4889_v26  ;;  %v4894_v34 = vpop.permute.xlu1 %857 }
  0xc7   : > { %7496 = vst [vmem:[#allocation29_spill] sm:$0xff] %v4894_v34  ;;  %1631 = vrot.lane.b32.xlu1 %v4679_v30, %s7188_s30  ;;  %4322 = vset.pattern.permute.xlu0 %v7208_v39  ;;  %s7503_s30 = smov 113  }
  0xc8   : > { %1644 = vperm.xlu0 %4322, %v1641_v29  }
  0xc9   : > { %v4899_v45 = vpop.permute.xlu0 %4298 }
  0xca   : > { %v4901_v46 = vpop.permute.xlu1 %891 }
  0xcb   : > { %7497 = vst [vmem:[#allocation30_spill] sm:$0xff] %v4901_v46  ;;  %1674 = vrot.lane.b32.xlu1 %v4588_v6, %s7230_s17  ;;  %v3237_v46 = vld [vmem:[#allocation2 + $0xc] sm:$0xf] }
  0xcc   : > { %4324 = vrot.lane.b32.xlu0 %v4323_v40, %s7230_s17  ;;  %v7203_v40 = vmov 15  }
  0xcd   : > { %v4906_v52 = vpop.permute.xlu0 %983  ;;  %4330 = vset.pattern.permute.xlu0 %v7200_v53  ;;  %v1789_v53 = vld [vmem:[%s7474_s4] sm:$0xf] }
  0xce   : > { %7498 = vst [vmem:[#allocation31_spill] sm:$0xff] %v4906_v52  ;;  %v4909_v61 = vpop.permute.xlu1 %905  ;;  %v3210_v52 = vld [vmem:[#allocation2 + $0xc] sm:$0xf] }
  0xcf   : > { %7499 = vst [vmem:[#allocation32_spill] sm:$0xff] %v4909_v61  ;;  %1676 = vrot.lane.b32.xlu1 %v4679_v30, %s7230_s17  ;;  %s7242_s17 = smov 96  }
  0xd0   : > { %1722 = vrot.lane.b32.xlu0 %v4588_v6, %s4444_s29 }
  0xd1   : > { %v4917_v17 = vpop.permute.xlu0 %4304 }
  0xd2   : > { %7500 = vst [vmem:[#allocation33_spill] sm:$0xff] %v4917_v17  ;;  %v4919_v29 = vpop.permute.xlu1 %937 }
  0xd3   : > { %7501 = vst [vmem:[#allocation34_spill] sm:$0xff] %v4919_v29  ;;  %1690 = vperm.xlu1 %4328, %v1687_v63   ;;  %v1762_v63 = vld [vmem:[%s7474_s4] sm:$0xf]  ;;  %v7235_v29 = vmov 20  }
  0xd4   : > { %1726 = vrot.lane.b32.xlu0 %v1698_v18, %s4444_s29 }
  0xd5   : > { %v4921_v31 = vpop.permute.xlu0 %1140 }
  0xd6   : > { %v4923_v33 = vpop.permute.xlu1 %951 }
  0xd7   : > { %7502 = vst [vmem:[#allocation35_spill] sm:$0xff] %v4923_v33  ;;  %1724 = vrot.lane.b32.xlu1 %v4679_v30, %s4444_s29  ;;  %s7246_s29 = smov 98  }
  0xd8   : > { %1750 = vrot.lane.b32.xlu0 %v4588_v6, %s7503_s30  ;;  %4329 = vset.pattern.permute.xlu1 %v7203_v40  ;;  %v7210_v40 = vmov 19  }
  0xd9   : > { %v4932_v15 = vpop.permute.xlu0 %1144 }
  0xda   : > { %v4937_v18 = vpop.permute.xlu1 %985 }
  0xdb   : > { %7504 = vst [vmem:[#allocation36_spill] sm:$0xff] %v4937_v18  ;;  %1738 = vperm.xlu1 %4329, %v1735_v12  }
  0xdc   : > { %1765 = vperm.xlu0 %4330, %v1762_v63  }
  0xdd   : > { %v4939_v59 = vpop.permute.xlu0 %1186 }
  0xde   : > { %v4941_v51 = vpop.permute.xlu1 %999 }
  0xdf   : > { %7505 = vst [vmem:[#allocation37_spill] sm:$0xff] %v4941_v51  ;;  %1752 = vrot.lane.b32.xlu1 %v4679_v30, %s7503_s30  ;;  %v1971_v51 = vld [vmem:[#allocation2 + $0xc] sm:$0xf] }
  0xe0   : > { %4331 = vset.pattern.permute.xlu0 %v7209_v60  ;;  %4333 = vset.pattern.permute.xlu1 %v7210_v40  ;;  %v4341_v26 = vpack.i.bf16 %v3210_v52, %v1971_v51  ;;  %v7238_v52 = vmov 21  }
  0xe1   : > { %1792 = vperm.xlu0 %4331, %v1789_v53   ;;  %v4950_v12 = vpop.permute.xlu0 %1190  ;;  %v1827_v53 = vld [vmem:[#allocation2 + $0xc] sm:$0xf] }
  0xe2   : > { %v4952_v63 = vpop.permute.xlu1 %1142 }
  0xe3   : > { %1777 = vrot.lane.b32.xlu1 %v4588_v6, %s7506_s23 }
  0xe5   : > { %4332 = vset.pattern.permute.xlu0 %v7214_v43  ;;  %v4960_v39 = vpop.permute.xlu0 %1232  ;;  %v3183_v43 = vld [vmem:[#allocation2 + $0xc] sm:$0xf] }
  0xe6   : > { %v4962_v60 = vpop.permute.xlu1 %1156  ;;  %1819 = vperm.xlu0 %4332, %v1816_v55   ;;  %v4334_v27 = vpack.i.bf16 %v3183_v43, %v1875_v32  ;;  %v1923_v32 = vld [vmem:[#allocation2 + $0xc] sm:$0xf] }
  0xe7   : > { %1779 = vrot.lane.b32.xlu1 %v4679_v30, %s7506_s23 }
  0xe9   : > { %v4966_v40 = vpop.permute.xlu0 %1236 }
  0xea   : > { %v4968_v35 = vpop.permute.xlu1 %1188  ;;  %1855 = vrot.lane.b32.xlu0 %v1827_v53, %s4449_s0  ;;  %v4981_v53 = vld [vmem:[#allocation2 + $0x4] sm:$0xff] }
  0xeb   : > { %1804 = vrot.lane.b32.xlu1 %v4588_v6, %s7507_s25  ;;  %4359 = vset.pattern.permute.xlu0 %v7222_v4  ;;  %7508 = vst [vmem:[#allocation38_spill] sm:$0xff] %v4981_v53  ;;  %v4990_v4 = vcombine.high %v4981_v53, %v4981_v53 }
  0xed   : > { %v4973_v2 = vpop.permute.xlu0 %1280 }
  0xee   : > { %v4975_v55 = vpop.permute.xlu1 %1202  ;;  %1899 = vrot.lane.b32.xlu0 %v4588_v6, %s7246_s29 }
  0xef   : > { %1806 = vrot.lane.b32.xlu1 %v4679_v30, %s7507_s25 }
  0xf1   : > { %v4983_v24 = vpop.permute.xlu0 %1284 }
  0xf2   : > { %v4985_v7 = vpop.permute.xlu1 %1234  ;;  %4335 = vrot.lane.b32.xlu0 %v4334_v27, %s7246_s29  ;;  %v1864_v27 = vld [vmem:[%s7474_s4] sm:$0xf] }
  0xf3   : > { %1851 = vrot.lane.b32.xlu1 %v4981_v53, %s4449_s0 }
  0xf5   : > { %v4993_v1 = vpop.permute.xlu0 %1333 }
  0xf6   : > { %v4995_v6 = vpop.permute.xlu1 %1248  ;;  %1947 = vrot.lane.b32.xlu0 %v4981_v53, %s4451_s26 }
  0xf7   : > { %1853 = vrot.lane.b32.xlu1 %v4990_v4, %s4449_s0  ;;  %s7382_s0 = smov 36  }
  0xf9   : > { %v5002_v43 = vpop.permute.xlu0 %1337 }
  0xfa   : > { %v5004_v3 = vpop.permute.xlu1 %1282  ;;  %1951 = vrot.lane.b32.xlu0 %v1923_v32, %s4451_s26  ;;  %v1912_v32 = vld [vmem:[%s7474_s4] sm:$0xf] }
  0xfb   : > { %1867 = vperm.xlu1 %4333, %v1864_v27  }
  0xfd   : > { %v5006_v33 = vpop.permute.xlu0 %1381 }
  0xfe   : > { %v5008_v18 = vpop.permute.xlu1 %1296  ;;  %1993 = vrot.lane.b32.xlu0 %v4981_v53, %s7242_s17 }
  0xff   : > { %1901 = vrot.lane.b32.xlu1 %v4679_v30, %s7246_s29  ;;  %v2017_v30 = vld [vmem:[#allocation2 + $0xc] sm:$0xf]  ;;  %s7521_s29 = smov 32  }
 0x100   : > { %4339 = vset.pattern.permute.xlu1 %v7235_v29  ;;  %v1960_v29 = vld [vmem:[%s7474_s4] sm:$0xf] }
 0x101   : > { %v5018_v27 = vpop.permute.xlu0 %1385 }
 0x102   : > { %v5020_v61 = vpop.permute.xlu1 %1335  ;;  %4342 = vrot.lane.b32.xlu0 %v4341_v26, %s7242_s17 }
 0x103   : > { %1915 = vperm.xlu1 %4339, %v1912_v32  }
 0x105   : > { %v5023_v34 = vpop.permute.xlu0 %1409 }
 0x106   : > { %7509 = vst [vmem:[#allocation39_spill] sm:$0xff] %v5023_v34  ;;  %v5025_v51 = vpop.permute.xlu1 %1349  ;;  %2041 = vrot.lane.b32.xlu0 %v4981_v53, %s4454_s20 }
 0x107   : > { %1949 = vrot.lane.b32.xlu1 %v4990_v4, %s4451_s26  ;;  %s7256_s26 = smov 94  }
 0x108   : > { %4340 = vset.pattern.permute.xlu1 %v7238_v52  ;;  %v4348_v52 = vpack.i.bf16 %v3237_v46, %v2065_v21  ;;  %v2215_v46 = vld [vmem:[#allocation2 + $0x8] sm:$0xf] }
 0x109   : > { %v5034_v26 = vpop.permute.xlu0 %1413 }
 0x10a   : > { %7510 = vst [vmem:[#allocation40_spill] sm:$0xff] %v5034_v26  ;;  %v5036_v32 = vpop.permute.xlu1 %1383  ;;  %2045 = vrot.lane.b32.xlu0 %v2017_v30, %s4454_s20 }
 0x10b   : > { %1963 = vperm.xlu1 %4340, %v1960_v29   ;;  %v2006_v29 = vld [vmem:[%s7474_s4] sm:$0xf]  ;;  %s4469_s4 = smov 124  }
 0x10d   : > { %v5039_v14 = vpop.permute.xlu0 %1436 }
 0x10e   : > { %7511 = vst [vmem:[#allocation41_spill] sm:$0xff] %v5039_v14  ;;  %v5041_v22 = vpop.permute.xlu1 %1397  ;;  %2089 = vrot.lane.b32.xlu0 %v4981_v53, %s7256_s26 }
 0x10f   : > { %7512 = vst [vmem:[#allocation42_spill] sm:$0xff] %v5041_v22  ;;  %1995 = vrot.lane.b32.xlu1 %v4990_v4, %s7242_s17  ;;  %s7517_s17 = smov 34  }
 0x110   : > { %4346 = vset.pattern.permute.xlu1 %v7244_v13  ;;  %v7248_v13 = vmov 23  }
 0x111   : > { %v5051_v30 = vpop.permute.xlu0 %1440 }
 0x112   : > { %7513 = vst [vmem:[#allocation43_spill] sm:$0xff] %v5051_v30  ;;  %v5053_v0 = vpop.permute.xlu1 %1411  ;;  %4349 = vrot.lane.b32.xlu0 %v4348_v52, %s7256_s26 }
 0x113   : > { %7514 = vst [vmem:[#allocation44_spill] sm:$0xff] %v5053_v0  ;;  %2009 = vperm.xlu1 %4346, %v2006_v29  }
 0x115   : > { %v5056_v38 = vpop.permute.xlu0 %1463 }
 0x116   : > { %7515 = vst [vmem:[#allocation45_spill] sm:$0xff] %v5056_v38  ;;  %v5058_v21 = vpop.permute.xlu1 %1424  ;;  %2219 = vrot.lane.b32.xlu0 %v2214_v58, %s7517_s17 }
 0x117   : > { %7516 = vst [vmem:[#allocation46_spill] sm:$0xff] %v5058_v21  ;;  %2043 = vrot.lane.b32.xlu1 %v4990_v4, %s4454_s20  ;;  %s7391_s20 = smov 62  }
 0x118   : > { %4347 = vset.pattern.permute.xlu1 %v7248_v13 }
 0x119   : > { %v5067_v52 = vpop.permute.xlu0 %1467 }
 0x11a   : > { %7518 = vst [vmem:[#allocation47_spill] sm:$0xff] %v5067_v52  ;;  %v5069_v29 = vpop.permute.xlu1 %1438  ;;  %2223 = vrot.lane.b32.xlu0 %v2215_v46, %s7517_s17 }
 0x11b   : > { %7519 = vst [vmem:[#allocation48_spill] sm:$0xff] %v5069_v29  ;;  %2057 = vperm.xlu1 %4347, %v2054_v57   ;;  %v5086_v57 = vcombine.high %v2214_v58, %v2214_v58 }
 0x11d   : > { %v5077_v13 = vpop.permute.xlu0 %1510  ;;  %7524 = vst [vmem:[#allocation52_spill] sm:$0xff] %v5086_v57 }
 0x11e   : > { %v5072_v5 = vpop.permute.xlu1 %1451  ;;  %2244 = vrot.lane.b32.xlu0 %v2214_v58, %s7521_s29  ;;  %7522 = vst [vmem:[#allocation50_spill] sm:$0xff] %v5077_v13 }
 0x11f   : > { %7520 = vst [vmem:[#allocation49_spill] sm:$0xff] %v5072_v5  ;;  %2091 = vrot.lane.b32.xlu1 %v4990_v4, %s7256_s26  ;;  %s7803_s26 = smov 2  }
 0x120   : > { %4353 = vset.pattern.permute.xlu1 %v7251_v36  ;;  %v2267_v36 = vld [vmem:[#allocation2 + $0x8] sm:$0xf] }
 0x121   : > { %v5088_v46 = vpop.permute.xlu0 %1514 }
 0x122   : > { %v5083_v56 = vpop.permute.xlu1 %1465  ;;  %2248 = vrot.lane.b32.xlu0 %v2240_v54, %s7521_s29  ;;  %7525 = vst [vmem:[#allocation53_spill] sm:$0xff] %v5088_v46 }
 0x123   : > { %7523 = vst [vmem:[#allocation51_spill] sm:$0xff] %v5083_v56  ;;  %2105 = vperm.xlu1 %4353, %v2102_v48  }
 0x125   : > { %v5102_v48 = vpop.permute.xlu0 %1556 }
 0x126   : > { %v5090_v4 = vpop.permute.xlu1 %1478  ;;  %2271 = vrot.lane.b32.xlu0 %v2214_v58, %s7380_s24  ;;  %7529 = vst [vmem:[#allocation56_spill] sm:$0xff] %v5102_v48  ;;  %v7536_v48 = vmov 2  }
 0x127   : > { %7526 = vst [vmem:[#allocation54_spill] sm:$0xff] %v5090_v4  ;;  %2221 = vrot.lane.b32.xlu1 %v5086_v57, %s7517_s17 }
 0x128   : > { %4354 = vset.pattern.permute.xlu1 %v7527_v42 }
 0x129   : > { %v5113_v53 = vpop.permute.xlu0 %1560 }
 0x12a   : > { %v5099_v54 = vpop.permute.xlu1 %1512  ;;  %2275 = vrot.lane.b32.xlu0 %v2267_v36, %s7380_s24  ;;  %7532 = vst [vmem:[#allocation58_spill] sm:$0xff] %v5113_v53  ;;  %v2310_v53 = vld [vmem:[%s7166_s6] sm:$0xf] }
 0x12b   : > { %7528 = vst [vmem:[#allocation55_spill] sm:$0xff] %v5099_v54  ;;  %2234 = vperm.xlu1 %4354, %v2231_v44   ;;  %v2637_v44 = vld [vmem:[%s7168_s8] sm:$0xf] }
 0x12e   : > { %v5104_v41 = vpop.permute.xlu1 %1526  ;;  %2298 = vrot.lane.b32.xlu0 %v2214_v58, %s7378_s28 }
 0x12f   : > { %7530 = vst [vmem:[#allocation57_spill] sm:$0xff] %v5104_v41  ;;  %2246 = vrot.lane.b32.xlu1 %v5086_v57, %s7521_s29  ;;  %v2283_v41 = vld [vmem:[%s7166_s6] sm:$0xf] }
 0x130   : > { %4355 = vset.pattern.permute.xlu1 %v7531_v37  ;;  %v5125_v37 = vpop.permute.xlu0 %1584 }
 0x131   : > { %7535 = vst [vmem:[#allocation61_spill] sm:$0xff] %v5125_v37  ;;  %v7541_v37 = vmov 3  }
 0x132   : > { %v5115_v36 = vpop.permute.xlu1 %1558  ;;  %2302 = vrot.lane.b32.xlu0 %v2294_v49, %s7378_s28 }
 0x133   : > { %7533 = vst [vmem:[#allocation59_spill] sm:$0xff] %v5115_v36  ;;  %2259 = vperm.xlu1 %4355, %v2256_v50   ;;  %v7538_v50 = vmov 4   ;;  %v613_v36 = vlaneseq }
 0x136   : > { %v5121_v58 = vpop.permute.xlu1 %1572  ;;  %2640 = vperm.xlu0 %4359, %v2637_v44  }
 0x137   : > { %7534 = vst [vmem:[#allocation60_spill] sm:$0xff] %v5121_v58  ;;  %2273 = vrot.lane.b32.xlu1 %v5086_v57, %s7380_s24  ;;  %v5135_v58 = vpop.permute.xlu0 %1588  ;;  %s569_s24 = scalar_lea.vmem %s7171_s11, %s4581_s27 }
 0x138   : > { %4356 = vset.pattern.permute.xlu1 %v7536_v48  ;;  %7539 = vst [vmem:[#allocation63_spill] sm:$0xff] %v5135_v58 }
 0x13a   : > { %v5131_v49 = vpop.permute.xlu1 %1586  ;;  %4360 = vset.pattern.permute.xlu0 %v7538_v50 }
 0x13b   : > { %7537 = vst [vmem:[#allocation62_spill] sm:$0xff] %v5131_v49  ;;  %2286 = vperm.xlu1 %4356, %v2283_v41   ;;  %802 = vperm.xlu0 %4360, %v4673_v28   ;;  %v5150_v28 = vshrl.u32 %v613_v36, 7 }
 0x13d   : > { %v5160_v49 = vsub.s32 0, %v5150_v28  ;;  %v5167_v36 = vsub.s32 2, %v5150_v28  ;;  %v5200_v46 = vsub.s32 3, %v5150_v28 }
 0x13e   : > { %v5137_v44 = vpop.permute.xlu1 %1599 }
 0x13f   : > { %7540 = vst [vmem:[#allocation64_spill] sm:$0xff] %v5137_v44  ;;  %2300 = vrot.lane.b32.xlu1 %v5086_v57, %s7378_s28  ;;  %v5155_v44 = vsel %vm7294_vm8, 1, %v7527_v42  ;;  %v664_v19 = vrot.slane %v4602_v9, %v5167_v36  ;;  %7553 = vst [vmem:[#allocation73_spill] sm:$0xff] %v5200_v46  ;;  %v965_v26 = vrot.slane %v961_v16, %v5160_v49  ;;  %s564_s28 = scalar_lea.vmem %s7788_s10, %s4581_s27  ;;  %s7835_s10 = smov 92  }
 0x140   : > { %4357 = vset.pattern.permute.xlu1 %v7541_v37  ;;  %v800_v37 = vld [vmem:[#allocation2 + $0x4] sm:$0xff]  ;;  %v4170_v58 = vrot.slane %v5155_v44, 9 }
 0x141   : > { %v5224_v21 = vrot.slane %v664_v19, %v5160_v49  ;;  %v827_v19 = vrot.slane %v4607_v10, %v5200_v46 }
 0x142   : > { %v5146_v50 = vpop.permute.xlu1 %1629  ;;  %v5148_v41 = vpop.permute.xlu0 %1608  ;;  %vm5178_vm10 = vcmp.ne.s32.totalorder %v4170_v58, 0  ;;  %v5196_v58 = vsub.s32 1, %v5150_v28 }
 0x143   : > { %7542 = vst [vmem:[#allocation65_spill] sm:$0xff] %v5146_v50  ;;  %7543 = vst [vmem:[#allocation66_spill] sm:$0xff] %v5148_v41  ;;  %2313 = vperm.xlu1 %4357, %v2310_v53   ;;  %v612_v53 = vsel %vm4635_vm3, 1, %v7527_v42 }
 0x144   : > { %v616_v4 = vrot.slane %v612_v53, %v5160_v49  ;;  %7552 = vst [vmem:[#allocation72_spill] sm:$0xff] %v5196_v58  ;;  %v620_v54 = vrot.slane %v612_v53, %v5167_v36  ;;  %vm1117_vm11 = vmand %vm7294_vm8, %vm5178_vm10  ;;  %v5281_v20 = vrot.slane %v827_v19, %v5196_v58  ;;  %v969_v19 = vrot.slane %v961_v16, %v5167_v36 }
 0x145   : > { %7557 = vst [vmem:[#allocation77_spill] sm:$0xff] %v5224_v21  ;;  %vm1358_vm3 = vmand %vm606_vm0, %vm5178_vm10 }
 0x146   : > { %v5157_v57 = vpop.permute.xlu1 %1631  ;;  %v5227_v14 = vrot.slane %v616_v4, %v5160_v49  ;;  %7569 = vst [vmem:[#allocation87_spill] sm:$0xff] %v5281_v20 }
 0x147   : > { %7544 = vst [vmem:[#allocation67_spill] sm:$0xff] %v5157_v57  ;;  %v5163_v13 = vpop.permute.xlu0 %1644  ;;  %2343 = vrot.lane.b32.xlu1 %v800_v37, %s7546_s19  ;;  %v660_v57 = vrot.slane %v4602_v9, %v5160_v49  ;;  %v5185_v37 = vsel %vm7295_vm9, 1, %v7527_v42 }
 0x148   : > { %7545 = vst [vmem:[#allocation68_spill] sm:$0xff] %v5163_v13  ;;  %4358 = vset.pattern.permute.xlu1 %v7527_v42  ;;  %v7548_v13 = vmov 0  ;;  %v4171_v23 = vrot.slane %v5185_v37, 9  ;;  %7558 = vst [vmem:[#allocation78_spill] sm:$0xff] %v5227_v14 }
 0x149   : > { %v7549_v13 = vsel %vm5178_vm10, 4294967295, %v7548_v13  ;;  %v5214_v53 = vrot.slane %v660_v57, %v5160_v49  ;;  %v867_v57 = vsel %vm4709_vm6, 1, %v7527_v42  ;;  %vm7301_vm6 = vcmask 277504  }
 0x14a   : > { %v5174_v50 = vpop.permute.xlu1 %1674  ;;  %7550 = vst [vmem:[#allocation70_spill] sm:$0xff] %v7549_v13  ;;  %vm5249_vm13 = vcmp.ne.s32.totalorder %v4171_v23, 0  ;;  %v871_v30 = vrot.slane %v867_v57, %v5160_v49  ;;  %v875_v62 = vrot.slane %v867_v57, %v5167_v36  ;;  %v7651_v13 = vld [vmem:[#allocation61_spill] sm:$0xff] }
 0x14b   : > { %7547 = vst [vmem:[#allocation69_spill] sm:$0xff] %v5174_v50  ;;  %v5187_v41 = vpop.permute.xlu0 %4324  ;;  %v709_v50 = vsel %vm4650_vm5, 1, %v7527_v42  ;;  %7555 = vst [vmem:[#allocation75_spill] sm:$0xff] %v5214_v53 }
 0x14c   : > { %7551 = vst [vmem:[#allocation71_spill] sm:$0xff] %v5187_v41  ;;  %v2591_v41 = vld [vmem:[%s7168_s8] sm:$0xf]  ;;  %v717_v38 = vrot.slane %v709_v50, %v5167_v36  ;;  %v713_v56 = vrot.slane %v709_v50, %v5160_v49  ;;  %v5235_v50 = vrot.slane %v620_v54, %v5160_v49  ;;  %v7561_v54 = vmov 0  ;;  %vm1310_vm15 = vmand %vm7294_vm8, %vm5249_vm13 }
 0x14d   : > { %2594 = vperm.xlu1 %4358, %v2591_v41   ;;  %v759_v41 = vrot.slane %v4602_v9, %v5196_v58  ;;  %v7562_v54 = vsel %vm5249_vm13, 4294967295, %v7561_v54  ;;  %v5302_v34 = vrot.slane %v875_v62, %v5160_v49  ;;  %vm1487_vm5 = vmand %vm606_vm0, %vm5249_vm13  ;;  %vm1387_vm8 = vcmask 146432  }
 0x14e   : > { %v5211_v5 = vpop.permute.xlu1 %1676  ;;  %7559 = vst [vmem:[#allocation79_spill] sm:$0xff] %v5235_v50  ;;  %v5243_v4 = vrot.slane %v717_v38, %v5160_v49  ;;  %7563 = vst [vmem:[#allocation81_spill] sm:$0xff] %v7562_v54  ;;  %v823_v38 = vrot.slane %v4607_v10, %v5196_v58 }
 0x14f   : > { %7554 = vst [vmem:[#allocation74_spill] sm:$0xff] %v5211_v5  ;;  %v5221_v52 = vpop.permute.xlu0 %1722  ;;  %v763_v5 = vrot.slane %v4602_v9, %v5200_v46  ;;  %v5257_v9 = vrot.slane %v713_v56, %v5160_v49  ;;  %v917_v56 = vrot.slane %v4607_v10, %v5160_v49  ;;  %7573 = vst [vmem:[#allocation91_spill] sm:$0xff] %v5302_v34 }
 0x150   : > { %7556 = vst [vmem:[#allocation76_spill] sm:$0xff] %v5221_v52  ;;  %v1118_v52 = vsel %vm1117_vm11, 1, %v7527_v42  ;;  %7560 = vst [vmem:[#allocation80_spill] sm:$0xff] %v5243_v4  ;;  %v5296_v20 = vrot.slane %v823_v38, %v5196_v58  ;;  %v5323_v38 = vrot.slane %v965_v26, %v5160_v49  ;;  %vm1192_vm11 = vcmask 269312  }
 0x151   : > { %4361 = vset.pattern.permute.xlu1 %v7536_v48  ;;  %7565 = vst [vmem:[#allocation83_spill] sm:$0xff] %v5257_v9  ;;  %v921_v48 = vrot.slane %v4607_v10, %v5167_v36  ;;  %v1122_v22 = vrot.slane %v1118_v52, %v5160_v49  ;;  %v5278_v57 = vrot.slane %v763_v5, %v5196_v58 }
 0x152   : > { %v5253_v29 = vpop.permute.xlu1 %1690  ;;  %v1172_v10 = vrot.slane %v1164_v47, %v5167_v36  ;;  %7571 = vst [vmem:[#allocation89_spill] sm:$0xff] %v5296_v20  ;;  %7578 = vst [vmem:[#allocation96_spill] sm:$0xff] %v5323_v38 }
 0x153   : > { %7564 = vst [vmem:[#allocation82_spill] sm:$0xff] %v5253_v29  ;;  %v5267_v23 = vpop.permute.xlu0 %1726  ;;  %v5270_v29 = vrot.slane %v759_v41, %v5196_v58  ;;  %7568 = vst [vmem:[#allocation86_spill] sm:$0xff] %v5278_v57  ;;  %v1126_v41 = vrot.slane %v1118_v52, %v5167_v36  ;;  %v5299_v57 = vrot.slane %v871_v30, %v5160_v49  ;;  %v1311_v30 = vsel %vm1310_vm15, 1, %v7527_v42 }
 0x154   : > { %7566 = vst [vmem:[#allocation84_spill] sm:$0xff] %v5267_v23  ;;  %v1168_v23 = vrot.slane %v1164_v47, %v5160_v49  ;;  %v1214_v52 = vrot.slane %v5155_v44, %v5160_v49  ;;  %v5309_v47 = vrot.slane %v917_v56, %v5160_v49  ;;  %v5315_v16 = vrot.slane %v1122_v22, %v5160_v49 }
 0x155   : > { %7567 = vst [vmem:[#allocation85_spill] sm:$0xff] %v5270_v29  ;;  %v1258_v29 = vsel %vm1257_vm14, 1, %v7527_v42  ;;  %7572 = vst [vmem:[#allocation90_spill] sm:$0xff] %v5299_v57  ;;  %v1218_v56 = vrot.slane %v5155_v44, %v5167_v36  ;;  %v5332_v22 = vrot.slane %v1126_v41, %v5160_v49  ;;  %v1315_v41 = vrot.slane %v1311_v30, %v5160_v49 }
 0x156   : > { %v5292_v5 = vpop.permute.xlu1 %1724  ;;  %7575 = vst [vmem:[#allocation93_spill] sm:$0xff] %v5309_v47  ;;  %7577 = vst [vmem:[#allocation95_spill] sm:$0xff] %v5315_v16  ;;  %v5326_v62 = vrot.slane %v1168_v23, %v5160_v49  ;;  %v5345_v23 = vrot.slane %v969_v19, %v5160_v49  ;;  %v5348_v38 = vrot.slane %v1214_v52, %v5160_v49  ;;  %vm7302_vm7 = vcmp.eq.s32.totalorder %v5315_v16, 1 }
 0x157   : > { %7570 = vst [vmem:[#allocation88_spill] sm:$0xff] %v5292_v5  ;;  %v5306_v0 = vpop.permute.xlu0 %1750  ;;  %v5312_v5 = vrot.slane %v921_v48, %v5160_v49  ;;  %v1262_v48 = vrot.slane %v1258_v29, %v5160_v49  ;;  %7579 = vst [vmem:[#allocation97_spill] sm:$0xff] %v5332_v22  ;;  %v5358_v19 = vrot.slane %v1218_v56, %v5160_v49  ;;  %vm7304_vm15 = vcmask 261120  }
 0x158   : > { %7574 = vst [vmem:[#allocation92_spill] sm:$0xff] %v5306_v0  ;;  %v5335_v0 = vrot.slane %v1172_v10, %v5160_v49  ;;  %7581 = vst [vmem:[#allocation99_spill] sm:$0xff] %v5345_v23  ;;  %v1359_v10 = vsel %vm1358_vm3, 1, %v7527_v42  ;;  %vm1181_vm0 = vcmp.eq.s32.totalorder %v5326_v62, 1  ;;  %vm7303_vm3 = vcmp.eq.s32.totalorder %v5348_v38, 1 }
 0x159   : > { %7576 = vst [vmem:[#allocation94_spill] sm:$0xff] %v5312_v5  ;;  %v1266_v5 = vrot.slane %v1258_v29, %v5167_v36  ;;  %7582 = vst [vmem:[#allocation100_spill] sm:$0xff] %v5348_v38  ;;  %v1319_v29 = vrot.slane %v1311_v30, %v5167_v36  ;;  %v5361_v52 = vrot.slane %v1262_v48, %v5160_v49  ;;  %v4460_v30 = vmov 839922192   ;;  %v7641_v38 = vld [vmem:[#allocation57_spill] sm:$0xff] }
 0x15a   : > { %v5342_v26 = vpop.permute.xlu1 %1738  ;;  %7584 = vst [vmem:[#allocation102_spill] sm:$0xff] %v5358_v19  ;;  %v1363_v23 = vrot.slane %v1359_v10, %v5160_v49  ;;  %v1367_v34 = vrot.slane %v1359_v10, %v5167_v36  ;;  %v805_v57 = vunpack.c.l.s4 %v4460_v30  ;;  %vm1182_vm14 = vcmp.eq.s32.totalorder %v5335_v0, 1 }
 0x15b   : > { %7580 = vst [vmem:[#allocation98_spill] sm:$0xff] %v5342_v26  ;;  %v5352_v47 = vpop.permute.xlu0 %1765  ;;  %v1488_v26 = vsel %vm1487_vm5, 1, %v7527_v42  ;;  %v5375_v56 = vrot.slane %v1315_v41, %v5160_v49  ;;  %v5378_v48 = vrot.slane %v1319_v29, %v5160_v49  ;;  %v1538_v10 = vrot.slane %v5155_v44, %v5196_v58 }
 0x15c   : > { %7583 = vst [vmem:[#allocation101_spill] sm:$0xff] %v5352_v47  ;;  %v5366_v47 = vrot.slane %v1266_v5, %v5160_v49  ;;  %v1492_v5 = vrot.slane %v1488_v26, %v5160_v49  ;;  %v1496_v9 = vrot.slane %v1488_v26, %v5167_v36  ;;  %v1542_v41 = vrot.slane %v5155_v44, %v5200_v46 }
 0x15d   : > { %7586 = vst [vmem:[#allocation104_spill] sm:$0xff] %v5375_v56  ;;  %7587 = vst [vmem:[#allocation105_spill] sm:$0xff] %v5378_v48  ;;  %v5392_v29 = vrot.slane %v1363_v23, %v5160_v49  ;;  %v5395_v26 = vrot.slane %v1367_v34, %v5160_v49  ;;  %vm7305_vm5 = vcmask 244736   ;;  %vm7306_vm9 = vcmp.eq.s32.totalorder %v5375_v56, 1 }
 0x15e   : > { %v5370_v20 = vpop.permute.xlu1 %1752  ;;  %v1147_v44 = vsel %vm7301_vm6, %v4921_v31, %v4952_v63  ;;  %v5408_v34 = vrot.slane %v1492_v5, %v5160_v49  ;;  %v5414_v23 = vrot.slane %v1538_v10, %v5196_v58  ;;  %v1239_v31 = vsel %vm7304_vm15, %v4960_v39, %v4985_v7 }
 0x15f   : > { %7585 = vst [vmem:[#allocation103_spill] sm:$0xff] %v5370_v20  ;;  %v806_v20 = vunpack.c.0.s8 %v805_v57  ;;  %v5411_v57 = vrot.slane %v1496_v9, %v5160_v49  ;;  %v5424_v17 = vrot.slane %v1542_v41, %v5196_v58  ;;  %v1148_v10 = vsel %vm7301_vm6, %v4952_v63, %v4932_v15 }
 0x160   : > { %v5384_v30 = vpop.permute.xlu0 %1792  ;;  %7590 = vst [vmem:[#allocation108_spill] sm:$0xff] %v5414_v23  ;;  %v1151_v41 = vsel %vm7302_vm7, %v1147_v44, 0.0  ;;  %v1660_v15 = vrot.slane %v5185_v37, %v5200_v46  ;;  %vm7307_vm6 = vcmask 138240   ;;  %v1240_v63 = vsel %vm7304_vm15, %v4985_v7, %v4966_v40 }
 0x161   : > { %7588 = vst [vmem:[#allocation106_spill] sm:$0xff] %v5384_v30  ;;  %v1193_v30 = vsel %vm1192_vm11, %v4939_v59, %v4968_v35  ;;  %7591 = vst [vmem:[#allocation109_spill] sm:$0xff] %v5424_v17  ;;  %vm7593_vm7 = vcmask 252928   ;;  %vm7594_vm12 = vcmp.eq.s32.totalorder %v5332_v22, 1  ;;  %v1159_v44 = vmul.f32 %v4962_v60, %v1151_v41  ;;  %v7630_v22 = vld [vmem:[#allocation54_spill] sm:$0xff] }
 0x162   : > { %v5397_v54 = vpop.permute.xlu1 %1777  ;;  %v1197_v59 = vsel %vm1181_vm0, %v1193_v30, 0.0  ;;  %vm1699_vm0 = vmand %vm703_vm1, %vm5178_vm10  ;;  %v1287_v62 = vsel %vm7593_vm7, %v4973_v2, %v5004_v3  ;;  %v1152_v30 = vsel %vm7594_vm12, %v1148_v10, 0.0  ;;  %v1656_v2 = vrot.slane %v5185_v37, %v5196_v58 }
 0x163   : > { %7589 = vst [vmem:[#allocation107_spill] sm:$0xff] %v5397_v54  ;;  %v1194_v54 = vsel %vm1192_vm11, %v4968_v35, %v4950_v12  ;;  %vm1376_vm11 = vcmp.eq.s32.totalorder %v5392_v29, 1  ;;  %v5437_v35 = vsub.s32 %v806_v20, %v5150_v28  ;;  %v1205_v9 = vmul.f32 %v4975_v55, %v1197_v59 }
 0x164   : > { %v1198_v20 = vsel %vm1182_vm14, %v1194_v54, 0.0  ;;  %v1243_v28 = vsel %vm7303_vm3, %v1239_v31, 0.0  ;;  %v1160_v7 = vmul.f32 %v4962_v60, %v1152_v30  ;;  %vm7595_vm3 = vmmov %vm7593_vm7  ;;  %v1700_v31 = vsel %vm1699_vm0, 1, %v7527_v42 }
 0x165   : > { %v5426_v5 = vpop.permute.xlu0 %1819  ;;  %7592 = vst [vmem:[#allocation110_spill] sm:$0xff] %v5437_v35  ;;  %v1206_v59 = vmul.f32 %v4975_v55, %v1198_v20  ;;  %v1251_v0 = vmul.f32 %v4995_v6, %v1243_v28  ;;  %v1288_v40 = vsel %vm7595_vm3, %v5004_v3, %v4983_v24  ;;  %vm7324_vm7 = vcmp.eq.s32.totalorder %v5227_v14, 1 }
 0x166   : > { %v5439_v39 = vpop.permute.xlu1 %1779  ;;  %vm7322_vm12 = vcmp.eq.s32.totalorder %v5235_v50, 1  ;;  %v1207_v55 = vadd.f32 %v1205_v9, %v1159_v44  ;;  %vm7596_vm15 = vcmp.eq.s32.totalorder %v5358_v19, 1  ;;  %vm7597_vm14 = vcmp.eq.s32.totalorder %v5361_v52, 1 }
 0x167   : > { %v1244_v41 = vsel %vm7596_vm15, %v1240_v63, 0.0  ;;  %v1291_v60 = vsel %vm7597_vm14, %v1287_v62, 0.0  ;;  %v1340_v3 = vsel %vm7305_vm5, %v4993_v1, %v5020_v61  ;;  %v1341_v28 = vsel %vm7305_vm5, %v5020_v61, %v5002_v43 }
 0x168   : > { %v1252_v24 = vmul.f32 %v4995_v6, %v1244_v41  ;;  %v1299_v20 = vmul.f32 %v5008_v18, %v1291_v60  ;;  %v5492_v9 = vrot.slane %v1660_v15, %v5196_v58  ;;  %vm7312_vm15 = vcmp.eq.s32.totalorder %v5224_v21, 1  ;;  %v7606_v60 = vld [vmem:[#allocation83_spill] sm:$0xff] }
 0x169   : > { %v5466_v54 = vpop.permute.xlu0 %1855  ;;  %v1208_v52 = vadd.f32 %v1206_v59, %v1160_v7  ;;  %v1253_v63 = vadd.f32 %v1251_v0, %v1207_v55  ;;  %vm7599_vm14 = vcmp.eq.s32.totalorder %v5366_v47, 1  ;;  %v1704_v62 = vrot.slane %v1700_v31, %v5160_v49  ;;  %v7602_v0 = vld [vmem:[#allocation33_spill] sm:$0xff]  ;;  %v7620_v7 = vld [vmem:[#allocation51_spill] sm:$0xff] }
 0x16a   : > { %v5475_v10 = vpop.permute.xlu1 %1804  ;;  %7598 = vst [vmem:[#allocation111_spill] sm:$0xff] %v5492_v9  ;;  %v1292_v1 = vsel %vm7599_vm14, %v1288_v40, 0.0  ;;  %vm7323_vm3 = vcmp.eq.s32.totalorder %v5214_v53, 1  ;;  %v1344_v61 = vsel %vm7306_vm9, %v1340_v3, 0.0  ;;  %v1388_v43 = vsel %vm1387_vm8, %v5006_v33, %v5036_v32  ;;  %v7608_v3 = vld [vmem:[#allocation44_spill] sm:$0xff] }
 0x16b   : > { %v1300_v30 = vmul.f32 %v5008_v18, %v1292_v1  ;;  %v1389_v47 = vsel %vm1387_vm8, %v5036_v32, %v5018_v27  ;;  %vm7321_vm14 = vcmp.eq.s32.totalorder %v5243_v4, 1  ;;  %vm7600_vm5 = vcmp.eq.s32.totalorder %v5378_v48, 1  ;;  %vm5527_vm8 = vmand %vm703_vm1, %vm5249_vm13  ;;  %v7612_v1 = vld [vmem:[#allocation42_spill] sm:$0xff]  ;;  %v7625_v48 = vld [vmem:[#allocation45_spill] sm:$0xff] }
 0x16c   : > { %v1345_v44 = vsel %vm7600_vm5, %v1341_v28, 0.0  ;;  %v1352_v18 = vmul.f32 %v5025_v51, %v1344_v61  ;;  %v5518_v59 = vrot.slane %v1656_v2, %v5196_v58  ;;  %v1708_v33 = vrot.slane %v1700_v31, %v5167_v36 }
 0x16d   : > { %v5498_v6 = vpop.permute.xlu0 %1899  ;;  %v1254_v27 = vadd.f32 %v1252_v24, %v1208_v52  ;;  %v1301_v32 = vadd.f32 %v1299_v20, %v1253_v63  ;;  %v1353_v40 = vmul.f32 %v5025_v51, %v1345_v44  ;;  %v1392_v2 = vsel %vm1376_vm11, %v1388_v43, 0.0  ;;  %v7609_v24 = vld [vmem:[#allocation39_spill] sm:$0xff]  ;;  %v7610_v20 = vld [vmem:[#allocation40_spill] sm:$0xff] }
 0x16e   : > { %v5510_v15 = vpop.permute.xlu1 %1806  ;;  %7601 = vst [vmem:[#allocation112_spill] sm:$0xff] %v5518_v59  ;;  %vm7607_vm9 = vcmp.eq.s32.totalorder %v5395_v26, 1  ;;  %v1415_v51 = vsel %vm7307_vm6, %v7609_v24, %v7608_v3  ;;  %v1416_v28 = vsel %vm7307_vm6, %v7608_v3, %v7610_v20  ;;  %v1400_v61 = vmul.f32 %v7612_v1, %v1392_v2  ;;  %v7614_v44 = vld [vmem:[#allocation43_spill] sm:$0xff]  ;;  %v7618_v20 = vld [vmem:[#allocation46_spill] sm:$0xff] }
 0x16f   : > { %v1393_v31 = vsel %vm7607_vm9, %v1389_v47, 0.0  ;;  %v1302_v63 = vadd.f32 %v1300_v30, %v1254_v27  ;;  %vm7337_vm11 = vcmp.eq.s32.totalorder %v5424_v17, 1  ;;  %v5549_v26 = vrot.slane %v1704_v62, %v5160_v49  ;;  %v7615_v30 = vld [vmem:[#allocation48_spill] sm:$0xff] }
 0x170   : > { %v1401_v29 = vmul.f32 %v7612_v1, %v1393_v31  ;;  %vm7613_vm9 = vcmp.lt.s32.totalorder %v4595_v8, 14  ;;  %vm7346_vm1 = vcmask 7168   ;;  %v1354_v47 = vadd.f32 %v1352_v18, %v1301_v32  ;;  %v7617_v32 = vld [vmem:[#allocation41_spill] sm:$0xff] }
 0x171   : > { %v5543_v52 = vpop.permute.xlu0 %4335  ;;  %vm1876_vm6 = vmand %vm7613_vm9, %vm5178_vm10  ;;  %vm7616_vm0 = vcmask 130048   ;;  %vm7339_vm5 = vcmp.eq.s32.totalorder %v5414_v23, 1  ;;  %v5562_v2 = vrot.slane %v1708_v33, %v5160_v49  ;;  %v5567_v62 = vsel %vm5527_vm8, 1, %v7527_v42 }
 0x172   : > { %7611 = vst [vmem:[#allocation33_spill] sm:$0xff] %v5543_v52  ;;  %v5551_v43 = vpop.permute.xlu1 %1851  ;;  %v1443_v27 = vsel %vm7616_vm0, %v7615_v30, %v7614_v44  ;;  %v1355_v31 = vadd.f32 %v1353_v40, %v1302_v63  ;;  %v1419_v3 = vsel %vm7324_vm7, %v1415_v51, 0.0  ;;  %v1420_v18 = vsel %vm7322_vm12, %v1416_v28, 0.0  ;;  %v7619_v44 = vld [vmem:[#allocation47_spill] sm:$0xff]  ;;  %v7622_v51 = vld [vmem:[#allocation86_spill] sm:$0xff] }
 0x173   : > { %v1442_v24 = vsel %vm7616_vm0, %v7617_v32, %v7615_v30  ;;  %v1427_v1 = vmul.f32 %v7618_v20, %v1419_v3  ;;  %v1428_v33 = vmul.f32 %v7618_v20, %v1420_v18  ;;  %vm7621_vm9 = vcmask 121856   ;;  %v7623_v18 = vld [vmem:[#allocation85_spill] sm:$0xff] }
 0x174   : > { %v1470_v41 = vsel %vm7621_vm9, %v7620_v7, %v7619_v44  ;;  %v5584_v40 = vsel %vm1876_vm6, 1, %v7527_v42  ;;  %vm7340_vm8 = vcmp.eq.s32.totalorder %v7622_v51, 1  ;;  %v1402_v28 = vadd.f32 %v1400_v61, %v1354_v47  ;;  %v7624_v44 = vld [vmem:[#allocation49_spill] sm:$0xff]  ;;  %v7628_v47 = vld [vmem:[#allocation55_spill] sm:$0xff]  ;;  %v7660_v51 = vld [vmem:[#allocation90_spill] sm:$0xff] }
 0x175   : > { %v5581_v12 = vpop.permute.xlu0 %1947  ;;  %v1403_v63 = vadd.f32 %v1401_v29, %v1355_v31  ;;  %v1447_v30 = vsel %vm7312_vm15, %v1443_v27, 0.0  ;;  %vm7342_vm0 = vcmp.eq.s32.totalorder %v7623_v18, 1  ;;  %vm7341_vm9 = vcmask 1039360   ;;  %v7627_v29 = vld [vmem:[#allocation53_spill] sm:$0xff] }
 0x176   : > { %v5589_v32 = vpop.permute.xlu1 %1853  ;;  %v1446_v20 = vsel %vm7323_vm3, %v1442_v24, 0.0  ;;  %v1455_v58 = vmul.f32 %v7624_v44, %v1447_v30  ;;  %vm7626_vm6 = vcmask 121856   ;;  %vm7629_vm15 = vcmask 113664  }
 0x177   : > { %v1469_v61 = vsel %vm7626_vm6, %v7625_v48, %v7620_v7  ;;  %v1518_v27 = vsel %vm7629_vm15, %v7628_v47, %v7627_v29  ;;  %v1454_v31 = vmul.f32 %v7624_v44, %v1446_v20  ;;  %v1474_v3 = vsel %vm7321_vm14, %v1470_v41, 0.0  ;;  %v7631_v48 = vld [vmem:[#allocation50_spill] sm:$0xff]  ;;  %vm7632_vm6 = vmmov %vm7629_vm15  ;;  %v7633_v20 = vld [vmem:[#allocation89_spill] sm:$0xff] }
 0x178   : > { %v1429_v30 = vadd.f32 %v1427_v1, %v1402_v28  ;;  %v1430_v46 = vadd.f32 %v1428_v33, %v1403_v63  ;;  %v1482_v56 = vmul.f32 %v7630_v22, %v1474_v3  ;;  %v1517_v7 = vsel %vm7632_vm6, %v7631_v48, %v7628_v47  ;;  %v7634_v44 = vld [vmem:[#allocation87_spill] sm:$0xff]  ;;  %v7637_v1 = vld [vmem:[#allocation58_spill] sm:$0xff] }
 0x179   : > { %v5614_v29 = vpop.permute.xlu0 %1951  ;;  %vm7345_vm15 = vcmp.eq.s32.totalorder %v7633_v20, 1  ;;  %vm7635_vm12 = vcmp.eq.s32.totalorder %v7606_v60, 1  ;;  %vm7636_vm3 = vcmp.eq.s32.totalorder %v5411_v57, 1  ;;  %v7638_v33 = vld [vmem:[#allocation59_spill] sm:$0xff]  ;;  %vm7639_vm7 = vcmask 15360   ;;  %v7640_v63 = vld [vmem:[#allocation66_spill] sm:$0xff] }
 0x17a   : > { %v1473_v41 = vsel %vm7635_vm12, %v1469_v61, 0.0  ;;  %v1522_v24 = vsel %vm7636_vm3, %v1518_v27, 0.0  ;;  %v1564_v28 = vsel %vm7639_vm7, %v7638_v33, %v7637_v1  ;;  %v1616_v3 = vrot.slane %v7640_v63, %v5437_v35  ;;  %v5627_v47 = vpop.permute.xlu1 %1867  ;;  %v7642_v61 = vld [vmem:[#allocation56_spill] sm:$0xff]  ;;  %vm7643_vm12 = vmmov %vm7639_vm7 }
 0x17b   : > { %v1457_v48 = vadd.f32 %v1455_v58, %v1430_v46  ;;  %v1481_v19 = vmul.f32 %v7630_v22, %v1473_v41  ;;  %v1530_v16 = vmul.f32 %v7641_v38, %v1522_v24  ;;  %v1563_v57 = vsel %vm7643_vm12, %v7642_v61, %v7638_v33  ;;  %v7649_v58 = vld [vmem:[#allocation63_spill] sm:$0xff]  ;;  %v7650_v22 = vld [vmem:[#allocation62_spill] sm:$0xff]  ;;  %v7678_v20 = vld [vmem:[#allocation68_spill] sm:$0xff] }
 0x17c   : > { %vm7354_vm3 = vcmp.eq.s32.totalorder %v5518_v59, 1  ;;  %vm7645_vm7 = vcmp.lt.s32.totalorder %v4595_v8, 14  ;;  %v1456_v63 = vadd.f32 %v1454_v31, %v1429_v30  ;;  %vm7648_vm6 = vcmp.eq.s32.totalorder %v5408_v34, 1 }
 0x17d   : > { %vm5639_vm14 = vmand %vm7645_vm7, %vm4624_vm2  ;;  %v1521_v46 = vsel %vm7648_vm6, %v1517_v7, 0.0  ;;  %v1591_v24 = vsel %vm7346_vm1, %v7650_v22, %v7649_v58  ;;  %v1885_v41 = vrot.slane %v5584_v40, %v5167_v36  ;;  %v1484_v33 = vadd.f32 %v1482_v56, %v1457_v48  ;;  %v5657_v34 = vpop.permute.xlu0 %1993  ;;  %v7652_v7 = vld [vmem:[#allocation60_spill] sm:$0xff]  ;;  %v7653_v56 = vld [vmem:[#allocation38_spill] sm:$0xff] }
 0x17e   : > { %v1529_v61 = vmul.f32 %v7641_v38, %v1521_v46  ;;  %v1568_v27 = vsel %vm7337_vm11, %v1564_v28, 0.0  ;;  %v1590_v31 = vsel %vm7346_vm1, %v7651_v13, %v7650_v22  ;;  %vm7363_vm2 = vcmp.eq.s32.totalorder %v5492_v9, 1  ;;  %v5663_v38 = vpop.permute.xlu1 %1901 }
 0x17f   : > { %vm1728_vm6 = vcmask 932864   ;;  %v1567_v30 = vsel %vm7339_vm5, %v1563_v57, 0.0  ;;  %v1576_v58 = vmul.f32 %v7652_v7, %v1568_v27  ;;  %v1618_v48 = vmul.f32 %v7653_v56, %v1616_v3  ;;  %v7654_v27 = vld [vmem:[#allocation64_spill] sm:$0xff]  ;;  %v7655_v3 = vld [vmem:[#allocation67_spill] sm:$0xff]  ;;  %v7656_v56 = vld [vmem:[#allocation65_spill] sm:$0xff] }
 0x180   : > { %v1925_v28 = vsel %vm5639_vm14, 1, %v7527_v42  ;;  %v1483_v46 = vadd.f32 %v1481_v19, %v1456_v63  ;;  %v1532_v13 = vadd.f32 %v1530_v16, %v1484_v33  ;;  %v1575_v22 = vmul.f32 %v7652_v7, %v1567_v30 }
 0x181   : > { %v1595_v17 = vsel %vm7340_vm8, %v1591_v24, 0.0  ;;  %vm7364_vm12 = vcmask 924672   ;;  %v1594_v57 = vsel %vm7342_vm0, %v1590_v31, 0.0  ;;  %v1635_v35 = vsel %vm7341_vm9, %v7656_v56, %v7655_v3  ;;  %v7658_v24 = vld [vmem:[#allocation71_spill] sm:$0xff]  ;;  %v5685_v31 = vpop.permute.xlu0 %4342 }
 0x182   : > { %v1603_v23 = vmul.f32 %v7654_v27, %v1595_v17  ;;  %v7657_v1 = vunpack.i.h.bf16 %v4865_v11  ;;  %vm1717_vm14 = vcmp.eq.s32.totalorder %v5549_v26, 1  ;;  %vm1718_vm7 = vcmp.eq.s32.totalorder %v5562_v2, 1  ;;  %7659 = vst [vmem:[#allocation44_spill] sm:$0xff] %v5685_v31  ;;  %v5688_v56 = vpop.permute.xlu1 %1915 }
 0x183   : > { %v1531_v19 = vadd.f32 %v1529_v61, %v1483_v46  ;;  %v1602_v63 = vmul.f32 %v7654_v27, %v1594_v57  ;;  %v4326_v33 = vunpack.i.l.bf16 %v7658_v24  ;;  %v1929_v17 = vrot.slane %v1925_v28, %v5160_v49  ;;  %v7661_v61 = vld [vmem:[#allocation91_spill] sm:$0xff] }
 0x184   : > { %v1636_v16 = vsel %vm7341_vm9, %v7655_v3, %v7657_v1  ;;  %vm7373_vm11 = vcmask 916480   ;;  %v1578_v30 = vadd.f32 %v1576_v58, %v1532_v13  ;;  %v1620_v7 = vcombine.high %v1618_v48, %v1618_v48  ;;  %v7663_v58 = vld [vmem:[#allocation74_spill] sm:$0xff]  ;;  %v7664_v13 = vld [vmem:[#allocation69_spill] sm:$0xff] }
 0x185   : > { %v1933_v3 = vrot.slane %v1925_v28, %v5167_v36  ;;  %v1975_v1 = vrot.slane %v5185_v37, %v5160_v49  ;;  %v1577_v46 = vadd.f32 %v1575_v22, %v1531_v19  ;;  %v1639_v57 = vsel %vm7345_vm15, %v1635_v35, 0.0 }
 0x186   : > { %vm7662_vm9 = vcmp.eq.s32.totalorder %v7634_v44, 1  ;;  %vm7665_vm0 = vcmask 1031168   ;;  %v1605_v11 = vadd.f32 %v1603_v23, %v1578_v30  ;;  %v7666_v28 = vrot.slane %v5567_v62, %v5160_v49  ;;  %v7674_v30 = vld [vmem:[#allocation93_spill] sm:$0xff] }
 0x187   : > { %v1640_v27 = vsel %vm7662_vm9, %v1636_v16, 0.0  ;;  %v1681_v24 = vsel %vm7665_vm0, %v7664_v13, %v7663_v58  ;;  %v7667_v22 = vrot.slane %v5567_v62, %v5167_v36  ;;  %v7668_v35 = vrot.slane %v5584_v40, %v5160_v49 }
 0x188   : > { %v5706_v18 = vrot.slane %v7666_v28, %v5160_v49  ;;  %vm7671_vm0 = vcmp.lt.s32.totalorder %v4595_v8, 14  ;;  %vm7370_vm15 = vcmp.eq.s32.totalorder %v7674_v30, 1  ;;  %v7675_v28 = vld [vmem:[#allocation94_spill] sm:$0xff]  ;;  %vm7369_vm8 = vcmask 908288  }
 0x189   : > { %v5712_v19 = vrot.slane %v7667_v22, %v5160_v49  ;;  %v5718_v16 = vrot.slane %v7668_v35, %v5160_v49  ;;  %vm5724_vm9 = vmand %vm7671_vm0, %vm4639_vm4  ;;  %vm7368_vm1 = vcmp.eq.s32.totalorder %v7675_v28, 1  ;;  %v1604_v62 = vadd.f32 %v1602_v63, %v1577_v46  ;;  %v5735_v35 = vpop.permute.xlu0 %2041  ;;  %v5744_v63 = vpop.permute.xlu1 %1949  ;;  %v7681_v46 = vld [vmem:[#allocation88_spill] sm:$0xff] }
 0x18a   : > { %vm7676_vm5 = vcmask 1031168   ;;  %v5733_v40 = vrot.slane %v1885_v41, %v5160_v49  ;;  %v5738_v13 = vrot.slane %v1929_v17, %v5160_v49  ;;  %v1623_v44 = vadd.f32 %v1620_v7, %v1605_v11 }
 0x18b   : > { %7669 = vst [vmem:[#allocation39_spill] sm:$0xff] %v5718_v16  ;;  %v1682_v22 = vsel %vm7676_vm5, %v7663_v58, %v4326_v33  ;;  %v1647_v4 = vmul.f32 %v7678_v20, %v1639_v57  ;;  %v1648_v60 = vmul.f32 %v7678_v20, %v1640_v27  ;;  %v1685_v21 = vsel %vm7354_vm3, %v1681_v24, 0.0  ;;  %v7680_v20 = vld [vmem:[#allocation96_spill] sm:$0xff]  ;;  %v7685_v58 = vld [vmem:[#allocation82_spill] sm:$0xff] }
 0x18c   : > { %7677 = vst [vmem:[#allocation40_spill] sm:$0xff] %v5733_v40  ;;  %vm1857_vm4 = vcmask 900096   ;;  %v5747_v33 = vrot.slane %v1933_v3, %v5160_v49  ;;  %v1979_v41 = vrot.slane %v5185_v37, %v5167_v36  ;;  %v5752_v17 = vrot.slane %v1975_v1, %v5160_v49  ;;  %v7682_v57 = vld [vmem:[#allocation76_spill] sm:$0xff]  ;;  %v7684_v1 = vld [vmem:[#allocation99_spill] sm:$0xff] }
 0x18d   : > { %v2019_v11 = vsel %vm5724_vm9, 1, %v7527_v42  ;;  %vm7371_vm5 = vcmp.eq.s32.totalorder %v7680_v20, 1  ;;  %v1622_v7 = vadd.f32 %v1618_v48, %v1604_v62  ;;  %v1686_v24 = vsel %vm7363_vm2, %v1682_v22, 0.0  ;;  %v7683_v27 = vld [vmem:[#allocation84_spill] sm:$0xff]  ;;  %v7686_v48 = vld [vmem:[#allocation103_spill] sm:$0xff]  ;;  %v5777_v50 = vpop.permute.xlu0 %2045  ;;  %v5780_v53 = vpop.permute.xlu1 %1963 }
 0x18e   : > { %7679 = vst [vmem:[#allocation42_spill] sm:$0xff] %v5752_v17  ;;  %v1729_v3 = vsel %vm1728_vm6, %v7682_v57, %v7681_v46  ;;  %v1730_v37 = vsel %vm1728_vm6, %v7681_v46, %v7683_v27  ;;  %vm7372_vm0 = vcmp.eq.s32.totalorder %v7684_v1, 1  ;;  %v1693_v23 = vmul.f32 %v7685_v58, %v1685_v21  ;;  %v7687_v62 = vld [vmem:[#allocation92_spill] sm:$0xff] }
 0x18f   : > { %v1694_v59 = vmul.f32 %v7685_v58, %v1686_v24  ;;  %v1756_v22 = vsel %vm7364_vm12, %v7687_v62, %v7686_v48  ;;  %v7688_v9 = vunpack.i.h.bf16 %v4882_v25  ;;  %vm7443_vm9 = vcmask 801792  }
 0x190   : > { %v1649_v46 = vadd.f32 %v1647_v4, %v1622_v7  ;;  %v1650_v27 = vadd.f32 %v1648_v60, %v1623_v44  ;;  %v2023_v21 = vrot.slane %v2019_v11, %v5160_v49  ;;  %v2027_v24 = vrot.slane %v2019_v11, %v5167_v36  ;;  %v7692_v60 = vld [vmem:[#allocation107_spill] sm:$0xff] }
 0x191   : > { %v1757_v57 = vsel %vm7364_vm12, %v7686_v48, %v7688_v9  ;;  %vm7689_vm2 = vcmp.lt.s32.totalorder %v4595_v8, 14  ;;  %v1733_v4 = vsel %vm1717_vm14, %v1729_v3, 0.0  ;;  %v1734_v9 = vsel %vm1718_vm7, %v1730_v37, 0.0  ;;  %v7694_v48 = vld [vmem:[#allocation98_spill] sm:$0xff] }
 0x192   : > { %vm5788_vm3 = vmand %vm7689_vm2, %vm5249_vm13  ;;  %v1783_v44 = vsel %vm7373_vm11, %v7692_v60, %v5439_v39  ;;  %v7693_v11 = vunpack.i.h.bf16 %v4899_v45  ;;  %vm1953_vm12 = vcmask 793600   ;;  %v1741_v62 = vmul.f32 %v7694_v48, %v1733_v4  ;;  %v5811_v60 = vpop.permute.xlu0 %2089 }
 0x193   : > { %v1742_v8 = vmul.f32 %v7694_v48, %v1734_v9  ;;  %vm7695_vm2 = vcmp.eq.s32.totalorder %v7660_v51, 1  ;;  %vm7696_vm14 = vcmp.eq.s32.totalorder %v7661_v61, 1  ;;  %vm7424_vm7 = vcmp.eq.s32.totalorder %v5718_v16, 1 }
 0x194   : > { %v1784_v7 = vsel %vm7373_vm11, %v5439_v39, %v7693_v11  ;;  %v1760_v26 = vsel %vm7695_vm2, %v1756_v22, 0.0  ;;  %v1761_v2 = vsel %vm7696_vm14, %v1757_v57, 0.0  ;;  %vm7442_vm6 = vcmp.eq.s32.totalorder %v5733_v40, 1 }
 0x195   : > { %v1695_v3 = vadd.f32 %v1693_v23, %v1649_v46  ;;  %v1696_v37 = vadd.f32 %v1694_v59, %v1650_v27  ;;  %v5814_v39 = vrot.slane %v1979_v41, %v5160_v49  ;;  %v2067_v4 = vsel %vm5788_vm3, 1, %v7527_v42  ;;  %v1996_v46 = vpop.permute.xlu1 %1995  ;;  %v7699_v27 = vld [vmem:[#allocation101_spill] sm:$0xff] }
 0x196   : > { %v1787_v22 = vsel %vm7370_vm15, %v1783_v44, 0.0  ;;  %v1788_v57 = vsel %vm7368_vm1, %v1784_v7, 0.0  ;;  %v1810_v23 = vsel %vm7369_vm8, %v5475_v10, %v5510_v15  ;;  %v7698_v59 = vunpack.i.h.bf16 %v7602_v0 }
 0x197   : > { %7697 = vst [vmem:[#allocation43_spill] sm:$0xff] %v5814_v39  ;;  %vm1942_vm2 = vcmp.eq.s32.totalorder %v5738_v13, 1  ;;  %vm1943_vm14 = vcmp.eq.s32.totalorder %v5747_v33, 1  ;;  %vm7423_vm3 = vcmask 785408   ;;  %v1768_v58 = vmul.f32 %v7699_v27, %v1760_v26 }
 0x198   : > { %v1811_v41 = vsel %vm7369_vm8, %v5510_v15, %v7698_v59  ;;  %v1769_v9 = vmul.f32 %v7699_v27, %v1761_v2  ;;  %v5835_v44 = vrot.slane %v2023_v21, %v5160_v49  ;;  %v5838_v10 = vrot.slane %v2027_v24, %v5160_v49  ;;  %v7700_v59 = vld [vmem:[#allocation106_spill] sm:$0xff]  ;;  %v5850_v24 = vpop.permute.xlu0 %4349 }
 0x199   : > { %v1743_v11 = vadd.f32 %v1741_v62, %v1695_v3  ;;  %v1744_v7 = vadd.f32 %v1742_v8, %v1696_v37  ;;  %v1858_v15 = vsel %vm1857_vm4, %v5551_v43, %v5589_v32  ;;  %v2071_v48 = vrot.slane %v2067_v4, %v5160_v49  ;;  %7701 = vst [vmem:[#allocation48_spill] sm:$0xff] %v5850_v24  ;;  %v2010_v62 = vpop.permute.xlu1 %2009 }
 0x19a   : > { %v1795_v55 = vmul.f32 %v7700_v59, %v1787_v22  ;;  %v1796_v26 = vmul.f32 %v7700_v59, %v1788_v57  ;;  %v1814_v2 = vsel %vm7371_vm5, %v1810_v23, 0.0  ;;  %v1815_v21 = vsel %vm7372_vm0, %v1811_v41, 0.0 }
 0x19b   : > { %vm7421_vm1 = vcmp.eq.s32.totalorder %v5752_v17, 1  ;;  %v4337_v8 = vunpack.i.l.bf16 %v5543_v52  ;;  %v1859_v43 = vsel %vm1857_vm4, %v5589_v32, %v5466_v54  ;;  %vm7422_vm8 = vcmp.eq.s32.totalorder %v5814_v39, 1 }
 0x19c   : > { %vm2047_vm15 = vcmask 777216   ;;  %v1770_v3 = vadd.f32 %v1768_v58, %v1743_v11  ;;  %v1771_v37 = vadd.f32 %v1769_v9, %v1744_v7  ;;  %vm7702_vm5 = vcmp.eq.s32.totalorder %v5706_v18, 1  ;;  %v5872_v9 = vpop.permute.xlu0 %2219 }
 0x19d   : > { %v1862_v22 = vsel %vm7702_vm5, %v1858_v15, 0.0  ;;  %vm2036_vm0 = vcmp.eq.s32.totalorder %v5835_v44, 1  ;;  %vm2037_vm11 = vcmp.eq.s32.totalorder %v5838_v10, 1  ;;  %v2075_v57 = vrot.slane %v2067_v4, %v5167_v36  ;;  %7704 = vst [vmem:[#allocation41_spill] sm:$0xff] %v5872_v9 }
 0x19e   : > { %v1822_v23 = vmul.f32 %v5426_v5, %v1814_v2  ;;  %v1823_v41 = vmul.f32 %v5426_v5, %v1815_v21  ;;  %v1906_v54 = vsel %vm7443_vm9, %v5498_v6, %v5663_v38  ;;  %v1907_v32 = vsel %vm7443_vm9, %v5663_v38, %v4337_v8  ;;  %v2044_v38 = vpop.permute.xlu1 %2043 }
 0x19f   : > { %v1797_v27 = vadd.f32 %v1795_v55, %v1770_v3  ;;  %v1798_v18 = vadd.f32 %v1796_v26, %v1771_v37  ;;  %vm7703_vm4 = vcmp.eq.s32.totalorder %v5712_v19, 1  ;;  %v5875_v4 = vrot.slane %v2071_v48, %v5160_v49 }
 0x1a0   : > { %v1863_v58 = vsel %vm7703_vm4, %v1859_v43, 0.0  ;;  %v1870_v11 = vmul.f32 %v5627_v47, %v1862_v22  ;;  %v1954_v6 = vsel %vm1953_vm12, %v5581_v12, %v5744_v63  ;;  %v1955_v55 = vsel %vm1953_vm12, %v5744_v63, %v5614_v29  ;;  %v5902_v8 = vpop.permute.xlu0 %2223 }
 0x1a1   : > { %7705 = vst [vmem:[#allocation46_spill] sm:$0xff] %v5875_v4  ;;  %v1871_v5 = vmul.f32 %v5627_v47, %v1863_v58  ;;  %v4344_v19 = vunpack.i.l.bf16 %v5685_v31  ;;  %v1910_v7 = vsel %vm7424_vm7, %v1906_v54, 0.0  ;;  %v1911_v15 = vsel %vm7442_vm6, %v1907_v32, 0.0  ;;  %7707 = vst [vmem:[#allocation51_spill] sm:$0xff] %v5902_v8 }
 0x1a2   : > { %v5891_v48 = vrot.slane %v2075_v57, %v5160_v49  ;;  %v1824_v47 = vadd.f32 %v1822_v23, %v1797_v27  ;;  %v1825_v59 = vadd.f32 %v1823_v41, %v1798_v18  ;;  %v1918_v12 = vmul.f32 %v5688_v56, %v1910_v7 }
 0x1a3   : > { %v1919_v26 = vmul.f32 %v5688_v56, %v1911_v15  ;;  %v1958_v29 = vsel %vm1942_vm2, %v1954_v6, 0.0  ;;  %v1959_v63 = vsel %vm1943_vm14, %v1955_v55, 0.0  ;;  %v2000_v2 = vsel %vm7423_vm3, %v5657_v34, %v1996_v46  ;;  %v2058_v56 = vpop.permute.xlu1 %2057 }
 0x1a4   : > { %7706 = vst [vmem:[#allocation47_spill] sm:$0xff] %v5891_v48  ;;  %v2001_v21 = vsel %vm7423_vm3, %v1996_v46, %v4344_v19  ;;  %v1872_v43 = vadd.f32 %v1870_v11, %v1824_v47  ;;  %v1873_v3 = vadd.f32 %v1871_v5, %v1825_v59  ;;  %v1966_v37 = vmul.f32 %v5780_v53, %v1958_v29  ;;  %v5916_v32 = vpop.permute.xlu0 %2244 }
 0x1a5   : > { %v1967_v22 = vmul.f32 %v5780_v53, %v1959_v63  ;;  %v2048_v13 = vsel %vm2047_vm15, %v5735_v35, %v2044_v38  ;;  %v2049_v33 = vsel %vm2047_vm15, %v2044_v38, %v5777_v50  ;;  %vm7376_vm12 = vcmask 769024   ;;  %7708 = vst [vmem:[#allocation49_spill] sm:$0xff] %v5916_v32  ;;  %v2112_v63 = vld [vmem:[%s7711_s5] sm:$0xf]  ;;  %s4470_s5 = smov 100  }
 0x1a6   : > { %vm7375_vm5 = vcmp.eq.s32.totalorder %v5875_v4, 1  ;;  %v1920_v34 = vadd.f32 %v1918_v12, %v1872_v43  ;;  %v1921_v46 = vadd.f32 %v1919_v26, %v1873_v3  ;;  %v2004_v57 = vsel %vm7421_vm1, %v2000_v2, 0.0  ;;  %v7715_v3 = vld [vmem:[#allocation16_spill] sm:$0xff] }
 0x1a7   : > { %v2005_v23 = vsel %vm7422_vm8, %v2001_v21, 0.0  ;;  %v4351_v53 = vunpack.i.l.bf16 %v5850_v24  ;;  %v2012_v41 = vmul.f32 %v2010_v62, %v2004_v57  ;;  %vm7374_vm2 = vcmp.eq.s32.totalorder %v5891_v48, 1  ;;  %v2092_v58 = vpop.permute.xlu1 %2091  ;;  %v7723_v57 = vld [vmem:[#allocation12_spill] sm:$0xff] }
 0x1a8   : > { %v2013_v54 = vmul.f32 %v2010_v62, %v2005_v23  ;;  %v1968_v50 = vadd.f32 %v1966_v37, %v1920_v34  ;;  %v1969_v35 = vadd.f32 %v1967_v22, %v1921_v46  ;;  %v2052_v27 = vsel %vm2036_vm0, %v2048_v13, 0.0  ;;  %v5926_v38 = vpop.permute.xlu0 %2248  ;;  %v7716_v37 = vld [vmem:[#allocation9_spill] sm:$0xff]  ;;  %v7719_v13 = vld [vmem:[#allocation11_spill] sm:$0xff] }
 0x1a9   : > { %v2053_v18 = vsel %vm2037_vm11, %v2049_v33, 0.0  ;;  %v2060_v11 = vmul.f32 %v2058_v56, %v2052_v27  ;;  %v2096_v6 = vsel %vm7376_vm12, %v5811_v60, %v2092_v58  ;;  %v2097_v62 = vsel %vm7376_vm12, %v2092_v58, %v4351_v53  ;;  %7709 = vst [vmem:[#allocation45_spill] sm:$0xff] %v5926_v38  ;;  %v7721_v34 = vld [vmem:[#allocation13_spill] sm:$0xff]  ;;  %v7730_v27 = vld [vmem:[#allocation75_spill] sm:$0xff] }
 0x1aa   : > { %v2061_v5 = vmul.f32 %v2058_v56, %v2053_v18  ;;  %v2014_v55 = vadd.f32 %v2012_v41, %v1968_v50  ;;  %v2015_v19 = vadd.f32 %v2013_v54, %v1969_v35  ;;  %v2100_v44 = vsel %vm7375_vm5, %v2096_v6, 0.0  ;;  %v7718_v56 = vld [vmem:[#allocation15_spill] sm:$0xff]  ;;  %v7727_v54 = vld [vmem:[#allocation18_spill] sm:$0xff] }
 0x1ab   : > { %v2106_v7 = vpop.permute.xlu1 %2105  ;;  %v2101_v10 = vsel %vm7374_vm2, %v2097_v62, 0.0  ;;  %vm7419_vm11 = vcmask 1043456   ;;  %vm7444_vm15 = vcmask 31744   ;;  %v7713_v21 = vmov 0.0   ;;  %v7728_v50 = vld [vmem:[#allocation14_spill] sm:$0xff]  ;;  %v7732_v58 = vld [vmem:[#allocation79_spill] sm:$0xff] }
 0x1ac   : > { %v2062_v15 = vadd.f32 %v2060_v11, %v2014_v55  ;;  %v2108_v47 = vmul.f32 %v2106_v7, %v2100_v44  ;;  %v2063_v59 = vadd.f32 %v2061_v5, %v2015_v19  ;;  %v2109_v12 = vmul.f32 %v2106_v7, %v2101_v10  ;;  %v5932_v26 = vpop.permute.xlu0 %2271  ;;  %v7734_v5 = vld [vmem:[#allocation77_spill] sm:$0xff]  ;;  %v7736_v62 = vld [vmem:[#allocation8_spill] sm:$0xff]  ;;  %v7739_v44 = vld [vmem:[#allocation83_spill] sm:$0xff] }
 0x1ad   : > { %7710 = vst [vmem:[#allocation53_spill] sm:$0xff] %v5932_v26  ;;  %vm7717_vm0 = vcmask 138240   ;;  %vm7720_vm14 = vcmask 130048   ;;  %vm7725_vm5 = vcmp.eq.s32.totalorder %v5227_v14, 1  ;;  %vm7731_vm12 = vcmp.eq.s32.totalorder %v7730_v27, 1  ;;  %v7737_v19 = vld [vmem:[#allocation17_spill] sm:$0xff] }
 0x1ae   : > { %v2111_v60 = vadd.f32 %v2109_v12, %v2063_v59  ;;  %v2110_v29 = vadd.f32 %v2108_v47, %v2062_v15  ;;  %v641_v22 = vsel %vm7717_vm0, %v7716_v37, %v7715_v3  ;;  %v685_v33 = vsel %vm7720_vm14, %v7719_v13, %v7718_v56  ;;  %vm7722_vm4 = vmmov %vm7717_vm0  ;;  %v7741_v15 = vld [vmem:[#allocation22_spill] sm:$0xff]  ;;  %v7742_v47 = vld [vmem:[#allocation19_spill] sm:$0xff] }
 0x1af   : > { %v642_v46 = vsel %vm7722_vm4, %v7715_v3, %v7721_v34  ;;  %vm7724_vm2 = vmmov %vm7720_vm14  ;;  %v645_v53 = vsel %vm7725_vm5, %v641_v22, 0.0  ;;  %vm7729_vm0 = vcmask 121856   ;;  %v689_v18 = vsel %vm7731_vm12, %v685_v33, 0.0  ;;  %v7745_v3 = vld [vmem:[#allocation20_spill] sm:$0xff]  ;;  %v7746_v22 = vld [vmem:[#allocation21_spill] sm:$0xff] }
 0x1b0   : > { %4172 = vmatprep.subr.msk.mxu1 %vm7419_vm11, %v2111_v60  ;;  %v5939_v2 = vpop.permute.xlu0 %2275  ;;  %v686_v23 = vsel %vm7724_vm2, %v7718_v56, %v7723_v57  ;;  %v738_v35 = vsel %vm7729_vm0, %v7728_v50, %v7727_v54  ;;  %vm7733_vm14 = vcmp.eq.s32.totalorder %v7732_v58, 1  ;;  %vm7735_vm4 = vcmp.eq.s32.totalorder %v7734_v5, 1  ;;  %vm7738_vm5 = vmmov %vm7729_vm0  ;;  %v7744_v60 = vld [vmem:[#allocation10_spill] sm:$0xff]  ;;  %v7748_v33 = vld [vmem:[#allocation80_spill] sm:$0xff] }
 0x1b1   : > { %4173 = vmatpush1.msk.msra.mxu1 %vm7419_vm11, %v2110_v29  ;;  %7712 = vst [vmem:[#allocation55_spill] sm:$0xff] %v5939_v2  ;;  %v646_v11 = vsel %vm7733_vm14, %v642_v46, 0.0  ;;  %v690_v6 = vsel %vm7735_vm4, %v686_v23, 0.0  ;;  %v653_v55 = vmul.f32 %v7736_v62, %v645_v53  ;;  %v739_v7 = vsel %vm7738_vm5, %v7727_v54, %v7737_v19  ;;  %v7750_v23 = vld [vmem:[#allocation85_spill] sm:$0xff]  ;;  %v7752_v54 = vld [vmem:[#allocation27_spill] sm:$0xff]  ;;  %v7753_v50 = vld [vmem:[#allocation26_spill] sm:$0xff] }
 0x1b2   : > { %4174 = vmatmul.mubr.msk.f32.vlgmr.msra.gmra.mrb[0].mxu1 %vm7444_vm15, %v2112_v63  ;;  %vm7740_vm2 = vcmp.eq.s32.totalorder %v7739_v44, 1  ;;  %vm7743_vm0 = vcmask 7168   ;;  %v697_v29 = vmul.f32 %v7744_v60, %v689_v18  ;;  %v654_v63 = vmul.f32 %v7736_v62, %v646_v11  ;;  %v7755_v18 = vld [vmem:[#allocation23_spill] sm:$0xff]  ;;  %v7756_v62 = vld [vmem:[#allocation86_spill] sm:$0xff]  ;;  %v2355_v44 = vld [vmem:[%s7166_s6] sm:$0xf] }
 0x1b3   : > { %3618 = vmatprep.mubr.f32.mxu1 %v7713_v21  ;;  %v742_v10 = vsel %vm7740_vm2, %v738_v35, 0.0  ;;  %v784_v59 = vsel %vm7743_vm0, %v7742_v47, %v7741_v15  ;;  %vm7747_vm12 = vmmov %vm7743_vm0  ;;  %v698_v13 = vmul.f32 %v7744_v60, %v690_v6  ;;  %vm7749_vm14 = vcmp.eq.s32.totalorder %v7748_v33, 1  ;;  %v6361_v33 = vld [vmem:[%s7457_s18] sm:$0xf] }
 0x1b4   : > { %v5943_v43 = vpop.permute.xlu0 %2298  ;;  %v750_v37 = vmul.f32 %v7745_v3, %v742_v10  ;;  %v785_v56 = vsel %vm7747_vm12, %v7741_v15, %v7746_v22  ;;  %v743_v34 = vsel %vm7749_vm14, %v739_v7, 0.0  ;;  %v699_v46 = vadd.f32 %v697_v29, %v653_v55  ;;  %v7758_v10 = vld [vmem:[#allocation24_spill] sm:$0xff]  ;;  %v7760_v29 = vld [vmem:[#allocation89_spill] sm:$0xff]  ;;  %v7762_v22 = vld [vmem:[#allocation110_spill] sm:$0xff]  ;;  %7831 = vst [vmem:[#allocation38_spill] sm:$0xff] %v6361_v33 }
 0x1b5   : > { %7714 = vst [vmem:[#allocation54_spill] sm:$0xff] %v5943_v43  ;;  %v751_v57 = vmul.f32 %v7745_v3, %v743_v34  ;;  %vm7751_vm4 = vcmp.eq.s32.totalorder %v7750_v23, 1  ;;  %vm7754_vm5 = vcmask 1039360   ;;  %v4288_v11 = vunpack.i.l.bf16 %v7755_v18  ;;  %v7763_v18 = vld [vmem:[#allocation30_spill] sm:$0xff]  ;;  %v3395_v27 = vld [vmem:[%s7168_s8] sm:$0xf] }
 0x1b6   : > { %v788_v53 = vsel %vm7751_vm4, %v784_v59, 0.0  ;;  %v848_v35 = vsel %vm7754_vm5, %v7753_v50, %v7752_v54  ;;  %vm7757_vm2 = vcmp.eq.s32.totalorder %v7756_v62, 1  ;;  %v700_v15 = vadd.f32 %v698_v13, %v654_v63  ;;  %vm7759_vm0 = vmmov %vm7754_vm5  ;;  %v6012_v13 = vld [vmem:[#allocation2 + $0x4] sm:$0xff] }
 0x1b7   : > { %v789_v19 = vsel %vm7757_vm2, %v785_v56, 0.0  ;;  %v796_v6 = vmul.f32 %v7758_v10, %v788_v53  ;;  %v752_v47 = vadd.f32 %v750_v37, %v699_v46  ;;  %v4294_v60 = vunpack.i.l.bf16 %v4882_v25  ;;  %v7764_v56 = vld [vmem:[#allocation25_spill] sm:$0xff] }
 0x1b8   : > { %v5959_v41 = vpop.permute.xlu0 %2302  ;;  %v797_v55 = vmul.f32 %v7758_v10, %v789_v19  ;;  %v849_v59 = vsel %vm7759_vm0, %v7752_v54, %v4288_v11  ;;  %vm7761_vm12 = vcmp.eq.s32.totalorder %v7760_v29, 1  ;;  %v753_v50 = vadd.f32 %v751_v57, %v700_v15  ;;  %v7767_v54 = vld [vmem:[#allocation87_spill] sm:$0xff] }
 0x1b9   : > { %7726 = vst [vmem:[#allocation50_spill] sm:$0xff] %v5959_v41  ;;  %v852_v3 = vsel %vm7761_vm12, %v848_v35, 0.0  ;;  %vm7765_vm14 = vcmask 924672   ;;  %v798_v63 = vadd.f32 %v796_v6, %v752_v47  ;;  %vm7768_vm5 = vcmp.eq.s32.totalorder %v7767_v54, 1  ;;  %v7769_v35 = vld [vmem:[#allocation29_spill] sm:$0xff] }
 0x1ba   : > { %v896_v53 = vsel %vm7765_vm14, %v7764_v56, %v7763_v18  ;;  %vm7766_vm4 = vmmov %vm7765_vm14  ;;  %v799_v46 = vadd.f32 %v797_v55, %v753_v50  ;;  %v853_v11 = vsel %vm7768_vm5, %v849_v59, 0.0  ;;  %v860_v19 = vmul.f32 %v7769_v35, %v852_v3  ;;  %v7773_v55 = vld [vmem:[#allocation34_spill] sm:$0xff]  ;;  %v7774_v50 = vld [vmem:[#allocation28_spill] sm:$0xff] }
 0x1bb   : > { %v897_v37 = vsel %vm7766_vm4, %v7763_v18, %v4294_v60  ;;  %v4300_v57 = vunpack.i.l.bf16 %v4899_v45  ;;  %vm7770_vm2 = vcmp.eq.s32.totalorder %v7660_v51, 1  ;;  %v861_v47 = vmul.f32 %v7769_v35, %v853_v11  ;;  %v7772_v60 = vld [vmem:[#allocation32_spill] sm:$0xff]  ;;  %v3264_v41 = vld [vmem:[#allocation2 + $0xc] sm:$0xf] }
 0x1bc   : > { %v5979_v12 = vpop.permute.xlu0 %2640  ;;  %v900_v10 = vsel %vm7770_vm2, %v896_v53, 0.0  ;;  %vm7771_vm0 = vcmp.eq.s32.totalorder %v7661_v61, 1  ;;  %vm7775_vm12 = vcmask 916480   ;;  %v4306_v3 = vunpack.i.l.bf16 %v7602_v0  ;;  %v7782_v61 = vld [vmem:[#allocation31_spill] sm:$0xff]  ;;  %v3253_v51 = vld [vmem:[%s7168_s8] sm:$0xf] }
 0x1bd   : > { %v942_v59 = vsel %vm7775_vm12, %v7774_v50, %v7773_v55  ;;  %vm7776_vm14 = vmmov %vm7775_vm12  ;;  %vm7777_vm4 = vcmp.eq.s32.totalorder %v7674_v30, 1  ;;  %vm7779_vm5 = vcmask 908288   ;;  %vm7780_vm2 = vcmp.eq.s32.totalorder %v7675_v28, 1  ;;  %v7781_v50 = vld [vmem:[#allocation35_spill] sm:$0xff] }
 0x1be   : > { %v943_v45 = vsel %vm7776_vm14, %v7773_v55, %v4300_v57  ;;  %vm7784_vm12 = vcmp.eq.s32.totalorder %v7684_v1, 1  ;;  %vm7785_vm14 = vcmp.eq.s32.totalorder %v7680_v20, 1  ;;  %v3135_v20 = vld [vmem:[#allocation2 + $0xc] sm:$0xf]  ;;  %v7829_v30 = vmov 18  }
 0x1bf   : > { %v7841_v32 = vmov 0  ;;  %vm2630_vm8 = vcmask 539648   ;;  %vm2676_vm3 = vcmask 523264   ;;  %vm2825_vm6 = vcmask 293888  }
 0x1c0   : > { %v803_v7 = vpop.permute.xlu0 %802 }
 0x1c1   : > { %v810_v34 = vrot.slane %v803_v7, %v7762_v22  ;;  %v901_v7 = vsel %vm7771_vm0, %v897_v37, 0.0  ;;  %vm7783_vm0 = vmmov %vm7779_vm5 }
 0x1c2   : > { %v909_v53 = vmul.f32 %v7772_v60, %v901_v7 }
 0x1c3   : > { %v812_v25 = vmul.f32 %v6012_v13, %v810_v34  ;;  %v908_v34 = vmul.f32 %v7772_v60, %v900_v10  ;;  %v947_v10 = vsel %vm7780_vm2, %v943_v45, 0.0  ;;  %v7786_v60 = vld [vmem:[#allocation37_spill] sm:$0xff]  ;;  %vm7445_vm2 = vcmask 228352  }
 0x1c5   : > { %v814_v15 = vcombine.high %v812_v25, %v812_v25  ;;  %v816_v6 = vadd.f32 %v812_v25, %v798_v63  ;;  %v946_v63 = vsel %vm7777_vm4, %v942_v59, 0.0  ;;  %v7778_v25 = vld [vmem:[#allocation36_spill] sm:$0xff]  ;;  %vm7408_vm4 = vcmask 3072  }
 0x1c6   : > { %v991_v37 = vsel %vm7779_vm5, %v7778_v25, %v4306_v3  ;;  %v954_v0 = vmul.f32 %v7781_v50, %v946_v63  ;;  %vm2550_vm5 = vcmp.ge.s32.totalorder %v6361_v33, 4 }
 0x1c7   : > { %v817_v18 = vadd.f32 %v814_v15, %v799_v46  ;;  %v862_v56 = vadd.f32 %v860_v19, %v816_v6  ;;  %v990_v46 = vsel %vm7783_vm0, %v7782_v61, %v7778_v25  ;;  %v955_v19 = vmul.f32 %v7781_v50, %v947_v10  ;;  %v1006_v61 = vld [vmem:[%s7787_s3] sm:$0xf] }
 0x1c8   : > { %v995_v15 = vsel %vm7784_vm12, %v991_v37, 0.0  ;;  %v6370_v5 = vsel %vm2550_vm5, 1, %v7527_v42  ;;  %vm7420_vm12 = vcmp.lt.s32.totalorder %v6361_v33, 12 }
 0x1c9   : > { %v863_v11 = vadd.f32 %v861_v47, %v817_v18  ;;  %v910_v35 = vadd.f32 %v908_v34, %v862_v56  ;;  %v994_v47 = vsel %vm7785_vm14, %v990_v46, 0.0  ;;  %v1003_v34 = vmul.f32 %v7786_v60, %v995_v15 }
 0x1ca   : > { %v1002_v55 = vmul.f32 %v7786_v60, %v994_v47  ;;  %v4182_v14 = vrot.slane %v6370_v5, 9 }
 0x1cb   : > { %v911_v57 = vadd.f32 %v909_v53, %v863_v11  ;;  %v956_v6 = vadd.f32 %v954_v0, %v910_v35 }
 0x1cc   : > { %vm6385_vm0 = vcmp.ne.s32.totalorder %v4182_v14, 0  ;;  %v7836_v14 = vmov 22  }
 0x1cd   : > { %v957_v7 = vadd.f32 %v955_v19, %v911_v57  ;;  %v1004_v3 = vadd.f32 %v1002_v55, %v956_v6  ;;  %v2683_v55 = vld [vmem:[%s7168_s8] sm:$0xf]  ;;  %vm2555_vm14 = vmand %vm2550_vm5, %vm6385_vm0 }
 0x1cf   : > { %v1005_v59 = vadd.f32 %v1003_v34, %v957_v7 }
 0x1d1   : > { %4166 = vmatprep.subr.msk.mxu0 %vm7419_vm11, %v1005_v59  ;;  %v2731_v59 = vld [vmem:[%s7168_s8] sm:$0xf] }
 0x1d2   : > { %4167 = vmatpush1.msk.msra.mxu0 %vm7419_vm11, %v1004_v3  ;;  %v7789_v3 = vmov 3  }
 0x1d3   : > { %4168 = vmatmul.mubr.msk.f32.vlgmr.msra.gmra.mrb[0].mxu0 %vm7444_vm15, %v1006_v61  ;;  %v4398_v61 = vld [vmem:[%s7166_s6] sm:$0xf]  ;;  %vm7850_vm15 = vcmask 277504  }
 0x1d4   : > { %2520 = vmatprep.mubr.f32.mxu0 %v7713_v21 }
 0x285   : > { %v2188_v45 = vpop.f32.mrb[0].mxu1 }
 0x286   : > { %v2198_v18 = vsel %vm7419_vm11, %v2188_v45, 0.0  ;;  %v2205_v56 = vmul.f32 %v2188_v45, %v2188_v45  ;;  %v2190_v53 = vpop.f32.mrb[1].mxu1 }
 0x287   : > { %v2195_v63 = vcombine.low %v2188_v45, %v2190_v53  ;;  %v2199_v25 = vsel %vm7419_vm11, %v2190_v53, 0.0  ;;  %v2206_v37 = vmul.f32 %v2190_v53, %v2190_v53  ;;  %v7790_v45 = vmov 5   ;;  %v2784_v53 = vld [vmem:[%s7168_s8] sm:$0xf] }
 0x288   : > { %v2200_v11 = vadd.f32 %v2199_v25, %v2198_v18  ;;  %v2207_v35 = vsel %vm7419_vm11, %v2205_v56, 0.0  ;;  %v7791_v18 = vld [vmem:[#allocation52_spill] sm:$0xff]  ;;  %v2549_v25 = vld [vmem:[#allocation2 + $0x8] sm:$0xf] }
 0x289   : > { %2197 = vst [vmem:[%s569_s24] sm:$0xff] %v2195_v63  ;;  %v2208_v21 = vsel %vm7419_vm11, %v2206_v37, 0.0  ;;  %s7383_s24 = smov 66   ;;  %v4399_v56 = vld [vmem:[#allocation2] sm:$0xff]  ;;  %v7792_v63 = vmov 12   ;;  %v2600_v37 = vld [vmem:[#allocation2 + $0x8] sm:$0xf] }
 0x28a   : > { %v2209_v10 = vadd.f32 %v2208_v21, %v2207_v35  ;;  %v6116_v35 = vpop.permute.xlu1 %2221  ;;  %v2648_v21 = vld [vmem:[#allocation2 + $0x8] sm:$0xf] }
 0x28b   : > { %7793 = vst [vmem:[#allocation58_spill] sm:$0xff] %v6116_v35  ;;  %v2652_v35 = vrot.slane %v6370_v5, %v5160_v49 }
 0x2a6   : > { %v1084_v50 = vpop.f32.mrb[0].mxu0 }
 0x2a7   : > { %v1094_v0 = vsel %vm7419_vm11, %v1084_v50, 0.0  ;;  %v1101_v46 = vmul.f32 %v1084_v50, %v1084_v50  ;;  %v1086_v19 = vpop.f32.mrb[1].mxu0 }
 0x2a8   : > { %v1091_v57 = vcombine.low %v1084_v50, %v1086_v19  ;;  %v1095_v15 = vsel %vm7419_vm11, %v1086_v19, 0.0  ;;  %v1102_v6 = vmul.f32 %v1086_v19, %v1086_v19  ;;  %v7796_v19 = vmov 13  }
 0x2a9   : > { %v1096_v47 = vadd.f32 %v1095_v15, %v1094_v0  ;;  %v1103_v7 = vsel %vm7419_vm11, %v1101_v46, 0.0  ;;  %v2832_v0 = vld [vmem:[%s7168_s8] sm:$0xf]  ;;  %v6133_v46 = vpop.permute.xlu1 %2234 }
 0x2aa   : > { %1093 = vst [vmem:[%s564_s28] sm:$0xff] %v1091_v57  ;;  %v1104_v60 = vsel %vm7419_vm11, %v1102_v6, 0.0  ;;  %s7389_s28 = smov 60   ;;  %7795 = vst [vmem:[#allocation59_spill] sm:$0xff] %v6133_v46  ;;  %v2694_v57 = vld [vmem:[#allocation2 + $0x8] sm:$0xf]  ;;  %v7798_v6 = vmov 6  }
 0x2ab   : > { %1097 = vadd.xlane.f32.xlu0 %v1096_v47  ;;  %v1105_v34 = vadd.f32 %v1104_v60, %v1103_v7  ;;  %v2859_v47 = vld [vmem:[%s7168_s8] sm:$0xf]  ;;  %v2972_v7 = vld [vmem:[#allocation2 + $0x8] sm:$0xf] }
 0x2ac   : > { %v2742_v60 = vld [vmem:[#allocation2 + $0x8] sm:$0xf] }
 0x2ad   : > { %1106 = vadd.xlane.f32.xlu1 %v1105_v34  ;;  %v6138_v15 = vpop.permute.xlu1 %2246 }
 0x2ae   : > { %7797 = vst [vmem:[#allocation66_spill] sm:$0xff] %v6138_v15  ;;  %v3312_v15 = vld [vmem:[#allocation2 + $0xc] sm:$0xf] }
 0x2af   : > { %2201 = vadd.xlane.f32.xlu0 %v2200_v11  ;;  %v6114_v11 = vld [vmem:[%s7168_s8] sm:$0xf] }
 0x2b1   : > { %v6148_v34 = vpop.permute.xlu1 %2259 }
 0x2b2   : > { %7799 = vst [vmem:[#allocation57_spill] sm:$0xff] %v6148_v34  ;;  %v3440_v34 = vld [vmem:[%s7168_s8] sm:$0xf] }
 0x2be   : > { %2686 = vperm.xlu1 %4361, %v2683_v55   ;;  %v3078_v55 = vld [vmem:[%s7168_s8] sm:$0xf] }
 0x2c2   : > { %4362 = vset.pattern.permute.xlu1 %v7789_v3  ;;  %v2886_v3 = vld [vmem:[%s7168_s8] sm:$0xf] }
 0x2c3   : > { %2734 = vperm.xlu1 %4362, %v2731_v59   ;;  %v7801_v59 = vmov 7  }
 0x2c5   : > { %2322 = vperm.xlu0 %4360, %v4398_v61   ;;  %v6158_v61 = vpop.permute.xlu1 %2273 }
 0x2c6   : > { %7802 = vst [vmem:[#allocation56_spill] sm:$0xff] %v6158_v61 }
 0x2c7   : > { %4363 = vset.pattern.permute.xlu1 %v7790_v45 }
 0x2c9   : > { %2580 = vrot.lane.b32.xlu0 %v7791_v18, %s7385_s2 }
 0x2cd   : > { %2626 = vrot.lane.b32.xlu0 %v7791_v18, %s7383_s24 }
 0x2d1   : > { %2578 = vrot.lane.b32.xlu0 %v4399_v56, %s7385_s2 }
 0x2d5   : > { %2787 = vperm.xlu0 %4360, %v2784_v53   ;;  %v3172_v53 = vld [vmem:[%s7168_s8] sm:$0xf] }
 0x2d9   : > { %2670 = vrot.lane.b32.xlu0 %v4399_v56, %s7387_s1 }
 0x2da   : > { %4369 = vset.pattern.permute.xlu0 %v7792_v63  ;;  %v7806_v63 = vmov 8  }
 0x2dd   : > { %2720 = vrot.lane.b32.xlu0 %v7791_v18, %s7391_s20 }
 0x2e1   : > { %2718 = vrot.lane.b32.xlu0 %v4399_v56, %s7391_s20 }
 0x2e5   : > { %2773 = vrot.lane.b32.xlu0 %v7791_v18, %s7389_s28 }
 0x2e7   : > { %2210 = vadd.xlane.f32.xlu1 %v2209_v10  ;;  %v6121_v10 = vld [vmem:[#allocation2] sm:$0xff] }
 0x2e8   : > { %v6126_v50 = vcombine.high %v6121_v10, %v6121_v10 }
 0x2e9   : > { %2771 = vrot.lane.b32.xlu0 %v4399_v56, %s7389_s28  ;;  %s584_s28 = scalar_lea.vmem %s7174_s14, %s4581_s27 }
 0x2ed   : > { %2821 = vrot.lane.b32.xlu0 %v7791_v18, %s7382_s0 }
 0x2f1   : > { %2819 = vrot.lane.b32.xlu0 %v4399_v56, %s7382_s0  ;;  %s7815_s0 = smov 98  }
 0x2f5   : > { %2849 = vrot.lane.b32.xlu0 %v7791_v18, %s7517_s17 }
 0x2f8   : > { %2582 = vrot.lane.b32.xlu1 %v2549_v25, %s7385_s2  ;;  %s7393_s2 = smov 28   ;;  %v2913_v25 = vld [vmem:[%s7168_s8] sm:$0xf] }
 0x2f9   : > { %2847 = vrot.lane.b32.xlu0 %v4399_v56, %s7517_s17 }
 0x2fc   : > { %2628 = vrot.lane.b32.xlu1 %v2600_v37, %s7383_s24  ;;  %v6171_v37 = vpop.permute.xlu1 %2286 }
 0x2fd   : > { %2876 = vrot.lane.b32.xlu0 %v7791_v18, %s7521_s29  ;;  %7807 = vst [vmem:[#allocation5_spill] sm:$0xff] %v6171_v37 }
 0x300   : > { %2624 = vrot.lane.b32.xlu1 %v4399_v56, %s7383_s24  ;;  %s7794_s24 = smov 30  }
 0x301   : > { %2874 = vrot.lane.b32.xlu0 %v4399_v56, %s7521_s29  ;;  %v7804_v56 = vmov 15  }
 0x304   : > { %2672 = vrot.lane.b32.xlu1 %v7791_v18, %s7387_s1  ;;  %v2795_v18 = vld [vmem:[#allocation2 + $0x8] sm:$0xf] }
 0x305   : > { %3045 = vperm.xlu0 %4369, %v6114_v11  }
 0x308   : > { %2674 = vrot.lane.b32.xlu1 %v2648_v21, %s7387_s1  ;;  %s7394_s1 = smov 4   ;;  %v3199_v21 = vld [vmem:[%s7168_s8] sm:$0xf] }
 0x309   : > { %2901 = vrot.lane.b32.xlu0 %v6121_v10, %s7794_s24 }
 0x30a   : > { %4371 = vset.pattern.permute.xlu0 %v7796_v19  ;;  %v2843_v19 = vld [vmem:[#allocation2 + $0x8] sm:$0xf] }
 0x30c   : > { %2835 = vperm.xlu1 %4363, %v2832_v0   ;;  %v7808_v0 = vmov 16  }
 0x30d   : > { %2950 = vrot.lane.b32.xlu0 %v6126_v50, %s7393_s2 }
 0x310   : > { %2722 = vrot.lane.b32.xlu1 %v2694_v57, %s7391_s20  ;;  %s7800_s20 = smov 60   ;;  %v6177_v57 = vpop.permute.xlu1 %2300 }
 0x311   : > { %2948 = vrot.lane.b32.xlu0 %v6121_v10, %s7393_s2  ;;  %4364 = vset.pattern.permute.xlu1 %v7798_v6  ;;  %7809 = vst [vmem:[#allocation63_spill] sm:$0xff] %v6177_v57  ;;  %s4210_s2 = smul.u32 48, %s8073_s22  ;;  %v6416_v57 = vsel %vm2555_vm14, 1, %v7527_v42  ;;  %vm2695_vm14 = vmand %vm2550_vm5, %vm5249_vm13 }
 0x312   : > { %v2560_v26 = vrot.slane %v6416_v57, %v5160_v49  ;;  %v6446_v43 = vsel %vm2695_vm14, 1, %v7527_v42 }
 0x313   : > { %s6212_s3 = scalar_lea.vmem %s7176_s16, %s4210_s2  ;;  %s7823_s2 = smov 68  }
 0x314   : > { %2862 = vperm.xlu1 %4364, %v2859_v47   ;;  %v7810_v47 = vmov 9   ;;  %v2568_v48 = vrot.slane %v2560_v26, %v5160_v49  ;;  %v7846_v26 = vmov 23  }
 0x315   : > { %2998 = vrot.lane.b32.xlu0 %v2972_v7, %s7394_s1  ;;  %s7805_s1 = smov 36   ;;  %v2961_v7 = vld [vmem:[%s7168_s8] sm:$0xf] }
 0x318   : > { %2775 = vrot.lane.b32.xlu1 %v2742_v60, %s7800_s20  ;;  %v6186_v60 = vcombine.high %v6012_v13, %v6012_v13 }
 0x319   : > { %3081 = vperm.xlu0 %4371, %v3078_v55   ;;  %4365 = vset.pattern.permute.xlu1 %v7801_v59  ;;  %v7811_v55 = vmov 19  }
 0x31c   : > { %2889 = vperm.xlu1 %4365, %v2886_v3   ;;  %v2870_v3 = vld [vmem:[#allocation2 + $0x8] sm:$0xf] }
 0x31d   : > { %3021 = vrot.lane.b32.xlu0 %v6121_v10, %s7803_s26 }
 0x31e   : > { %4373 = vset.pattern.permute.xlu0 %v7804_v56  ;;  %v7813_v56 = vmov 10  }
 0x320   : > { %2823 = vrot.lane.b32.xlu1 %v2795_v18, %s7805_s1  ;;  %v6191_v18 = vpop.permute.xlu1 %2313  ;;  %s7818_s1 = smov 94  }
 0x321   : > { %3175 = vperm.xlu0 %4373, %v3172_v53   ;;  %4366 = vset.pattern.permute.xlu1 %v7806_v63  ;;  %7812 = vst [vmem:[#allocation62_spill] sm:$0xff] %v6191_v18  ;;  %v3006_v53 = vld [vmem:[%s7168_s8] sm:$0xf] }
 0x324   : > { %2916 = vperm.xlu1 %4366, %v2913_v25   ;;  %v6200_v25 = vpop.permute.xlu1 %2343 }
 0x325   : > { %4374 = vset.pattern.permute.xlu0 %v7808_v0  ;;  %7814 = vst [vmem:[#allocation61_spill] sm:$0xff] %v6200_v25  ;;  %v3301_v0 = vld [vmem:[%s7168_s8] sm:$0xf]  ;;  %v7832_v25 = vmov 21  }
 0x326   : > { %3202 = vperm.xlu0 %4374, %v3199_v21  }
 0x328   : > { %2851 = vrot.lane.b32.xlu1 %v2843_v19, %s7517_s17  ;;  %v6205_v21 = vpop.permute.xlu1 %2594  ;;  %s7822_s17 = smov 4  }
 0x329   : > { %4367 = vset.pattern.permute.xlu1 %v7810_v47  ;;  %v2897_v47 = vld [vmem:[#allocation2 + $0x8] sm:$0xf] }
 0x32a   : > { %3111 = vrot.lane.b32.xlu0 %v6012_v13, %s4469_s4 }
 0x32b   : > { %4377 = vset.pattern.permute.xlu0 %v7811_v55 }
 0x32c   : > { %2964 = vperm.xlu1 %4367, %v2961_v7   ;;  %v7816_v7 = vmov 11  }
 0x32e   : > { %3161 = vrot.lane.b32.xlu0 %v6186_v60, %s4470_s5 }
 0x330   : > { %2878 = vrot.lane.b32.xlu1 %v2870_v3, %s7521_s29  ;;  %v3348_v3 = vld [vmem:[%s7168_s8] sm:$0xf]  ;;  %s7819_s29 = smov 28  }
 0x331   : > { %4368 = vset.pattern.permute.xlu1 %v7813_v56 }
 0x332   : > { %3159 = vrot.lane.b32.xlu0 %v6012_v13, %s4470_s5 }
 0x334   : > { %3009 = vperm.xlu1 %4368, %v3006_v53   ;;  %v7817_v53 = vmov 20  }
 0x336   : > { %3189 = vrot.lane.b32.xlu0 %v6186_v60, %s7815_s0 }
 0x338   : > { %2903 = vrot.lane.b32.xlu1 %v6126_v50, %s7794_s24  ;;  %v1098_v19 = vpop.xlane.xlu0 %1097 }
 0x339   : > { %1100 = vst.msk [vmem:[%s6212_s3] sm:$0xf] %vm7408_vm4, %v1098_v19  ;;  %4370 = vset.pattern.permute.xlu1 %v7816_v7  ;;  %v2924_v19 = vld [vmem:[#allocation2 + $0x8] sm:$0xf]  ;;  %v2382_v7 = vld [vmem:[%s7166_s6] sm:$0xf] }
 0x33a   : > { %v1107_v55 = vpop.xlane.xlu1 %1106  ;;  %3304 = vperm.xlu0 %4377, %v3301_v0  }
 0x33b   : > { %4169 = vst.msk [vmem:[%s6212_s3 + $0x4] sm:$0xf] %vm7408_vm4, %v1107_v55 }
 0x33c   : > { %2905 = vrot.lane.b32.xlu1 %v2897_v47, %s7794_s24  ;;  %v2202_v56 = vpop.xlane.xlu0 %2201  ;;  %v7821_v47 = vmov 14   ;;  %s7396_s24 = smov 92  }
 0x33d   : > { %4175 = vst.msk [vmem:[%s6212_s3 + $0x8] sm:$0xf] %vm7408_vm4, %v2202_v56  ;;  %v3017_v56 = vld [vmem:[#allocation2 + $0x8] sm:$0xf] }
 0x33e   : > { %4378 = vset.pattern.permute.xlu0 %v7817_v53  ;;  %v3124_v53 = vld [vmem:[%s7168_s8] sm:$0xf] }
 0x33f   : > { %3351 = vperm.xlu0 %4378, %v3348_v3   ;;  %v2409_v3 = vld [vmem:[%s7166_s6] sm:$0xf] }
 0x340   : > { %3036 = vperm.xlu1 %4370, %v6114_v11  }
 0x343   : > { %3241 = vrot.lane.b32.xlu0 %v6012_v13, %s7818_s1 }
 0x344   : > { %2952 = vrot.lane.b32.xlu1 %v2924_v19, %s7819_s29  ;;  %v6235_v0 = vpop.permute.xlu0 %2322  ;;  %4381 = vset.pattern.permute.xlu0 %v7798_v6  ;;  %v2436_v19 = vld [vmem:[%s7166_s6] sm:$0xf]  ;;  %s7827_s29 = smov 64  }
 0x345   : > { %7820 = vst [vmem:[#allocation60_spill] sm:$0xff] %v6235_v0  ;;  %4372 = vset.pattern.permute.xlu1 %v7821_v47  ;;  %v7825_v47 = vmov 17  }
 0x347   : > { %3290 = vrot.lane.b32.xlu0 %v6186_v60, %s7396_s24  ;;  %s7824_s24 = smov 66  }
 0x348   : > { %2996 = vrot.lane.b32.xlu1 %v6126_v50, %s7822_s17  ;;  %v6243_v11 = vpop.permute.xlu0 %2580 }
 0x34b   : > { %2385 = vperm.xlu0 %4381, %v2382_v7  }
 0x34c   : > { %2994 = vrot.lane.b32.xlu1 %v6121_v10, %s7822_s17  ;;  %v6250_v6 = vpop.permute.xlu0 %2626  ;;  %s7830_s17 = smov 62  }
 0x34f   : > { %3338 = vrot.lane.b32.xlu0 %v6186_v60, %s7823_s2 }
 0x350   : > { %3023 = vrot.lane.b32.xlu1 %v6126_v50, %s7803_s26  ;;  %v6256_v55 = vpop.permute.xlu0 %2578  ;;  %4383 = vset.pattern.permute.xlu0 %v7801_v59 }
 0x353   : > { %2412 = vperm.xlu0 %4383, %v2409_v3   ;;  %v7826_v3 = vmov 24  }
 0x354   : > { %3025 = vrot.lane.b32.xlu1 %v3017_v56, %s7803_s26  ;;  %v6263_v10 = vpop.permute.xlu0 %2787  ;;  %v3089_v56 = vld [vmem:[#allocation2 + $0xc] sm:$0xf]  ;;  %s7828_s26 = smov 96  }
 0x357   : > { %2345 = vrot.lane.b32.xlu0 %v6186_v60, %s7546_s19 }
 0x358   : > { %3127 = vperm.xlu1 %4372, %v3124_v53   ;;  %v6270_v50 = vpop.permute.xlu0 %2670  ;;  %4385 = vset.pattern.permute.xlu0 %v7806_v63 }
 0x35b   : > { %3385 = vrot.lane.b32.xlu0 %v6186_v60, %s7824_s24 }
 0x35c   : > { %3068 = vrot.lane.b32.xlu1 %v6186_v60, %s7546_s19  ;;  %v6277_v59 = vpop.permute.xlu0 %2720 }
 0x35d   : > { %4375 = vset.pattern.permute.xlu1 %v7825_v47  ;;  %v6302_v47 = vpop.permute.xlu1 %2686 }
 0x35f   : > { %2439 = vperm.xlu0 %4385, %v2436_v19   ;;  %v3226_v19 = vld [vmem:[%s7168_s8] sm:$0xf] }
 0x360   : > { %3066 = vrot.lane.b32.xlu1 %v6012_v13, %s7546_s19  ;;  %v6285_v7 = vpop.permute.xlu0 %2718 }
 0x363   : > { %2372 = vrot.lane.b32.xlu0 %v6186_v60, %s7815_s0 }
 0x364   : > { %3113 = vrot.lane.b32.xlu1 %v6186_v60, %s4469_s4  ;;  %v6291_v63 = vpop.permute.xlu0 %2773  ;;  %4387 = vset.pattern.permute.xlu0 %v7826_v3 }
 0x367   : > { %3430 = vrot.lane.b32.xlu0 %v6186_v60, %s7827_s29 }
 0x368   : > { %3115 = vrot.lane.b32.xlu1 %v3089_v56, %s4469_s4  ;;  %v6297_v53 = vpop.permute.xlu0 %2771  ;;  %v6310_v56 = vpop.permute.xlu1 %2734 }
 0x36b   : > { %2370 = vrot.lane.b32.xlu0 %v6012_v13, %s7815_s0 }
 0x36c   : > { %3229 = vperm.xlu1 %4375, %v3226_v19   ;;  %v6306_v1 = vpop.permute.xlu0 %2821 }
 0x36f   : > { %2399 = vrot.lane.b32.xlu0 %v6186_v60, %s7828_s26 }
 0x370   : > { %3163 = vrot.lane.b32.xlu1 %v3135_v20, %s4470_s5  ;;  %v6313_v28 = vpop.permute.xlu0 %2819  ;;  %s589_s5 = scalar_lea.vmem %s7175_s15, %s4581_s27 }
 0x371   : > { %4376 = vset.pattern.permute.xlu1 %v7829_v30 }
 0x373   : > { %3477 = vrot.lane.b32.xlu0 %v6186_v60, %s7830_s17 }
 0x374   : > { %3256 = vperm.xlu1 %4376, %v3253_v51   ;;  %v2211_v19 = vpop.xlane.xlu1 %2210  ;;  %v6321_v54 = vpop.permute.xlu0 %2849 }
 0x375   : > { %4176 = vst.msk [vmem:[%s6212_s3 + $0xc] sm:$0xf] %vm7408_vm4, %v2211_v19  ;;  %vm2601_vm4 = vmand %vm2550_vm5, %vm5178_vm10 }
 0x376   : > { %v6422_v2 = vsel %vm2601_vm4, 1, %v7527_v42 }
 0x377   : > { %2397 = vrot.lane.b32.xlu0 %v6012_v13, %s7828_s26  ;;  %v2606_v8 = vrot.slane %v6422_v2, %v5160_v49 }
 0x378   : > { %3187 = vrot.lane.b32.xlu1 %v6012_v13, %s7815_s0  ;;  %v6329_v30 = vpop.permute.xlu1 %2582  ;;  %v6331_v20 = vpop.permute.xlu0 %2847 }
 0x379   : > { %4379 = vset.pattern.permute.xlu1 %v7790_v45  ;;  %v2614_v61 = vrot.slane %v2606_v8, %v5160_v49  ;;  %v7844_v8 = vld [vmem:[#allocation4_spill] sm:$0xff] }
 0x37a   : > { %vm7845_vm14 = vcmp.ge.s32.totalorder %v7844_v8, 2 }
 0x37b   : > { %2426 = vrot.lane.b32.xlu0 %v6186_v60, %s7818_s1  ;;  %vm2796_vm1 = vmand %vm7845_vm14, %vm6385_vm0  ;;  %vm2619_vm7 = vcmp.eq.s32.totalorder %v2614_v61, 1 }
 0x37c   : > { %3216 = vrot.lane.b32.xlu1 %v6186_v60, %s7828_s26  ;;  %v6338_v51 = vpop.permute.xlu1 %2628  ;;  %v6340_v19 = vpop.permute.xlu0 %2876  ;;  %v6481_v31 = vsel %vm2796_vm1, 1, %v7527_v42  ;;  %vm2724_vm1 = vcmask 506880  }
 0x37f   : > { %3524 = vrot.lane.b32.xlu0 %v6186_v60, %s7800_s20 }
 0x380   : > { %3214 = vrot.lane.b32.xlu1 %v6012_v13, %s7828_s26  ;;  %v6346_v29 = vpop.permute.xlu1 %2624  ;;  %v6348_v62 = vpop.permute.xlu0 %2874 }
 0x383   : > { %2424 = vrot.lane.b32.xlu0 %v6012_v13, %s7818_s1 }
 0x384   : > { %3243 = vrot.lane.b32.xlu1 %v6186_v60, %s7818_s1  ;;  %v6354_v45 = vpop.permute.xlu1 %2672  ;;  %v6356_v23 = vpop.permute.xlu0 %3045 }
 0x388   : > { %2358 = vperm.xlu1 %4379, %v2355_v44   ;;  %v6372_v60 = vpop.permute.xlu1 %2674  ;;  %v6374_v58 = vpop.permute.xlu0 %2901 }
 0x38c   : > { %4380 = vset.pattern.permute.xlu1 %v7832_v25  ;;  %v6381_v18 = vpop.permute.xlu1 %2835  ;;  %v6383_v0 = vpop.permute.xlu0 %2950 }
 0x38d   : > { %3398 = vperm.xlu1 %4380, %v3395_v27   ;;  %v6405_v27 = vsel %vm7420_vm12, 1, %v7527_v42  ;;  %vm2584_vm12 = vcmask 556032  }
 0x38e   : > { %7837 = vst [vmem:[#allocation64_spill] sm:$0xff] %v6405_v27  ;;  %v2585_v39 = vsel %vm2584_vm12, %v6256_v55, %v6243_v11 }
 0x390   : > { %v6390_v37 = vpop.permute.xlu1 %2722  ;;  %v2949_v46 = vpop.permute.xlu0 %2948 }
 0x391   : > { %3292 = vrot.lane.b32.xlu1 %v3264_v41, %s7835_s10  ;;  %v6395_v25 = vsel %vm7445_vm2, %v2949_v46, %v6383_v0  ;;  %vm3165_vm2 = vcmask 818176  }
 0x392   : > { %4382 = vset.pattern.permute.xlu1 %v7836_v14  ;;  %v4183_v14 = vrot.slane %v6405_v27, 9 }
 0x394   : > { %v6411_v41 = vpop.permute.xlu1 %2862  ;;  %v6413_v46 = vpop.permute.xlu0 %2998  ;;  %vm6441_vm4 = vcmp.ne.s32.totalorder %v4183_v14, 0  ;;  %v2700_v14 = vrot.slane %v6446_v43, %v5160_v49 }
 0x395   : > { %3288 = vrot.lane.b32.xlu1 %v6012_v13, %s7835_s10  ;;  %v7842_v32 = vsel %vm6441_vm4, 4294967295, %v7841_v32  ;;  %vm2748_vm11 = vmand %vm2550_vm5, %vm6441_vm4  ;;  %vm2573_vm5 = vcmp.eq.s32.totalorder %v2568_v48, 1 }
 0x396   : > { %7843 = vst [vmem:[#allocation65_spill] sm:$0xff] %v7842_v32  ;;  %v2708_v48 = vrot.slane %v2700_v14, %v5160_v49  ;;  %v2589_v16 = vsel %vm2573_vm5, %v2585_v39, 0.0  ;;  %v2339_v39 = vld [vmem:[#allocation2 + $0xc] sm:$0xf]  ;;  %vm7849_vm5 = vcmp.ge.s32.totalorder %v7844_v8, 2 }
 0x398   : > { %v6435_v38 = vpop.permute.xlu1 %2775  ;;  %v6437_v9 = vpop.permute.xlu0 %3081 }
 0x399   : > { %7840 = vst [vmem:[#allocation67_spill] sm:$0xff] %v6437_v9  ;;  %3443 = vperm.xlu1 %4382, %v3440_v34   ;;  %v2660_v34 = vrot.slane %v2652_v35, %v5160_v49  ;;  %v2631_v35 = vsel %vm2630_vm8, %v6346_v29, %v6250_v6  ;;  %v2677_v29 = vsel %vm2676_vm3, %v6270_v50, %v6354_v45 }
 0x39a   : > { %v2635_v61 = vsel %vm2619_vm7, %v2631_v35, 0.0  ;;  %vm2713_vm7 = vcmp.eq.s32.totalorder %v2708_v48, 1  ;;  %v2564_v35 = vrot.slane %v6416_v57, %v5167_v36  ;;  %v2597_v9 = vmul.f32 %v6205_v21, %v2589_v16 }
 0x39b   : > { %vm2665_vm14 = vcmp.eq.s32.totalorder %v2660_v34, 1  ;;  %v2801_v34 = vrot.slane %v6481_v31, %v5160_v49  ;;  %v2643_v52 = vmul.f32 %v5979_v12, %v2635_v61 }
 0x39c   : > { %v6450_v4 = vpop.permute.xlu1 %2889  ;;  %v6452_v24 = vpop.permute.xlu0 %3021  ;;  %v2681_v40 = vsel %vm2665_vm14, %v2677_v29, 0.0  ;;  %v2725_v29 = vsel %vm2724_vm1, %v6285_v7, %v6277_v59  ;;  %vm2925_vm14 = vmand %vm7849_vm5, %vm6441_vm4  ;;  %v2572_v7 = vrot.slane %v2564_v35, %v5160_v49 }
 0x39d   : > { %3340 = vrot.lane.b32.xlu1 %v3312_v15, %s7823_s2  ;;  %v6471_v15 = vsel %vm2748_vm11, 1, %v7527_v42  ;;  %v2689_v61 = vmul.f32 %v6302_v47, %v2681_v40  ;;  %vm2777_vm11 = vcmask 490496   ;;  %v2645_v57 = vadd.f32 %v2643_v52, %v2597_v9  ;;  %v3359_v52 = vld [vmem:[#allocation2 + $0xc] sm:$0xf] }
 0x39e   : > { %4384 = vset.pattern.permute.xlu1 %v7846_v26  ;;  %v3487_v26 = vld [vmem:[%s7168_s8] sm:$0xf]  ;;  %v2753_v55 = vrot.slane %v6471_v15, %v5160_v49  ;;  %v2729_v40 = vsel %vm2713_vm7, %v2725_v29, 0.0  ;;  %v2778_v9 = vsel %vm2777_vm11, %v6297_v53, %v6291_v63  ;;  %v6533_v48 = vsel %vm2925_vm14, 1, %v7527_v42 }
 0x39f   : > { %v2757_v53 = vrot.slane %v6471_v15, %v5167_v36  ;;  %vm2574_vm7 = vcmp.eq.s32.totalorder %v2572_v7, 1  ;;  %v2632_v15 = vsel %vm2630_vm8, %v6250_v6, %v6338_v51  ;;  %v2586_v6 = vsel %vm2584_vm12, %v6243_v11, %v6329_v30  ;;  %v7852_v51 = vld [vmem:[#allocation95_spill] sm:$0xff] }
 0x3a0   : > { %v6473_v33 = vpop.permute.xlu1 %2823  ;;  %v6475_v17 = vpop.permute.xlu0 %3175  ;;  %v2761_v27 = vrot.slane %v2753_v55, %v5160_v49  ;;  %v2779_v7 = vsel %vm2777_vm11, %v6291_v63, %v6435_v38  ;;  %v2934_v38 = vrot.slane %v6533_v48, %v5167_v36 }
 0x3a1   : > { %7847 = vst [vmem:[#allocation74_spill] sm:$0xff] %v6475_v17  ;;  %3336 = vrot.lane.b32.xlu1 %v6012_v13, %s7823_s2  ;;  %v2610_v17 = vrot.slane %v6422_v2, %v5167_v36  ;;  %v2656_v2 = vrot.slane %v6370_v5, %v5167_v36 }
 0x3a2   : > { %vm2766_vm9 = vcmp.eq.s32.totalorder %v2761_v27, 1 }
 0x3a3   : > { %v2618_v55 = vrot.slane %v2610_v17, %v5160_v49  ;;  %v2737_v17 = vmul.f32 %v6310_v56, %v2729_v40  ;;  %v2664_v27 = vrot.slane %v2656_v2, %v5160_v49 }
 0x3a4   : > { %v6496_v50 = vpop.permute.xlu1 %2916 }
 0x3a5   : > { %3490 = vperm.xlu1 %4384, %v3487_v26   ;;  %v6499_v14 = vpop.permute.xlu0 %3202  ;;  %v2809_v26 = vrot.slane %v2801_v34, %v5160_v49  ;;  %v2691_v34 = vadd.f32 %v2689_v61, %v2645_v57  ;;  %vm2620_vm14 = vcmp.eq.s32.totalorder %v2618_v55, 1  ;;  %v2853_v61 = vsel %vm7850_vm15, %v6331_v20, %v6321_v54 }
 0x3a6   : > { %7848 = vst [vmem:[#allocation69_spill] sm:$0xff] %v6499_v14  ;;  %vm2666_vm15 = vcmp.eq.s32.totalorder %v2664_v27, 1 }
 0x3a7   : > { %vm2814_vm5 = vcmp.eq.s32.totalorder %v2809_v26, 1  ;;  %v2739_v57 = vadd.f32 %v2737_v17, %v2691_v34  ;;  %v2765_v26 = vrot.slane %v2757_v53, %v5160_v49  ;;  %v3534_v17 = vld [vmem:[%s7168_s8] sm:$0xf] }
 0x3a8   : > { %v6512_v14 = vpop.permute.xlu1 %2851 }
 0x3a9   : > { %2347 = vrot.lane.b32.xlu1 %v2339_v39, %s7546_s19  ;;  %v6521_v16 = vpop.permute.xlu0 %3111  ;;  %v2704_v39 = vrot.slane %v6446_v43, %v5167_v36  ;;  %v2782_v43 = vsel %vm2766_vm9, %v2778_v9, 0.0  ;;  %vm7851_vm9 = vcmask 261120  }
 0x3aa   : > { %4386 = vset.pattern.permute.xlu1 %v7826_v3  ;;  %v2826_v3 = vsel %vm2825_vm6, %v6313_v28, %v6306_v1  ;;  %v2930_v28 = vrot.slane %v6533_v48, %v5160_v49  ;;  %v2790_v32 = vmul.f32 %v6263_v10, %v2782_v43  ;;  %v2880_v20 = vsel %vm7851_vm9, %v6348_v62, %v6340_v19  ;;  %v7854_v43 = vld [vmem:[#allocation100_spill] sm:$0xff] }
 0x3ab   : > { %v2830_v2 = vsel %vm2814_vm5, %v2826_v3, 0.0  ;;  %v2712_v40 = vrot.slane %v2704_v39, %v5160_v49  ;;  %vm7853_vm5 = vcmp.eq.s32.totalorder %v7852_v51, 1  ;;  %v2678_v39 = vsel %vm2676_vm3, %v6354_v45, %v6372_v60 }
 0x3ac   : > { %v6535_v29 = vpop.permute.xlu1 %2964  ;;  %v2636_v3 = vsel %vm2620_vm14, %v2632_v15, 0.0  ;;  %v2792_v53 = vadd.f32 %v2790_v32, %v2739_v57  ;;  %v2838_v11 = vmul.f32 %v6381_v18, %v2830_v2  ;;  %v2938_v30 = vrot.slane %v2930_v28, %v5160_v49  ;;  %v2366_v28 = vld [vmem:[#allocation2 + $0xc] sm:$0xf] }
 0x3ad   : > { %3387 = vrot.lane.b32.xlu1 %v3359_v52, %s7824_s24  ;;  %v6545_v35 = vpop.permute.xlu0 %3161  ;;  %v2805_v52 = vrot.slane %v6481_v31, %v5167_v36  ;;  %v2857_v31 = vsel %vm7853_vm5, %v2853_v61, 0.0  ;;  %vm7855_vm9 = vcmp.eq.s32.totalorder %v7854_v43, 1  ;;  %vm2714_vm5 = vcmp.eq.s32.totalorder %v2712_v40, 1  ;;  %v7857_v40 = vld [vmem:[#allocation104_spill] sm:$0xff] }
 0x3ae   : > { %v2884_v61 = vsel %vm7855_vm9, %v2880_v20, 0.0  ;;  %v2682_v51 = vsel %vm2666_vm15, %v2678_v39, 0.0  ;;  %v2726_v32 = vsel %vm2724_vm1, %v6277_v59, %v6390_v37  ;;  %v2865_v55 = vmul.f32 %v6411_v41, %v2857_v31  ;;  %v3406_v31 = vld [vmem:[#allocation2 + $0xc] sm:$0xf] }
 0x3af   : > { %v2813_v45 = vrot.slane %v2805_v52, %v5160_v49  ;;  %v2644_v57 = vmul.f32 %v5979_v12, %v2636_v3  ;;  %vm2767_vm14 = vcmp.eq.s32.totalorder %v2765_v26, 1  ;;  %v2840_v2 = vadd.f32 %v2838_v11, %v2792_v53 }
 0x3b0   : > { %v2879_v9 = vpop.permute.xlu1 %2878  ;;  %vm2943_vm9 = vcmp.eq.s32.totalorder %v2938_v30, 1  ;;  %v2892_v27 = vmul.f32 %v6450_v4, %v2884_v61  ;;  %v2690_v52 = vmul.f32 %v6302_v47, %v2682_v51  ;;  %v2730_v37 = vsel %vm2714_vm5, %v2726_v32, 0.0 }
 0x3b1   : > { %3383 = vrot.lane.b32.xlu1 %v6012_v13, %s7824_s24  ;;  %v3160_v34 = vpop.permute.xlu0 %3159  ;;  %v2867_v20 = vadd.f32 %v2865_v55, %v2840_v2  ;;  %v2827_v12 = vsel %vm2825_vm6, %v6306_v1, %v6473_v33  ;;  %vm7856_vm15 = vcmask 244736   ;;  %v2959_v63 = vsel %vm2943_vm9, %v6395_v25, 0.0  ;;  %v7865_v55 = vld [vmem:[#allocation102_spill] sm:$0xff]  ;;  %v7867_v2 = vld [vmem:[#allocation105_spill] sm:$0xff]  ;;  %s7893_s24 = smov 1  }
 0x3b2   : > { %v6576_v62 = vsel %vm3165_vm2, %v3160_v34, %v6545_v35  ;;  %v2590_v34 = vsel %vm2574_vm7, %v2586_v6, 0.0  ;;  %vm2815_vm7 = vcmp.eq.s32.totalorder %v2813_v45, 1  ;;  %v2783_v47 = vsel %vm2767_vm14, %v2779_v7, 0.0 }
 0x3b3   : > { %v2598_v15 = vmul.f32 %v6205_v21, %v2590_v34  ;;  %vm7858_vm5 = vcmp.eq.s32.totalorder %v7857_v40, 1  ;;  %v2738_v39 = vmul.f32 %v6310_v56, %v2730_v37  ;;  %v2894_v1 = vadd.f32 %v2892_v27, %v2867_v20  ;;  %v7861_v56 = vld [vmem:[#allocation97_spill] sm:$0xff] }
 0x3b4   : > { %v6587_v60 = vpop.permute.xlu1 %3009  ;;  %vm7859_vm6 = vcmask 277504   ;;  %v2791_v25 = vmul.f32 %v6263_v10, %v2783_v47  ;;  %v2967_v26 = vmul.f32 %v6535_v29, %v2959_v63  ;;  %vm7860_vm14 = vcmask 261120   ;;  %v2393_v27 = vld [vmem:[#allocation2 + $0xc] sm:$0xf] }
 0x3b5   : > { %3537 = vperm.xlu1 %4386, %v3534_v17   ;;  %v2646_v21 = vadd.f32 %v2644_v57, %v2598_v15  ;;  %v2831_v17 = vsel %vm2815_vm7, %v2827_v12, 0.0  ;;  %v2881_v53 = vsel %vm7860_vm14, %v6340_v19, %v2879_v9  ;;  %vm7862_vm9 = vcmp.eq.s32.totalorder %v7861_v56, 1  ;;  %vm7864_vm7 = vmmov %vm7856_vm15 }
 0x3b6   : > { %v2839_v34 = vmul.f32 %v6381_v18, %v2831_v17  ;;  %vm7870_vm14 = vcmask 228352   ;;  %v3053_v17 = vrot.slane %v6356_v23, %v7762_v22 }
 0x3b7   : > { %v2692_v48 = vadd.f32 %v2690_v52, %v2646_v21  ;;  %v7869_v52 = vld [vmem:[#allocation72_spill] sm:$0xff]  ;;  %v3451_v21 = vld [vmem:[#allocation2 + $0xc] sm:$0xf] }
 0x3b8   : > { %v2904_v59 = vpop.permute.xlu1 %2903 }
 0x3b9   : > { %v2907_v6 = vsel %vm7856_vm15, %v6374_v58, %v2904_v59  ;;  %2374 = vrot.lane.b32.xlu1 %v2366_v28, %s7815_s0  ;;  %v2854_v58 = vsel %vm7859_vm6, %v6321_v54, %v6512_v14  ;;  %v2942_v54 = vrot.slane %v2934_v38, %v5160_v49  ;;  %v7863_v14 = vld [vmem:[#allocation73_spill] sm:$0xff]  ;;  %v2740_v45 = vadd.f32 %v2738_v39, %v2692_v48  ;;  %s7891_s0 = smov 16  }
 0x3ba   : > { %v2911_v51 = vsel %vm7858_vm5, %v2907_v6, 0.0  ;;  %v2858_v30 = vsel %vm7862_vm9, %v2854_v58, 0.0  ;;  %v2980_v61 = vrot.slane %v6370_v5, %v7863_v14  ;;  %vm7866_vm15 = vcmp.eq.s32.totalorder %v7865_v55, 1  ;;  %v2420_v48 = vld [vmem:[#allocation2 + $0xc] sm:$0xf] }
 0x3bb   : > { %v2919_v33 = vmul.f32 %v6496_v50, %v2911_v51  ;;  %v2885_v19 = vsel %vm7866_vm15, %v2881_v53, 0.0  ;;  %v2793_v57 = vadd.f32 %v2791_v25, %v2740_v45  ;;  %v2866_v28 = vmul.f32 %v6411_v41, %v2858_v30 }
 0x3bc   : > { %v2906_v3 = vpop.permute.xlu1 %2905  ;;  %vm7868_vm5 = vcmp.eq.s32.totalorder %v7867_v2, 1  ;;  %vm2944_vm6 = vcmp.eq.s32.totalorder %v2942_v54, 1  ;;  %v2893_v18 = vmul.f32 %v6450_v4, %v2885_v19  ;;  %v2988_v37 = vrot.slane %v2980_v61, %v7869_v52 }
 0x3bd   : > { %v2921_v11 = vadd.f32 %v2919_v33, %v2894_v1  ;;  %3432 = vrot.lane.b32.xlu1 %v3406_v31, %s7827_s29  ;;  %v2908_v10 = vsel %vm7864_vm7, %v2904_v59, %v2906_v3  ;;  %v2841_v15 = vadd.f32 %v2839_v34, %v2793_v57  ;;  %v2976_v59 = vrot.slane %v6370_v5, %v7869_v52  ;;  %v7878_v34 = vld [vmem:[#allocation109_spill] sm:$0xff] }
 0x3be   : > { %v2912_v7 = vsel %vm7868_vm5, %v2908_v10, 0.0  ;;  %vm2990_vm9 = vcmp.eq.s32.totalorder %v2988_v37, 1  ;;  %vm7871_vm7 = vcmask 31744   ;;  %v3055_v30 = vmul.f32 %v6012_v13, %v3053_v17 }
 0x3bf   : > { %v2969_v32 = vadd.f32 %v2967_v26, %v2921_v11  ;;  %v2868_v12 = vadd.f32 %v2866_v28, %v2841_v15  ;;  %v2920_v41 = vmul.f32 %v6496_v50, %v2912_v7  ;;  %v2984_v4 = vrot.slane %v2976_v59, %v7869_v52  ;;  %vm7872_vm5 = vmmov %vm7871_vm7  ;;  %v7874_v26 = vld [vmem:[#allocation108_spill] sm:$0xff]  ;;  %v3498_v11 = vld [vmem:[#allocation2 + $0xc] sm:$0xf] }
 0x3c0   : > { %v3037_v9 = vpop.permute.xlu1 %3036  ;;  %v3057_v19 = vcombine.high %v3055_v30, %v3055_v30  ;;  %v6678_v15 = vld [vmem:[#allocation2 + $0x4] sm:$0xff] }
 0x3c1   : > { %3428 = vrot.lane.b32.xlu1 %v6012_v13, %s7827_s29  ;;  %v2895_v63 = vadd.f32 %v2893_v18, %v2868_v12  ;;  %vm2989_vm15 = vcmp.eq.s32.totalorder %v2984_v4, 1  ;;  %v7880_v18 = vld [vmem:[#allocation71_spill] sm:$0xff]  ;;  %s7897_s29 = smov 127  }
 0x3c2   : > { %v4327_v37 = vunpack.i.h.bf16 %v7880_v18 }
 0x3c3   : > { %v2922_v31 = vadd.f32 %v2920_v41, %v2895_v63 }
 0x3c4   : > { %v2953_v20 = vpop.permute.xlu1 %2952 }
 0x3c5   : > { %v2956_v6 = vsel %vm7870_vm14, %v6383_v0, %v2953_v20  ;;  %2401 = vrot.lane.b32.xlu1 %v2393_v27, %s7828_s26  ;;  %vm7875_vm14 = vcmp.eq.s32.totalorder %v7874_v26, 1  ;;  %v6676_v27 = vpop.permute.xlu0 %3189  ;;  %v7881_v20 = vld [vmem:[#allocation64_spill] sm:$0xff] }
 0x3c6   : > { %v2960_v38 = vsel %vm2944_vm6, %v2956_v6, 0.0  ;;  %vm7873_vm6 = vcmask 15360   ;;  %v3093_v12 = vrot.slane %v7881_v20, %v7869_v52 }
 0x3c7   : > { %v2968_v47 = vmul.f32 %v6535_v29, %v2960_v38  ;;  %v7883_v38 = vld [vmem:[#allocation111_spill] sm:$0xff] }
 0x3c8   : > { %v2997_v51 = vpop.permute.xlu1 %2996 }
 0x3c9   : > { %v3001_v5 = vsel %vm7871_vm7, %v2997_v51, %v6413_v46  ;;  %3479 = vrot.lane.b32.xlu1 %v3451_v21, %s7830_s17  ;;  %v2970_v39 = vadd.f32 %v2968_v47, %v2922_v31  ;;  %v6689_v63 = vpop.permute.xlu0 %3304  ;;  %v7885_v47 = vld [vmem:[#allocation67_spill] sm:$0xff]  ;;  %v3097_v31 = vrot.slane %v7881_v20, %v7863_v14 }
 0x3ca   : > { %v3005_v50 = vsel %vm2990_vm9, %v3001_v5, 0.0  ;;  %vm7876_vm9 = vcmp.lt.s32.totalorder %v7844_v8, 14 }
 0x3cb   : > { %v3013_v0 = vmul.f32 %v6587_v60, %v3005_v50  ;;  %vm3136_vm7 = vmand %vm7876_vm9, %vm6385_vm0  ;;  %v3646_v50 = vld [vmem:[#allocation3] sm:$0xff]  ;;  %v3105_v17 = vrot.slane %v3097_v31, %v7869_v52  ;;  %v7898_v31 = vld [vmem:[#allocation40_spill] sm:$0xff] }
 0x3cc   : > { %v2995_v1 = vpop.permute.xlu1 %2994 }
 0x3cd   : > { %v3015_v58 = vadd.f32 %v3013_v0, %v2970_v39  ;;  %v3000_v33 = vsel %vm7872_vm5, %v2995_v1, %v2997_v51  ;;  %3475 = vrot.lane.b32.xlu1 %v6012_v13, %s7830_s17  ;;  %vm7879_vm5 = vcmp.eq.s32.totalorder %v7878_v34, 1  ;;  %v3101_v51 = vrot.slane %v3093_v12, %v7869_v52  ;;  %v6724_v12 = vld [vmem:[#allocation3 + $0x4] sm:$0xff] }
 0x3ce   : > { %v3004_v29 = vsel %vm2989_vm15, %v3000_v33, 0.0  ;;  %vm7877_vm15 = vmmov %vm7873_vm6  ;;  %v3650_v1 = vcombine.high %v3646_v50, %v3646_v50 }
 0x3cf   : > { %v3012_v46 = vmul.f32 %v6587_v60, %v3004_v29  ;;  %v3647_v29 = vld [vmem:[#allocation3 + $0x8] sm:$0xf] }
 0x3d0   : > { %v3024_v3 = vpop.permute.xlu1 %3023 }
 0x3d1   : > { %v3027_v25 = vsel %vm7873_vm6, %v6452_v24, %v3024_v3  ;;  %2428 = vrot.lane.b32.xlu1 %v2420_v48, %s7818_s1  ;;  %v3014_v23 = vadd.f32 %v3012_v46, %v2969_v32  ;;  %v3137_v24 = vsel %vm3136_vm7, 1, %v7527_v42  ;;  %vm7882_vm6 = vcmask 1031168   ;;  %s7892_s1 = smov 15  }
 0x3d2   : > { %v3031_v53 = vsel %vm7875_vm14, %v3027_v25, 0.0  ;;  %v3141_v7 = vrot.slane %v3137_v24, %v5160_v49  ;;  %vm7884_vm14 = vcmp.eq.s32.totalorder %v7883_v38, 1  ;;  %vm7886_vm7 = vmmov %vm7882_vm6  ;;  %v3145_v52 = vrot.slane %v3137_v24, %v5167_v36 }
 0x3d3   : > { %v3039_v54 = vmul.f32 %v3037_v9, %v3031_v53 }
 0x3d4   : > { %v3026_v60 = vpop.permute.xlu1 %3025 }
 0x3d5   : > { %v3041_v61 = vadd.f32 %v3039_v54, %v3014_v23  ;;  %v3028_v45 = vsel %vm7877_vm15, %v3024_v3, %v3026_v60  ;;  %3526 = vrot.lane.b32.xlu1 %v3498_v11, %s7800_s20  ;;  %v6703_v3 = vpop.permute.xlu0 %3351 }
 0x3d6   : > { %v3032_v10 = vsel %vm7879_vm5, %v3028_v45, 0.0  ;;  %vm3117_vm5 = vcmask 1014784  }
 0x3d7   : > { %v3040_v13 = vmul.f32 %v3037_v9, %v3032_v10  ;;  %v3059_v57 = vadd.f32 %v3055_v30, %v3041_v61  ;;  %v3149_v9 = vrot.slane %v3141_v7, %v5160_v49  ;;  %v7890_v30 = vld [vmem:[#allocation74_spill] sm:$0xff] }
 0x3d8   : > { %v3128_v28 = vpop.permute.xlu1 %3127 }
 0x3d9   : > { %v3042_v32 = vadd.f32 %v3040_v13, %v3015_v58  ;;  %3522 = vrot.lane.b32.xlu1 %v6678_v15, %s7800_s20  ;;  %vm3154_vm9 = vcmp.eq.s32.totalorder %v3149_v9, 1  ;;  %s7887_s20 = smov 17   ;;  %v7888_v58 = vld [vmem:[#allocation112_spill] sm:$0xff]  ;;  %v3242_v10 = vpop.permute.xlu0 %3241 }
 0x3da   : > { %3651 = vrot.lane.b32.xlu0 %v3646_v50, %s7887_s20  ;;  %vm7889_vm15 = vcmp.eq.s32.totalorder %v7888_v58, 1  ;;  %v3170_v14 = vsel %vm3154_vm9, %v6576_v62, 0.0 }
 0x3db   : > { %v3060_v59 = vadd.f32 %v3057_v19, %v3042_v32  ;;  %v3178_v23 = vmul.f32 %v7890_v30, %v3170_v14  ;;  %v3153_v19 = vrot.slane %v3145_v52, %v5160_v49 }
 0x3dc   : > { %v3069_v41 = vpop.permute.xlu1 %3068 }
 0x3dd   : > { %v3073_v6 = vsel %vm7882_vm6, %v3069_v41, %v4327_v37  ;;  %vm3106_vm6 = vcmp.eq.s32.totalorder %v3101_v51, 1  ;;  %3653 = vrot.lane.b32.xlu1 %v3650_v1, %s7887_s20  ;;  %vm3155_vm9 = vcmp.eq.s32.totalorder %v3153_v19, 1  ;;  %v6717_v32 = vpop.permute.xlu0 %3290 }
 0x3de   : > { %v3077_v21 = vsel %vm7884_vm14, %v3073_v6, 0.0  ;;  %3655 = vrot.lane.b32.xlu0 %v3647_v29, %s7887_s20  ;;  %vm3107_vm14 = vcmp.eq.s32.totalorder %v3105_v17, 1  ;;  %s574_s20 = scalar_lea.vmem %s7172_s12, %s4581_s27 }
 0x3df   : > { %v3085_v4 = vmul.f32 %v7885_v47, %v3077_v21 }
 0x3e0   : > { %v3067_v5 = vpop.permute.xlu1 %3066 }
 0x3e1   : > { %v3087_v39 = vadd.f32 %v3085_v4, %v3060_v59  ;;  %v3072_v0 = vsel %vm7886_vm7, %v3067_v5, %v3069_v41  ;;  %3666 = vrot.lane.b32.xlu1 %v3646_v50, %s7891_s0  ;;  %v7894_v41 = vld [vmem:[#allocation33_spill] sm:$0xff]  ;;  %vm7895_vm7 = vcmask 801792  }
 0x3e2   : > { %v3076_v33 = vsel %vm7889_vm15, %v3072_v0, 0.0  ;;  %3668 = vrot.lane.b32.xlu0 %v3650_v1, %s7891_s0  ;;  %v4338_v9 = vunpack.i.h.bf16 %v7894_v41  ;;  %vm7899_vm15 = vcmp.eq.s32.totalorder %v7898_v31, 1  ;;  %v3739_v0 = vld [vmem:[#allocation3 + $0xc] sm:$0xf] }
 0x3e3   : > { %v3084_v48 = vmul.f32 %v7885_v47, %v3076_v33  ;;  %v6730_v47 = vpop.permute.xlu0 %2385 }
 0x3e4   : > { %v3114_v46 = vpop.permute.xlu1 %3113  ;;  %v3194_v21 = vsel %vm7895_vm7, %v6676_v27, %v4338_v9  ;;  %v7915_v9 = vld [vmem:[#allocation47_spill] sm:$0xff] }
 0x3e5   : > { %v3086_v25 = vadd.f32 %v3084_v48, %v3059_v57  ;;  %v3118_v53 = vsel %vm3117_vm5, %v6521_v16, %v3114_v46  ;;  %3670 = vrot.lane.b32.xlu1 %v3647_v29, %s7891_s0  ;;  %v3198_v5 = vsel %vm7899_vm15, %v3194_v21, 0.0 }
 0x3e6   : > { %v3122_v11 = vsel %vm3106_vm6, %v3118_v53, 0.0  ;;  %3686 = vrot.lane.b32.xlu0 %v3646_v50, %s7892_s1  ;;  %vm7904_vm6 = vcmask 785408   ;;  %v7905_v53 = vld [vmem:[#allocation43_spill] sm:$0xff] }
 0x3e7   : > { %v3130_v54 = vmul.f32 %v3128_v28, %v3122_v11  ;;  %v6750_v14 = vpop.permute.xlu0 %3338 }
 0x3e8   : > { %v3116_v60 = vpop.permute.xlu1 %3115 }
 0x3e9   : > { %v3132_v62 = vadd.f32 %v3130_v54, %v3086_v25  ;;  %v3119_v61 = vsel %vm3117_vm5, %v3114_v46, %v3116_v60  ;;  %3688 = vrot.lane.b32.xlu1 %v3650_v1, %s7892_s1 }
 0x3ea   : > { %v3123_v45 = vsel %vm3107_vm14, %v3119_v61, 0.0  ;;  %3690 = vrot.lane.b32.xlu0 %v3647_v29, %s7892_s1  ;;  %vm7906_vm14 = vcmp.eq.s32.totalorder %v7905_v53, 1 }
 0x3eb   : > { %v3131_v16 = vmul.f32 %v3128_v28, %v3123_v45  ;;  %v3180_v13 = vadd.f32 %v3178_v23, %v3132_v62  ;;  %v7908_v62 = vld [vmem:[#allocation42_spill] sm:$0xff]  ;;  %v7910_v45 = vld [vmem:[#allocation48_spill] sm:$0xff]  ;;  %v6764_v19 = vpop.permute.xlu0 %2412 }
 0x3ec   : > { %v3230_v57 = vpop.permute.xlu1 %3229 }
 0x3ed   : > { %v3133_v7 = vadd.f32 %v3131_v16, %v3087_v39  ;;  %3706 = vrot.lane.b32.xlu1 %v3646_v50, %s7893_s24  ;;  %v7900_v50 = vld [vmem:[#allocation39_spill] sm:$0xff]  ;;  %v4352_v16 = vunpack.i.h.bf16 %v7910_v45 }
 0x3ee   : > { %3708 = vrot.lane.b32.xlu0 %v3650_v1, %s7893_s24  ;;  %vm7901_vm5 = vcmp.eq.s32.totalorder %v7900_v50, 1  ;;  %v7902_v1 = vld [vmem:[#allocation44_spill] sm:$0xff] }
 0x3ef   : > { %v4345_v33 = vunpack.i.h.bf16 %v7902_v1 }
 0x3f0   : > { %v3164_v24 = vpop.permute.xlu1 %3163 }
 0x3f1   : > { %v3167_v18 = vsel %vm3165_vm2, %v6545_v35, %v3164_v24  ;;  %3710 = vrot.lane.b32.xlu1 %v3647_v29, %s7893_s24  ;;  %v6735_v35 = vcombine.high %v6724_v12, %v6724_v12  ;;  %vm7896_vm2 = vmmov %vm7895_vm7  ;;  %v7903_v29 = vld [vmem:[#allocation69_spill] sm:$0xff]  ;;  %vm7909_vm7 = vcmp.eq.s32.totalorder %v7908_v62, 1  ;;  %s579_s24 = scalar_lea.vmem %s7173_s13, %s4581_s27 }
 0x3f2   : > { %v3171_v28 = vsel %vm3155_vm9, %v3167_v18, 0.0  ;;  %3743 = vrot.lane.b32.xlu0 %v6724_v12, %s7897_s29  ;;  %vm7907_vm9 = vmmov %vm7904_vm6 }
 0x3f3   : > { %v3179_v37 = vmul.f32 %v7890_v30, %v3171_v28 }
 0x3f4   : > { %v3257_v59 = vpop.permute.xlu1 %3256 }
 0x3f5   : > { %v3181_v6 = vadd.f32 %v3179_v37, %v3133_v7  ;;  %3745 = vrot.lane.b32.xlu1 %v6735_v35, %s7897_s29  ;;  %v7913_v37 = vld [vmem:[#allocation46_spill] sm:$0xff] }
 0x3f6   : > { %3747 = vrot.lane.b32.xlu0 %v3739_v0, %s7897_s29 }
 0x3f8   : > { %v3188_v4 = vpop.permute.xlu1 %3187 }
 0x3f9   : > { %v3193_v51 = vsel %vm7896_vm2, %v3188_v4, %v6676_v27  ;;  %v3206_v27 = vmul.f32 %v7903_v29, %v3198_v5  ;;  %3767 = vrot.lane.b32.xlu1 %v6724_v12, %s7503_s30  ;;  %vm7911_vm2 = vcmask 769024  }
 0x3fa   : > { %v3197_v39 = vsel %vm7901_vm5, %v3193_v51, 0.0  ;;  %3769 = vrot.lane.b32.xlu0 %v6735_v35, %s7503_s30  ;;  %vm7912_vm15 = vmmov %vm7911_vm2  ;;  %vm7914_vm5 = vcmp.eq.s32.totalorder %v7913_v37, 1  ;;  %v6779_v51 = vpop.permute.xlu0 %2345 }
 0x3fb   : > { %v3205_v48 = vmul.f32 %v7903_v29, %v3197_v39  ;;  %v3208_v30 = vadd.f32 %v3206_v27, %v3181_v6 }
 0x3fc   : > { %v3217_v17 = vpop.permute.xlu1 %3216 }
 0x3fd   : > { %v3207_v46 = vadd.f32 %v3205_v48, %v3180_v13  ;;  %v3221_v25 = vsel %vm7904_vm6, %v3217_v17, %v4345_v33  ;;  %3771 = vrot.lane.b32.xlu1 %v3739_v0, %s7503_s30  ;;  %vm7916_vm6 = vcmp.eq.s32.totalorder %v7915_v9, 1 }
 0x3fe   : > { %v3225_v11 = vsel %vm7906_vm14, %v3221_v25, 0.0  ;;  %3787 = vrot.lane.b32.xlu0 %v6724_v12, %s7506_s23  ;;  %v6788_v1 = vpop.permute.xlu0 %3385  ;;  %vm7918_vm14 = vcmp.lt.s32.totalorder %v7844_v8, 14 }
 0x3ff   : > { %v3233_v23 = vmul.f32 %v3230_v57, %v3225_v11 }
 0x400   : > { %v3215_v54 = vpop.permute.xlu1 %3214 }
 0x401   : > { %v3235_v52 = vadd.f32 %v3233_v23, %v3208_v30  ;;  %v3220_v60 = vsel %vm7907_vm9, %v3215_v54, %v3217_v17  ;;  %3789 = vrot.lane.b32.xlu1 %v6735_v35, %s7506_s23  ;;  %vm3265_vm9 = vmand %vm7918_vm14, %vm6441_vm4  ;;  %v7919_v17 = vld [vmem:[#allocation38_spill] sm:$0xff] }
 0x402   : > { %v3224_v61 = vsel %vm7909_vm7, %v3220_v60, 0.0  ;;  %3791 = vrot.lane.b32.xlu0 %v3739_v0, %s7506_s23  ;;  %v6793_v33 = vpop.permute.xlu0 %2439  ;;  %vm7920_vm7 = vcmp.lt.s32.totalorder %v7919_v17, 12  ;;  %v3266_v27 = vsel %vm3265_vm9, 1, %v7527_v42 }
 0x403   : > { %v3232_v13 = vmul.f32 %v3230_v57, %v3224_v61  ;;  %v3274_v11 = vrot.slane %v3266_v27, %v5167_v36 }
 0x404   : > { %v3244_v7 = vpop.permute.xlu1 %3243 }
 0x405   : > { %v3234_v24 = vadd.f32 %v3232_v13, %v3207_v46  ;;  %v3247_v18 = vsel %vm7911_vm2, %v3242_v10, %v3244_v7  ;;  %v3248_v28 = vsel %vm7912_vm15, %v3244_v7, %v4352_v16  ;;  %3806 = vrot.lane.b32.xlu1 %v6724_v12, %s7507_s25  ;;  %vm3313_vm2 = vmand %vm7920_vm7, %vm6385_vm0  ;;  %v3282_v54 = vrot.slane %v3274_v11, %v5160_v49 }
 0x406   : > { %v3251_v41 = vsel %vm7914_vm5, %v3247_v18, 0.0  ;;  %v3252_v6 = vsel %vm7916_vm6, %v3248_v28, 0.0  ;;  %3808 = vrot.lane.b32.xlu0 %v6735_v35, %s7507_s25  ;;  %v6806_v25 = vpop.permute.xlu0 %2372  ;;  %vm7922_vm15 = vmmov %vm7920_vm7  ;;  %vm3294_vm0 = vcmask 752640  }
 0x407   : > { %v3259_v21 = vmul.f32 %v3257_v59, %v3251_v41  ;;  %v3260_v4 = vmul.f32 %v3257_v59, %v3252_v6  ;;  %vm3360_vm5 = vmand %vm7922_vm15, %vm5178_vm10  ;;  %vm3284_vm6 = vcmp.eq.s32.totalorder %v3282_v54, 1  ;;  %vm7928_vm15 = vcmask 277504  }
 0x408   : > { %v6777_v57 = vpop.permute.xlu1 %2358  ;;  %v3361_v61 = vsel %vm3360_vm5, 1, %v7527_v42  ;;  %vm7933_vm5 = vcmask 244736  }
 0x409   : > { %v6781_v10 = vadd.f32 %v3259_v21, %v3234_v24  ;;  %v3262_v5 = vadd.f32 %v3260_v4, %v3235_v52  ;;  %3810 = vrot.lane.b32.xlu1 %v3739_v0, %s7507_s25  ;;  %v3314_v0 = vsel %vm3313_vm2, 1, %v7527_v42  ;;  %v3270_v52 = vrot.slane %v3266_v27, %v5160_v49 }
 0x40a   : > { %v3322_v23 = vrot.slane %v3314_v0, %v5167_v36  ;;  %v6815_v44 = vpop.permute.xlu0 %3430  ;;  %v3318_v16 = vrot.slane %v3314_v0, %v5160_v49  ;;  %v3369_v24 = vrot.slane %v3361_v61, %v5167_v36  ;;  %v3365_v27 = vrot.slane %v3361_v61, %v5160_v49 }
 0x40b   : > { %v3278_v7 = vrot.slane %v3270_v52, %v5160_v49  ;;  %vm7925_vm2 = vcmask 261120  }
 0x40c   : > { %v6786_v39 = vpop.permute.xlu1 %3398  ;;  %v3330_v45 = vrot.slane %v3322_v23, %v5160_v49  ;;  %v3326_v6 = vrot.slane %v3318_v16, %v5160_v49 }
 0x40d   : > { %vm3283_vm14 = vcmp.eq.s32.totalorder %v3278_v7, 1 }
 0x40e   : > { %v6828_v28 = vpop.permute.xlu0 %2370  ;;  %vm3332_vm10 = vcmp.eq.s32.totalorder %v3330_v45, 1  ;;  %vm3331_vm9 = vcmp.eq.s32.totalorder %v3326_v6, 1 }
 0x410   : > { %v3293_v59 = vpop.permute.xlu1 %3292 }
 0x411   : > { %v3296_v13 = vsel %vm3294_vm0, %v6717_v32, %v3293_v59  ;;  %v3377_v59 = vrot.slane %v3369_v24, %v5160_v49 }
 0x412   : > { %v3300_v21 = vsel %vm3284_vm6, %v3296_v13, 0.0  ;;  %v6842_v54 = vpop.permute.xlu0 %2399  ;;  %vm7936_vm6 = vmmov %vm7928_vm15 }
 0x413   : > { %v3308_v23 = vmul.f32 %v6689_v63, %v3300_v21  ;;  %vm3379_vm7 = vcmp.eq.s32.totalorder %v3377_v59, 1 }
 0x414   : > { %v3289_v29 = vpop.permute.xlu1 %3288 }
 0x415   : > { %v3295_v4 = vsel %vm3294_vm0, %v3289_v29, %v6717_v32  ;;  %v3373_v32 = vrot.slane %v3365_v27, %v5160_v49  ;;  %v3310_v61 = vadd.f32 %v3308_v23, %v3262_v5  ;;  %v7923_v23 = vld [vmem:[#allocation66_spill] sm:$0xff]  ;;  %vm7934_vm0 = vcmp.eq.s32.totalorder %v7854_v43, 1 }
 0x416   : > { %v3299_v8 = vsel %vm3283_vm14, %v3295_v4, 0.0  ;;  %v6851_v6 = vpop.permute.xlu0 %3477  ;;  %vm7940_vm14 = vcmp.eq.s32.totalorder %v7865_v55, 1 }
 0x417   : > { %v3307_v16 = vmul.f32 %v6689_v63, %v3299_v8 }
 0x418   : > { %v6804_v46 = vpop.permute.xlu1 %3443 }
 0x419   : > { %v3309_v21 = vadd.f32 %v3307_v16, %v6781_v10  ;;  %v7927_v10 = vld [vmem:[#allocation41_spill] sm:$0xff]  ;;  %v7931_v16 = vld [vmem:[#allocation56_spill] sm:$0xff] }
 0x41c   : > { %v3341_v30 = vpop.permute.xlu1 %3340 }
 0x41d   : > { %v3343_v41 = vsel %vm2584_vm12, %v6750_v14, %v3341_v30 }
 0x41e   : > { %v3347_v0 = vsel %vm3332_vm10, %v3343_v41, 0.0 }
 0x41f   : > { %v3355_v52 = vmul.f32 %v6703_v3, %v3347_v0 }
 0x420   : > { %v3337_v60 = vpop.permute.xlu1 %3336 }
 0x421   : > { %v3342_v30 = vsel %vm2584_vm12, %v3337_v60, %v6750_v14  ;;  %v3357_v24 = vadd.f32 %v3355_v52, %v3310_v61  ;;  %vm3378_vm12 = vcmp.eq.s32.totalorder %v3373_v32, 1  ;;  %v2398_v52 = vpop.permute.xlu0 %2397  ;;  %v7926_v32 = vld [vmem:[#allocation58_spill] sm:$0xff]  ;;  %v7929_v61 = vld [vmem:[#allocation45_spill] sm:$0xff] }
 0x422   : > { %v3346_v29 = vsel %vm3331_vm9, %v3342_v30, 0.0  ;;  %v7924_v30 = vld [vmem:[#allocation49_spill] sm:$0xff]  ;;  %vm7942_vm9 = vmmov %vm7933_vm5 }
 0x423   : > { %v3354_v14 = vmul.f32 %v6703_v3, %v3346_v29  ;;  %v2250_v8 = vsel %vm7925_vm2, %v7924_v30, %v7923_v23  ;;  %v2225_v29 = vsel %vm7928_vm15, %v7927_v10, %v7926_v32  ;;  %v7945_v30 = vld [vmem:[#allocation54_spill] sm:$0xff]  ;;  %v7947_v10 = vld [vmem:[#allocation59_spill] sm:$0xff] }
 0x424   : > { %v6826_v18 = vpop.permute.xlu1 %3490 }
 0x425   : > { %v3356_v59 = vadd.f32 %v3354_v14, %v3309_v21  ;;  %v7939_v21 = vld [vmem:[#allocation57_spill] sm:$0xff]  ;;  %v6896_v55 = vpop.permute.xlu0 %2426 }
 0x428   : > { %v6837_v11 = vpop.permute.xlu1 %2347 }
 0x42c   : > { %v3388_v45 = vpop.permute.xlu1 %3387 }
 0x42d   : > { %v3390_v13 = vsel %vm2630_vm8, %v6788_v1, %v3388_v45 }
 0x42e   : > { %v3394_v7 = vsel %vm3379_vm7, %v3390_v13, 0.0  ;;  %vm7943_vm7 = vcmp.eq.s32.totalorder %v7857_v40, 1 }
 0x42f   : > { %v3402_v60 = vmul.f32 %v6786_v39, %v3394_v7  ;;  %v2254_v7 = vsel %vm7934_vm0, %v2250_v8, 0.0  ;;  %vm7956_vm0 = vcmp.lt.s32.totalorder %v7919_v17, 12 }
 0x430   : > { %v3384_v41 = vpop.permute.xlu1 %3383 }
 0x431   : > { %v6854_v4 = vadd.f32 %v3402_v60, %v3357_v24  ;;  %v3389_v63 = vsel %vm2630_vm8, %v3384_v41, %v6788_v1  ;;  %vm7930_vm8 = vmmov %vm7925_vm2  ;;  %v7935_v24 = vld [vmem:[#allocation51_spill] sm:$0xff]  ;;  %vm7949_vm2 = vcmp.eq.s32.totalorder %v7861_v56, 1 }
 0x432   : > { %v3393_v5 = vsel %vm3378_vm12, %v3389_v63, 0.0  ;;  %v2251_v1 = vsel %vm7930_vm8, %v7923_v23, %v7929_v61  ;;  %v2226_v14 = vsel %vm7936_vm6, %v7926_v32, %v7935_v24  ;;  %v7937_v60 = vld [vmem:[#allocation95_spill] sm:$0xff]  ;;  %v2262_v63 = vmul.f32 %v7939_v21, %v2254_v7  ;;  %vm3452_vm6 = vmand %vm7956_vm0, %vm5249_vm13 }
 0x433   : > { %v3401_v27 = vmul.f32 %v6786_v39, %v3393_v5  ;;  %v7932_v39 = vld [vmem:[#allocation53_spill] sm:$0xff]  ;;  %vm7938_vm10 = vcmp.eq.s32.totalorder %v7937_v60, 1  ;;  %v2255_v5 = vsel %vm7940_vm14, %v2251_v1, 0.0  ;;  %v7944_v23 = vld [vmem:[#allocation63_spill] sm:$0xff]  ;;  %vm7946_vm12 = vcmask 15360   ;;  %vm7961_vm13 = vmmov %vm7956_vm0 }
 0x434   : > { %v6859_v0 = vpop.permute.xlu1 %3537  ;;  %v2277_v13 = vsel %vm7933_vm5, %v7932_v39, %v7931_v16  ;;  %v2229_v41 = vsel %vm7938_vm10, %v2225_v29, 0.0  ;;  %v2304_v8 = vsel %vm7946_vm12, %v7945_v30, %v7944_v23  ;;  %v2263_v29 = vmul.f32 %v7939_v21, %v2255_v5  ;;  %v7948_v39 = vld [vmem:[#allocation5_spill] sm:$0xff]  ;;  %vm7951_vm15 = vmmov %vm7946_vm12 }
 0x435   : > { %v6861_v3 = vadd.f32 %v3401_v27, %v3356_v59  ;;  %v7941_v59 = vld [vmem:[#allocation55_spill] sm:$0xff]  ;;  %v2281_v43 = vsel %vm7943_vm7, %v2277_v13, 0.0  ;;  %v2237_v61 = vmul.f32 %v7947_v10, %v2229_v41  ;;  %v2230_v1 = vsel %vm7949_vm2, %v2226_v14, 0.0  ;;  %v7952_v13 = vld [vmem:[#allocation60_spill] sm:$0xff]  ;;  %v7957_v14 = vld [vmem:[#allocation62_spill] sm:$0xff] }
 0x436   : > { %v2278_v27 = vsel %vm7942_vm9, %v7931_v16, %v7941_v59  ;;  %v2289_v7 = vmul.f32 %v7948_v39, %v2281_v43  ;;  %v7950_v16 = vld [vmem:[#allocation50_spill] sm:$0xff]  ;;  %v2330_v24 = vrot.slane %v7952_v13, %v7762_v22  ;;  %v2238_v60 = vmul.f32 %v7947_v10, %v2230_v1  ;;  %vm3499_vm9 = vmand %vm7961_vm13, %vm6441_vm4 }
 0x437   : > { %v2305_v40 = vsel %vm7951_vm15, %v7944_v23, %v7950_v16  ;;  %v2264_v59 = vadd.f32 %v2262_v63, %v2237_v61  ;;  %vm7953_vm8 = vcmp.eq.s32.totalorder %v7867_v2, 1  ;;  %vm7954_vm5 = vcmp.eq.s32.totalorder %v7874_v26, 1  ;;  %v6928_v61 = vpop.permute.xlu0 %3524 }
 0x438   : > { %v2375_v45 = vpop.permute.xlu1 %2374  ;;  %v2282_v41 = vsel %vm7953_vm8, %v2278_v27, 0.0  ;;  %v2308_v21 = vsel %vm7954_vm5, %v2304_v8, 0.0  ;;  %v2265_v22 = vadd.f32 %v2263_v29, %v2238_v60  ;;  %vm7958_vm10 = vcmp.eq.s32.totalorder %v7878_v34, 1  ;;  %v7959_v27 = vld [vmem:[#allocation61_spill] sm:$0xff] }
 0x439   : > { %v2290_v56 = vmul.f32 %v7948_v39, %v2282_v41  ;;  %v2316_v43 = vmul.f32 %v7957_v14, %v2308_v21  ;;  %v2291_v30 = vadd.f32 %v2289_v7, %v2264_v59  ;;  %v2309_v63 = vsel %vm7958_vm10, %v2305_v40, 0.0 }
 0x43a   : > { %v2317_v2 = vmul.f32 %v7957_v14, %v2309_v63  ;;  %v2332_v26 = vmul.f32 %v6678_v15, %v2330_v24  ;;  %vm7960_vm14 = vcmask 1031168   ;;  %v3453_v10 = vsel %vm3452_vm6, 1, %v7527_v42 }
 0x43b   : > { %v2349_v8 = vsel %vm7960_vm14, %v7959_v27, %v6779_v51  ;;  %v3414_v34 = vrot.slane %v7881_v20, %v5167_v36  ;;  %v2292_v29 = vadd.f32 %v2290_v56, %v2265_v22  ;;  %v2318_v39 = vadd.f32 %v2316_v43, %v2291_v30  ;;  %vm7964_vm4 = vmmov %vm7960_vm14  ;;  %v2425_v5 = vpop.permute.xlu0 %2424 }
 0x43c   : > { %v3433_v32 = vpop.permute.xlu1 %3432  ;;  %vm7962_vm7 = vcmask 801792   ;;  %v3410_v7 = vrot.slane %v7881_v20, %v5160_v49  ;;  %vm7963_vm12 = vcmp.eq.s32.totalorder %v7888_v58, 1  ;;  %v2350_v17 = vsel %vm7964_vm4, %v6779_v51, %v6837_v11 }
 0x43d   : > { %v2376_v15 = vsel %vm7962_vm7, %v6828_v28, %v6806_v25  ;;  %v2353_v48 = vsel %vm7963_vm12, %v2349_v8, 0.0  ;;  %v3461_v16 = vrot.slane %v3453_v10, %v5167_v36  ;;  %v3500_v40 = vsel %vm3499_vm9, 1, %v7527_v42  ;;  %vm7966_vm15 = vmmov %vm7962_vm7 }
 0x43e   : > { %v2319_v13 = vadd.f32 %v2317_v2, %v2292_v29  ;;  %v2334_v24 = vcombine.high %v2332_v26, %v2332_v26  ;;  %v2361_v60 = vmul.f32 %v6777_v57, %v2353_v48  ;;  %vm7965_vm2 = vcmp.eq.s32.totalorder %v7900_v50, 1 }
 0x43f   : > { %v2380_v28 = vsel %vm7965_vm2, %v2376_v15, 0.0  ;;  %v2336_v20 = vadd.f32 %v2332_v26, %v2318_v39  ;;  %v2377_v58 = vsel %vm7966_vm15, %v6806_v25, %v2375_v45  ;;  %v3422_v59 = vrot.slane %v3414_v34, %v5160_v49 }
 0x440   : > { %v3429_v23 = vpop.permute.xlu1 %3428  ;;  %vm7967_vm8 = vcmask 785408   ;;  %vm7968_vm5 = vcmp.eq.s32.totalorder %v7883_v38, 1  ;;  %v3457_v41 = vrot.slane %v3453_v10, %v5160_v49  ;;  %v3508_v21 = vrot.slane %v3500_v40, %v5167_v36 }
 0x441   : > { %v2403_v51 = vsel %vm7967_vm8, %v2398_v52, %v6842_v54  ;;  %v2354_v11 = vsel %vm7968_vm5, %v2350_v17, 0.0  ;;  %v3418_v50 = vrot.slane %v3410_v7, %v5160_v49  ;;  %vm7969_vm0 = vmmov %vm7967_vm8  ;;  %v3469_v25 = vrot.slane %v3461_v16, %v5160_v49 }
 0x442   : > { %v2388_v45 = vmul.f32 %v6730_v47, %v2380_v28  ;;  %v2363_v14 = vadd.f32 %v2361_v60, %v2336_v20  ;;  %v2337_v52 = vadd.f32 %v2334_v24, %v2319_v13  ;;  %vm7970_vm6 = vcmp.eq.s32.totalorder %v7898_v31, 1 }
 0x443   : > { %v2381_v38 = vsel %vm7970_vm6, %v2377_v58, 0.0  ;;  %vm7971_vm10 = vcmp.eq.s32.totalorder %v7908_v62, 1  ;;  %v2362_v22 = vmul.f32 %v6777_v57, %v2354_v11  ;;  %vm3424_vm14 = vcmp.eq.s32.totalorder %v3422_v59, 1 }
 0x444   : > { %v2402_v1 = vpop.permute.xlu1 %2401  ;;  %v2407_v43 = vsel %vm7971_vm10, %v2403_v51, 0.0  ;;  %v3435_v30 = vsel %vm2676_vm3, %v6815_v44, %v3433_v32  ;;  %vm7972_vm13 = vcmask 769024   ;;  %vm7973_vm9 = vcmp.eq.s32.totalorder %v7905_v53, 1 }
 0x445   : > { %v2404_v56 = vsel %vm7969_vm0, %v6842_v54, %v2402_v1  ;;  %v2430_v54 = vsel %vm7972_vm13, %v2425_v5, %v6896_v55  ;;  %v3465_v2 = vrot.slane %v3457_v41, %v5160_v49  ;;  %v3516_v31 = vrot.slane %v3508_v21, %v5160_v49  ;;  %vm7975_vm8 = vmmov %vm7972_vm13 }
 0x446   : > { %v2408_v63 = vsel %vm7973_vm9, %v2404_v56, 0.0  ;;  %v2389_v62 = vmul.f32 %v6730_v47, %v2381_v38  ;;  %vm3423_vm7 = vcmp.eq.s32.totalorder %v3418_v50, 1  ;;  %vm3471_vm12 = vcmp.eq.s32.totalorder %v3469_v25, 1  ;;  %v3544_v38 = vld [vmem:[%s7169_s9] sm:$0xf] }
 0x447   : > { %v2415_v32 = vmul.f32 %v6764_v19, %v2407_v43  ;;  %v2390_v27 = vadd.f32 %v2388_v45, %v2363_v14  ;;  %v3439_v8 = vsel %vm3424_vm14, %v3435_v30, 0.0  ;;  %v3504_v10 = vrot.slane %v3500_v40, %v5160_v49 }
 0x448   : > { %v3480_v42 = vpop.permute.xlu1 %3479  ;;  %vm7974_vm4 = vcmp.eq.s32.totalorder %v7913_v37, 1  ;;  %v2364_v34 = vadd.f32 %v2362_v22, %v2337_v52  ;;  %v3434_v29 = vsel %vm2676_vm3, %v3429_v23, %v6815_v44  ;;  %v2416_v47 = vmul.f32 %v6764_v19, %v2408_v63  ;;  %v7985_v63 = vld [vmem:[#allocation78_spill] sm:$0xff] }
 0x449   : > { %v3482_v57 = vsel %vm2724_vm1, %v6851_v6, %v3480_v42  ;;  %v2434_v53 = vsel %vm7974_vm4, %v2430_v54, 0.0  ;;  %vm3470_vm2 = vcmp.eq.s32.totalorder %v3465_v2, 1  ;;  %vm3518_vm15 = vcmp.eq.s32.totalorder %v3516_v31, 1  ;;  %v7988_v31 = vld [vmem:[#allocation75_spill] sm:$0xff] }
 0x44a   : > { %v3486_v39 = vsel %vm3471_vm12, %v3482_v57, 0.0  ;;  %v2391_v7 = vadd.f32 %v2389_v62, %v2364_v34  ;;  %v3447_v1 = vmul.f32 %v6804_v46, %v3439_v8  ;;  %v2417_v17 = vadd.f32 %v2415_v32, %v2390_v27 }
 0x44b   : > { %v2442_v16 = vmul.f32 %v6793_v33, %v2434_v53  ;;  %v3438_v44 = vsel %vm3423_vm7, %v3434_v29, 0.0  ;;  %vm7976_vm3 = vcmp.eq.s32.totalorder %v7915_v9, 1  ;;  %v3494_v40 = vmul.f32 %v6826_v18, %v3486_v39  ;;  %v7994_v53 = vld [vmem:[#allocation79_spill] sm:$0xff] }
 0x44c   : > { %v3476_v26 = vpop.permute.xlu1 %3475  ;;  %v2418_v23 = vadd.f32 %v2416_v47, %v2391_v7  ;;  %v3512_v24 = vrot.slane %v3504_v10, %v5160_v49  ;;  %v3652_v60 = vpop.permute.xlu0 %3651  ;;  %v3446_v20 = vmul.f32 %v6804_v46, %v3438_v44  ;;  %vm7979_vm6 = vcmask 31744  }
 0x44d   : > { %v3481_v48 = vsel %vm2724_vm1, %v3476_v26, %v6851_v6  ;;  %v2444_v59 = vadd.f32 %v2442_v16, %v2417_v17  ;;  %vm7977_vm1 = vcmask 1043456   ;;  %vm7982_vm13 = vmmov %vm7979_vm6  ;;  %vm7984_vm9 = vcmask 130048  }
 0x44e   : > { %v3485_v6 = vsel %vm3470_vm2, %v3481_v48, 0.0  ;;  %vm3517_vm5 = vcmp.eq.s32.totalorder %v3512_v24, 1  ;;  %vm7978_vm0 = vmmov %vm7977_vm1  ;;  %v3448_v21 = vadd.f32 %v3446_v20, %v6861_v3  ;;  %vm7986_vm7 = vcmp.eq.s32.totalorder %v7985_v63, 1  ;;  %v8000_v48 = vld [vmem:[#allocation83_spill] sm:$0xff] }
 0x44f   : > { %v3493_v42 = vmul.f32 %v6826_v18, %v3485_v6  ;;  %vm7980_vm10 = vmmov %vm7978_vm0  ;;  %vm7989_vm4 = vcmp.eq.s32.totalorder %v7988_v31, 1  ;;  %v8005_v6 = vld [vmem:[#allocation80_spill] sm:$0xff]  ;;  %v8022_v31 = vld [vmem:[#allocation87_spill] sm:$0xff] }
 0x450   : > { %v2429_v15 = vpop.permute.xlu1 %2428  ;;  %v3656_v46 = vpop.permute.xlu0 %3655  ;;  %vm7981_vm14 = vmmov %vm7978_vm0 }
 0x451   : > { %v2431_v37 = vsel %vm7975_vm8, %v6896_v55, %v2429_v15  ;;  %v3449_v55 = vadd.f32 %v3447_v1, %v6854_v4  ;;  %v3495_v25 = vadd.f32 %v3493_v42, %v3448_v21  ;;  %vm7990_vm2 = vmmov %vm7984_vm9  ;;  %v7997_v15 = vld [vmem:[#allocation77_spill] sm:$0xff] }
 0x452   : > { %v2435_v19 = vsel %vm7976_vm3, %v2431_v37, 0.0  ;;  %vm7992_vm8 = vmmov %vm7986_vm7 }
 0x453   : > { %v2443_v13 = vmul.f32 %v6793_v33, %v2435_v19  ;;  %v2446_v33 = vld [vmem:[%s7167_s7] sm:$0xf]  ;;  %v3496_v11 = vadd.f32 %v3494_v40, %v3449_v55  ;;  %vm7993_vm3 = vmmov %vm7989_vm4 }
 0x454   : > { %v3527_v28 = vpop.permute.xlu1 %3526  ;;  %v3669_v45 = vpop.permute.xlu0 %3668 }
 0x455   : > { %v2445_v58 = vadd.f32 %v2443_v13, %v2418_v23  ;;  %v3529_v9 = vsel %vm2777_vm11, %v6928_v61, %v3527_v28 }
 0x456   : > { %v3533_v51 = vsel %vm3518_vm15, %v3529_v9, 0.0  ;;  %vm7991_vm15 = vcmask 121856  }
 0x457   : > { %v3541_v41 = vmul.f32 %v6859_v0, %v3533_v51  ;;  %4177 = vmatprep.subr.msk.mxu0 %vm7977_vm1, %v2445_v58  ;;  %vm7995_vm1 = vcmp.eq.s32.totalorder %v7994_v53, 1  ;;  %v8008_v58 = vld [vmem:[#allocation85_spill] sm:$0xff] }
 0x458   : > { %v3523_v4 = vpop.permute.xlu1 %3522  ;;  %4178 = vmatpush1.msk.msra.mxu0 %vm7978_vm0, %v2444_v59  ;;  %v3687_v3 = vpop.permute.xlu0 %3686  ;;  %vm7998_vm0 = vcmp.eq.s32.totalorder %v7997_v15, 1  ;;  %v8029_v15 = vld [vmem:[#allocation91_spill] sm:$0xff] }
 0x459   : > { %v3543_v5 = vadd.f32 %v3541_v41, %v3496_v11  ;;  %v3528_v50 = vsel %vm2777_vm11, %v3523_v4, %v6928_v61  ;;  %4179 = vmatmul.mubr.msk.f32.vlgmr.msra.gmra.mrb[2].mxu0 %vm7979_vm6, %v2446_v33  ;;  %vm7983_vm11 = vcmask 138240   ;;  %vm7999_vm6 = vmmov %vm7998_vm0  ;;  %v8012_v4 = vld [vmem:[#allocation86_spill] sm:$0xff] }
 0x45a   : > { %v3532_v56 = vsel %vm3517_vm5, %v3528_v50, 0.0  ;;  %vm7987_vm12 = vmmov %vm7983_vm11 }
 0x45b   : > { %v3540_v18 = vmul.f32 %v6859_v0, %v3532_v56  ;;  %4184 = vmatprep.subr.msk.mxu1 %vm7980_vm10, %v3543_v5  ;;  %vm7996_vm5 = vmmov %vm7995_vm1  ;;  %vm8001_vm10 = vcmp.eq.s32.totalorder %v8000_v48, 1 }
 0x45c   : > { %v3654_v14 = vpop.permute.xlu1 %3653  ;;  %v3691_v43 = vpop.permute.xlu0 %3690 }
 0x45d   : > { %v3542_v52 = vadd.f32 %v3540_v18, %v3495_v25  ;;  %v3657_v30 = vsel %vm7983_vm11, %v3652_v60, %v3654_v14  ;;  %v3658_v26 = vsel %vm7987_vm12, %v3654_v14, %v3656_v46  ;;  %vm8004_vm11 = vmmov %vm8001_vm10  ;;  %vm8009_vm12 = vcmp.eq.s32.totalorder %v8008_v58, 1  ;;  %v8016_v18 = vld [vmem:[#allocation7_spill] sm:$0xff] }
 0x45e   : > { %v3663_v2 = vsel %vm7986_vm7, %v3657_v30, 0.0  ;;  %v3661_v8 = vsel %vm7992_vm8, %v3657_v30, -inf  ;;  %v3662_v34 = vsel %vm7995_vm1, %v3658_v26, -inf  ;;  %v3664_v39 = vsel %vm7996_vm5, %v3658_v26, 0.0 }
 0x45f   : > { %4185 = vmatpush1.msk.msra.mxu1 %vm7981_vm14, %v3542_v52  ;;  %vm8002_vm14 = vmmov %vm7991_vm15  ;;  %4395 = vrcp.f32 %v8016_v18 }
 0x460   : > { %4186 = vmatmul.mubr.msk.f32.vlgmr.msra.gmra.mrb[2].mxu1 %vm7982_vm13, %v3544_v38  ;;  %v3667_v61 = vpop.permute.xlu1 %3666  ;;  %v3709_v54 = vpop.permute.xlu0 %3708  ;;  %vm8003_vm13 = vcmask 7168  }
 0x461   : > { %v3672_v0 = vsel %vm7984_vm9, %v3667_v61, %v3669_v45  ;;  %vm8006_vm9 = vcmp.eq.s32.totalorder %v8005_v6, 1 }
 0x462   : > { %v3678_v62 = vsel %vm7989_vm4, %v3672_v0, 0.0  ;;  %v3676_v10 = vsel %vm7993_vm3, %v3672_v0, -inf  ;;  %vm8007_vm7 = vmmov %vm8006_vm9  ;;  %vm8015_vm3 = vcmask 1039360  }
 0x463   : > { %v3683_v29 = vadd.f32 %v3678_v62, %v3663_v2  ;;  %v3681_v16 = vmax.f32 %v3661_v8, %v3676_v10  ;;  %vm8010_vm4 = vmmov %vm8003_vm13 }
 0x464   : > { %v3671_v22 = vpop.permute.xlu1 %3670  ;;  %v3744_v47 = vpop.permute.xlu0 %3743  ;;  %vm8019_vm5 = vmmov %vm8015_vm3 }
 0x465   : > { %v3673_v32 = vsel %vm7990_vm2, %v3669_v45, %v3671_v22  ;;  %vm8011_vm2 = vmmov %vm8009_vm12 }
 0x466   : > { %v3677_v7 = vsel %vm7998_vm0, %v3673_v32, -inf  ;;  %v3679_v1 = vsel %vm7999_vm6, %v3673_v32, 0.0  ;;  %vm8020_vm0 = vcmask 924672  }
 0x467   : > { %v3682_v40 = vmax.f32 %v3662_v34, %v3677_v7  ;;  %v3684_v13 = vadd.f32 %v3679_v1, %v3664_v39 }
 0x468   : > { %v3689_v57 = vpop.permute.xlu1 %3688  ;;  %v3748_v60 = vpop.permute.xlu0 %3747 }
 0x469   : > { %v3692_v27 = vsel %vm7991_vm15, %v3687_v3, %v3689_v57  ;;  %v3693_v44 = vsel %vm8002_vm14, %v3689_v57, %v3691_v43  ;;  %vm8013_vm15 = vcmp.eq.s32.totalorder %v8012_v4, 1  ;;  %v8017_v3 = vld [vmem:[#allocation89_spill] sm:$0xff]  ;;  %v4396_v39 = vpop.eup %4395 }
 0x46a   : > { %v3698_v37 = vsel %vm8001_vm10, %v3692_v27, 0.0  ;;  %v3696_v23 = vsel %vm8004_vm11, %v3692_v27, -inf  ;;  %v3697_v28 = vsel %vm8006_vm9, %v3693_v44, -inf  ;;  %v3699_v55 = vsel %vm8007_vm7, %v3693_v44, 0.0  ;;  %vm8014_vm8 = vmmov %vm8013_vm15  ;;  %v8034_v44 = vld [vmem:[#allocation93_spill] sm:$0xff] }
 0x46b   : > { %v3703_v24 = vadd.f32 %v3698_v37, %v3683_v29  ;;  %v3701_v59 = vmax.f32 %v3681_v16, %v3696_v23  ;;  %v3702_v11 = vmax.f32 %v3682_v40, %v3697_v28  ;;  %v3704_v42 = vadd.f32 %v3699_v55, %v3684_v13  ;;  %vm8027_vm11 = vmmov %vm8020_vm0  ;;  %v8037_v55 = vld [vmem:[#allocation94_spill] sm:$0xff] }
 0x46c   : > { %v3707_v17 = vpop.permute.xlu1 %3706  ;;  %v3770_v46 = vpop.permute.xlu0 %3769  ;;  %vm8018_vm1 = vcmp.eq.s32.totalorder %v8017_v3, 1  ;;  %vm8023_vm10 = vcmp.eq.s32.totalorder %v8022_v31, 1  ;;  %vm8030_vm7 = vcmp.eq.s32.totalorder %v8029_v15, 1  ;;  %v3853_v6 = vrot.slane %v4396_v39, %v5160_v49 }
 0x46d   : > { %v3712_v19 = vsel %vm8003_vm13, %v3707_v17, %v3709_v54  ;;  %vm8021_vm6 = vmmov %vm8018_vm1 }
 0x46e   : > { %v3718_v9 = vsel %vm8009_vm12, %v3712_v19, 0.0  ;;  %v3716_v33 = vsel %vm8011_vm2, %v3712_v19, -inf  ;;  %vm8024_vm14 = vmmov %vm8023_vm10  ;;  %v3863_v4 = vrot.slane %v3853_v6, %v5160_v49 }
 0x46f   : > { %v3722_v41 = vadd.f32 %v3718_v9, %v3703_v24  ;;  %v3720_v56 = vmax.f32 %v3701_v59, %v3716_v33  ;;  %vm8031_vm12 = vmmov %vm8030_vm7  ;;  %v3857_v59 = vrot.slane %v4396_v39, %v5167_v36  ;;  %v8041_v33 = vld [vmem:[#allocation96_spill] sm:$0xff] }
 0x470   : > { %v3711_v20 = vpop.permute.xlu1 %3710  ;;  %v3788_v38 = vpop.permute.xlu0 %3787 }
 0x471   : > { %v3713_v51 = vsel %vm8010_vm4, %v3709_v54, %v3711_v20  ;;  %v3735_v52 = vadd.f32 %v6724_v12, %v3722_v41  ;;  %v3733_v22 = vmax.f32 %v3720_v56, %v6724_v12  ;;  %v8025_v12 = vld [vmem:[#allocation90_spill] sm:$0xff]  ;;  %vm8032_vm4 = vcmask 916480  }
 0x472   : > { %v3717_v21 = vsel %vm8013_vm15, %v3713_v51, -inf  ;;  %v3719_v5 = vsel %vm8014_vm8, %v3713_v51, 0.0  ;;  %vm8026_vm13 = vcmp.eq.s32.totalorder %v8025_v12, 1  ;;  %vm8033_vm2 = vmmov %vm8032_vm4  ;;  %vm8035_vm15 = vcmp.eq.s32.totalorder %v8034_v44, 1 }
 0x473   : > { %v3721_v45 = vmax.f32 %v3702_v11, %v3717_v21  ;;  %v3723_v14 = vadd.f32 %v3719_v5, %v3704_v42  ;;  %vm8028_vm9 = vmmov %vm8026_vm13 }
 0x474   : > { %v3746_v50 = vpop.permute.xlu1 %3745  ;;  %v3792_v8 = vpop.permute.xlu0 %3791  ;;  %vm8036_vm8 = vmmov %vm8035_vm15 }
 0x475   : > { %v3749_v25 = vsel %vm8015_vm3, %v3744_v47, %v3746_v50  ;;  %v3750_v30 = vsel %vm8019_vm5, %v3746_v50, %v3748_v60  ;;  %v3734_v2 = vmax.f32 %v3721_v45, %v6735_v35  ;;  %v3736_v26 = vadd.f32 %v6735_v35, %v3723_v14 }
 0x476   : > { %v3755_v61 = vsel %vm8018_vm1, %v3749_v25, 0.0  ;;  %v3753_v54 = vsel %vm8021_vm6, %v3749_v25, -inf  ;;  %v3754_v62 = vsel %vm8023_vm10, %v3750_v30, -inf  ;;  %v3756_v57 = vsel %vm8024_vm14, %v3750_v30, 0.0  ;;  %v8045_v25 = vld [vmem:[#allocation99_spill] sm:$0xff] }
 0x477   : > { %v3760_v63 = vadd.f32 %v3755_v61, %v3735_v52  ;;  %v3758_v10 = vmax.f32 %v3733_v22, %v3753_v54  ;;  %v3759_v29 = vmax.f32 %v3734_v2, %v3754_v62  ;;  %v3761_v47 = vadd.f32 %v3756_v57, %v3736_v26 }
 0x478   : > { %v3768_v43 = vpop.permute.xlu1 %3767  ;;  %v3809_v40 = vpop.permute.xlu0 %3808  ;;  %vm8038_vm3 = vcmp.eq.s32.totalorder %v8037_v55, 1  ;;  %vm8040_vm5 = vcmask 908288   ;;  %v3867_v50 = vrot.slane %v3857_v59, %v5160_v49  ;;  %vm8046_vm14 = vcmp.eq.s32.totalorder %v8045_v25, 1 }
 0x479   : > { %v3773_v0 = vsel %vm8020_vm0, %v3768_v43, %v3770_v46  ;;  %vm8039_vm1 = vmmov %vm8038_vm3  ;;  %vm8042_vm0 = vcmp.eq.s32.totalorder %v8041_v33, 1 }
 0x47a   : > { %v3779_v27 = vsel %vm8026_vm13, %v3773_v0, 0.0  ;;  %v3777_v34 = vsel %vm8028_vm9, %v3773_v0, -inf  ;;  %vm8043_vm6 = vmmov %vm8042_vm0 }
 0x47b   : > { %v3784_v35 = vadd.f32 %v3779_v27, %v3760_v63  ;;  %v3782_v37 = vmax.f32 %v3758_v10, %v3777_v34  ;;  %vm8044_vm10 = vmmov %vm8040_vm5 }
 0x47c   : > { %v3772_v32 = vpop.permute.xlu1 %3771  ;;  %vm8047_vm13 = vmmov %vm8046_vm14 }
 0x47d   : > { %v3774_v53 = vsel %vm8027_vm11, %v3770_v46, %v3772_v32  ;;  %vm8048_vm11 = vcmask 1043456  }
 0x47e   : > { %v3778_v7 = vsel %vm8030_vm7, %v3774_v53, -inf  ;;  %v3780_v1 = vsel %vm8031_vm12, %v3774_v53, 0.0  ;;  %vm8049_vm9 = vmmov %vm8048_vm11 }
 0x47f   : > { %v3783_v13 = vmax.f32 %v3759_v29, %v3778_v7  ;;  %v3785_v24 = vadd.f32 %v3780_v1, %v3761_v47  ;;  %vm8050_vm7 = vmmov %vm8049_vm9 }
 0x480   : > { %v3790_v48 = vpop.permute.xlu1 %3789  ;;  %vm8051_vm12 = vmmov %vm8050_vm7 }
 0x481   : > { %v3793_v17 = vsel %vm8032_vm4, %v3788_v38, %v3790_v48  ;;  %v3794_v16 = vsel %vm8033_vm2, %v3790_v48, %v3792_v8  ;;  %vm8052_vm4 = vmmov %vm8050_vm7 }
 0x482   : > { %v3797_v19 = vsel %vm8035_vm15, %v3793_v17, -inf  ;;  %v3799_v23 = vsel %vm8036_vm8, %v3793_v17, 0.0  ;;  %v3798_v20 = vsel %vm8038_vm3, %v3794_v16, -inf  ;;  %v3800_v58 = vsel %vm8039_vm1, %v3794_v16, 0.0  ;;  %vm8053_vm2 = vmmov %vm8052_vm4 }
 0x483   : > { %v3803_v60 = vadd.f32 %v3799_v23, %v3784_v35  ;;  %v3801_v9 = vmax.f32 %v3782_v37, %v3797_v19  ;;  %v3802_v41 = vmax.f32 %v3783_v13, %v3798_v20  ;;  %v3804_v46 = vadd.f32 %v3800_v58, %v3785_v24  ;;  %vm8054_vm15 = vmmov %vm8053_vm2 }
 0x484   : > { %v3807_v28 = vpop.permute.xlu1 %3806  ;;  %vm8055_vm8 = vmmov %vm8053_vm2 }
 0x485   : > { %v3812_v51 = vsel %vm8040_vm5, %v3807_v28, %v3809_v40  ;;  %vm8056_vm3 = vmmov %vm8053_vm2 }
 0x486   : > { %v3816_v11 = vsel %vm8042_vm0, %v3812_v51, -inf  ;;  %v3818_v42 = vsel %vm8043_vm6, %v3812_v51, 0.0  ;;  %vm8057_vm1 = vmmov %vm8053_vm2 }
 0x487   : > { %v3823_v21 = vadd.f32 %v3818_v42, %v3803_v60  ;;  %v3821_v56 = vmax.f32 %v3801_v9, %v3816_v11  ;;  %vm8058_vm5 = vmmov %vm8057_vm1 }
 0x488   : > { %v3811_v5 = vpop.permute.xlu1 %3810  ;;  %vm8059_vm0 = vmmov %vm8057_vm1 }
 0x489   : > { %v3813_v36 = vsel %vm8044_vm10, %v3809_v40, %v3811_v5  ;;  %v3868_v38 = vmul.f32 %v3863_v4, %v3823_v21  ;;  %v3831_v43 = vsel %vm8048_vm11, %v3821_v56, 0.0  ;;  %v3838_v30 = vmul.f32 %v3821_v56, %v3821_v56  ;;  %vm8060_vm6 = vmmov %vm8059_vm0 }
 0x48a   : > { %v3817_v18 = vsel %vm8046_vm14, %v3813_v36, -inf  ;;  %v3819_v45 = vsel %vm8047_vm13, %v3813_v36, 0.0  ;;  %vm8061_vm10 = vmmov %vm8059_vm0  ;;  %vm8064_vm11 = vcmask 3072  }
 0x48b   : > { %v3822_v14 = vmax.f32 %v3802_v41, %v3817_v18  ;;  %v3824_v52 = vadd.f32 %v3819_v45, %v3804_v46  ;;  %v3875_v63 = vsel %vm8050_vm7, %v3868_v38, 0.0  ;;  %v3840_v26 = vsel %vm8052_vm4, %v3838_v30, 0.0  ;;  %vm8062_vm14 = vmmov %vm8059_vm0 }
 0x48c   : > { %v3882_v32 = vmul.f32 %v3868_v38, %v3868_v38  ;;  %vm8063_vm13 = vmmov %vm8059_vm0 }
 0x48d   : > { %v3828_v3 = vcombine.low %v3821_v56, %v3822_v14  ;;  %v3869_v61 = vmul.f32 %v3867_v50, %v3824_v52  ;;  %v3832_v22 = vsel %vm8049_vm9, %v3822_v14, 0.0  ;;  %v3839_v0 = vmul.f32 %v3822_v14, %v3822_v14  ;;  %vm8065_vm9 = vmmov %vm8064_vm11 }
 0x48e   : > { %v3833_v54 = vadd.f32 %v3832_v22, %v3831_v43  ;;  %v3884_v27 = vsel %vm8054_vm15, %v3882_v32, 0.0  ;;  %vm8066_vm7 = vmmov %vm8065_vm9 }
 0x48f   : > { %3830 = vst [vmem:[%s584_s28] sm:$0xff] %v3828_v3  ;;  %v3872_v49 = vcombine.low %v3868_v38, %v3869_v61  ;;  %v3876_v2 = vsel %vm8051_vm12, %v3869_v61, 0.0  ;;  %v3841_v31 = vsel %vm8053_vm2, %v3839_v0, 0.0  ;;  %v3883_v12 = vmul.f32 %v3869_v61, %v3869_v61  ;;  %vm8067_vm12 = vmmov %vm8066_vm7 }
 0x490   : > { %v3877_v62 = vadd.f32 %v3876_v2, %v3875_v63  ;;  %v3842_v57 = vadd.f32 %v3841_v31, %v3840_v26  ;;  %vm8068_vm4 = vmmov %vm8066_vm7 }
 0x491   : > { %3874 = vst [vmem:[%s589_s5] sm:$0xff] %v3872_v49  ;;  %v3885_v8 = vsel %vm8055_vm8, %v3883_v12, 0.0  ;;  %vm8069_vm2 = vmmov %vm8068_vm4 }
 0x492   : > { %v3886_v10 = vadd.f32 %v3885_v8, %v3884_v27  ;;  %vm8070_vm15 = vmmov %vm8069_vm2 }
 0x493   : > { %vm8071_vm8 = vmmov %vm8069_vm2 }
 0x52c   : > { %v2522_v53 = vpop.f32.mrb[2].mxu0 }
 0x52d   : > { %v2532_v34 = vsel %vm8056_vm3, %v2522_v53, 0.0  ;;  %v2539_v29 = vmul.f32 %v2522_v53, %v2522_v53  ;;  %v2524_v47 = vpop.f32.mrb[3].mxu0 }
 0x52e   : > { %v2529_v35 = vcombine.low %v2522_v53, %v2524_v47  ;;  %v2533_v39 = vsel %vm8057_vm1, %v2524_v47, 0.0  ;;  %v2540_v15 = vmul.f32 %v2524_v47, %v2524_v47 }
 0x52f   : > { %v2534_v7 = vadd.f32 %v2533_v39, %v2532_v34  ;;  %v2541_v1 = vsel %vm8058_vm5, %v2539_v29, 0.0 }
 0x530   : > { %2531 = vst [vmem:[%s574_s20] sm:$0xff] %v2529_v35  ;;  %v2542_v48 = vsel %vm8059_vm0, %v2540_v15, 0.0 }
 0x531   : > { %v2543_v37 = vadd.f32 %v2542_v48, %v2541_v1  ;;  %2535 = vadd.xlane.f32.xlu0 %v2534_v7 }
 0x533   : > { %v3620_v17 = vpop.f32.mrb[2].mxu1  ;;  %2544 = vadd.xlane.f32.xlu1 %v2543_v37 }
 0x534   : > { %v3630_v16 = vsel %vm8060_vm6, %v3620_v17, 0.0  ;;  %v3637_v44 = vmul.f32 %v3620_v17, %v3620_v17  ;;  %v3622_v19 = vpop.f32.mrb[3].mxu1 }
 0x535   : > { %v3627_v23 = vcombine.low %v3620_v17, %v3622_v19  ;;  %v3631_v40 = vsel %vm8061_vm10, %v3622_v19, 0.0  ;;  %v3638_v13 = vmul.f32 %v3622_v19, %v3622_v19 }
 0x536   : > { %v3632_v24 = vadd.f32 %v3631_v40, %v3630_v16  ;;  %v3639_v60 = vsel %vm8062_vm14, %v3637_v44, 0.0 }
 0x537   : > { %3629 = vst [vmem:[%s579_s24] sm:$0xff] %v3627_v23  ;;  %v3640_v6 = vsel %vm8063_vm13, %v3638_v13, 0.0  ;;  %3834 = vadd.xlane.f32.xlu1 %v3833_v54 }
 0x538   : > { %3633 = vadd.xlane.f32.xlu0 %v3632_v24  ;;  %v3641_v28 = vadd.f32 %v3640_v6, %v3639_v60 }
 0x53b   : > { %3878 = vadd.xlane.f32.xlu1 %v3877_v62 }
 0x53c   : > { %3642 = vadd.xlane.f32.xlu0 %v3641_v28 }
 0x540   : > { %3843 = vadd.xlane.f32.xlu0 %v3842_v57 }
 0x544   : > { %3887 = vadd.xlane.f32.xlu0 %v3886_v10 }
 0x5be   : > { %v2536_v55 = vpop.xlane.xlu0 %2535 }
 0x5bf   : > { %4180 = vst.msk [vmem:[%s6212_s3 + $0x10] sm:$0xf] %vm8064_vm11, %v2536_v55 }
 0x5c0   : > { %v2545_v20 = vpop.xlane.xlu1 %2544 }
 0x5c1   : > { %4181 = vst.msk [vmem:[%s6212_s3 + $0x14] sm:$0xf] %vm8065_vm9, %v2545_v20 }
 0x5c4   : > { %v3835_v58 = vpop.xlane.xlu1 %3834 }
 0x5c5   : > { %4197 = vst.msk [vmem:[%s6212_s3 + $0x20] sm:$0xf] %vm8066_vm7, %v3835_v58  ;;  %v3634_v9 = vpop.xlane.xlu0 %3633 }
 0x5c6   : > { %4187 = vst.msk [vmem:[%s6212_s3 + $0x18] sm:$0xf] %vm8067_vm12, %v3634_v9 }
 0x5c8   : > { %v3879_v59 = vpop.xlane.xlu1 %3878 }
 0x5c9   : > { %4199 = vst.msk [vmem:[%s6212_s3 + $0x28] sm:$0xf] %vm8068_vm4, %v3879_v59  ;;  %v3643_v51 = vpop.xlane.xlu0 %3642 }
 0x5ca   : > { %4188 = vst.msk [vmem:[%s6212_s3 + $0x1c] sm:$0xf] %vm8069_vm2, %v3643_v51 }
 0x5cd   : > { %v3844_v33 = vpop.xlane.xlu0 %3843 }
 0x5ce   : > { %4198 = vst.msk [vmem:[%s6212_s3 + $0x24] sm:$0xf] %vm8070_vm15, %v3844_v33 }
 0x5d1   : > { %v3888_v11 = vpop.xlane.xlu0 %3887 }
 0x5d2   : > { %4200 = vst.msk [vmem:[%s6212_s3 + $0x2c] sm:$0xf] %vm8071_vm8, %v3888_v11 }
 0x5d3 PF: > { %s27_s21 = sadd.s32 1, %s4408_s21  }
 0x5d4   : > { %p24_p4 = scmp.ge.s32.totalorder %s27_s21, 4  }
 0x5d6   :  { %26 = sbr.rel (!%p24_p4) target bundleno = 8 (0x8), region = 173 }

</bundles_post_ra>
